<compile_context>
chip_gen: v5e
topology: v5e:2x2
jax: 0.10.0
libtpu: 0.0.40
codegen_flags: <defaults>
</compile_context>

<pallas_src>
import functools

import numpy as np
import jax
import jax.numpy as jnp
from jax import lax
from jax.experimental import pallas as pl
from jax.experimental.pallas import tpu as pltpu

NFFT, HOP, WIN = 512, 256, 512          # module defaults


def _round_up(x, m):
    return -(-x // m) * m


# --------------------------------------------------------------------------
# Cached transposed ISTFT synthesis basis, shape (nfft, 2F-2) = (512, 512):
#   columns [0 .. F-1]      : irfft cosine rows (k = 0..nfft/2) * sqrt-Hann window
#   columns [F .. 2F-3]     : irfft  -sine rows (k = 1..nfft/2-1) * sqrt-Hann window
# The imaginary DC / Nyquist rows are exactly zero (torch.fft.irfft ignores them),
# so dropping them keeps the matmul K at exactly 512.
# --------------------------------------------------------------------------
@functools.lru_cache(maxsize=None)
def _istft_basis_t(nfft=NFFT, win=WIN):
    F = nfft // 2 + 1
    n = np.arange(nfft)
    window = np.sqrt(0.5 - 0.5 * np.cos(2.0 * np.pi * n / win))        # sqrt-Hann
    k_cos = np.arange(F)                                               # 0..nfft/2
    k_sin = np.arange(1, F - 1)                                        # 1..nfft/2-1
    ang_c = 2.0 * np.pi * ((n[:, None] * k_cos[None, :]) % nfft) / nfft
    ang_s = 2.0 * np.pi * ((n[:, None] * k_sin[None, :]) % nfft) / nfft
    scale_c = np.where((k_cos == 0) | (k_cos == nfft // 2), 1.0, 2.0) / nfft
    cw = np.cos(ang_c) * scale_c[None, :] * window[:, None]            # (nfft, F)
    sw = -np.sin(ang_s) * (2.0 / nfft) * window[:, None]               # (nfft, F-2)
    return np.concatenate([cw, sw], axis=1).astype(np.float32)         # (nfft, 2F-2)


# --------------------------------------------------------------------------
# Fused kernel.  Grid (B, frame_chunks); the per-batch output block (1, 6, tc)
# is resident across the chunk axis and accumulates
#   rows 0..2 : compressed-MSE partial sums   [sum dr^2, sum di^2, sum dm^2]
#   rows 3..5 : SI-SNR partial sums           [<y_t,y_p>, ||y_t||^2, ||y_p||^2]
# A (hop, 2) scratch carries the previous frame's second half across chunk tiles.
# --------------------------------------------------------------------------
def _hybrid_kernel(pr_ref, pi_ref, tr_ref, ti_ref, basis_ref, out_ref, carry_ref,
                   *, F, hop, tc, t_valid, mxu_dtype):
    j = pl.program_id(1)

    @pl.when(j == 0)
    def _():
        out_ref[...] = jnp.zeros_like(out_ref)
        carry_ref[...] = jnp.zeros_like(carry_ref)

    pr, pi = pr_ref[0], pi_ref[0]            # (F, tc): freq on sublanes, frames on lanes
    tr, ti = tr_ref[0], ti_ref[0]

    # ---- compressed-spectrum MSE partials (EUP/VPU work; hides under the MXU) ----
    # mag = sqrt(re^2+im^2+1e-12);  mag**p == exp(0.5*p*log(re^2+im^2+1e-12))
    pm2 = pr * pr + pi * pi + 1e-12
    tm2 = tr * tr + ti * ti + 1e-12
    lp = jnp.log(pm2)
    lt = jnp.log(tm2)
    p_i7 = jnp.exp(-0.35 * lp)               # |P|**-0.7
    t_i7 = jnp.exp(-0.35 * lt)
    dr = pr * p_i7 - tr * t_i7               # compressed real diff
    di = pi * p_i7 - ti * t_i7               # compressed imag diff
    dm = jnp.exp(0.15 * lp) - jnp.exp(0.15 * lt)   # |P|**0.3 - |T|**0.3
    out_ref[0, 0:1, :] = out_ref[0, 0:1, :] + jnp.sum(dr * dr, axis=0, keepdims=True)
    out_ref[0, 1:2, :] = out_ref[0, 1:2, :] + jnp.sum(di * di, axis=0, keepdims=True)
    out_ref[0, 2:3, :] = out_ref[0, 2:3, :] + jnp.sum(dm * dm, axis=0, keepdims=True)

    # ---- fused ISTFT: one MXU matmul for pred AND true (stacked along lanes) ----
    # RHS rows = [Re k=0..F-1 ; Im k=1..F-2]  (imag DC/Nyquist dropped -> K = 512).
    rhs = jnp.concatenate(
        [jnp.concatenate([pr, pi[1:F - 1, :]], axis=0),
         jnp.concatenate([tr, ti[1:F - 1, :]], axis=0)], axis=1).astype(mxu_dtype)
    frames = jnp.dot(basis_ref[...], rhs,
                     preferred_element_type=jnp.float32)            # (nfft, 2*tc)

    first_p, first_t = frames[:hop, :tc], frames[:hop, tc:]         # frame[:hop]
    second_p, second_t = frames[hop:, :tc], frames[hop:, tc:]       # frame[hop:]

    # torch.istft (center=True, hop = nfft/2, sqrt-Hann): output chunk c (1<=c<=T-1)
    # is frame_c[:hop] + frame_{c-1}[hop:]; the window-square OLA envelope is exactly
    # 1 at 50% overlap, so no envelope division is needed.  The one-frame shift along
    # the lane (frame) axis is an XLU roll; lane 0 takes the carry from the previous
    # tile (zero at j==0, where chunk c=0 is masked out anyway).
    prev_p = pltpu.roll(second_p, shift=1, axis=1)
    prev_t = pltpu.roll(second_t, shift=1, axis=1)
    new_carry_p = prev_p[:, 0:1]             # == second_p[:, tc-1:tc]
    new_carry_t = prev_t[:, 0:1]
    lane = lax.broadcasted_iota(jnp.int32, (hop, tc), 1)
    prev_p = jnp.where(lane == 0, carry_ref[:, 0:1], prev_p)
    prev_t = jnp.where(lane == 0, carry_ref[:, 1:2], prev_t)

    # mask chunk 0 (center trim) and zero-padded frames past the real frame count
    col = j * tc + lane[0:1, :]
    valid = (col >= 1) & (col <= t_valid - 1)
    y_p = jnp.where(valid, first_p + prev_p, 0.0)                    # (hop, tc)
    y_t = jnp.where(valid, first_t + prev_t, 0.0)

    out_ref[0, 3:4, :] = out_ref[0, 3:4, :] + jnp.sum(y_t * y_p, axis=0, keepdims=True)
    out_ref[0, 4:5, :] = out_ref[0, 4:5, :] + jnp.sum(y_t * y_t, axis=0, keepdims=True)
    out_ref[0, 5:6, :] = out_ref[0, 5:6, :] + jnp.sum(y_p * y_p, axis=0, keepdims=True)

    # carry the last frame's second half into the next frame chunk
    carry_ref[:, 0:1] = new_carry_p
    carry_ref[:, 1:2] = new_carry_t


# --------------------------------------------------------------------------
# Wrapper reproducing HybridLoss.forward
# --------------------------------------------------------------------------
def hybrid_loss(pred_stft, true_stft, nfft=NFFT, hop=HOP, win=WIN,
                mxu_dtype=jnp.bfloat16, max_frame_tile=512):
    assert hop * 2 == nfft and win == nfft, "fused OLA kernel assumes 50% overlap"
    B, F, T, _ = pred_stft.shape
    assert F == nfft // 2 + 1 and T >= 2

    f32 = jnp.float32
    pr = pred_stft[..., 0].astype(f32)
    pi = pred_stft[..., 1].astype(f32)
    tr = true_stft[..., 0].astype(f32)
    ti = true_stft[..., 1].astype(f32)

    # Lane-dense frame tile (multiple of 128), capped to keep VMEM comfortable on
    # v7x (64 MiB) while still amortizing per-grid-step overhead.
    tc = min(max_frame_tile, _round_up(T, 128))
    Tp = _round_up(T, tc)
    if Tp != T:        # zero-padded frames contribute exactly 0 to every partial sum
        pad = ((0, 0), (0, 0), (0, Tp - T))
        pr, pi, tr, ti = [jnp.pad(x, pad) for x in (pr, pi, tr, ti)]

    basis = jnp.asarray(_istft_basis_t(nfft, win), dtype=mxu_dtype)   # (nfft, 512)
    K = basis.shape[1]

    spec = pl.BlockSpec((1, F, tc), lambda b, j: (b, 0, j))
    kern = functools.partial(_hybrid_kernel, F=F, hop=hop, tc=tc, t_valid=T,
                             mxu_dtype=mxu_dtype)
    out = pl.pallas_call(
        kern,
        out_shape=jax.ShapeDtypeStruct((B, 6, tc), f32),
        grid=(B, Tp // tc),
        in_specs=[spec, spec, spec, spec,
                  pl.BlockSpec((nfft, K), lambda b, j: (0, 0))],
        out_specs=pl.BlockSpec((1, 6, tc), lambda b, j: (b, 0, 0)),
        scratch_shapes=[pltpu.VMEM((hop, 2), f32)],
        compiler_params=pltpu.CompilerParams(
            dimension_semantics=("parallel", "arbitrary"),
            vmem_limit_bytes=48 * 1024 * 1024),
    )(pr, pi, tr, ti, basis)

    # ---- finalize (a handful of scalars, plain JAX) ----
    mse = jnp.sum(out[:, 0:3, :], axis=(0, 2))                        # (3,)
    n_elem = B * F * T
    real_loss = mse[0] / n_elem
    imag_loss = mse[1] / n_elem
    mag_loss = mse[2] / n_elem

    dot = jnp.sum(out[:, 3, :], axis=-1)                              # <y_true, y_pred>
    et = jnp.sum(out[:, 4, :], axis=-1)                               # ||y_true||^2
    ep = jnp.sum(out[:, 5, :], axis=-1)                               # ||y_pred||^2

    # s_tgt = alpha * y_true;  ||s_tgt||^2 = alpha^2 ||y_true||^2
    # ||y_pred - s_tgt||^2 = ||y_pred||^2 - 2 alpha <y_t,y_p> + alpha^2 ||y_true||^2
    alpha = dot / (et + 1e-8)
    num = alpha * alpha * et
    den = jnp.maximum(ep - 2.0 * alpha * dot + num, 0.0)
    # NOTE: the reference module uses -log10(...) (no factor of 10); reproduced verbatim.
    sisnr = jnp.mean(-jnp.log10(num / (den + 1e-8) + 1e-8))

    return 0.3 * (real_loss + imag_loss) + 0.7 * mag_loss + 0.01 * sisnr


if __name__ == "__main__":
    key = jax.random.PRNGKey(0)
    B, T = 2, 8                     # small: 2 utterances, 8 STFT frames
    F = NFFT // 2 + 1               # 257 frequency bins (nfft = 512)
    k1, k2 = jax.random.split(key)
    pred_stft = jax.random.normal(k1, (B, F, T, 2), dtype=jnp.float32)
    true_stft = jax.random.normal(k2, (B, F, T, 2), dtype=jnp.float32)

    loss = jax.jit(hybrid_loss)(pred_stft, true_stft)
    loss = jax.block_until_ready(loss)
    assert jnp.isfinite(loss)
    print("KERNEL_OK")
</pallas_src>

<mosaic_0001>
module attributes {stable_mosaic.version = 11 : i64} {
  func.func @_hybrid_kernel(%arg0: i32, %arg1: i32, %arg2: memref<1x257x128xf32, #tpu.memory_space<vmem>>, %arg3: memref<1x257x128xf32, #tpu.memory_space<vmem>>, %arg4: memref<1x257x128xf32, #tpu.memory_space<vmem>>, %arg5: memref<1x257x128xf32, #tpu.memory_space<vmem>>, %arg6: memref<512x512xbf16, #tpu.memory_space<vmem>>, %arg7: memref<1x6x128xf32, #tpu.memory_space<vmem>>, %arg8: memref<256x2xf32, #tpu.memory_space<vmem>>) attributes {dimension_semantics = [#tpu.dimension_semantics<parallel>, #tpu.dimension_semantics<arbitrary>], iteration_bounds = array<i64: 2, 1>, scalar_prefetch = 0 : i64, scratch_operands = 1 : i64, tpu.core_type = #tpu.core_type<tc>, window_params = [{transform_indices = @transform_0, window_bounds = array<i64: 1, 257, 128>}, {transform_indices = @transform_1, window_bounds = array<i64: 1, 257, 128>}, {transform_indices = @transform_2, window_bounds = array<i64: 1, 257, 128>}, {transform_indices = @transform_3, window_bounds = array<i64: 1, 257, 128>}, {pipeline_mode = #tpu.pipeline_mode<synchronous>, transform_indices = @transform_4, window_bounds = array<i64: 512, 512>}, {transform_indices = @transform_5, window_bounds = array<i64: 1, 6, 128>}]} {
    %c0_i32 = arith.constant 0 : i32
    %0 = arith.cmpi eq, %arg1, %c0_i32 : i32
    %1 = arith.extui %0 : i1 to i32
    %c0_i32_0 = arith.constant 0 : i32
    %2 = arith.cmpi ne, %1, %c0_i32_0 : i32
    scf.if %2 {
      %cst_71 = arith.constant 0.000000e+00 : f32
      %146 = vector.broadcast %cst_71 : f32 to vector<1x6x128xf32>
      %c0_72 = arith.constant 0 : index
      %c0_73 = arith.constant 0 : index
      %c0_74 = arith.constant 0 : index
      %147 = vector.load %arg7[%c0_72, %c0_73, %c0_74] : memref<1x6x128xf32, #tpu.memory_space<vmem>>, vector<1x6x128xf32>
      tpu.vector_store %arg7[%c0_72, %c0_73, %c0_74], %146 {strides = array<i32>} : memref<1x6x128xf32, #tpu.memory_space<vmem>>, vector<1x6x128xf32>,
      %cst_75 = arith.constant 0.000000e+00 : f32
      %148 = vector.broadcast %cst_75 : f32 to vector<256x2xf32>
      %c0_76 = arith.constant 0 : index
      %c0_77 = arith.constant 0 : index
      %149 = vector.load %arg8[%c0_76, %c0_77] : memref<256x2xf32, #tpu.memory_space<vmem>>, vector<256x2xf32>
      tpu.vector_store %arg8[%c0_76, %c0_77], %148 {strides = array<i32>} : memref<256x2xf32, #tpu.memory_space<vmem>>, vector<256x2xf32>,
    } else {
    }
    %c0 = arith.constant 0 : index
    %c0_1 = arith.constant 0 : index
    %c0_2 = arith.constant 0 : index
    %3 = vector.load %arg2[%c0, %c0_1, %c0_2] : memref<1x257x128xf32, #tpu.memory_space<vmem>>, vector<1x257x128xf32>
    %4 = vector.shape_cast %3 : vector<1x257x128xf32> to vector<257x128xf32>
    %c0_3 = arith.constant 0 : index
    %c0_4 = arith.constant 0 : index
    %c0_5 = arith.constant 0 : index
    %5 = vector.load %arg3[%c0_3, %c0_4, %c0_5] : memref<1x257x128xf32, #tpu.memory_space<vmem>>, vector<1x257x128xf32>
    %6 = vector.shape_cast %5 : vector<1x257x128xf32> to vector<257x128xf32>
    %c0_6 = arith.constant 0 : index
    %c0_7 = arith.constant 0 : index
    %c0_8 = arith.constant 0 : index
    %7 = vector.load %arg4[%c0_6, %c0_7, %c0_8] : memref<1x257x128xf32, #tpu.memory_space<vmem>>, vector<1x257x128xf32>
    %8 = vector.shape_cast %7 : vector<1x257x128xf32> to vector<257x128xf32>
    %c0_9 = arith.constant 0 : index
    %c0_10 = arith.constant 0 : index
    %c0_11 = arith.constant 0 : index
    %9 = vector.load %arg5[%c0_9, %c0_10, %c0_11] : memref<1x257x128xf32, #tpu.memory_space<vmem>>, vector<1x257x128xf32>
    %10 = vector.shape_cast %9 : vector<1x257x128xf32> to vector<257x128xf32>
    %11 = arith.mulf %4, %4 : vector<257x128xf32>
    %12 = arith.mulf %6, %6 : vector<257x128xf32>
    %13 = arith.addf %11, %12 : vector<257x128xf32>
    %cst = arith.constant 9.99999996E-13 : f32
    %14 = vector.broadcast %cst : f32 to vector<257x128xf32>
    %15 = arith.addf %13, %14 : vector<257x128xf32>
    %16 = arith.mulf %8, %8 : vector<257x128xf32>
    %17 = arith.mulf %10, %10 : vector<257x128xf32>
    %18 = arith.addf %16, %17 : vector<257x128xf32>
    %cst_12 = arith.constant 9.99999996E-13 : f32
    %19 = vector.broadcast %cst_12 : f32 to vector<257x128xf32>
    %20 = arith.addf %18, %19 : vector<257x128xf32>
    %21 = math.log %15 : vector<257x128xf32>
    %22 = math.log %20 : vector<257x128xf32>
    %cst_13 = arith.constant -3.500000e-01 : f32
    %23 = vector.broadcast %cst_13 : f32 to vector<257x128xf32>
    %24 = arith.mulf %23, %21 : vector<257x128xf32>
    %25 = math.exp %24 : vector<257x128xf32>
    %cst_14 = arith.constant -3.500000e-01 : f32
    %26 = vector.broadcast %cst_14 : f32 to vector<257x128xf32>
    %27 = arith.mulf %26, %22 : vector<257x128xf32>
    %28 = math.exp %27 : vector<257x128xf32>
    %29 = arith.mulf %4, %25 : vector<257x128xf32>
    %30 = arith.mulf %8, %28 : vector<257x128xf32>
    %31 = arith.subf %29, %30 : vector<257x128xf32>
    %32 = arith.mulf %6, %25 : vector<257x128xf32>
    %33 = arith.mulf %10, %28 : vector<257x128xf32>
    %34 = arith.subf %32, %33 : vector<257x128xf32>
    %cst_15 = arith.constant 1.500000e-01 : f32
    %35 = vector.broadcast %cst_15 : f32 to vector<257x128xf32>
    %36 = arith.mulf %35, %21 : vector<257x128xf32>
    %37 = math.exp %36 : vector<257x128xf32>
    %cst_16 = arith.constant 1.500000e-01 : f32
    %38 = vector.broadcast %cst_16 : f32 to vector<257x128xf32>
    %39 = arith.mulf %38, %22 : vector<257x128xf32>
    %40 = math.exp %39 : vector<257x128xf32>
    %41 = arith.subf %37, %40 : vector<257x128xf32>
    %c0_17 = arith.constant 0 : index
    %c0_18 = arith.constant 0 : index
    %c0_19 = arith.constant 0 : index
    %42 = vector.load %arg7[%c0_17, %c0_18, %c0_19] : memref<1x6x128xf32, #tpu.memory_space<vmem>>, vector<1x1x128xf32>
    %43 = vector.shape_cast %42 : vector<1x1x128xf32> to vector<1x128xf32>
    %44 = arith.mulf %31, %31 : vector<257x128xf32>
    %cst_20 = arith.constant dense<0.000000e+00> : vector<128xf32>
    %45 = vector.multi_reduction <add>, %44, %cst_20 [0] : vector<257x128xf32> to vector<128xf32>
    %46 = vector.shape_cast %45 : vector<128xf32> to vector<1x128xf32>
    %47 = arith.addf %43, %46 : vector<1x128xf32>
    %c0_21 = arith.constant 0 : index
    %c0_22 = arith.constant 0 : index
    %c0_23 = arith.constant 0 : index
    %48 = vector.load %arg7[%c0_21, %c0_22, %c0_23] : memref<1x6x128xf32, #tpu.memory_space<vmem>>, vector<1x1x128xf32>
    %49 = vector.shape_cast %48 : vector<1x1x128xf32> to vector<1x128xf32>
    %50 = vector.shape_cast %47 : vector<1x128xf32> to vector<1x1x128xf32>
    tpu.vector_store %arg7[%c0_21, %c0_22, %c0_23], %50 {strides = array<i32>} : memref<1x6x128xf32, #tpu.memory_space<vmem>>, vector<1x1x128xf32>,
    %c0_24 = arith.constant 0 : index
    %c1 = arith.constant 1 : index
    %c0_25 = arith.constant 0 : index
    %51 = vector.load %arg7[%c0_24, %c1, %c0_25] : memref<1x6x128xf32, #tpu.memory_space<vmem>>, vector<1x1x128xf32>
    %52 = vector.shape_cast %51 : vector<1x1x128xf32> to vector<1x128xf32>
    %53 = arith.mulf %34, %34 : vector<257x128xf32>
    %cst_26 = arith.constant dense<0.000000e+00> : vector<128xf32>
    %54 = vector.multi_reduction <add>, %53, %cst_26 [0] : vector<257x128xf32> to vector<128xf32>
    %55 = vector.shape_cast %54 : vector<128xf32> to vector<1x128xf32>
    %56 = arith.addf %52, %55 : vector<1x128xf32>
    %c0_27 = arith.constant 0 : index
    %c1_28 = arith.constant 1 : index
    %c0_29 = arith.constant 0 : index
    %57 = vector.load %arg7[%c0_27, %c1_28, %c0_29] : memref<1x6x128xf32, #tpu.memory_space<vmem>>, vector<1x1x128xf32>
    %58 = vector.shape_cast %57 : vector<1x1x128xf32> to vector<1x128xf32>
    %59 = vector.shape_cast %56 : vector<1x128xf32> to vector<1x1x128xf32>
    tpu.vector_store %arg7[%c0_27, %c1_28, %c0_29], %59 {strides = array<i32>} : memref<1x6x128xf32, #tpu.memory_space<vmem>>, vector<1x1x128xf32>,
    %c0_30 = arith.constant 0 : index
    %c2 = arith.constant 2 : index
    %c0_31 = arith.constant 0 : index
    %60 = vector.load %arg7[%c0_30, %c2, %c0_31] : memref<1x6x128xf32, #tpu.memory_space<vmem>>, vector<1x1x128xf32>
    %61 = vector.shape_cast %60 : vector<1x1x128xf32> to vector<1x128xf32>
    %62 = arith.mulf %41, %41 : vector<257x128xf32>
    %cst_32 = arith.constant dense<0.000000e+00> : vector<128xf32>
    %63 = vector.multi_reduction <add>, %62, %cst_32 [0] : vector<257x128xf32> to vector<128xf32>
    %64 = vector.shape_cast %63 : vector<128xf32> to vector<1x128xf32>
    %65 = arith.addf %61, %64 : vector<1x128xf32>
    %c0_33 = arith.constant 0 : index
    %c2_34 = arith.constant 2 : index
    %c0_35 = arith.constant 0 : index
    %66 = vector.load %arg7[%c0_33, %c2_34, %c0_35] : memref<1x6x128xf32, #tpu.memory_space<vmem>>, vector<1x1x128xf32>
    %67 = vector.shape_cast %66 : vector<1x1x128xf32> to vector<1x128xf32>
    %68 = vector.shape_cast %65 : vector<1x128xf32> to vector<1x1x128xf32>
    tpu.vector_store %arg7[%c0_33, %c2_34, %c0_35], %68 {strides = array<i32>} : memref<1x6x128xf32, #tpu.memory_space<vmem>>, vector<1x1x128xf32>,
    %69 = vector.extract_strided_slice %6 {offsets = [1, 0], sizes = [255, 128], strides = [1, 1]} : vector<257x128xf32> to vector<255x128xf32>
    %70 = tpu.concatenate %4, %69 in 0 : vector<257x128xf32>, vector<255x128xf32> -> vector<512x128xf32>
    %71 = vector.extract_strided_slice %10 {offsets = [1, 0], sizes = [255, 128], strides = [1, 1]} : vector<257x128xf32> to vector<255x128xf32>
    %72 = tpu.concatenate %8, %71 in 0 : vector<257x128xf32>, vector<255x128xf32> -> vector<512x128xf32>
    %73 = tpu.concatenate %70, %72 in 1 : vector<512x128xf32>, vector<512x128xf32> -> vector<512x256xf32>
    %74 = arith.truncf %73 : vector<512x256xf32> to vector<512x256xbf16>
    %c0_36 = arith.constant 0 : index
    %c0_37 = arith.constant 0 : index
    %75 = vector.load %arg6[%c0_36, %c0_37] : memref<512x512xbf16, #tpu.memory_space<vmem>>, vector<512x512xbf16>
    %cst_38 = arith.constant dense<0.000000e+00> : vector<512x256xf32>
    %76 = tpu.matmul %75, %74, %cst_38 {dimension_numbers = #tpu.dot_dimension_numbers<[1], [0], [0], [1], [0, 0, 1, 1], [], []>} : vector<512x512xbf16>, vector<512x256xbf16>, vector<512x256xf32> -> vector<512x256xf32>
    %77 = vector.extract_strided_slice %76 {offsets = [0, 0], sizes = [256, 128], strides = [1, 1]} : vector<512x256xf32> to vector<256x128xf32>
    %78 = vector.extract_strided_slice %76 {offsets = [0, 128], sizes = [256, 128], strides = [1, 1]} : vector<512x256xf32> to vector<256x128xf32>
    %79 = vector.extract_strided_slice %76 {offsets = [256, 0], sizes = [256, 128], strides = [1, 1]} : vector<512x256xf32> to vector<256x128xf32>
    %80 = vector.extract_strided_slice %76 {offsets = [256, 128], sizes = [256, 128], strides = [1, 1]} : vector<512x256xf32> to vector<256x128xf32>
    %c1_i32 = arith.constant 1 : i32
    %81 = tpu.dynamic_rotate %79 by %c1_i32 dim 1 : vector<256x128xf32>, i32 -> vector<256x128xf32>
    %c1_i32_39 = arith.constant 1 : i32
    %82 = tpu.dynamic_rotate %80 by %c1_i32_39 dim 1 : vector<256x128xf32>, i32 -> vector<256x128xf32>
    %83 = vector.extract_strided_slice %81 {offsets = [0, 0], sizes = [256, 1], strides = [1, 1]} : vector<256x128xf32> to vector<256x1xf32>
    %84 = vector.extract_strided_slice %82 {offsets = [0, 0], sizes = [256, 1], strides = [1, 1]} : vector<256x128xf32> to vector<256x1xf32>
    %85 = tpu.iota {dimensions = array<i32: 1>} : vector<256x128xi32>
    %c0_i32_40 = arith.constant 0 : i32
    %86 = vector.broadcast %c0_i32_40 : i32 to vector<256x128xi32>
    %87 = arith.cmpi eq, %85, %86 : vector<256x128xi32>
    %c0_41 = arith.constant 0 : index
    %c0_42 = arith.constant 0 : index
    %88 = vector.load %arg8[%c0_41, %c0_42] : memref<256x2xf32, #tpu.memory_space<vmem>>, vector<256x1xf32>
    %89 = vector.shape_cast %88 : vector<256x1xf32> to vector<256x1xf32>
    %90 = vector.broadcast %89 : vector<256x1xf32> to vector<256x128xf32>
    %91 = arith.select %87, %90, %81 : vector<256x128xi1>, vector<256x128xf32>
    %c0_i32_43 = arith.constant 0 : i32
    %92 = vector.broadcast %c0_i32_43 : i32 to vector<256x128xi32>
    %93 = arith.cmpi eq, %85, %92 : vector<256x128xi32>
    %c0_44 = arith.constant 0 : index
    %c1_45 = arith.constant 1 : index
    %94 = vector.load %arg8[%c0_44, %c1_45] : memref<256x2xf32, #tpu.memory_space<vmem>>, vector<256x1xf32>
    %95 = vector.shape_cast %94 : vector<256x1xf32> to vector<256x1xf32>
    %96 = vector.broadcast %95 : vector<256x1xf32> to vector<256x128xf32>
    %97 = arith.select %93, %96, %82 : vector<256x128xi1>, vector<256x128xf32>
    %c128_i32 = arith.constant 128 : i32
    %98 = arith.muli %arg1, %c128_i32 : i32
    %99 = vector.extract_strided_slice %85 {offsets = [0, 0], sizes = [1, 128], strides = [1, 1]} : vector<256x128xi32> to vector<1x128xi32>
    %100 = vector.broadcast %98 : i32 to vector<1x128xi32>
    %101 = arith.addi %100, %99 : vector<1x128xi32>
    %c1_i32_46 = arith.constant 1 : i32
    %102 = vector.broadcast %c1_i32_46 : i32 to vector<1x128xi32>
    %103 = arith.cmpi sge, %101, %102 : vector<1x128xi32>
    %c7_i32 = arith.constant 7 : i32
    %104 = vector.broadcast %c7_i32 : i32 to vector<1x128xi32>
    %105 = arith.cmpi sle, %101, %104 : vector<1x128xi32>
    %106 = arith.andi %103, %105 : vector<1x128xi1>
    %107 = arith.addf %77, %91 : vector<256x128xf32>
    %cst_47 = arith.constant 0.000000e+00 : f32
    %108 = vector.shape_cast %106 : vector<1x128xi1> to vector<1x128xi1>
    %109 = vector.broadcast %108 : vector<1x128xi1> to vector<256x128xi1>
    %110 = vector.broadcast %cst_47 : f32 to vector<256x128xf32>
    %111 = arith.select %109, %107, %110 : vector<256x128xi1>, vector<256x128xf32>
    %112 = arith.addf %78, %97 : vector<256x128xf32>
    %cst_48 = arith.constant 0.000000e+00 : f32
    %113 = vector.shape_cast %106 : vector<1x128xi1> to vector<1x128xi1>
    %114 = vector.broadcast %113 : vector<1x128xi1> to vector<256x128xi1>
    %115 = vector.broadcast %cst_48 : f32 to vector<256x128xf32>
    %116 = arith.select %114, %112, %115 : vector<256x128xi1>, vector<256x128xf32>
    %c0_49 = arith.constant 0 : index
    %c3 = arith.constant 3 : index
    %c0_50 = arith.constant 0 : index
    %117 = vector.load %arg7[%c0_49, %c3, %c0_50] : memref<1x6x128xf32, #tpu.memory_space<vmem>>, vector<1x1x128xf32>
    %118 = vector.shape_cast %117 : vector<1x1x128xf32> to vector<1x128xf32>
    %119 = arith.mulf %116, %111 : vector<256x128xf32>
    %cst_51 = arith.constant dense<0.000000e+00> : vector<128xf32>
    %120 = vector.multi_reduction <add>, %119, %cst_51 [0] : vector<256x128xf32> to vector<128xf32>
    %121 = vector.shape_cast %120 : vector<128xf32> to vector<1x128xf32>
    %122 = arith.addf %118, %121 : vector<1x128xf32>
    %c0_52 = arith.constant 0 : index
    %c3_53 = arith.constant 3 : index
    %c0_54 = arith.constant 0 : index
    %123 = vector.load %arg7[%c0_52, %c3_53, %c0_54] : memref<1x6x128xf32, #tpu.memory_space<vmem>>, vector<1x1x128xf32>
    %124 = vector.shape_cast %123 : vector<1x1x128xf32> to vector<1x128xf32>
    %125 = vector.shape_cast %122 : vector<1x128xf32> to vector<1x1x128xf32>
    tpu.vector_store %arg7[%c0_52, %c3_53, %c0_54], %125 {strides = array<i32>} : memref<1x6x128xf32, #tpu.memory_space<vmem>>, vector<1x1x128xf32>,
    %c0_55 = arith.constant 0 : index
    %c4 = arith.constant 4 : index
    %c0_56 = arith.constant 0 : index
    %126 = vector.load %arg7[%c0_55, %c4, %c0_56] : memref<1x6x128xf32, #tpu.memory_space<vmem>>, vector<1x1x128xf32>
    %127 = vector.shape_cast %126 : vector<1x1x128xf32> to vector<1x128xf32>
    %128 = arith.mulf %116, %116 : vector<256x128xf32>
    %cst_57 = arith.constant dense<0.000000e+00> : vector<128xf32>
    %129 = vector.multi_reduction <add>, %128, %cst_57 [0] : vector<256x128xf32> to vector<128xf32>
    %130 = vector.shape_cast %129 : vector<128xf32> to vector<1x128xf32>
    %131 = arith.addf %127, %130 : vector<1x128xf32>
    %c0_58 = arith.constant 0 : index
    %c4_59 = arith.constant 4 : index
    %c0_60 = arith.constant 0 : index
    %132 = vector.load %arg7[%c0_58, %c4_59, %c0_60] : memref<1x6x128xf32, #tpu.memory_space<vmem>>, vector<1x1x128xf32>
    %133 = vector.shape_cast %132 : vector<1x1x128xf32> to vector<1x128xf32>
    %134 = vector.shape_cast %131 : vector<1x128xf32> to vector<1x1x128xf32>
    tpu.vector_store %arg7[%c0_58, %c4_59, %c0_60], %134 {strides = array<i32>} : memref<1x6x128xf32, #tpu.memory_space<vmem>>, vector<1x1x128xf32>,
    %c0_61 = arith.constant 0 : index
    %c5 = arith.constant 5 : index
    %c0_62 = arith.constant 0 : index
    %135 = vector.load %arg7[%c0_61, %c5, %c0_62] : memref<1x6x128xf32, #tpu.memory_space<vmem>>, vector<1x1x128xf32>
    %136 = vector.shape_cast %135 : vector<1x1x128xf32> to vector<1x128xf32>
    %137 = arith.mulf %111, %111 : vector<256x128xf32>
    %cst_63 = arith.constant dense<0.000000e+00> : vector<128xf32>
    %138 = vector.multi_reduction <add>, %137, %cst_63 [0] : vector<256x128xf32> to vector<128xf32>
    %139 = vector.shape_cast %138 : vector<128xf32> to vector<1x128xf32>
    %140 = arith.addf %136, %139 : vector<1x128xf32>
    %c0_64 = arith.constant 0 : index
    %c5_65 = arith.constant 5 : index
    %c0_66 = arith.constant 0 : index
    %141 = vector.load %arg7[%c0_64, %c5_65, %c0_66] : memref<1x6x128xf32, #tpu.memory_space<vmem>>, vector<1x1x128xf32>
    %142 = vector.shape_cast %141 : vector<1x1x128xf32> to vector<1x128xf32>
    %143 = vector.shape_cast %140 : vector<1x128xf32> to vector<1x1x128xf32>
    tpu.vector_store %arg7[%c0_64, %c5_65, %c0_66], %143 {strides = array<i32>} : memref<1x6x128xf32, #tpu.memory_space<vmem>>, vector<1x1x128xf32>,
    %c0_67 = arith.constant 0 : index
    %c0_68 = arith.constant 0 : index
    %144 = vector.load %arg8[%c0_67, %c0_68] : memref<256x2xf32, #tpu.memory_space<vmem>>, vector<256x1xf32>
    tpu.vector_store %arg8[%c0_67, %c0_68], %83 {strides = array<i32>} : memref<256x2xf32, #tpu.memory_space<vmem>>, vector<256x1xf32>,
    %c0_69 = arith.constant 0 : index
    %c1_70 = arith.constant 1 : index
    %145 = vector.load %arg8[%c0_69, %c1_70] : memref<256x2xf32, #tpu.memory_space<vmem>>, vector<256x1xf32>
    tpu.vector_store %arg8[%c0_69, %c1_70], %84 {strides = array<i32>} : memref<256x2xf32, #tpu.memory_space<vmem>>, vector<256x1xf32>,
    return
  }
  func.func @transform_0(%arg0: i32, %arg1: i32) -> (i32, i32, i32) {
    %c0_i32 = arith.constant 0 : i32
    %c0_i32_0 = arith.constant 0 : i32
    return %arg0, %c0_i32, %arg1 : i32, i32, i32
  }
  func.func @transform_1(%arg0: i32, %arg1: i32) -> (i32, i32, i32) {
    %c0_i32 = arith.constant 0 : i32
    %c0_i32_0 = arith.constant 0 : i32
    return %arg0, %c0_i32, %arg1 : i32, i32, i32
  }
  func.func @transform_2(%arg0: i32, %arg1: i32) -> (i32, i32, i32) {
    %c0_i32 = arith.constant 0 : i32
    %c0_i32_0 = arith.constant 0 : i32
    return %arg0, %c0_i32, %arg1 : i32, i32, i32
  }
  func.func @transform_3(%arg0: i32, %arg1: i32) -> (i32, i32, i32) {
    %c0_i32 = arith.constant 0 : i32
    %c0_i32_0 = arith.constant 0 : i32
    return %arg0, %c0_i32, %arg1 : i32, i32, i32
  }
  func.func @transform_4(%arg0: i32, %arg1: i32) -> (i32, i32) {
    %c0_i32 = arith.constant 0 : i32
    %c0_i32_0 = arith.constant 0 : i32
    %c0_i32_1 = arith.constant 0 : i32
    return %c0_i32, %c0_i32_0 : i32, i32
  }
  func.func @transform_5(%arg0: i32, %arg1: i32) -> (i32, i32, i32) {
    %c0_i32 = arith.constant 0 : i32
    %c0_i32_0 = arith.constant 0 : i32
    %c0_i32_1 = arith.constant 0 : i32
    return %arg0, %c0_i32, %c0_i32_0 : i32, i32, i32
  }
}

</mosaic_0001>

<bundles_post_ra>
// kernel: hybrid_loss.1
= control target key start
LH: loop header
LB: loop body
LE: loop exit
PB: predicated region body
PF: predicated region fallthrough
CT: control target
= control target key end

     0   :  { %s6323_s18 = smov 0   ;;  %s6325_s19 = smov 0   ;;  %s10549_s0 = inlined_call_operand.vmem [shape: f32[2,257,128], index: 0, kind: input, shape index: {}]   ;;  %s10550_s1 = inlined_call_operand.vmem [shape: f32[2,257,128], index: 1, kind: input, shape index: {}]   ;;  %s10551_s2 = inlined_call_operand.vmem [shape: f32[2,257,128], index: 2, kind: input, shape index: {}]   ;;  %s10552_s3 = inlined_call_operand.vmem [shape: f32[2,257,128], index: 3, kind: input, shape index: {}]   ;;  %s10553_s4 = inlined_call_operand.vmem [shape: bf16[512,512], index: 4, kind: input, shape index: {}]   ;;  %s10554_s5 = inlined_call_operand.vmem [shape: f32[2,6,128], index: 5, kind: output, shape index: {}]  }
   0x1   :  { %s6327_s20 = smov 0  }
   0x2 LB: > { %s27_s21 = sadd.s32 1, %s6283_s19  ;;  %p5130_p0 = scmp.ge.s32.totalorder %s6287_s20, 1  ;;  %s6287_s20 = sphi %s6327_s20, %s15_s20   ;;  %s6283_s19 = sphi %s6325_s19, %s11403_s19   ;;  %s6279_s18 = sphi %s6323_s18, %s11402_s18  }
   0x3   : > { %p29_p1 = scmp.ge.s32.totalorder %s27_s21, 2  ;;  %p249_p2 = scmp.lt.s32.totalorder %s6287_s20, 3 }
   0x5   : > { %s11405_s21 = smov (%p29_p1, %s27_s21), 0  ;;  %p250_p3 = pnand %p5130_p0, %p249_p2 }
   0x7   : > { %253 = sbr.rel (%p250_p3) target bundleno = 1449 (0x5a9), region = 40 }
   0xc   : > { %p303_p4 = scmp.lt.s32.totalorder %s6279_s18, 1  ;;  %vm1597_vm0 = vcmask 1040384   ;;  %vm344_vm1 = vcmask 15360   ;;  %vm4811_vm3 = vcmask 7168   ;;  %vm4972_vm7 = vcmask 15368  }
   0xe   : > { %s11407_s18 = smov (!%p303_p4, %s6279_s18), 1 }
   0xf   : > { %s6344_s22 = smul.u32 264, %s11407_s18  ;;  %s5135_s14 = sshll.u32 %s11407_s18, 3 }
  0x10   : > { %s8567_s18 = scalar_lea.vmem %s10554_s5, %s5135_s14 }
  0x11   : > { %s6350_s25 = scalar_lea.vmem %s10549_s0, %s6344_s22  ;;  %s6356_s28 = scalar_lea.vmem %s10550_s1, %s6344_s22 }
  0x12   : > { %v6359_v0 = vld [vmem:[%s6350_s25 + $0x70] sm:$0xff]  ;;  %v6362_v1 = vld [vmem:[%s6350_s25 + $0x78] sm:$0xff]  ;;  %v6387_v10 = vld [vmem:[%s6350_s25 + $0x60] sm:$0xff]  ;;  %s6557_s12 = scalar_lea.vmem %s10552_s3, %s6344_s22  ;;  %s6575_s15 = scalar_lea.vmem %s10551_s2, %s6344_s22 }
  0x13   : > { %v6365_v2 = vld [vmem:[%s6350_s25 + $0xf0] sm:$0xff]  ;;  %v1774_v3 = vpack.c.bf16 %v6362_v1, %v6359_v0  ;;  %v6370_v4 = vld [vmem:[%s6350_s25 + $0xf8] sm:$0xff]  ;;  %v6394_v13 = vld [vmem:[%s6350_s25 + $0x68] sm:$0xff]  ;;  %s6292_s22 = smov 1  }
  0x14   : > { %v6373_v5 = vld [vmem:[%s6356_s28 + $0x70] sm:$0xff]  ;;  %v6376_v6 = vld [vmem:[%s6356_s28 + $0x78] sm:$0xff]  ;;  %v1790_v7 = vpack.c.bf16 %v6370_v4, %v6365_v2  ;;  %v6397_v14 = vld [vmem:[%s6350_s25 + $0xe0] sm:$0xff]  ;;  %v1772_v16 = vpack.c.bf16 %v6394_v13, %v6387_v10 }
  0x15   : > { %v6381_v8 = vld [vmem:[%s6356_s28 + $0xf0] sm:$0xff]  ;;  %v6384_v9 = vld [vmem:[%s6356_s28 + $0xf8] sm:$0xff]  ;;  %2592 = vmatpush.bf16.msra.mxu0 %v1774_v3  ;;  %v1806_v11 = vpack.c.bf16 %v6376_v6, %v6373_v5  ;;  %v6400_v15 = vld [vmem:[%s6350_s25 + $0xe8] sm:$0xff] }
  0x16   : > { %v1822_v12 = vpack.c.bf16 %v6384_v9, %v6381_v8  ;;  %2761 = vmatpush.bf16.msra.mxu1 %v1790_v7  ;;  %v6405_v17 = vld [vmem:[%s6356_s28 + $0x60] sm:$0xff]  ;;  %v6408_v18 = vld [vmem:[%s6356_s28 + $0x68] sm:$0xff]  ;;  %v1788_v21 = vpack.c.bf16 %v6400_v15, %v6397_v14  ;;  %v6423_v24 = vld [vmem:[%s6350_s25 + $0x50] sm:$0xff] }
  0x17   : > { %2930 = vmatpush.bf16.msra.mxu2 %v1806_v11  ;;  %v6411_v19 = vld [vmem:[%s6356_s28 + $0xe0] sm:$0xff]  ;;  %v6414_v20 = vld [vmem:[%s6356_s28 + $0xe8] sm:$0xff]  ;;  %v1804_v22 = vpack.c.bf16 %v6408_v18, %v6405_v17  ;;  %v388_v25 = vld [vmem:[%s6350_s25 + $0x58] sm:$0xff] }
  0x18   : > { %3099 = vmatpush.bf16.msra.mxu3 %v1822_v12  ;;  %v1820_v23 = vpack.c.bf16 %v6414_v20, %v6411_v19  ;;  %v403_v26 = vld [vmem:[%s6350_s25 + $0xd0] sm:$0xff]  ;;  %v404_v27 = vld [vmem:[%s6350_s25 + $0xd8] sm:$0xff]  ;;  %v1770_v31 = vpack.c.bf16 %v388_v25, %v6423_v24  ;;  %v385_v33 = vld [vmem:[%s6350_s25 + $0x40] sm:$0xff] }
  0x19   : > { %2593 = vmatpush.bf16.msra.mxu0 %v1772_v16  ;;  %v6429_v28 = vld [vmem:[%s6356_s28 + $0x50] sm:$0xff]  ;;  %v421_v29 = vld [vmem:[%s6356_s28 + $0x58] sm:$0xff]  ;;  %v386_v34 = vld [vmem:[%s6350_s25 + $0x48] sm:$0xff]  ;;  %v1786_v35 = vpack.c.bf16 %v404_v27, %v403_v26 }
  0x1a   : > { %2762 = vmatpush.bf16.msra.mxu1 %v1788_v21  ;;  %v436_v30 = vld [vmem:[%s6356_s28 + $0xd0] sm:$0xff]  ;;  %v437_v32 = vld [vmem:[%s6356_s28 + $0xd8] sm:$0xff]  ;;  %v1802_v36 = vpack.c.bf16 %v421_v29, %v6429_v28  ;;  %v401_v37 = vld [vmem:[%s6350_s25 + $0xc0] sm:$0xff]  ;;  %v1768_v40 = vpack.c.bf16 %v386_v34, %v385_v33 }
  0x1b   : > { %2931 = vmatpush.bf16.msra.mxu2 %v1804_v22  ;;  %v402_v38 = vld [vmem:[%s6350_s25 + $0xc8] sm:$0xff]  ;;  %v1818_v39 = vpack.c.bf16 %v437_v32, %v436_v30  ;;  %v418_v41 = vld [vmem:[%s6356_s28 + $0x40] sm:$0xff]  ;;  %v383_v46 = vld [vmem:[%s6350_s25 + $0x30] sm:$0xff] }
  0x1c   : > { %3100 = vmatpush.bf16.msra.mxu3 %v1820_v23  ;;  %v419_v42 = vld [vmem:[%s6356_s28 + $0x48] sm:$0xff]  ;;  %v434_v43 = vld [vmem:[%s6356_s28 + $0xc0] sm:$0xff]  ;;  %v1784_v45 = vpack.c.bf16 %v402_v38, %v401_v37  ;;  %v384_v47 = vld [vmem:[%s6350_s25 + $0x38] sm:$0xff] }
  0x1d   : > { %2594 = vmatpush.bf16.msra.mxu0 %v1770_v31  ;;  %v435_v44 = vld [vmem:[%s6356_s28 + $0xc8] sm:$0xff]  ;;  %v1800_v48 = vpack.c.bf16 %v419_v42, %v418_v41  ;;  %v1766_v50 = vpack.c.bf16 %v384_v47, %v383_v46  ;;  %v399_v51 = vld [vmem:[%s6350_s25 + $0xb0] sm:$0xff]  ;;  %v400_v52 = vld [vmem:[%s6350_s25 + $0xb8] sm:$0xff] }
  0x1e   : > { %2763 = vmatpush.bf16.msra.mxu1 %v1786_v35  ;;  %v1816_v49 = vpack.c.bf16 %v435_v44, %v434_v43  ;;  %v416_v53 = vld [vmem:[%s6356_s28 + $0x30] sm:$0xff]  ;;  %v417_v54 = vld [vmem:[%s6356_s28 + $0x38] sm:$0xff]  ;;  %v381_v57 = vld [vmem:[%s6350_s25 + $0x20] sm:$0xff]  ;;  %v1782_v61 = vpack.c.bf16 %v400_v52, %v399_v51 }
  0x1f   : > { %2932 = vmatpush.bf16.msra.mxu2 %v1802_v36  ;;  %v432_v55 = vld [vmem:[%s6356_s28 + $0xb0] sm:$0xff]  ;;  %v433_v56 = vld [vmem:[%s6356_s28 + $0xb8] sm:$0xff]  ;;  %v382_v58 = vld [vmem:[%s6350_s25 + $0x28] sm:$0xff]  ;;  %v1798_v7 = vpack.c.bf16 %v417_v54, %v416_v53 }
  0x20   : > { %3101 = vmatpush.bf16.msra.mxu3 %v1818_v39  ;;  %v397_v59 = vld [vmem:[%s6350_s25 + $0xa0] sm:$0xff]  ;;  %v398_v60 = vld [vmem:[%s6350_s25 + $0xa8] sm:$0xff]  ;;  %v379_v12 = vld [vmem:[%s6350_s25 + $0x10] sm:$0xff]  ;;  %v1814_v21 = vpack.c.bf16 %v433_v56, %v432_v55  ;;  %v1764_v22 = vpack.c.bf16 %v382_v58, %v381_v57 }
  0x21   : > { %2595 = vmatpush.bf16.msra.mxu0 %v1768_v40  ;;  %v414_v62 = vld [vmem:[%s6356_s28 + $0x20] sm:$0xff]  ;;  %v415_v63 = vld [vmem:[%s6356_s28 + $0x28] sm:$0xff]  ;;  %v380_v16 = vld [vmem:[%s6350_s25 + $0x18] sm:$0xff]  ;;  %v1780_v23 = vpack.c.bf16 %v398_v60, %v397_v59 }
  0x22   : > { %2764 = vmatpush.bf16.msra.mxu1 %v1784_v45  ;;  %v430_v3 = vld [vmem:[%s6356_s28 + $0xa0] sm:$0xff]  ;;  %v431_v11 = vld [vmem:[%s6356_s28 + $0xa8] sm:$0xff]  ;;  %v395_v25 = vld [vmem:[%s6350_s25 + $0x90] sm:$0xff]  ;;  %v1796_v27 = vpack.c.bf16 %v415_v63, %v414_v62  ;;  %v1762_v30 = vpack.c.bf16 %v380_v16, %v379_v12  ;;  %v557_v12 = vmul.f32 %v6376_v6, %v6376_v6 }
  0x23   : > { %2933 = vmatpush.bf16.msra.mxu2 %v1800_v48  ;;  %v396_v26 = vld [vmem:[%s6350_s25 + $0x98] sm:$0xff]  ;;  %v1812_v29 = vpack.c.bf16 %v431_v11, %v430_v3  ;;  %v412_v31 = vld [vmem:[%s6356_s28 + $0x10] sm:$0xff]  ;;  %v377_v35 = vld [vmem:[%s6350_s25] sm:$0xff]  ;;  %v523_v3 = vmul.f32 %v6359_v0, %v6359_v0  ;;  %v524_v11 = vmul.f32 %v6362_v1, %v6362_v1 }
  0x24   : > { %3102 = vmatpush.bf16.msra.mxu3 %v1816_v49  ;;  %v413_v32 = vld [vmem:[%s6356_s28 + $0x18] sm:$0xff]  ;;  %v428_v33 = vld [vmem:[%s6356_s28 + $0x90] sm:$0xff]  ;;  %v378_v36 = vld [vmem:[%s6350_s25 + $0x8] sm:$0xff]  ;;  %v1778_v37 = vpack.c.bf16 %v396_v26, %v395_v25  ;;  %v572_v25 = vmul.f32 %v6381_v8, %v6381_v8  ;;  %v540_v26 = vmul.f32 %v6370_v4, %v6370_v4 }
  0x25   : > { %2596 = vmatpush.bf16.msra.mxu0 %v1766_v50  ;;  %v429_v34 = vld [vmem:[%s6356_s28 + $0x98] sm:$0xff]  ;;  %v1794_v38 = vpack.c.bf16 %v413_v32, %v412_v31  ;;  %v1760_v40 = vpack.c.bf16 %v378_v36, %v377_v35  ;;  %v393_v41 = vld [vmem:[%s6350_s25 + $0x80] sm:$0xff]  ;;  %v394_v42 = vld [vmem:[%s6350_s25 + $0x88] sm:$0xff]  ;;  %v522_v36 = vmul.f32 %v6394_v13, %v6394_v13 }
  0x26   : > { %2765 = vmatpush.bf16.msra.mxu1 %v1782_v61  ;;  %v1810_v39 = vpack.c.bf16 %v429_v34, %v428_v33  ;;  %v409_v43 = vld [vmem:[%s6350_s25 + $0x100] sm:$0x1]  ;;  %v427_v46 = vld [vmem:[%s6356_s28 + $0x88] sm:$0xff]  ;;  %v5652_v49 = vld [vmem:[%s10553_s4 + $0xc] sm:$0xf0]  ;;  %v1776_v50 = vpack.c.bf16 %v394_v42, %v393_v41  ;;  %v521_v34 = vmul.f32 %v6387_v10, %v6387_v10 }
  0x27   : > { %2934 = vmatpush.bf16.msra.mxu2 %v1798_v7  ;;  %v410_v44 = vld [vmem:[%s6356_s28] sm:$0xff]  ;;  %v411_v47 = vld [vmem:[%s6356_s28 + $0x8] sm:$0xff]  ;;  %v5140_v52 = vld [vmem:[%s10553_s4 + $0x10] sm:$0xf0]  ;;  %v556_v7 = vmul.f32 %v6373_v5, %v6373_v5 }
  0x28   : > { %3103 = vmatpush.bf16.msra.mxu3 %v1814_v21  ;;  %v426_v45 = vld [vmem:[%s6356_s28 + $0x80] sm:$0xff]  ;;  %v1758_v53 = vsel %vm1597_vm0, %v409_v43, %v410_v44  ;;  %v5146_v55 = vld [vmem:[%s10553_s4 + $0x8] sm:$0xf]  ;;  %v5653_v56 = vld [vmem:[%s10553_s4 + $0x14] sm:$0xf0]  ;;  %v537_v43 = vmul.f32 %v6397_v14, %v6397_v14  ;;  %v570_v44 = vmul.f32 %v6411_v19, %v6411_v19 }
  0x29   : > { %2597 = vmatpush.bf16.msra.mxu0 %v1764_v22  ;;  %v5138_v48 = vld [vmem:[%s10553_s4] sm:$0xf]  ;;  %v5650_v51 = vld [vmem:[%s10553_s4 + $0x4] sm:$0xf]  ;;  %v1808_v54 = vpack.c.bf16 %v427_v46, %v426_v45  ;;  %v1792_v57 = vpack.c.bf16 %v411_v47, %v1758_v53  ;;  %v5651_v60 = vld [vmem:[%s10553_s4 + $0xc] sm:$0xf]  ;;  %v6506_v62 = vor.u32 %v5653_v56, %v5146_v55  ;;  %v539_v22 = vmul.f32 %v6365_v2, %v6365_v2 }
  0x2a   : > { %2766 = vmatpush.bf16.msra.mxu1 %v1780_v23  ;;  %v6496_v58 = vor.u32 %v5652_v49, %v5138_v48  ;;  %v6498_v59 = vor.u32 %v5650_v51, %v5140_v52  ;;  %v5148_v61 = vld [vmem:[%s10553_s4 + $0x18] sm:$0xf0]  ;;  %v5154_v16 = vld [vmem:[%s10553_s4 + $0x20] sm:$0xf]  ;;  %v5656_v21 = vld [vmem:[%s10553_s4 + $0x2c] sm:$0xf0]  ;;  %v589_v23 = vadd.f32 %v556_v7, %v523_v3 }
  0x2b   : > { %2935 = vmatpush.bf16.msra.mxu2 %v1796_v27  ;;  %10716 = vst [vmem:[#allocation5_spill] sm:$0xff] %v6506_v62  ;;  %v6510_v63 = vor.u32 %v5651_v60, %v5148_v61  ;;  %v573_v27 = vmul.f32 %v6384_v9, %v6384_v9  ;;  %v605_v32 = vadd.f32 %v572_v25, %v539_v22  ;;  %v6566_v48 = vld [vmem:[%s6557_s12 + $0x70] sm:$0xff]  ;;  %v6569_v49 = vld [vmem:[%s6557_s12 + $0x78] sm:$0xff]  ;;  %v5162_v3 = vld [vmem:[%s10553_s4 + $0x28] sm:$0xf] }
  0x2c   : > { %3104 = vmatpush.bf16.msra.mxu3 %v1812_v29  ;;  %10714 = vst [vmem:[#allocation3_spill] sm:$0xff] %v6496_v58  ;;  %v6536_v29 = vor.u32 %v5656_v21, %v5154_v16  ;;  %v622_v31 = vadd.f32 1e-12, %v589_v23  ;;  %v6579_v51 = vld [vmem:[%s6557_s12 + $0xf0] sm:$0xff]  ;;  %v6582_v52 = vld [vmem:[%s6557_s12 + $0xf8] sm:$0xff]  ;;  %v688_v56 = vmul.f32 %v6566_v48, %v6566_v48  ;;  %v689_v60 = vmul.f32 %v6569_v49, %v6569_v49 }
  0x2d   : > { %2598 = vmatpush.bf16.msra.mxu0 %v1762_v30  ;;  %10715 = vst [vmem:[#allocation4_spill] sm:$0xff] %v6498_v59  ;;  %v590_v30 = vadd.f32 %v557_v12, %v524_v11  ;;  %v606_v33 = vadd.f32 %v573_v27, %v540_v26  ;;  %v638_v41 = vadd.f32 1e-12, %v605_v32  ;;  %v6591_v61 = vld [vmem:[%s6575_s15 + $0x70] sm:$0xff]  ;;  %v5657_v7 = vld [vmem:[%s10553_s4 + $0x34] sm:$0xf0]  ;;  %v1823_v12 = vpack.c.bf16 %v6582_v52, %v6579_v51 }
  0x2e   : > { %2767 = vmatpush.bf16.msra.mxu1 %v1778_v37  ;;  %10717 = vst [vmem:[#allocation6_spill] sm:$0xff] %v6510_v63  ;;  %v554_v37 = vmul.f32 %v6405_v17, %v6405_v17  ;;  %5813 = vlog2.f32 %v622_v31  ;;  %v6602_v16 = vld [vmem:[%s6575_s15 + $0x78] sm:$0xff]  ;;  %v655_v21 = vmul.f32 %v6591_v61, %v6591_v61  ;;  %v538_v23 = vmul.f32 %v6400_v15, %v6400_v15 }
  0x2f   : > { %2936 = vmatpush.bf16.msra.mxu2 %v1794_v38  ;;  %10718 = vst [vmem:[#allocation7_spill] sm:$0xff] %v6536_v29  ;;  %v623_v35 = vadd.f32 1e-12, %v590_v30  ;;  %v555_v38 = vmul.f32 %v6408_v18, %v6408_v18  ;;  %v639_v42 = vadd.f32 1e-12, %v606_v33  ;;  %v571_v25 = vmul.f32 %v6414_v20, %v6414_v20 }
  0x30   : > { %3105 = vmatpush.bf16.msra.mxu3 %v1810_v39  ;;  %v5654_v39 = vld [vmem:[%s10553_s4 + $0x24] sm:$0xf]  ;;  %v587_v45 = vadd.f32 %v554_v37, %v521_v34  ;;  %v656_v26 = vmul.f32 %v6602_v16, %v6602_v16  ;;  %v721_v31 = vadd.f32 %v688_v56, %v655_v21  ;;  %v6612_v32 = vor.u32 %v5657_v7, %v5162_v3 }
  0x31   : > { %2599 = vmatpush.bf16.msra.mxu0 %v1760_v40  ;;  %v5156_v40 = vld [vmem:[%s10553_s4 + $0x30] sm:$0xf0]  ;;  %5815 = vlog2.f32 %v623_v35  ;;  %v588_v46 = vadd.f32 %v555_v38, %v522_v36  ;;  %v604_v37 = vadd.f32 %v571_v25, %v538_v23 }
  0x32   : > { %2768 = vmatpush.bf16.msra.mxu1 %v1776_v50  ;;  %v6563_v47 = vor.u32 %v5654_v39, %v5156_v40  ;;  %5817 = vlog2.f32 %v638_v41  ;;  %v603_v50 = vadd.f32 %v570_v44, %v537_v43  ;;  %10720 = vst [vmem:[#allocation9_spill] sm:$0xff] %v6612_v32  ;;  %v722_v35 = vadd.f32 %v689_v60, %v656_v26 }
  0x33   : > { %2937 = vmatpush.bf16.msra.mxu2 %v1792_v57  ;;  %5819 = vlog2.f32 %v639_v42  ;;  %v621_v55 = vadd.f32 1e-12, %v588_v46  ;;  %v1807_v57 = vpack.c.bf16 %v6569_v49, %v6566_v48  ;;  %v754_v36 = vadd.f32 1e-12, %v721_v31 }
  0x34   : > { %3106 = vmatpush.bf16.msra.mxu3 %v1808_v54  ;;  %2600 = vmatmul.bf16.vlgmr.msra.gmra.mxu0 %v6496_v58  ;;  %10719 = vst [vmem:[#allocation8_spill] sm:$0xff] %v6563_v47  ;;  %v5814_v53 = vpop.eup %5813  ;;  %v620_v54 = vadd.f32 1e-12, %v587_v45  ;;  %v636_v30 = vadd.f32 1e-12, %v603_v50 }
  0x35   : > { %2769 = vmatmul.bf16.vlgmr.msra.gmra.mxu1 %v6498_v59  ;;  %v802_v22 = vmul.f32 0.6931472, %v5814_v53  ;;  %v637_v46 = vadd.f32 1e-12, %v604_v37  ;;  %v5655_v53 = vld [vmem:[%s10553_s4 + $0x2c] sm:$0xf]  ;;  %v705_v37 = vmul.f32 %v6582_v52, %v6582_v52 }
  0x36   : > { %2938 = vmatmul.bf16.vlgmr.msra.gmra.mxu2 %v6506_v62  ;;  %5821 = vlog2.f32 %v620_v54  ;;  %v5164_v54 = vld [vmem:[%s10553_s4 + $0x38] sm:$0xf0]  ;;  %v6791_v62 = vld [vmem:[%s6575_s15 + $0xe0] sm:$0xff] }
  0x37   : > { %3107 = vmatmul.bf16.vlgmr.msra.gmra.mxu3 %v6510_v63  ;;  %v5816_v11 = vpop.eup %5815  ;;  %3606 = vmatpush.bf16.msrb.mxu2 %v1807_v57  ;;  %5823 = vlog2.f32 %v621_v55  ;;  %v919_v15 = vmul.f32 -0.35, %v802_v22  ;;  %v1315_v42 = vmul.f32 0.15, %v802_v22  ;;  %v6621_v21 = vor.u32 %v5655_v53, %v5164_v54 }
  0x38   : > { %v5818_v27 = vpop.eup %5817  ;;  %3775 = vmatpush.bf16.msrb.mxu3 %v1823_v12  ;;  %v804_v34 = vmul.f32 0.6931472, %v5816_v11  ;;  %5825 = vlog2.f32 %v636_v30 }
  0x39   : > { %v5820_v33 = vpop.eup %5819  ;;  %v834_v38 = vmul.f32 0.6931472, %v5818_v27  ;;  %5827 = vlog2.f32 %v754_v36  ;;  %v966_v44 = vmul.f32 1.442695, %v919_v15  ;;  %v1362_v3 = vmul.f32 1.442695, %v1315_v42 }
  0x3a   : > { %v920_v39 = vmul.f32 -0.35, %v804_v34  ;;  %v836_v40 = vmul.f32 0.6931472, %v5820_v33  ;;  %v1316_v45 = vmul.f32 0.15, %v804_v34  ;;  %5829 = vlog2.f32 %v637_v46 }
  0x3b   : > { %v935_v50 = vmul.f32 -0.35, %v834_v38  ;;  %v1331_v57 = vmul.f32 0.15, %v834_v38  ;;  %10721 = vst [vmem:[#allocation10_spill] sm:$0xff] %v6621_v21  ;;  %5831 = vpow2.f32 %v966_v44  ;;  %v704_v15 = vmul.f32 %v6579_v51, %v6579_v51  ;;  %v6638_v46 = vld [vmem:[%s6575_s15 + $0xf8] sm:$0xff] }
  0x3c   : > { %v5822_v41 = vpop.eup %5821  ;;  %v968_v55 = vmul.f32 1.442695, %v920_v39  ;;  %v936_v56 = vmul.f32 -0.35, %v836_v40  ;;  %v1364_v22 = vmul.f32 1.442695, %v1316_v45  ;;  %v1775_v42 = vpack.c.bf16 %v6602_v16, %v6591_v61 }
  0x3d   : > { %v5824_v43 = vpop.eup %5823  ;;  %v798_v7 = vmul.f32 0.6931472, %v5822_v41  ;;  %v998_v23 = vmul.f32 1.442695, %v935_v50  ;;  %v1332_v25 = vmul.f32 0.15, %v836_v40 }
  0x3e   : > { %v5826_v60 = vpop.eup %5825  ;;  %v800_v11 = vmul.f32 0.6931472, %v5824_v43  ;;  %5833 = vpow2.f32 %v968_v55  ;;  %v1000_v26 = vmul.f32 1.442695, %v936_v56  ;;  %v1394_v27 = vmul.f32 1.442695, %v1331_v57  ;;  %3268 = vmatpush.bf16.msrb.mxu0 %v1775_v42 }
  0x3f   : > { %v5828_v12 = vpop.eup %5827  ;;  %5835 = vpow2.f32 %v1362_v3  ;;  %v917_v31 = vmul.f32 -0.35, %v798_v7  ;;  %v6624_v34 = vmul.f32 0.6931472, %v5826_v60  ;;  %v1313_v36 = vmul.f32 0.15, %v798_v7 }
  0x40   : > { %v868_v30 = vmul.f32 0.6931472, %v5828_v12  ;;  %v918_v33 = vmul.f32 -0.35, %v800_v11  ;;  %v6631_v39 = vld [vmem:[%s6575_s15 + $0xf0] sm:$0xff]  ;;  %v5830_v44 = vpop.eup %5829  ;;  %5837 = vpow2.f32 %v1364_v22 }
  0x41   : > { %v755_v40 = vadd.f32 1e-12, %v722_v35  ;;  %v671_v43 = vmul.f32 %v6631_v39, %v6631_v39  ;;  %v5170_v50 = vld [vmem:[%s10553_s4 + $0x40] sm:$0xf]  ;;  %v5832_v53 = vpop.eup %5831  ;;  %5839 = vpow2.f32 %v998_v23  ;;  %v672_v35 = vmul.f32 %v6638_v46, %v6638_v46  ;;  %v5660_v55 = vld [vmem:[%s10553_s4 + $0x4c] sm:$0xf0] }
  0x42   : > { %v1018_v38 = vmul.f32 -0.35, %v868_v30  ;;  %v1414_v41 = vmul.f32 0.15, %v868_v30  ;;  %v5658_v56 = vld [vmem:[%s10553_s4 + $0x44] sm:$0xf]  ;;  %5841 = vpow2.f32 %v1000_v26 }
  0x43   : > { %v737_v60 = vadd.f32 %v704_v15, %v671_v43  ;;  %v5172_v3 = vld [vmem:[%s10553_s4 + $0x50] sm:$0xf0]  ;;  %v5178_v7 = vld [vmem:[%s10553_s4 + $0x48] sm:$0xf]  ;;  %v5661_v12 = vld [vmem:[%s10553_s4 + $0x54] sm:$0xf0]  ;;  %5843 = vlog2.f32 %v755_v40  ;;  %v1791_v15 = vpack.c.bf16 %v6638_v46, %v6631_v39 }
  0x44   : > { %2605 = vmatmul.bf16.gmra.mxu0 %v6536_v29  ;;  %v1065_v45 = vmul.f32 1.442695, %v1018_v38  ;;  %v1461_v54 = vmul.f32 1.442695, %v1414_v41  ;;  %v6651_v57 = vpop.eup %5833  ;;  %v1314_v23 = vmul.f32 0.15, %v800_v11  ;;  %v738_v38 = vadd.f32 %v705_v37, %v672_v35 }
  0x45   : > { %2774 = vmatmul.bf16.gmra.mxu1 %v6563_v47  ;;  %v5836_v22 = vpop.eup %5835  ;;  %v6662_v30 = vmul.f32 0.6931472, %v5830_v44  ;;  %v770_v26 = vadd.f32 1e-12, %v737_v60  ;;  %v6666_v41 = vor.u32 %v5660_v55, %v5170_v50  ;;  %v6668_v43 = vor.u32 %v5658_v56, %v5172_v3  ;;  %v5659_v11 = vld [vmem:[%s10553_s4 + $0x4c] sm:$0xf] }
  0x46   : > { %2943 = vmatmul.bf16.gmra.mxu2 %v6612_v32  ;;  %5845 = vpow2.f32 %v1065_v45  ;;  %v771_v42 = vadd.f32 1e-12, %v738_v38  ;;  %v5180_v37 = vld [vmem:[%s10553_s4 + $0x58] sm:$0xf0]  ;;  %v6678_v40 = vpop.eup %5837  ;;  %v1396_v44 = vmul.f32 1.442695, %v1332_v25  ;;  %3437 = vmatpush.bf16.msrb.mxu1 %v1791_v15  ;;  %v1216_v3 = vmul.f32 %v5832_v53, %v6373_v5 }
  0x47   : > { %3112 = vmatmul.bf16.gmra.mxu3 %v6621_v21  ;;  %10722 = vst [vmem:[#allocation11_spill] sm:$0xff] %v6666_v41  ;;  %5847 = vpow2.f32 %v1461_v54  ;;  %v6670_v21 = vor.u32 %v5661_v12, %v5178_v7  ;;  %v933_v45 = vmul.f32 -0.35, %v6624_v34  ;;  %v6682_v50 = vpop.eup %5839  ;;  %v962_v54 = vmul.f32 1.442695, %v917_v31 }
  0x48   : > { %10723 = vst [vmem:[#allocation12_spill] sm:$0xff] %v6668_v43  ;;  %5849 = vlog2.f32 %v770_v26  ;;  %v6686_v35 = vpop.eup %5841  ;;  %v6688_v55 = vmul.f32 1.442695, %v918_v33  ;;  %v6690_v25 = vmul.f32 1.442695, %v1313_v36  ;;  %v6692_v56 = vor.u32 %v5659_v11, %v5180_v37 }
  0x49   : > { %10724 = vst [vmem:[#allocation13_spill] sm:$0xff] %v6670_v21  ;;  %5851 = vlog2.f32 %v771_v42  ;;  %v5844_v60 = vpop.eup %5843  ;;  %v6695_v7 = vmul.f32 1.442695, %v1314_v23  ;;  %v6698_v31 = vmul.f32 -0.35, %v6662_v30  ;;  %v1117_v12 = vmul.f32 %v5832_v53, %v6359_v0 }
  0x4a   : > { %5853 = vpow2.f32 %v1394_v27  ;;  %10725 = vst [vmem:[#allocation14_spill] sm:$0xff] %v6692_v56  ;;  %v6703_v27 = vmul.f32 %v6651_v57, %v6376_v6  ;;  %v6705_v33 = vmul.f32 1.442695, %v933_v45  ;;  %v870_v36 = vmul.f32 0.6931472, %v5844_v60 }
  0x4b   : > { %5855 = vpow2.f32 %v1396_v44  ;;  %v6709_v5 = vmul.f32 %v6682_v50, %v6381_v8  ;;  %v5186_v0 = vld [vmem:[%s10553_s4 + $0x60] sm:$0xf]  ;;  %v5664_v6 = vld [vmem:[%s10553_s4 + $0x6c] sm:$0xf0]  ;;  %v5662_v8 = vld [vmem:[%s10553_s4 + $0x64] sm:$0xf]  ;;  %v6734_v45 = vmul.f32 %v6651_v57, %v6362_v1 }
  0x4c   : > { %v5846_v38 = vpop.eup %5845  ;;  %5857 = vpow2.f32 %v962_v54  ;;  %v1415_v42 = vmul.f32 0.15, %v870_v36  ;;  %v5188_v37 = vld [vmem:[%s10553_s4 + $0x70] sm:$0xf0] }
  0x4d   : > { %v5848_v26 = vpop.eup %5847  ;;  %v1150_v23 = vmul.f32 %v5846_v38, %v6591_v61  ;;  %v1249_v15 = vmul.f32 %v5846_v38, %v6566_v48  ;;  %v6724_v61 = vmul.f32 %v6686_v35, %v6384_v9  ;;  %v1019_v48 = vmul.f32 -0.35, %v870_v36  ;;  %v6744_v38 = vld [vmem:[%s6557_s12 + $0x60] sm:$0xff]  ;;  %v6747_v36 = vld [vmem:[%s6557_s12 + $0x68] sm:$0xff] }
  0x4e   : > { %v5850_v53 = vpop.eup %5849  ;;  %v6726_v11 = vsub.f32 %v5836_v22, %v5848_v26  ;;  %v5194_v22 = vld [vmem:[%s10553_s4 + $0x68] sm:$0xf]  ;;  %v1463_v1 = vmul.f32 1.442695, %v1415_v42 }
  0x4f   : > { %v5852_v44 = vpop.eup %5851  ;;  %v6736_v54 = vsub.f32 %v1117_v12, %v1150_v23  ;;  %v6738_v60 = vsub.f32 %v1216_v3, %v1249_v15  ;;  %v900_v9 = vmul.f32 0.6931472, %v5850_v53  ;;  %v6751_v12 = vor.u32 %v5664_v6, %v5186_v0  ;;  %v5665_v53 = vld [vmem:[%s10553_s4 + $0x74] sm:$0xf0]  ;;  %v6765_v6 = vld [vmem:[%s6557_s12 + $0xe0] sm:$0xff] }
  0x50   : > { %10726 = vst [vmem:[#allocation15_spill] sm:$0xff] %v6726_v11  ;;  %v6749_v26 = vpop.eup %5853  ;;  %v902_v57 = vmul.f32 0.6931472, %v5852_v44  ;;  %v6753_v15 = vor.u32 %v5662_v8, %v5188_v37  ;;  %v687_v0 = vmul.f32 %v6747_v36, %v6747_v36  ;;  %v6768_v8 = vld [vmem:[%s6557_s12 + $0xe8] sm:$0xff]  ;;  %v6780_v29 = vor.u32 %v5665_v53, %v5194_v22 }
  0x51   : > { %10727 = vst [vmem:[#allocation16_spill] sm:$0xff] %v6736_v54  ;;  %v1034_v3 = vmul.f32 -0.35, %v900_v9  ;;  %v1430_v23 = vmul.f32 0.15, %v900_v9  ;;  %v702_v63 = vmul.f32 %v6765_v6, %v6765_v6  ;;  %v703_v22 = vmul.f32 %v6768_v8, %v6768_v8 }
  0x52   : > { %10728 = vst [vmem:[#allocation17_spill] sm:$0xff] %v6738_v60  ;;  %v1431_v42 = vmul.f32 0.15, %v902_v57  ;;  %v1133_v11 = vmul.f32 %v6682_v50, %v6365_v2 }
  0x53   : > { %10729 = vst [vmem:[#allocation18_spill] sm:$0xff] %v6751_v12  ;;  %v1097_v44 = vmul.f32 1.442695, %v1034_v3  ;;  %v1493_v9 = vmul.f32 1.442695, %v1430_v23 }
  0x54   : > { %2610 = vmatmul.bf16.gmra.mxu0 %v6666_v41  ;;  %10730 = vst [vmem:[#allocation19_spill] sm:$0xff] %v6753_v15  ;;  %v1805_v41 = vpack.c.bf16 %v6747_v36, %v6744_v38  ;;  %v1495_v47 = vmul.f32 1.442695, %v1431_v42  ;;  %v5663_v42 = vld [vmem:[%s10553_s4 + $0x6c] sm:$0xf] }
  0x55   : > { %2779 = vmatmul.bf16.gmra.mxu1 %v6668_v43  ;;  %v6760_v43 = vpop.eup %5855  ;;  %10731 = vst [vmem:[#allocation20_spill] sm:$0xff] %v6765_v6 }
  0x56   : > { %2948 = vmatmul.bf16.gmra.mxu2 %v6670_v21  ;;  %v686_v21 = vmul.f32 %v6744_v38, %v6744_v38  ;;  %10732 = vst [vmem:[#allocation21_spill] sm:$0xff] %v6768_v8  ;;  %v6770_v37 = vpop.eup %5857 }
  0x57   : > { %3117 = vmatmul.bf16.gmra.mxu3 %v6692_v56  ;;  %v1067_v56 = vmul.f32 1.442695, %v1019_v48  ;;  %v1035_v48 = vmul.f32 -0.35, %v902_v57  ;;  %v6778_v57 = vld [vmem:[%s6575_s15 + $0x68] sm:$0xff]  ;;  %10733 = vst [vmem:[#allocation22_spill] sm:$0xff] %v6780_v29  ;;  %3607 = vmatpush.bf16.msrb.mxu2 %v1805_v41  ;;  %v669_v41 = vmul.f32 %v6791_v62, %v6791_v62 }
  0x58   : > { %v654_v23 = vmul.f32 %v6778_v57, %v6778_v57 }
  0x59   : > { %5859 = vpow2.f32 %v1067_v56  ;;  %v6775_v56 = vld [vmem:[%s6575_s15 + $0x60] sm:$0xff]  ;;  %v1099_v32 = vmul.f32 1.442695, %v1035_v48  ;;  %v6798_v48 = vld [vmem:[%s6575_s15 + $0xe8] sm:$0xff]  ;;  %v735_v54 = vadd.f32 %v702_v63, %v669_v41 }
  0x5a   : > { %5861 = vpow2.f32 %v1463_v1  ;;  %v1821_v1 = vpack.c.bf16 %v6768_v8, %v6765_v6  ;;  %v653_v3 = vmul.f32 %v6775_v56, %v6775_v56  ;;  %v1773_v53 = vpack.c.bf16 %v6778_v57, %v6775_v56 }
  0x5b   : > { %5863 = vpow2.f32 %v1097_v44  ;;  %v720_v59 = vadd.f32 %v687_v0, %v654_v23  ;;  %v670_v58 = vmul.f32 %v6798_v48, %v6798_v48  ;;  %v1789_v63 = vpack.c.bf16 %v6798_v48, %v6791_v62 }
  0x5c   : > { %5865 = vpow2.f32 %v1099_v32  ;;  %v5196_v32 = vld [vmem:[%s10553_s4 + $0x78] sm:$0xf0]  ;;  %3776 = vmatpush.bf16.msrb.mxu3 %v1821_v1  ;;  %v719_v44 = vadd.f32 %v686_v21, %v653_v3  ;;  %3269 = vmatpush.bf16.msrb.mxu0 %v1773_v53 }
  0x5d   : > { %5867 = vpow2.f32 %v1493_v9  ;;  %v1134_v9 = vmul.f32 %v6686_v35, %v6370_v4  ;;  %v753_v1 = vadd.f32 1e-12, %v720_v59  ;;  %v6822_v50 = vor.u32 %v5663_v42, %v5196_v32  ;;  %3438 = vmatpush.bf16.msrb.mxu1 %v1789_v63 }
  0x5e   : > { %5869 = vpow2.f32 %v1495_v47  ;;  %v752_v0 = vadd.f32 1e-12, %v719_v44  ;;  %v736_v4 = vadd.f32 %v703_v22, %v670_v58  ;;  %v768_v35 = vadd.f32 1e-12, %v735_v54  ;;  %v5210_v22 = vld [vmem:[%s10553_s4 + $0x88] sm:$0xf] }
  0x5f   : > { %v5860_v60 = vpop.eup %5859  ;;  %10735 = vst [vmem:[#allocation24_spill] sm:$0xff] %v6822_v50 }
  0x60   : > { %v5862_v8 = vpop.eup %5861  ;;  %v1151_v6 = vmul.f32 %v5860_v60, %v6602_v16  ;;  %v1250_v21 = vmul.f32 %v5860_v60, %v6569_v49  ;;  %5871 = vlog2.f32 %v752_v0 }
  0x61   : > { %v6820_v2 = vsub.f32 %v6678_v40, %v5862_v8  ;;  %v5864_v47 = vpop.eup %5863  ;;  %v1329_v40 = vmul.f32 0.15, %v6624_v34  ;;  %5873 = vlog2.f32 %v753_v1 }
  0x62   : > { %v6827_v16 = vsub.f32 %v6734_v45, %v1151_v6  ;;  %v6830_v49 = vsub.f32 %v6703_v27, %v1250_v21  ;;  %v5866_v59 = vpop.eup %5865  ;;  %v1166_v60 = vmul.f32 %v5864_v47, %v6631_v39  ;;  %v1265_v8 = vmul.f32 %v5864_v47, %v6579_v51 }
  0x63   : > { %10734 = vst [vmem:[#allocation23_spill] sm:$0xff] %v6820_v2  ;;  %v5868_v58 = vpop.eup %5867  ;;  %5875 = vpow2.f32 %v6688_v55  ;;  %v1330_v45 = vmul.f32 0.15, %v6662_v30  ;;  %v1167_v6 = vmul.f32 %v5866_v59, %v6638_v46  ;;  %v1266_v27 = vmul.f32 %v5866_v59, %v6582_v52 }
  0x64   : > { %2615 = vmatmul.bf16.gmra.mxu0 %v6751_v12  ;;  %10736 = vst [vmem:[#allocation25_spill] sm:$0xff] %v6827_v16  ;;  %v5870_v3 = vpop.eup %5869  ;;  %v6839_v54 = vsub.f32 %v1133_v11, %v1166_v60  ;;  %v6842_v34 = vsub.f32 %v6709_v5, %v1265_v8  ;;  %v6845_v39 = vsub.f32 %v6749_v26, %v5868_v58  ;;  %v769_v51 = vadd.f32 1e-12, %v736_v4  ;;  %v5202_v5 = vld [vmem:[%s10553_s4 + $0x80] sm:$0xf] }
  0x65   : > { %2784 = vmatmul.bf16.gmra.mxu1 %v6753_v15  ;;  %10737 = vst [vmem:[#allocation26_spill] sm:$0xff] %v6830_v49  ;;  %v6848_v23 = vsub.f32 %v1134_v9, %v1167_v6  ;;  %v6851_v30 = vsub.f32 %v6724_v61, %v1266_v27  ;;  %v6854_v46 = vsub.f32 %v6760_v43, %v5870_v3  ;;  %5877 = vlog2.f32 %v768_v35  ;;  %v5668_v61 = vld [vmem:[%s10553_s4 + $0x8c] sm:$0xf0]  ;;  %v5666_v43 = vld [vmem:[%s10553_s4 + $0x84] sm:$0xf] }
  0x66   : > { %2953 = vmatmul.bf16.gmra.mxu2 %v6780_v29  ;;  %10738 = vst [vmem:[#allocation27_spill] sm:$0xff] %v6839_v54  ;;  %v996_v52 = vmul.f32 1.442695, %v6698_v31  ;;  %v1390_v55 = vmul.f32 1.442695, %v1329_v40  ;;  %5879 = vlog2.f32 %v769_v51  ;;  %v5872_v11 = vpop.eup %5871  ;;  %v6878_v44 = vor.u32 %v5668_v61, %v5202_v5 }
  0x67   : > { %10739 = vst [vmem:[#allocation28_spill] sm:$0xff] %v6842_v34  ;;  %3122 = vmatmul.bf16.gmra.mxu3 %v6822_v50  ;;  %5881 = vpow2.f32 %v6690_v25  ;;  %v5204_v31 = vld [vmem:[%s10553_s4 + $0x90] sm:$0xf0]  ;;  %v5874_v26 = vpop.eup %5873  ;;  %v5669_v25 = vld [vmem:[%s10553_s4 + $0x94] sm:$0xf0] }
  0x68   : > { %10740 = vst [vmem:[#allocation29_spill] sm:$0xff] %v6845_v39  ;;  %5883 = vpow2.f32 %v6695_v7  ;;  %v864_v53 = vmul.f32 0.6931472, %v5872_v11  ;;  %v1392_v42 = vmul.f32 1.442695, %v1330_v45  ;;  %v6880_v0 = vor.u32 %v5666_v43, %v5204_v31 }
  0x69   : > { %10741 = vst [vmem:[#allocation30_spill] sm:$0xff] %v6848_v23  ;;  %v5876_v41 = vpop.eup %5875  ;;  %5885 = vpow2.f32 %v6705_v33  ;;  %v866_v32 = vmul.f32 0.6931472, %v5874_v26  ;;  %v6882_v1 = vor.u32 %v5669_v25, %v5210_v22  ;;  %v5667_v4 = vld [vmem:[%s10553_s4 + $0x8c] sm:$0xf] }
  0x6a   : > { %10742 = vst [vmem:[#allocation31_spill] sm:$0xff] %v6851_v30  ;;  %5887 = vpow2.f32 %v996_v52  ;;  %v1016_v9 = vmul.f32 -0.35, %v864_v53  ;;  %v1412_v21 = vmul.f32 0.15, %v864_v53 }
  0x6b   : > { %10743 = vst [vmem:[#allocation32_spill] sm:$0xff] %v6854_v46  ;;  %v5878_v7 = vpop.eup %5877  ;;  %v5212_v33 = vld [vmem:[%s10553_s4 + $0x98] sm:$0xf0]  ;;  %v1017_v63 = vmul.f32 -0.35, %v866_v32  ;;  %5889 = vpow2.f32 %v1390_v55 }
  0x6c   : > { %10744 = vst [vmem:[#allocation33_spill] sm:$0xff] %v6878_v44  ;;  %v1413_v47 = vmul.f32 0.15, %v866_v32  ;;  %v5880_v35 = vpop.eup %5879  ;;  %v1061_v59 = vmul.f32 1.442695, %v1016_v9  ;;  %5891 = vpow2.f32 %v1392_v42  ;;  %v6893_v61 = vor.u32 %v5667_v4, %v5212_v33 }
  0x6d   : > { %10745 = vst [vmem:[#allocation34_spill] sm:$0xff] %v6880_v0  ;;  %v1457_v40 = vmul.f32 1.442695, %v1412_v21  ;;  %v896_v60 = vmul.f32 0.6931472, %v5878_v7  ;;  %v5882_v8 = vpop.eup %5881  ;;  %v1214_v42 = vmul.f32 %v6770_v37, %v6405_v17  ;;  %v1115_v32 = vmul.f32 %v6770_v37, %v6387_v10 }
  0x6e   : > { %10746 = vst [vmem:[#allocation35_spill] sm:$0xff] %v6882_v1  ;;  %v1063_v58 = vmul.f32 1.442695, %v1017_v63  ;;  %v1459_v45 = vmul.f32 1.442695, %v1413_v47  ;;  %v5884_v27 = vpop.eup %5883  ;;  %5893 = vpow2.f32 %v1061_v59  ;;  %v1215_v21 = vmul.f32 %v5876_v41, %v6408_v18 }
  0x6f   : > { %v898_v6 = vmul.f32 0.6931472, %v5880_v35  ;;  %v1032_v3 = vmul.f32 -0.35, %v896_v60  ;;  %v1428_v51 = vmul.f32 0.15, %v896_v60  ;;  %v5886_v52 = vpop.eup %5885  ;;  %v1116_v7 = vmul.f32 %v5876_v41, %v6394_v13 }
  0x70   : > { %5895 = vpow2.f32 %v1063_v58  ;;  %v5888_v11 = vpop.eup %5887  ;;  %10747 = vst [vmem:[#allocation36_spill] sm:$0xff] %v6893_v61  ;;  %v519_v17 = vmul.f32 %v6423_v24, %v6423_v24  ;;  %v5218_v13 = vld [vmem:[%s10553_s4 + $0xa0] sm:$0xf]  ;;  %v5672_v18 = vld [vmem:[%s10553_s4 + $0xac] sm:$0xf0] }
  0x71   : > { %v1033_v55 = vmul.f32 -0.35, %v898_v6  ;;  %v1429_v5 = vmul.f32 0.15, %v898_v6  ;;  %5897 = vpow2.f32 %v1457_v40  ;;  %v1093_v43 = vmul.f32 1.442695, %v1032_v3  ;;  %v5890_v25 = vpop.eup %5889 }
  0x72   : > { %v1489_v31 = vmul.f32 1.442695, %v1428_v51  ;;  %5899 = vpow2.f32 %v1459_v45  ;;  %v5892_v53 = vpop.eup %5891  ;;  %v5220_v35 = vld [vmem:[%s10553_s4 + $0xb0] sm:$0xf0]  ;;  %v5226_v59 = vld [vmem:[%s10553_s4 + $0xa8] sm:$0xf]  ;;  %v1230_v51 = vmul.f32 %v5886_v52, %v6411_v19 }
  0x73   : > { %v1095_v26 = vmul.f32 1.442695, %v1033_v55  ;;  %v1491_v22 = vmul.f32 1.442695, %v1429_v5  ;;  %5901 = vpow2.f32 %v1093_v43  ;;  %v5673_v40 = vld [vmem:[%s10553_s4 + $0xb4] sm:$0xf0]  ;;  %v1231_v55 = vmul.f32 %v5888_v11, %v6414_v20 }
  0x74   : > { %2620 = vmatmul.bf16.gmra.mxu0 %v6878_v44  ;;  %v5894_v9 = vpop.eup %5893  ;;  %v552_v5 = vmul.f32 %v6429_v28, %v6429_v28  ;;  %v10758_v20 = vld [vmem:[#allocation20_spill] sm:$0xff] }
  0x75   : > { %2789 = vmatmul.bf16.gmra.mxu1 %v6880_v0  ;;  %5903 = vpow2.f32 %v1095_v26  ;;  %v1148_v33 = vmul.f32 %v5894_v9, %v6775_v56  ;;  %v1247_v63 = vmul.f32 %v5894_v9, %v6744_v38  ;;  %v5670_v38 = vld [vmem:[%s10553_s4 + $0xa4] sm:$0xf] }
  0x76   : > { %2958 = vmatmul.bf16.gmra.mxu2 %v6882_v1  ;;  %5905 = vpow2.f32 %v1489_v31  ;;  %v5896_v4 = vpop.eup %5895  ;;  %v5258_v1 = vld [vmem:[%s10553_s4 + $0xe8] sm:$0xf] }
  0x77   : > { %3127 = vmatmul.bf16.gmra.mxu3 %v6893_v61  ;;  %5907 = vpow2.f32 %v1491_v22  ;;  %v5898_v47 = vpop.eup %5897  ;;  %v1149_v10 = vmul.f32 %v5896_v4, %v6778_v57  ;;  %v1248_v37 = vmul.f32 %v5896_v4, %v6747_v36  ;;  %v6917_v41 = vsub.f32 %v1115_v32, %v1148_v33  ;;  %v10759_v32 = vld [vmem:[#allocation21_spill] sm:$0xff] }
  0x78   : > { %v5900_v56 = vpop.eup %5899  ;;  %v6919_v24 = vsub.f32 %v1214_v42, %v1247_v63  ;;  %v6921_v57 = vsub.f32 %v5882_v8, %v5898_v47  ;;  %v1131_v36 = vmul.f32 %v5886_v52, %v6397_v14  ;;  %v6209_v14 = vld [vmem:[%s6350_s25 + $0xe8] sm:$0xff]  ;;  %v6946_v22 = vor.u32 %v5672_v18, %v5218_v13  ;;  %v6988_v18 = vld [vmem:[%s6356_s28 + $0xd0] sm:$0xff] }
  0x79   : > { %10748 = vst [vmem:[#allocation37_spill] sm:$0xff] %v6917_v41  ;;  %v5902_v60 = vpop.eup %5901  ;;  %v6933_v58 = vsub.f32 %v1116_v7, %v1149_v10  ;;  %v6935_v45 = vsub.f32 %v1215_v21, %v1248_v37  ;;  %v6937_v8 = vsub.f32 %v5884_v27, %v5900_v56  ;;  %v1132_v6 = vmul.f32 %v6209_v14, %v5888_v11  ;;  %v6963_v21 = vld [vmem:[%s6350_s25 + $0x58] sm:$0xff]  ;;  %v5671_v63 = vld [vmem:[%s10553_s4 + $0xac] sm:$0xf]  ;;  %v5252_v61 = vld [vmem:[%s10553_s4 + $0xf0] sm:$0xf0] }
  0x7a   : > { %10749 = vst [vmem:[#allocation38_spill] sm:$0xff] %v6919_v24  ;;  %v1164_v43 = vmul.f32 %v5902_v60, %v6791_v62  ;;  %v6948_v27 = vor.u32 %v5670_v38, %v5220_v35  ;;  %v6950_v42 = vor.u32 %v5673_v40, %v5226_v59  ;;  %v1263_v11 = vmul.f32 %v5902_v60, %v10758_v20  ;;  %v6983_v10 = vld [vmem:[%s6356_s28 + $0x58] sm:$0xff] }
  0x7b   : > { %10750 = vst [vmem:[#allocation39_spill] sm:$0xff] %v6921_v57  ;;  %v5904_v3 = vpop.eup %5903  ;;  %v520_v7 = vmul.f32 %v6963_v21, %v6963_v21  ;;  %v553_v37 = vmul.f32 %v6983_v10, %v6983_v10  ;;  %v585_v13 = vadd.f32 %v552_v5, %v519_v17  ;;  %v568_v38 = vmul.f32 %v6988_v18, %v6988_v18  ;;  %v6998_v40 = vld [vmem:[%s6350_s25 + $0xd8] sm:$0xff]  ;;  %v5674_v5 = vld [vmem:[%s10553_s4 + $0xc4] sm:$0xf] }
  0x7c   : > { %10751 = vst [vmem:[#allocation40_spill] sm:$0xff] %v6933_v58  ;;  %v5906_v31 = vpop.eup %5905  ;;  %v1165_v26 = vmul.f32 %v5904_v3, %v6798_v48  ;;  %v6952_v52 = vsub.f32 %v1131_v36, %v1164_v43  ;;  %v1264_v28 = vmul.f32 %v5904_v3, %v10759_v32  ;;  %v6967_v4 = vsub.f32 %v1230_v51, %v1263_v11  ;;  %v7003_v60 = vld [vmem:[%s6356_s28 + $0xd8] sm:$0xff]  ;;  %v5234_v51 = vld [vmem:[%s10553_s4 + $0xc0] sm:$0xf]  ;;  %v7817_v58 = vld [vmem:[%s6575_s15 + $0xb0] sm:$0xff] }
  0x7d   : > { %10752 = vst [vmem:[#allocation41_spill] sm:$0xff] %v6935_v45  ;;  %v5908_v19 = vpop.eup %5907  ;;  %v6956_v62 = vsub.f32 %v5890_v25, %v5906_v31  ;;  %v5228_v25 = vld [vmem:[%s10553_s4 + $0xb8] sm:$0xf0]  ;;  %v586_v36 = vadd.f32 %v553_v37, %v520_v7  ;;  %v618_v35 = vadd.f32 1e-12, %v585_v13  ;;  %v536_v17 = vmul.f32 %v6998_v40, %v6998_v40  ;;  %v7811_v45 = vld [vmem:[%s6575_s15 + $0x30] sm:$0xff] }
  0x7e   : > { %10753 = vst [vmem:[#allocation42_spill] sm:$0xff] %v6937_v8  ;;  %v6958_v9 = vsub.f32 %v1132_v6, %v1165_v26  ;;  %v6960_v48 = vsub.f32 %v5892_v53, %v5908_v19  ;;  %v6969_v33 = vsub.f32 %v1231_v55, %v1264_v28  ;;  %v6978_v53 = vld [vmem:[%s6350_s25 + $0xd0] sm:$0xff]  ;;  %v6995_v56 = vor.u32 %v5671_v63, %v5228_v25  ;;  %v5242_v26 = vld [vmem:[%s10553_s4 + $0xc8] sm:$0xf]  ;;  %v5677_v19 = vld [vmem:[%s10553_s4 + $0xd4] sm:$0xf0] }
  0x7f   : > { %10754 = vst [vmem:[#allocation43_spill] sm:$0xff] %v6946_v22  ;;  %v535_v47 = vmul.f32 %v6978_v53, %v6978_v53  ;;  %v569_v14 = vmul.f32 %v7003_v60, %v7003_v60  ;;  %v619_v6 = vadd.f32 1e-12, %v586_v36  ;;  %5909 = vlog2.f32 %v618_v35  ;;  %v5676_v55 = vld [vmem:[%s10553_s4 + $0xcc] sm:$0xf0]  ;;  %v7814_v57 = vld [vmem:[%s6575_s15 + $0x38] sm:$0xff] }
  0x80   : > { %10755 = vst [vmem:[#allocation44_spill] sm:$0xff] %v6948_v27  ;;  %v5236_v31 = vld [vmem:[%s10553_s4 + $0xd0] sm:$0xf0]  ;;  %v7026_v20 = vor.u32 %v5676_v55, %v5234_v51  ;;  %v7030_v32 = vor.u32 %v5677_v19, %v5242_v26  ;;  %v5675_v63 = vld [vmem:[%s10553_s4 + $0xcc] sm:$0xf]  ;;  %v7068_v19 = vld [vmem:[%s6575_s15 + $0x58] sm:$0xff] }
  0x81   : > { %10756 = vst [vmem:[#allocation45_spill] sm:$0xff] %v6950_v42  ;;  %v601_v59 = vadd.f32 %v568_v38, %v535_v47  ;;  %v602_v43 = vadd.f32 %v569_v14, %v536_v17  ;;  %5911 = vlog2.f32 %v619_v6  ;;  %v7028_v11 = vor.u32 %v5674_v5, %v5236_v31  ;;  %v5244_v25 = vld [vmem:[%s10553_s4 + $0xd8] sm:$0xf0]  ;;  %v7045_v14 = vld [vmem:[%s6557_s12 + $0x50] sm:$0xff] }
  0x82   : > { %10757 = vst [vmem:[#allocation46_spill] sm:$0xff] %v6952_v52  ;;  %v7041_v13 = vor.u32 %v5675_v63, %v5244_v25  ;;  %v7048_v6 = vld [vmem:[%s6557_s12 + $0x58] sm:$0xff]  ;;  %v684_v51 = vmul.f32 %v7045_v14, %v7045_v14  ;;  %v7065_v26 = vld [vmem:[%s6575_s15 + $0x50] sm:$0xff] }
  0x83   : > { %10760 = vst [vmem:[#allocation20_spill] sm:$0xff] %v6956_v62  ;;  %v634_v3 = vadd.f32 1e-12, %v601_v59  ;;  %v635_v7 = vadd.f32 1e-12, %v602_v43  ;;  %v685_v55 = vmul.f32 %v7048_v6, %v7048_v6  ;;  %v1803_v5 = vpack.c.bf16 %v7048_v6, %v7045_v14  ;;  %v7060_v43 = vld [vmem:[%s6557_s12 + $0xd8] sm:$0xff] }
  0x84   : > { %10761 = vst [vmem:[#allocation21_spill] sm:$0xff] %v6958_v9  ;;  %2625 = vmatmul.bf16.gmra.mxu0 %v6946_v22  ;;  %v651_v25 = vmul.f32 %v7065_v26, %v7065_v26 }
  0x85   : > { %10762 = vst [vmem:[#allocation47_spill] sm:$0xff] %v6960_v48  ;;  %2794 = vmatmul.bf16.gmra.mxu1 %v6948_v27  ;;  %5913 = vlog2.f32 %v634_v3  ;;  %v5910_v28 = vpop.eup %5909  ;;  %v7051_v3 = vld [vmem:[%s6557_s12 + $0xd0] sm:$0xff]  ;;  %3608 = vmatpush.bf16.msrb.mxu2 %v1803_v5  ;;  %v5681_v5 = vld [vmem:[%s10553_s4 + $0xf4] sm:$0xf0] }
  0x86   : > { %10763 = vst [vmem:[#allocation48_spill] sm:$0xff] %v6967_v4  ;;  %2963 = vmatmul.bf16.gmra.mxu2 %v6950_v42  ;;  %v794_v47 = vmul.f32 0.6931472, %v5910_v28  ;;  %5915 = vlog2.f32 %v635_v7  ;;  %v700_v31 = vmul.f32 %v7051_v3, %v7051_v3  ;;  %v701_v7 = vmul.f32 %v7060_v43, %v7060_v43 }
  0x87   : > { %10764 = vst [vmem:[#allocation49_spill] sm:$0xff] %v6969_v33  ;;  %3132 = vmatmul.bf16.gmra.mxu3 %v6995_v56  ;;  %v5912_v37 = vpop.eup %5911  ;;  %v1819_v63 = vpack.c.bf16 %v7060_v43, %v7051_v3  ;;  %v1771_v42 = vpack.c.bf16 %v7068_v19, %v7065_v26  ;;  %v717_v44 = vadd.f32 %v684_v51, %v651_v25  ;;  %v5266_v25 = vld [vmem:[%s10553_s4 + $0x100] sm:$0xf] }
  0x88   : > { %10765 = vst [vmem:[#allocation50_spill] sm:$0xff] %v6995_v56  ;;  %v796_v36 = vmul.f32 0.6931472, %v5912_v37  ;;  %v915_v35 = vmul.f32 -0.35, %v794_v47  ;;  %v7079_v37 = vld [vmem:[%s6575_s15 + $0xd0] sm:$0xff]  ;;  %v7114_v33 = vor.u32 %v5681_v5, %v5258_v1 }
  0x89   : > { %10766 = vst [vmem:[#allocation51_spill] sm:$0xff] %v7026_v20  ;;  %v1311_v59 = vmul.f32 0.15, %v794_v47  ;;  %v652_v47 = vmul.f32 %v7068_v19, %v7068_v19  ;;  %v667_v27 = vmul.f32 %v7079_v37, %v7079_v37  ;;  %3777 = vmatpush.bf16.msrb.mxu3 %v1819_v63  ;;  %3270 = vmatpush.bf16.msrb.mxu0 %v1771_v42  ;;  %v750_v48 = vadd.f32 1e-12, %v717_v44 }
  0x8a   : > { %10767 = vst [vmem:[#allocation52_spill] sm:$0xff] %v7028_v11  ;;  %v916_v29 = vmul.f32 -0.35, %v796_v36  ;;  %v958_v51 = vmul.f32 1.442695, %v915_v35 }
  0x8b   : > { %10768 = vst [vmem:[#allocation53_spill] sm:$0xff] %v7030_v32  ;;  %v5914_v38 = vpop.eup %5913  ;;  %v718_v50 = vadd.f32 %v685_v55, %v652_v47  ;;  %v733_v12 = vadd.f32 %v700_v31, %v667_v27  ;;  %v1312_v55 = vmul.f32 0.15, %v796_v36  ;;  %5917 = vlog2.f32 %v750_v48  ;;  %v5684_v47 = vld [vmem:[%s10553_s4 + $0x10c] sm:$0xf0] }
  0x8c   : > { %10769 = vst [vmem:[#allocation54_spill] sm:$0xff] %v7041_v13  ;;  %v826_v17 = vmul.f32 0.6931472, %v5914_v38  ;;  %v5916_v28 = vpop.eup %5915  ;;  %v7082_v38 = vld [vmem:[%s6575_s15 + $0xd8] sm:$0xff]  ;;  %v960_v44 = vmul.f32 1.442695, %v916_v29 }
  0x8d   : > { %v668_v22 = vmul.f32 %v7082_v38, %v7082_v38  ;;  %v828_v15 = vmul.f32 0.6931472, %v5916_v28  ;;  %v751_v62 = vadd.f32 1e-12, %v718_v50  ;;  %v1787_v30 = vpack.c.bf16 %v7082_v38, %v7079_v37  ;;  %10772 = vst [vmem:[#allocation57_spill] sm:$0xff] %v7114_v33 }
  0x8e   : > { %v931_v42 = vmul.f32 -0.35, %v826_v17  ;;  %v5260_v50 = vld [vmem:[%s10553_s4 + $0xf8] sm:$0xf0]  ;;  %v1356_v1 = vmul.f32 1.442695, %v1312_v55 }
  0x8f   : > { %v734_v46 = vadd.f32 %v701_v7, %v668_v22  ;;  %3439 = vmatpush.bf16.msrb.mxu1 %v1787_v30  ;;  %v5679_v22 = vld [vmem:[%s10553_s4 + $0xec] sm:$0xf]  ;;  %5919 = vlog2.f32 %v751_v62  ;;  %v1328_v27 = vmul.f32 0.15, %v828_v15  ;;  %v5268_v55 = vld [vmem:[%s10553_s4 + $0x110] sm:$0xf0] }
  0x90   : > { %v7125_v48 = vor.u32 %v5679_v22, %v5260_v50  ;;  %v990_v62 = vmul.f32 1.442695, %v931_v42  ;;  %v5274_v42 = vld [vmem:[%s10553_s4 + $0x108] sm:$0xf]  ;;  %v5685_v22 = vld [vmem:[%s10553_s4 + $0x114] sm:$0xf0] }
  0x91   : > { %v1388_v28 = vmul.f32 1.442695, %v1328_v27 }
  0x92   : > { %10773 = vst [vmem:[#allocation58_spill] sm:$0xff] %v7125_v48 }
  0x94   : > { %2630 = vmatmul.bf16.gmra.mxu0 %v7026_v20 }
  0x95   : > { %2799 = vmatmul.bf16.gmra.mxu1 %v7028_v11  ;;  %v5678_v11 = vld [vmem:[%s10553_s4 + $0xe4] sm:$0xf] }
  0x96   : > { %2968 = vmatmul.bf16.gmra.mxu2 %v7030_v32  ;;  %v5680_v32 = vld [vmem:[%s10553_s4 + $0xec] sm:$0xf0]  ;;  %v7112_v34 = vor.u32 %v5678_v11, %v5252_v61  ;;  %v932_v61 = vmul.f32 -0.35, %v828_v15 }
  0x97   : > { %3137 = vmatmul.bf16.gmra.mxu3 %v7041_v13  ;;  %v5250_v13 = vld [vmem:[%s10553_s4 + $0xe0] sm:$0xf] }
  0x98   : > { %v7108_v39 = vor.u32 %v5680_v32, %v5250_v13  ;;  %10771 = vst [vmem:[#allocation56_spill] sm:$0xff] %v7112_v34  ;;  %v5918_v32 = vpop.eup %5917  ;;  %v992_v13 = vmul.f32 1.442695, %v932_v61 }
  0x99   : > { %v5920_v35 = vpop.eup %5919 }
  0x9a   : > { %10770 = vst [vmem:[#allocation55_spill] sm:$0xff] %v7108_v39  ;;  %v862_v15 = vmul.f32 0.6931472, %v5920_v35 }
  0x9c   : > { %v1015_v50 = vmul.f32 -0.35, %v862_v15 }
  0xa4   : > { %2635 = vmatmul.bf16.gmra.mxu0 %v7108_v39 }
  0xa5   : > { %2804 = vmatmul.bf16.gmra.mxu1 %v7112_v34 }
  0xa6   : > { %2973 = vmatmul.bf16.gmra.mxu2 %v7114_v33 }
  0xa7   : > { %3142 = vmatmul.bf16.gmra.mxu3 %v7125_v48 }
  0xb1   : > { %v2601_v20 = vpop.f32.mrf.mxu0 }
  0xb2   : > { %v2770_v56 = vpop.f32.mrf.mxu1 }
  0xb3   : > { %v2771_v0 = vadd.f32 %v2770_v56, %v2601_v20  ;;  %v766_v56 = vadd.f32 1e-12, %v733_v12  ;;  %v767_v20 = vadd.f32 1e-12, %v734_v46  ;;  %v1354_v12 = vmul.f32 1.442695, %v1311_v59 }
  0xb4   : > { %v1327_v46 = vmul.f32 0.15, %v826_v17  ;;  %v860_v17 = vmul.f32 0.6931472, %v5918_v32 }
  0xb5   : > { %5921 = vlog2.f32 %v766_v56 }
  0xb6   : > { %5923 = vlog2.f32 %v767_v20  ;;  %v1386_v59 = vmul.f32 1.442695, %v1327_v46  ;;  %v1014_v5 = vmul.f32 -0.35, %v860_v17  ;;  %v1410_v56 = vmul.f32 0.15, %v860_v17 }
  0xb7   : > { %5925 = vpow2.f32 %v958_v51  ;;  %v5682_v51 = vld [vmem:[%s10553_s4 + $0x104] sm:$0xf] }
  0xb8   : > { %5927 = vpow2.f32 %v960_v44  ;;  %v1411_v44 = vmul.f32 0.15, %v862_v15  ;;  %v1057_v46 = vmul.f32 1.442695, %v1014_v5  ;;  %v7156_v5 = vor.u32 %v5685_v22, %v5274_v42  ;;  %v6217_v42 = vld [vmem:[%s6350_s25 + $0x50] sm:$0xff] }
  0xb9   : > { %v2939_v30 = vpop.f32.mrf.mxu2  ;;  %5929 = vpow2.f32 %v1354_v12  ;;  %v7130_v7 = vpop.f32.mrf.mxu0 }
  0xba   : > { %v2940_v11 = vadd.f32 %v2939_v30, %v2771_v0  ;;  %v3108_v29 = vpop.f32.mrf.mxu3  ;;  %5931 = vpow2.f32 %v1356_v1  ;;  %10775 = vst [vmem:[#allocation60_spill] sm:$0xff] %v7130_v7  ;;  %v7132_v0 = vpop.f32.mrf.mxu1  ;;  %v1453_v30 = vmul.f32 1.442695, %v1410_v56  ;;  %2978 = vmatmul.bf16.gmra.mxu2 %v7156_v5 }
  0xbb   : > { %v5922_v31 = vpop.eup %5921  ;;  %10776 = vst [vmem:[#allocation61_spill] sm:$0xff] %v7132_v0  ;;  %5933 = vpow2.f32 %v990_v62  ;;  %v1455_v62 = vmul.f32 1.442695, %v1411_v44  ;;  %v7152_v0 = vor.u32 %v5684_v47, %v5266_v25  ;;  %v5683_v25 = vld [vmem:[%s10553_s4 + $0x10c] sm:$0xf] }
  0xbc   : > { %v7127_v36 = vadd.f32 %v3108_v29, %v2940_v11  ;;  %v5924_v63 = vpop.eup %5923  ;;  %v892_v20 = vmul.f32 0.6931472, %v5922_v31  ;;  %5935 = vpow2.f32 %v992_v13  ;;  %v1059_v11 = vmul.f32 1.442695, %v1015_v50  ;;  %10779 = vst [vmem:[#allocation64_spill] sm:$0xff] %v7156_v5 }
  0xbd   : > { %v894_v61 = vmul.f32 0.6931472, %v5924_v63  ;;  %v5926_v12 = vpop.eup %5925  ;;  %5937 = vpow2.f32 %v1386_v59  ;;  %10777 = vst [vmem:[#allocation62_spill] sm:$0xff] %v7152_v0  ;;  %v7154_v63 = vor.u32 %v5682_v51, %v5268_v55  ;;  %v5276_v47 = vld [vmem:[%s10553_s4 + $0x118] sm:$0xf0]  ;;  %v6216_v51 = vld [vmem:[%s6356_s28 + $0x50] sm:$0xff]  ;;  %2640 = vmatmul.bf16.gmra.mxu0 %v7152_v0 }
  0xbe   : > { %10774 = vst [vmem:[#allocation59_spill] sm:$0xff] %v7127_v36  ;;  %v1030_v1 = vmul.f32 -0.35, %v892_v20  ;;  %v5928_v27 = vpop.eup %5927  ;;  %5939 = vpow2.f32 %v1388_v28  ;;  %v1426_v35 = vmul.f32 0.15, %v892_v20  ;;  %v1212_v55 = vmul.f32 %v6216_v51, %v5926_v12 }
  0xbf   : > { %v1031_v29 = vmul.f32 -0.35, %v894_v61  ;;  %v5930_v32 = vpop.eup %5929  ;;  %5941 = vpow2.f32 %v1057_v46  ;;  %v1427_v17 = vmul.f32 0.15, %v894_v61  ;;  %10778 = vst [vmem:[#allocation63_spill] sm:$0xff] %v7154_v63  ;;  %v1113_v22 = vmul.f32 %v6217_v42, %v5926_v12  ;;  %2809 = vmatmul.bf16.gmra.mxu1 %v7154_v63 }
  0xc0   : > { %v1089_v13 = vmul.f32 1.442695, %v1030_v1  ;;  %v5932_v31 = vpop.eup %5931  ;;  %5943 = vpow2.f32 %v1059_v11  ;;  %v1485_v28 = vmul.f32 1.442695, %v1426_v35  ;;  %v1213_v1 = vmul.f32 %v6983_v10, %v5928_v27  ;;  %v5691_v63 = vld [vmem:[%s10553_s4 + $0x14c] sm:$0xf] }
  0xc1   : > { %v1091_v15 = vmul.f32 1.442695, %v1031_v29  ;;  %v5934_v59 = vpop.eup %5933  ;;  %5945 = vpow2.f32 %v1453_v30  ;;  %v1487_v50 = vmul.f32 1.442695, %v1427_v17  ;;  %v2606_v61 = vpop.f32.mrf.mxu0  ;;  %v1114_v11 = vmul.f32 %v6963_v21, %v5928_v27 }
  0xc2   : > { %v5936_v56 = vpop.eup %5935  ;;  %5947 = vpow2.f32 %v1455_v62  ;;  %v2775_v46 = vpop.f32.mrf.mxu1 }
  0xc3   : > { %v5938_v44 = vpop.eup %5937  ;;  %5949 = vpow2.f32 %v1089_v13  ;;  %v7171_v62 = vadd.f32 %v2775_v46, %v2606_v61  ;;  %v7173_v13 = vor.u32 %v5683_v25, %v5276_v47  ;;  %v7186_v25 = vpop.f32.mrf.mxu2 }
  0xc4   : > { %v5940_v20 = vpop.eup %5939  ;;  %5951 = vpow2.f32 %v1091_v15  ;;  %10784 = vst [vmem:[#allocation69_spill] sm:$0xff] %v7186_v25 }
  0xc5   : > { %v5942_v30 = vpop.eup %5941  ;;  %5953 = vpow2.f32 %v1485_v28  ;;  %10780 = vst [vmem:[#allocation65_spill] sm:$0xff] %v7173_v13  ;;  %v1129_v28 = vmul.f32 %v6978_v53, %v5934_v59  ;;  %3147 = vmatmul.bf16.gmra.mxu3 %v7173_v13 }
  0xc6   : > { %v5944_v29 = vpop.eup %5943  ;;  %v1146_v12 = vmul.f32 %v5942_v30, %v7065_v26  ;;  %v1245_v35 = vmul.f32 %v5942_v30, %v7045_v14  ;;  %5955 = vpow2.f32 %v1487_v50 }
  0xc7   : > { %v5946_v17 = vpop.eup %5945  ;;  %v1147_v10 = vmul.f32 %v5944_v29, %v7068_v19  ;;  %v1246_v15 = vmul.f32 %v5944_v29, %v7048_v6  ;;  %v1130_v6 = vmul.f32 %v6998_v40, %v5936_v56  ;;  %v7235_v29 = vld [vmem:[%s6356_s28 + $0x48] sm:$0xff] }
  0xc8   : > { %v5948_v51 = vpop.eup %5947  ;;  %v7179_v42 = vsub.f32 %v1113_v22, %v1146_v12  ;;  %v7181_v21 = vsub.f32 %v1212_v55, %v1245_v35  ;;  %v7183_v27 = vsub.f32 %v5930_v32, %v5946_v17  ;;  %v1228_v55 = vmul.f32 %v6988_v18, %v5934_v59  ;;  %v7207_v18 = vld [vmem:[%s6350_s25 + $0x40] sm:$0xff] }
  0xc9   : > { %v5950_v26 = vpop.eup %5949  ;;  %v7188_v47 = vsub.f32 %v1114_v11, %v1147_v10  ;;  %v7190_v14 = vsub.f32 %v1213_v1, %v1246_v15  ;;  %v7192_v19 = vsub.f32 %v5932_v31, %v5948_v51  ;;  %v1229_v32 = vmul.f32 %v7003_v60, %v5936_v56  ;;  %v7230_v11 = vld [vmem:[%s6350_s25 + $0x48] sm:$0xff]  ;;  %v5284_v10 = vld [vmem:[%s10553_s4 + $0x130] sm:$0xf0]  ;;  %v5689_v51 = vld [vmem:[%s10553_s4 + $0x134] sm:$0xf0] }
  0xca   : > { %10781 = vst [vmem:[#allocation66_spill] sm:$0xff] %v7179_v42  ;;  %v5952_v50 = vpop.eup %5951  ;;  %v1162_v53 = vmul.f32 %v5950_v26, %v7079_v37  ;;  %v1261_v30 = vmul.f32 %v5950_v26, %v7051_v3  ;;  %v517_v60 = vmul.f32 %v7207_v18, %v7207_v18  ;;  %v7212_v37 = vld [vmem:[%s6356_s28 + $0x40] sm:$0xff]  ;;  %v551_v12 = vmul.f32 %v7235_v29, %v7235_v29  ;;  %v5290_v15 = vld [vmem:[%s10553_s4 + $0x128] sm:$0xf] }
  0xcb   : > { %10782 = vst [vmem:[#allocation67_spill] sm:$0xff] %v7181_v21  ;;  %v5954_v22 = vpop.eup %5953  ;;  %v1163_v61 = vmul.f32 %v5952_v50, %v7082_v38  ;;  %v1262_v40 = vmul.f32 %v5952_v50, %v7060_v43  ;;  %v550_v38 = vmul.f32 %v7212_v37, %v7212_v37  ;;  %v5282_v3 = vld [vmem:[%s10553_s4 + $0x120] sm:$0xf]  ;;  %v5688_v43 = vld [vmem:[%s10553_s4 + $0x12c] sm:$0xf0]  ;;  %v7256_v50 = vor.u32 %v5689_v51, %v5290_v15  ;;  %v2608_v51 = vpop.f32.mrf.mxu0 }
  0xcc   : > { %10783 = vst [vmem:[#allocation68_spill] sm:$0xff] %v7183_v27  ;;  %v5956_v46 = vpop.eup %5955  ;;  %v7200_v31 = vsub.f32 %v1129_v28, %v1162_v53  ;;  %v7204_v1 = vsub.f32 %v5938_v44, %v5954_v22  ;;  %v5686_v44 = vld [vmem:[%s10553_s4 + $0x124] sm:$0xf]  ;;  %v7239_v35 = vsub.f32 %v1228_v55, %v1261_v30  ;;  %v7252_v28 = vor.u32 %v5688_v43, %v5282_v3  ;;  %v7268_v30 = vpop.f32.mrf.mxu3  ;;  %v7278_v3 = vld [vmem:[%s6350_s25 + $0xc8] sm:$0xff] }
  0xcd   : > { %10785 = vst [vmem:[#allocation70_spill] sm:$0xff] %v7188_v47  ;;  %v7216_v59 = vsub.f32 %v1130_v6, %v1163_v61  ;;  %v7218_v56 = vsub.f32 %v5940_v20, %v5956_v46  ;;  %v518_v20 = vmul.f32 %v7230_v11, %v7230_v11  ;;  %v7241_v17 = vsub.f32 %v1229_v32, %v1262_v40  ;;  %v7259_v55 = vld [vmem:[%s6350_s25 + $0xc0] sm:$0xff]  ;;  %v2944_v46 = vpop.f32.mrf.mxu2  ;;  %v5687_v40 = vld [vmem:[%s10553_s4 + $0x12c] sm:$0xf] }
  0xce   : > { %10786 = vst [vmem:[#allocation71_spill] sm:$0xff] %v7190_v14  ;;  %v583_v26 = vadd.f32 %v550_v38, %v517_v60  ;;  %v7254_v6 = vor.u32 %v5686_v44, %v5284_v10  ;;  %v533_v32 = vmul.f32 %v7259_v55, %v7259_v55  ;;  %v7264_v22 = vld [vmem:[%s6356_s28 + $0xc0] sm:$0xff]  ;;  %v5292_v60 = vld [vmem:[%s10553_s4 + $0x138] sm:$0xf0]  ;;  %v2945_v38 = vadd.f32 %v2944_v46, %v7171_v62  ;;  %v7283_v44 = vld [vmem:[%s6356_s28 + $0xc8] sm:$0xff] }
  0xcf   : > { %10787 = vst [vmem:[#allocation72_spill] sm:$0xff] %v7192_v19  ;;  %v584_v53 = vadd.f32 %v551_v12, %v518_v20  ;;  %v566_v61 = vmul.f32 %v7264_v22, %v7264_v22  ;;  %v534_v43 = vmul.f32 %v7278_v3, %v7278_v3  ;;  %v567_v20 = vmul.f32 %v7283_v44, %v7283_v44 }
  0xd0   : > { %10788 = vst [vmem:[#allocation73_spill] sm:$0xff] %v7200_v31  ;;  %2645 = vmatmul.bf16.gmra.mxu0 %v7252_v28  ;;  %v616_v12 = vadd.f32 1e-12, %v583_v26  ;;  %2814 = vmatmul.bf16.gmra.mxu1 %v7254_v6  ;;  %v7290_v62 = vor.u32 %v5687_v40, %v5292_v60  ;;  %v5298_v26 = vld [vmem:[%s10553_s4 + $0x140] sm:$0xf] }
  0xd1   : > { %10789 = vst [vmem:[#allocation74_spill] sm:$0xff] %v7204_v1  ;;  %2983 = vmatmul.bf16.gmra.mxu2 %v7256_v50  ;;  %v617_v10 = vadd.f32 1e-12, %v584_v53  ;;  %v599_v15 = vadd.f32 %v566_v61, %v533_v32  ;;  %v600_v46 = vadd.f32 %v567_v20, %v534_v43  ;;  %v5692_v32 = vld [vmem:[%s10553_s4 + $0x14c] sm:$0xf0]  ;;  %v7385_v1 = vld [vmem:[%s6575_s15 + $0x40] sm:$0xff] }
  0xd2   : > { %10790 = vst [vmem:[#allocation75_spill] sm:$0xff] %v7216_v59  ;;  %5957 = vlog2.f32 %v616_v12  ;;  %v5690_v53 = vld [vmem:[%s10553_s4 + $0x144] sm:$0xf]  ;;  %v5300_v60 = vld [vmem:[%s10553_s4 + $0x150] sm:$0xf0] }
  0xd3   : > { %10791 = vst [vmem:[#allocation76_spill] sm:$0xff] %v7218_v56  ;;  %5959 = vlog2.f32 %v617_v10  ;;  %v632_v25 = vadd.f32 1e-12, %v599_v15  ;;  %v633_v7 = vadd.f32 1e-12, %v600_v46 }
  0xd4   : > { %10792 = vst [vmem:[#allocation77_spill] sm:$0xff] %v7239_v35  ;;  %v3113_v13 = vpop.f32.mrf.mxu3  ;;  %v5306_v43 = vld [vmem:[%s10553_s4 + $0x148] sm:$0xf]  ;;  %v5693_v20 = vld [vmem:[%s10553_s4 + $0x154] sm:$0xf0] }
  0xd5   : > { %10793 = vst [vmem:[#allocation78_spill] sm:$0xff] %v7241_v17  ;;  %3152 = vmatmul.bf16.gmra.mxu3 %v7290_v62  ;;  %5961 = vlog2.f32 %v632_v25  ;;  %v7302_v61 = vadd.f32 %v3113_v13, %v2945_v38  ;;  %v2946_v40 = vpop.f32.mrf.mxu2  ;;  %v7313_v25 = vor.u32 %v5692_v32, %v5298_v26  ;;  %v2611_v13 = vpop.f32.mrf.mxu0  ;;  %v7315_v38 = vor.u32 %v5690_v53, %v5300_v60 }
  0xd6   : > { %10794 = vst [vmem:[#allocation79_spill] sm:$0xff] %v7252_v28  ;;  %5963 = vlog2.f32 %v633_v7  ;;  %v7317_v46 = vor.u32 %v5693_v20, %v5306_v43  ;;  %v5308_v7 = vld [vmem:[%s10553_s4 + $0x158] sm:$0xf0] }
  0xd7   : > { %10795 = vst [vmem:[#allocation80_spill] sm:$0xff] %v7254_v6  ;;  %v7330_v53 = vor.u32 %v5691_v63, %v5308_v7  ;;  %v7343_v63 = vld [vmem:[%s6557_s12 + $0x48] sm:$0xff]  ;;  %v7346_v7 = vld [vmem:[%s6557_s12 + $0xc0] sm:$0xff] }
  0xd8   : > { %10796 = vst [vmem:[#allocation81_spill] sm:$0xff] %v7256_v50  ;;  %v5958_v12 = vpop.eup %5957  ;;  %v683_v48 = vmul.f32 %v7343_v63, %v7343_v63  ;;  %v698_v33 = vmul.f32 %v7346_v7, %v7346_v7 }
  0xd9   : > { %10797 = vst [vmem:[#allocation82_spill] sm:$0xff] %v7268_v30  ;;  %v2777_v30 = vpop.f32.mrf.mxu1  ;;  %v5960_v10 = vpop.eup %5959 }
  0xda   : > { %10798 = vst [vmem:[#allocation83_spill] sm:$0xff] %v7290_v62  ;;  %v2778_v15 = vadd.f32 %v2777_v30, %v2608_v51  ;;  %v790_v62 = vmul.f32 0.6931472, %v5958_v12  ;;  %v792_v28 = vmul.f32 0.6931472, %v5960_v10 }
  0xdb   : > { %10799 = vst [vmem:[#allocation84_spill] sm:$0xff] %v7302_v61  ;;  %v5962_v30 = vpop.eup %5961  ;;  %v7391_v61 = vld [vmem:[%s6575_s15 + $0xc0] sm:$0xff] }
  0xdc   : > { %10800 = vst [vmem:[#allocation85_spill] sm:$0xff] %v7313_v25  ;;  %v2947_v50 = vadd.f32 %v2946_v40, %v2778_v15  ;;  %v3115_v51 = vpop.f32.mrf.mxu3  ;;  %v5964_v26 = vpop.eup %5963  ;;  %v914_v40 = vmul.f32 -0.35, %v792_v28  ;;  %v7332_v60 = vmul.f32 0.6931472, %v5962_v30 }
  0xdd   : > { %10801 = vst [vmem:[#allocation86_spill] sm:$0xff] %v7315_v38  ;;  %v2949_v43 = vpop.f32.mrf.mxu2  ;;  %v1309_v20 = vmul.f32 0.15, %v790_v62  ;;  %v7334_v12 = vmul.f32 0.15, %v792_v28 }
  0xde   : > { %10802 = vst [vmem:[#allocation87_spill] sm:$0xff] %v7317_v46  ;;  %v7328_v32 = vadd.f32 %v3115_v51, %v2947_v50  ;;  %v7336_v10 = vmul.f32 0.6931472, %v5964_v26  ;;  %v7340_v50 = vld [vmem:[%s6557_s12 + $0x40] sm:$0xff]  ;;  %v956_v30 = vmul.f32 1.442695, %v914_v40 }
  0xdf   : > { %10804 = vst [vmem:[#allocation89_spill] sm:$0xff] %v7330_v53  ;;  %v929_v51 = vmul.f32 -0.35, %v7332_v60  ;;  %v1801_v28 = vpack.c.bf16 %v7343_v63, %v7340_v50  ;;  %v7352_v26 = vld [vmem:[%s6557_s12 + $0xc8] sm:$0xff]  ;;  %v5694_v40 = vld [vmem:[%s10553_s4 + $0x164] sm:$0xf]  ;;  %v682_v0 = vmul.f32 %v7340_v50, %v7340_v50 }
  0xe0   : > { %2650 = vmatmul.bf16.gmra.mxu0 %v7313_v25  ;;  %2819 = vmatmul.bf16.gmra.mxu1 %v7315_v38  ;;  %10803 = vst [vmem:[#allocation88_spill] sm:$0xff] %v7328_v32  ;;  %v5697_v25 = vld [vmem:[%s10553_s4 + $0x174] sm:$0xf0]  ;;  %v1350_v34 = vmul.f32 1.442695, %v1309_v20  ;;  %v699_v56 = vmul.f32 %v7352_v26, %v7352_v26  ;;  %v7388_v32 = vld [vmem:[%s6575_s15 + $0x48] sm:$0xff] }
  0xe1   : > { %v2780_v6 = vpop.f32.mrf.mxu1  ;;  %2988 = vmatmul.bf16.gmra.mxu2 %v7317_v46  ;;  %v650_v17 = vmul.f32 %v7388_v32, %v7388_v32  ;;  %v7400_v20 = vld [vmem:[%s6575_s15 + $0xc8] sm:$0xff]  ;;  %v930_v59 = vmul.f32 -0.35, %v7336_v10 }
  0xe2   : > { %v2781_v5 = vadd.f32 %v2780_v6, %v2611_v13  ;;  %v913_v6 = vmul.f32 -0.35, %v790_v62  ;;  %v2613_v13 = vpop.f32.mrf.mxu0  ;;  %3609 = vmatpush.bf16.msrb.mxu2 %v1801_v28  ;;  %v649_v28 = vmul.f32 %v7385_v1, %v7385_v1 }
  0xe3   : > { %v716_v9 = vadd.f32 %v683_v48, %v650_v17 }
  0xe4   : > { %v2950_v15 = vadd.f32 %v2949_v43, %v2781_v5  ;;  %v954_v46 = vmul.f32 1.442695, %v913_v6  ;;  %v5314_v5 = vld [vmem:[%s10553_s4 + $0x160] sm:$0xf]  ;;  %v5696_v6 = vld [vmem:[%s10553_s4 + $0x16c] sm:$0xf0]  ;;  %v3118_v43 = vpop.f32.mrf.mxu3  ;;  %v715_v36 = vadd.f32 %v682_v0, %v649_v28 }
  0xe5   : > { %3157 = vmatmul.bf16.gmra.mxu3 %v7330_v53  ;;  %v5322_v53 = vld [vmem:[%s10553_s4 + $0x168] sm:$0xf]  ;;  %v1326_v28 = vmul.f32 0.15, %v7336_v10 }
  0xe6   : > { %5965 = vpow2.f32 %v954_v46  ;;  %v7380_v39 = vadd.f32 %v3118_v43, %v2950_v15  ;;  %v1769_v46 = vpack.c.bf16 %v7388_v32, %v7385_v1  ;;  %v665_v15 = vmul.f32 %v7391_v61, %v7391_v61 }
  0xe7   : > { %v7404_v43 = vor.u32 %v5696_v6, %v5314_v5  ;;  %v7408_v35 = vor.u32 %v5697_v25, %v5322_v53  ;;  %5967 = vpow2.f32 %v956_v30  ;;  %v5695_v5 = vld [vmem:[%s10553_s4 + $0x16c] sm:$0xf]  ;;  %v5324_v25 = vld [vmem:[%s10553_s4 + $0x178] sm:$0xf0]  ;;  %v1785_v30 = vpack.c.bf16 %v7400_v20, %v7391_v61 }
  0xe8   : > { %10805 = vst [vmem:[#allocation90_spill] sm:$0xff] %v7380_v39  ;;  %v666_v39 = vmul.f32 %v7400_v20, %v7400_v20  ;;  %3271 = vmatpush.bf16.msrb.mxu0 %v1769_v46  ;;  %v731_v52 = vadd.f32 %v698_v33, %v665_v15  ;;  %5969 = vpow2.f32 %v1350_v34  ;;  %v1325_v33 = vmul.f32 0.15, %v7332_v60 }
  0xe9   : > { %v2782_v38 = vpop.f32.mrf.mxu1  ;;  %10806 = vst [vmem:[#allocation91_spill] sm:$0xff] %v7404_v43  ;;  %3440 = vmatpush.bf16.msrb.mxu1 %v1785_v30  ;;  %v1384_v60 = vmul.f32 1.442695, %v1326_v28 }
  0xea   : > { %v2783_v62 = vadd.f32 %v2782_v38, %v2613_v13  ;;  %v1817_v38 = vpack.c.bf16 %v7352_v26, %v7346_v7  ;;  %v5316_v13 = vld [vmem:[%s10553_s4 + $0x170] sm:$0xf0]  ;;  %10808 = vst [vmem:[#allocation93_spill] sm:$0xff] %v7408_v35  ;;  %v2616_v54 = vpop.f32.mrf.mxu0  ;;  %v732_v53 = vadd.f32 %v699_v56, %v666_v39  ;;  %v764_v0 = vadd.f32 1e-12, %v731_v52 }
  0xeb   : > { %v7406_v4 = vor.u32 %v5694_v40, %v5316_v13  ;;  %v749_v40 = vadd.f32 1e-12, %v716_v9  ;;  %v1352_v13 = vmul.f32 1.442695, %v7334_v12  ;;  %v7431_v52 = vor.u32 %v5695_v5, %v5324_v25  ;;  %v5698_v25 = vld [vmem:[%s10553_s4 + $0x184] sm:$0xf] }
  0xec   : > { %3778 = vmatpush.bf16.msrb.mxu3 %v1817_v38  ;;  %v2951_v38 = vpop.f32.mrf.mxu2  ;;  %v7419_v48 = vpop.eup %5965  ;;  %v765_v17 = vadd.f32 1e-12, %v732_v53  ;;  %v988_v9 = vmul.f32 1.442695, %v930_v59  ;;  %v5330_v59 = vld [vmem:[%s10553_s4 + $0x180] sm:$0xf] }
  0xed   : > { %10807 = vst [vmem:[#allocation92_spill] sm:$0xff] %v7406_v4  ;;  %v2952_v23 = vadd.f32 %v2951_v38, %v2783_v62  ;;  %v748_v62 = vadd.f32 1e-12, %v715_v36  ;;  %v3120_v39 = vpop.f32.mrf.mxu3  ;;  %v7433_v36 = vpop.eup %5967  ;;  %v5332_v53 = vld [vmem:[%s10553_s4 + $0x190] sm:$0xf0] }
  0xee   : > { %10810 = vst [vmem:[#allocation95_spill] sm:$0xff] %v7431_v52  ;;  %v7435_v46 = vpop.eup %5969 }
  0xef   : > { %5971 = vlog2.f32 %v748_v62  ;;  %v7429_v34 = vadd.f32 %v3120_v39, %v2952_v23 }
  0xf0   : > { %2655 = vmatmul.bf16.gmra.mxu0 %v7404_v43  ;;  %2824 = vmatmul.bf16.gmra.mxu1 %v7406_v4  ;;  %5973 = vlog2.f32 %v749_v40 }
  0xf1   : > { %v2785_v31 = vpop.f32.mrf.mxu1  ;;  %2993 = vmatmul.bf16.gmra.mxu2 %v7408_v35  ;;  %10809 = vst [vmem:[#allocation94_spill] sm:$0xff] %v7429_v34  ;;  %5975 = vlog2.f32 %v764_v0  ;;  %v7512_v34 = vld [vmem:[%s6356_s28 + $0x38] sm:$0xff] }
  0xf2   : > { %v2786_v6 = vadd.f32 %v2785_v31, %v2616_v54  ;;  %v986_v54 = vmul.f32 1.442695, %v929_v51  ;;  %v1382_v31 = vmul.f32 1.442695, %v1325_v33  ;;  %5977 = vlog2.f32 %v765_v17  ;;  %v2618_v10 = vpop.f32.mrf.mxu0  ;;  %v5700_v51 = vld [vmem:[%s10553_s4 + $0x18c] sm:$0xf0] }
  0xf3   : > { %5979 = vpow2.f32 %v1352_v13  ;;  %v7450_v0 = vor.u32 %v5700_v51, %v5330_v59  ;;  %v5338_v33 = vld [vmem:[%s10553_s4 + $0x188] sm:$0xf]  ;;  %v5701_v17 = vld [vmem:[%s10553_s4 + $0x194] sm:$0xf0] }
  0xf4   : > { %v2954_v56 = vpop.f32.mrf.mxu2  ;;  %5981 = vpow2.f32 %v986_v54 }
  0xf5   : > { %v2955_v12 = vadd.f32 %v2954_v56, %v2786_v6  ;;  %3162 = vmatmul.bf16.gmra.mxu3 %v7431_v52  ;;  %v5972_v15 = vpop.eup %5971  ;;  %5983 = vpow2.f32 %v988_v9  ;;  %v3123_v40 = vpop.f32.mrf.mxu3  ;;  %10811 = vst [vmem:[#allocation96_spill] sm:$0xff] %v7450_v0  ;;  %v7462_v56 = vor.u32 %v5698_v25, %v5332_v53 }
  0xf6   : > { %v5974_v5 = vpop.eup %5973  ;;  %5985 = vpow2.f32 %v1382_v31  ;;  %v856_v6 = vmul.f32 0.6931472, %v5972_v15  ;;  %v7466_v15 = vor.u32 %v5701_v17, %v5338_v33 }
  0xf7   : > { %v5976_v62 = vpop.eup %5975  ;;  %5987 = vpow2.f32 %v1384_v60  ;;  %v858_v30 = vmul.f32 0.6931472, %v5974_v5  ;;  %v7458_v28 = vadd.f32 %v3123_v40, %v2955_v12  ;;  %10813 = vst [vmem:[#allocation98_spill] sm:$0xff] %v7462_v56 }
  0xf8   : > { %v5978_v13 = vpop.eup %5977  ;;  %v1012_v39 = vmul.f32 -0.35, %v856_v6  ;;  %v1408_v54 = vmul.f32 0.15, %v856_v6  ;;  %v888_v9 = vmul.f32 0.6931472, %v5976_v62 }
  0xf9   : > { %v2787_v23 = vpop.f32.mrf.mxu1  ;;  %10812 = vst [vmem:[#allocation97_spill] sm:$0xff] %v7458_v28  ;;  %v7460_v31 = vpop.eup %5979  ;;  %v1013_v60 = vmul.f32 -0.35, %v858_v30  ;;  %v1210_v28 = vmul.f32 %v7212_v37, %v7419_v48 }
  0xfa   : > { %v2788_v38 = vadd.f32 %v2787_v23, %v2618_v10  ;;  %v1409_v10 = vmul.f32 0.15, %v858_v30  ;;  %v890_v23 = vmul.f32 0.6931472, %v5978_v13  ;;  %v7464_v59 = vpop.eup %5981  ;;  %10814 = vst [vmem:[#allocation99_spill] sm:$0xff] %v7466_v15  ;;  %v2621_v6 = vpop.f32.mrf.mxu0 }
  0xfb   : > { %v1053_v52 = vmul.f32 1.442695, %v1012_v39  ;;  %v1449_v5 = vmul.f32 1.442695, %v1408_v54  ;;  %v1028_v35 = vmul.f32 -0.35, %v888_v9  ;;  %v7468_v12 = vpop.eup %5983 }
  0xfc   : > { %v2956_v51 = vpop.f32.mrf.mxu2  ;;  %v1055_v62 = vmul.f32 1.442695, %v1013_v60  ;;  %v1451_v4 = vmul.f32 1.442695, %v1409_v10  ;;  %v1029_v25 = vmul.f32 -0.35, %v890_v23  ;;  %v7470_v53 = vpop.eup %5985 }
  0xfd   : > { %v2957_v40 = vadd.f32 %v2956_v51, %v2788_v38  ;;  %5989 = vpow2.f32 %v1053_v52  ;;  %v1085_v13 = vmul.f32 1.442695, %v1028_v35  ;;  %v1424_v33 = vmul.f32 0.15, %v888_v9  ;;  %v7472_v39 = vpop.eup %5987  ;;  %v5699_v38 = vld [vmem:[%s10553_s4 + $0x18c] sm:$0xf] }
  0xfe   : > { %v1425_v17 = vmul.f32 0.15, %v890_v23  ;;  %v5340_v60 = vld [vmem:[%s10553_s4 + $0x198] sm:$0xf0]  ;;  %5991 = vpow2.f32 %v1055_v62  ;;  %v1087_v10 = vmul.f32 1.442695, %v1029_v25  ;;  %v3125_v25 = vpop.f32.mrf.mxu3 }
  0xff   : > { %v7481_v51 = vld [vmem:[%s6350_s25 + $0x30] sm:$0xff]  ;;  %5993 = vpow2.f32 %v1449_v5  ;;  %v1481_v52 = vmul.f32 1.442695, %v1424_v33  ;;  %v7487_v9 = vld [vmem:[%s6350_s25 + $0x38] sm:$0xff]  ;;  %v7507_v43 = vor.u32 %v5699_v38, %v5340_v60 }
 0x100   : > { %v515_v35 = vmul.f32 %v7481_v51, %v7481_v51  ;;  %2660 = vmatmul.bf16.gmra.mxu0 %v7450_v0  ;;  %v516_v23 = vmul.f32 %v7487_v9, %v7487_v9  ;;  %2829 = vmatmul.bf16.gmra.mxu1 %v7462_v56  ;;  %5995 = vpow2.f32 %v1451_v4  ;;  %v1483_v5 = vmul.f32 1.442695, %v1425_v17 }
 0x101   : > { %v2790_v30 = vpop.f32.mrf.mxu1  ;;  %2998 = vmatmul.bf16.gmra.mxu2 %v7466_v15  ;;  %v7505_v0 = vadd.f32 %v3125_v25, %v2957_v40  ;;  %10816 = vst [vmem:[#allocation101_spill] sm:$0xff] %v7507_v43  ;;  %5997 = vpow2.f32 %v1085_v13  ;;  %v549_v15 = vmul.f32 %v7512_v34, %v7512_v34  ;;  %v1111_v4 = vmul.f32 %v7207_v18, %v7419_v48 }
 0x102   : > { %v2791_v54 = vadd.f32 %v2790_v30, %v2621_v6  ;;  %v7492_v6 = vld [vmem:[%s6350_s25 + $0xb0] sm:$0xff]  ;;  %5999 = vpow2.f32 %v1087_v10  ;;  %v1211_v40 = vmul.f32 %v7235_v29, %v7433_v36  ;;  %v1112_v13 = vmul.f32 %v7230_v11, %v7433_v36 }
 0x103   : > { %v7496_v62 = vmul.f32 %v7492_v6, %v7492_v6  ;;  %v7501_v30 = vld [vmem:[%s6356_s28 + $0x30] sm:$0xff]  ;;  %10815 = vst [vmem:[#allocation100_spill] sm:$0xff] %v7505_v0  ;;  %v5990_v17 = vpop.eup %5989  ;;  %6001 = vpow2.f32 %v1481_v52  ;;  %v2623_v0 = vpop.f32.mrf.mxu0  ;;  %v1127_v48 = vmul.f32 %v7259_v55, %v7464_v59  ;;  %v10617_v55 = vmov 0.0  }
 0x104   : > { %v548_v33 = vmul.f32 %v7501_v30, %v7501_v30  ;;  %v2959_v25 = vpop.f32.mrf.mxu2  ;;  %v5992_v38 = vpop.eup %5991  ;;  %v1144_v60 = vmul.f32 %v5990_v17, %v7385_v1  ;;  %v1243_v56 = vmul.f32 %v5990_v17, %v7340_v50  ;;  %6003 = vpow2.f32 %v1483_v5  ;;  %347 = vst.msk [vmem:[#allocation2 + $0x10] sm:$0xff] %vm344_vm1, %v10617_v55 }
 0x105   : > { %v2960_v37 = vadd.f32 %v2959_v25, %v2791_v54  ;;  %v5994_v49 = vpop.eup %5993  ;;  %3167 = vmatmul.bf16.gmra.mxu3 %v7507_v43  ;;  %v1145_v18 = vmul.f32 %v5992_v38, %v7388_v32  ;;  %v1244_v29 = vmul.f32 %v5992_v38, %v7343_v63  ;;  %v5346_v32 = vld [vmem:[%s10553_s4 + $0x1a0] sm:$0xf]  ;;  %v5704_v63 = vld [vmem:[%s10553_s4 + $0x1ac] sm:$0xf0]  ;;  %345 = vst.msk [vmem:[#allocation2] sm:$0xff] %vm344_vm1, %v10617_v55  ;;  %v7768_v43 = vld [vmem:[%s6557_s12 + $0x38] sm:$0xff] }
 0x106   : > { %v5996_v36 = vpop.eup %5995  ;;  %v7529_v54 = vsub.f32 %v1111_v4, %v1144_v60  ;;  %v7531_v1 = vsub.f32 %v1210_v28, %v1243_v56  ;;  %v7534_v50 = vsub.f32 %v7435_v46, %v5994_v49  ;;  %v581_v5 = vadd.f32 %v548_v33, %v515_v35  ;;  %v3128_v17 = vpop.f32.mrf.mxu3  ;;  %346 = vst.msk [vmem:[#allocation2 + $0x8] sm:$0xff] %vm344_vm1, %v10617_v55  ;;  %v5354_v25 = vld [vmem:[%s10553_s4 + $0x1a8] sm:$0xf] }
 0x107   : > { %v5998_v52 = vpop.eup %5997  ;;  %v7544_v28 = vsub.f32 %v1112_v13, %v1145_v18  ;;  %v7546_v49 = vsub.f32 %v1211_v40, %v1244_v29  ;;  %v7549_v46 = vsub.f32 %v7460_v31, %v5996_v36  ;;  %v1226_v56 = vmul.f32 %v7264_v22, %v7464_v59  ;;  %v5702_v31 = vld [vmem:[%s10553_s4 + $0x1a4] sm:$0xf]  ;;  %v5348_v40 = vld [vmem:[%s10553_s4 + $0x1b0] sm:$0xf0]  ;;  %v5705_v13 = vld [vmem:[%s10553_s4 + $0x1b4] sm:$0xf0] }
 0x108   : > { %10817 = vst [vmem:[#allocation102_spill] sm:$0xff] %v7529_v54  ;;  %v1227_v4 = vmul.f32 %v7283_v44, %v7468_v12  ;;  %v1128_v35 = vmul.f32 %v7278_v3, %v7468_v12  ;;  %v1160_v33 = vmul.f32 %v5998_v52, %v7391_v61  ;;  %v582_v59 = vadd.f32 %v549_v15, %v516_v23  ;;  %v7569_v44 = vld [vmem:[%s6356_s28 + $0xb0] sm:$0xff] }
 0x109   : > { %v2792_v11 = vpop.f32.mrf.mxu1  ;;  %10818 = vst [vmem:[#allocation103_spill] sm:$0xff] %v7531_v1  ;;  %v564_v3 = vmul.f32 %v7569_v44, %v7569_v44  ;;  %v7573_v12 = vadd.f32 %v3128_v17, %v2960_v37  ;;  %v7575_v61 = vor.u32 %v5704_v63, %v5346_v32  ;;  %v1259_v37 = vmul.f32 %v5998_v52, %v7346_v7 }
 0x10a   : > { %10819 = vst [vmem:[#allocation104_spill] sm:$0xff] %v7534_v50  ;;  %v2793_v10 = vadd.f32 %v2792_v11, %v2623_v0  ;;  %v6000_v0 = vpop.eup %5999  ;;  %v7586_v38 = vsub.f32 %v1127_v48, %v1160_v33  ;;  %v7598_v36 = vor.u32 %v5702_v31, %v5348_v40  ;;  %v6290_v32 = vmov 0   ;;  %v5356_v33 = vld [vmem:[%s10553_s4 + $0x1b8] sm:$0xf0] }
 0x10b   : > { %10820 = vst [vmem:[#allocation105_spill] sm:$0xff] %v7544_v28  ;;  %v6002_v22 = vpop.eup %6001  ;;  %v1161_v23 = vmul.f32 %v6000_v0, %v7400_v20  ;;  %v1260_v60 = vmul.f32 %v6000_v0, %v7352_v26  ;;  %v7604_v26 = vsub.f32 %v1226_v56, %v1259_v37  ;;  %v2626_v48 = vpop.f32.mrf.mxu0  ;;  %5809 = vset.pattern.permute.xlu0 %v6290_v32  ;;  %v7610_v52 = vld [vmem:[#allocation2 + $0x10] sm:$0xff]  ;;  %v7615_v0 = vld [vmem:[%s6350_s25 + $0xb8] sm:$0xff]  ;;  %v614_v40 = vadd.f32 1e-12, %v581_v5 }
 0x10c   : > { %10821 = vst [vmem:[#allocation106_spill] sm:$0xff] %v7546_v49  ;;  %v6004_v15 = vpop.eup %6003  ;;  %v7593_v18 = vsub.f32 %v7470_v53, %v6002_v22  ;;  %v2961_v11 = vpop.f32.mrf.mxu2  ;;  %v7608_v53 = vor.u32 %v5705_v13, %v5354_v25  ;;  %5807 = vset.pattern.permute.xlu1 %v6290_v32  ;;  %5808 = vset.pattern.permute.xlu2 %v6290_v32  ;;  %v7631_v31 = vld [vmem:[#allocation2] sm:$0xff]  ;;  %v615_v22 = vadd.f32 1e-12, %v582_v59 }
 0x10d   : > { %10822 = vst [vmem:[#allocation107_spill] sm:$0xff] %v7549_v46  ;;  %v7596_v29 = vsub.f32 %v7472_v39, %v6004_v15  ;;  %v7602_v7 = vsub.f32 %v1128_v35, %v1161_v23  ;;  %v7606_v20 = vsub.f32 %v1227_v4, %v1260_v60  ;;  %v2962_v39 = vadd.f32 %v2961_v11, %v2793_v10  ;;  %v7620_v4 = vld [vmem:[%s6356_s28 + $0xb8] sm:$0xff]  ;;  %v5703_v10 = vld [vmem:[%s10553_s4 + $0x1ac] sm:$0xf] }
 0x10e   : > { %10823 = vst [vmem:[#allocation108_spill] sm:$0xff] %v7573_v12  ;;  %v532_v56 = vmul.f32 %v7615_v0, %v7615_v0  ;;  %v565_v17 = vmul.f32 %v7620_v4, %v7620_v4  ;;  %4119 = vperm.xlu0 %5809, %v7610_v52   ;;  %4109 = vperm.xlu1 %5807, %v7631_v31   ;;  %v3130_v13 = vpop.f32.mrf.mxu3  ;;  %6005 = vlog2.f32 %v614_v40  ;;  %v5713_v12 = vld [vmem:[%s10553_s4 + $0x1f4] sm:$0xf0] }
 0x10f   : > { %10824 = vst [vmem:[#allocation109_spill] sm:$0xff] %v7575_v61  ;;  %v597_v25 = vadd.f32 %v564_v3, %v7496_v62  ;;  %v7642_v15 = vadd.f32 %v3130_v13, %v2962_v39  ;;  %v7644_v5 = vor.u32 %v5703_v10, %v5356_v33  ;;  %6007 = vlog2.f32 %v615_v22  ;;  %v5364_v10 = vld [vmem:[%s10553_s4 + $0x1d0] sm:$0xf0]  ;;  %v5370_v22 = vld [vmem:[%s10553_s4 + $0x1c8] sm:$0xf] }
 0x110   : > { %348 = vst.msk [vmem:[#allocation2 + $0x18] sm:$0xff] %vm344_vm1, %v10617_v55  ;;  %2665 = vmatmul.bf16.gmra.mxu0 %v7575_v61  ;;  %2834 = vmatmul.bf16.gmra.mxu1 %v7598_v36  ;;  %v598_v23 = vadd.f32 %v565_v17, %v532_v56  ;;  %v5708_v56 = vld [vmem:[%s10553_s4 + $0x1cc] sm:$0xf0]  ;;  %v7691_v13 = vld [vmem:[#allocation2 + $0x8] sm:$0xff]  ;;  %v5378_v61 = vld [vmem:[%s10553_s4 + $0x1e0] sm:$0xf] }
 0x111   : > { %10825 = vst [vmem:[#allocation110_spill] sm:$0xff] %v7586_v38  ;;  %v2795_v63 = vpop.f32.mrf.mxu1  ;;  %3003 = vmatmul.bf16.gmra.mxu2 %v7608_v53  ;;  %v630_v59 = vadd.f32 1e-12, %v597_v25  ;;  %v5709_v25 = vld [vmem:[%s10553_s4 + $0x1d4] sm:$0xf0]  ;;  %4114 = vperm.xlu2 %5808, %v7691_v13  }
 0x112   : > { %349 = vst.msk [vmem:[#allocation2 + $0x20] sm:$0xff] %vm344_vm1, %v10617_v55  ;;  %v2796_v35 = vadd.f32 %v2795_v63, %v2626_v48  ;;  %v631_v48 = vadd.f32 1e-12, %v598_v23  ;;  %v5362_v63 = vld [vmem:[%s10553_s4 + $0x1c0] sm:$0xf] }
 0x113   : > { %10826 = vst [vmem:[#allocation111_spill] sm:$0xff] %v7593_v18  ;;  %v2628_v37 = vpop.f32.mrf.mxu0  ;;  %6009 = vlog2.f32 %v630_v59  ;;  %v7696_v59 = vor.u32 %v5708_v56, %v5362_v63  ;;  %v681_v18 = vmul.f32 %v7768_v43, %v7768_v43 }
 0x114   : > { %10827 = vst [vmem:[#allocation112_spill] sm:$0xff] %v7596_v29  ;;  %v2964_v62 = vpop.f32.mrf.mxu2  ;;  %v6006_v33 = vpop.eup %6005  ;;  %6011 = vlog2.f32 %v631_v48 }
 0x115   : > { %10828 = vst [vmem:[#allocation113_spill] sm:$0xff] %v7598_v36  ;;  %v2965_v3 = vadd.f32 %v2964_v62, %v2796_v35  ;;  %3172 = vmatmul.bf16.gmra.mxu3 %v7644_v5  ;;  %v5706_v35 = vld [vmem:[%s10553_s4 + $0x1c4] sm:$0xf]  ;;  %v6008_v23 = vpop.eup %6007 }
 0x116   : > { %350 = vst.msk [vmem:[#allocation2 + $0x28] sm:$0xff] %vm344_vm1, %v10617_v55  ;;  %v3133_v17 = vpop.f32.mrf.mxu3 }
 0x117   : > { %10829 = vst [vmem:[#allocation114_spill] sm:$0xff] %v7602_v7  ;;  %v7654_v60 = vld [vmem:[#allocation2 + $0x18] sm:$0xff]  ;;  %v7681_v40 = vadd.f32 %v3133_v17, %v2965_v3  ;;  %v786_v3 = vmul.f32 0.6931472, %v6006_v33  ;;  %v7700_v17 = vor.u32 %v5706_v35, %v5364_v10 }
 0x118   : > { %10830 = vst [vmem:[#allocation115_spill] sm:$0xff] %v7604_v26  ;;  %4124 = vperm.xlu1 %5807, %v7654_v60   ;;  %v5372_v35 = vld [vmem:[%s10553_s4 + $0x1d8] sm:$0xf0] }
 0x119   : > { %10831 = vst [vmem:[#allocation116_spill] sm:$0xff] %v7606_v20  ;;  %v2797_v11 = vpop.f32.mrf.mxu1  ;;  %v6010_v63 = vpop.eup %6009  ;;  %v911_v33 = vmul.f32 -0.35, %v786_v3 }
 0x11a   : > { %10832 = vst [vmem:[#allocation117_spill] sm:$0xff] %v7608_v53  ;;  %v2798_v32 = vadd.f32 %v2797_v11, %v2628_v37  ;;  %v788_v53 = vmul.f32 0.6931472, %v6008_v23  ;;  %v7728_v23 = vmul.f32 0.6931472, %v6010_v63 }
 0x11b   : > { %351 = vst.msk [vmem:[#allocation2 + $0x30] sm:$0xff] %vm344_vm1, %v10617_v55  ;;  %v2631_v11 = vpop.f32.mrf.mxu0 }
 0x11c   : > { %352 = vst.msk [vmem:[#allocation2 + $0x38] sm:$0xff] %vm344_vm1, %v10617_v55  ;;  %v2966_v62 = vpop.f32.mrf.mxu2 }
 0x11d   : > { %353 = vst.msk [vmem:[#allocation2 + $0x40] sm:$0xff] %vm344_vm1, %v10617_v55  ;;  %v2967_v37 = vadd.f32 %v2966_v62, %v2798_v32  ;;  %v5707_v32 = vld [vmem:[%s10553_s4 + $0x1cc] sm:$0xf] }
 0x11e   : > { %10833 = vst [vmem:[#allocation118_spill] sm:$0xff] %v7642_v15  ;;  %v7718_v10 = vld [vmem:[#allocation2 + $0x28] sm:$0xff] }
 0x11f   : > { %10834 = vst [vmem:[#allocation119_spill] sm:$0xff] %v7644_v5  ;;  %v7702_v5 = vor.u32 %v5709_v25, %v5370_v22  ;;  %v1307_v22 = vmul.f32 0.15, %v786_v3  ;;  %v3135_v25 = vpop.f32.mrf.mxu3  ;;  %v4079_v3 = vld [vmem:[#allocation2 + $0x20] sm:$0xff] }
 0x120   : > { %354 = vst.msk [vmem:[#allocation2 + $0x48] sm:$0xff] %vm344_vm1, %v10617_v55  ;;  %2670 = vmatmul.bf16.gmra.mxu0 %v7696_v59  ;;  %2839 = vmatmul.bf16.gmra.mxu1 %v7700_v17  ;;  %v7730_v62 = vadd.f32 %v3135_v25, %v2967_v37 }
 0x121   : > { %355 = vst.msk [vmem:[#allocation2 + $0x50] sm:$0xff] %vm344_vm1, %v10617_v55  ;;  %v2800_v36 = vpop.f32.mrf.mxu1  ;;  %3008 = vmatmul.bf16.gmra.mxu2 %v7702_v5  ;;  %4134 = vperm.xlu1 %5807, %v7718_v10  }
 0x122   : > { %356 = vst.msk [vmem:[#allocation2 + $0x58] sm:$0xff] %vm344_vm1, %v10617_v55  ;;  %v2801_v56 = vadd.f32 %v2800_v36, %v2631_v11  ;;  %v6012_v36 = vpop.eup %6011  ;;  %v7732_v11 = vor.u32 %v5707_v32, %v5372_v35  ;;  %4129 = vperm.xlu2 %5808, %v4079_v3   ;;  %v950_v32 = vmul.f32 1.442695, %v911_v33  ;;  %v7745_v35 = vmul.f32 1.442695, %v1307_v22  ;;  %v7760_v22 = vld [vmem:[%s6557_s12 + $0x30] sm:$0xff] }
 0x123   : > { %357 = vst.msk [vmem:[#allocation2 + $0x60] sm:$0xff] %vm344_vm1, %v10617_v55  ;;  %v7661_v39 = vld [vmem:[#allocation2 + $0x38] sm:$0xff]  ;;  %v7741_v63 = vmul.f32 0.6931472, %v6012_v36  ;;  %v680_v29 = vmul.f32 %v7760_v22, %v7760_v22  ;;  %v4081_v50 = vld [vmem:[#allocation2 + $0x30] sm:$0xff] }
 0x124   : > { %358 = vst.msk [vmem:[#allocation2 + $0x68] sm:$0xff] %vm344_vm1, %v10617_v55  ;;  %4144 = vperm.xlu0 %5809, %v7661_v39   ;;  %v2969_v37 = vpop.f32.mrf.mxu2  ;;  %v7757_v33 = vld [vmem:[#allocation2 + $0x40] sm:$0xff]  ;;  %6013 = vpow2.f32 %v950_v32  ;;  %v647_v32 = vmul.f32 %v7811_v45, %v7811_v45 }
 0x125   : > { %359 = vst.msk [vmem:[#allocation2 + $0x70] sm:$0xff] %vm344_vm1, %v10617_v55  ;;  %v2970_v25 = vadd.f32 %v2969_v37, %v2801_v56  ;;  %3177 = vmatmul.bf16.gmra.mxu3 %v7732_v11  ;;  %v928_v7 = vmul.f32 -0.35, %v7741_v63 }
 0x126   : > { %360 = vst.msk [vmem:[#allocation2 + $0x78] sm:$0xff] %vm344_vm1, %v10617_v55  ;;  %v713_v54 = vadd.f32 %v680_v29, %v647_v32 }
 0x127   : > { %361 = vst.msk [vmem:[#allocation2 + $0x80] sm:$0xff] %vm344_vm1, %v10617_v55  ;;  %v3138_v15 = vpop.f32.mrf.mxu3 }
 0x128   : > { %10835 = vst [vmem:[#allocation120_spill] sm:$0xff] %v7681_v40  ;;  %v7706_v48 = vld [vmem:[#allocation2 + $0x50] sm:$0xff]  ;;  %v7774_v40 = vld [vmem:[%s6557_s12 + $0xb8] sm:$0xff]  ;;  %v7805_v38 = vadd.f32 %v3138_v15, %v2970_v25  ;;  %v648_v15 = vmul.f32 %v7814_v57, %v7814_v57  ;;  %v1767_v25 = vpack.c.bf16 %v7814_v57, %v7811_v45 }
 0x129   : > { %362 = vst.msk [vmem:[#allocation2 + $0x88] sm:$0xff] %vm344_vm1, %v10617_v55  ;;  %v2802_v36 = vpop.f32.mrf.mxu1  ;;  %4149 = vperm.xlu1 %5807, %v7757_v33   ;;  %v697_v8 = vmul.f32 %v7774_v40, %v7774_v40 }
 0x12a   : > { %363 = vst.msk [vmem:[#allocation2 + $0x90] sm:$0xff] %vm344_vm1, %v10617_v55  ;;  %v714_v27 = vadd.f32 %v681_v18, %v648_v15  ;;  %3272 = vmatpush.bf16.msrb.mxu0 %v1767_v25  ;;  %4139 = vperm.xlu2 %5808, %v4081_v50   ;;  %v746_v18 = vadd.f32 1e-12, %v713_v54  ;;  %v984_v50 = vmul.f32 1.442695, %v928_v7  ;;  %v7924_v16 = vld [vmem:[#allocation2 + $0x60] sm:$0xff] }
 0x12b   : > { %10836 = vst [vmem:[#allocation121_spill] sm:$0xff] %v7696_v59  ;;  %v912_v59 = vmul.f32 -0.35, %v788_v53  ;;  %v7749_v3 = vld [vmem:[#allocation2 + $0x68] sm:$0xff]  ;;  %v5394_v15 = vld [vmem:[%s10553_s4 + $0x200] sm:$0xf] }
 0x12c   : > { %364 = vst.msk [vmem:[#allocation2 + $0x98] sm:$0xff] %vm344_vm1, %v10617_v55  ;;  %4159 = vperm.xlu0 %5809, %v7706_v48   ;;  %v2971_v19 = vpop.f32.mrf.mxu2  ;;  %v5716_v25 = vld [vmem:[%s10553_s4 + $0x20c] sm:$0xf0] }
 0x12d   : > { %10837 = vst [vmem:[#allocation122_spill] sm:$0xff] %v7700_v17  ;;  %v2633_v17 = vpop.f32.mrf.mxu0  ;;  %v952_v56 = vmul.f32 1.442695, %v912_v59  ;;  %v5712_v59 = vld [vmem:[%s10553_s4 + $0x1ec] sm:$0xf0] }
 0x12e   : > { %10838 = vst [vmem:[#allocation123_spill] sm:$0xff] %v7702_v5  ;;  %v7739_v5 = vmul.f32 0.15, %v788_v53  ;;  %v7752_v53 = vmul.f32 -0.35, %v7728_v23  ;;  %v2803_v37 = vadd.f32 %v2802_v36, %v2633_v17  ;;  %v1799_v36 = vpack.c.bf16 %v7768_v43, %v7760_v22  ;;  %v7838_v21 = vld [vmem:[#allocation2 + $0x80] sm:$0xff] }
 0x12f   : > { %365 = vst.msk [vmem:[#allocation2 + $0xa0] sm:$0xff] %vm344_vm1, %v10617_v55  ;;  %v5710_v17 = vld [vmem:[%s10553_s4 + $0x1e4] sm:$0xf]  ;;  %v7830_v46 = vor.u32 %v5712_v59, %v5378_v61  ;;  %6015 = vpow2.f32 %v952_v56  ;;  %v1323_v56 = vmul.f32 0.15, %v7728_v23 }
 0x130   : > { %366 = vst.msk [vmem:[#allocation2 + $0xa8] sm:$0xff] %vm344_vm1, %v10617_v55  ;;  %3610 = vmatpush.bf16.msrb.mxu2 %v1799_v36  ;;  %v7826_v36 = vld [vmem:[%s6575_s15 + $0xb8] sm:$0xff]  ;;  %v2972_v28 = vadd.f32 %v2971_v19, %v2803_v37  ;;  %6017 = vpow2.f32 %v7745_v35  ;;  %v7926_v2 = vld [vmem:[#allocation2 + $0x88] sm:$0xff] }
 0x131   : > { %367 = vst.msk [vmem:[#allocation2 + $0xb0] sm:$0xff] %vm344_vm1, %v10617_v55  ;;  %v664_v49 = vmul.f32 %v7826_v36, %v7826_v36  ;;  %v2805_v42 = vpop.f32.mrf.mxu1  ;;  %v7846_v19 = vld [vmem:[#allocation2 + $0x58] sm:$0xff]  ;;  %2675 = vmatmul.bf16.gmra.mxu0 %v7830_v46  ;;  %v1783_v59 = vpack.c.bf16 %v7826_v36, %v7817_v58  ;;  %6019 = vlog2.f32 %v746_v18  ;;  %v1378_v23 = vmul.f32 1.442695, %v1323_v56  ;;  %v5714_v18 = vld [vmem:[%s10553_s4 + $0x204] sm:$0xf] }
 0x132   : > { %368 = vst.msk [vmem:[#allocation2 + $0xb8] sm:$0xff] %vm344_vm1, %v10617_v55  ;;  %4164 = vperm.xlu1 %5807, %v7846_v19  }
 0x133   : > { %369 = vst.msk [vmem:[#allocation2 + $0xc0] sm:$0xff] %vm344_vm1, %v10617_v55  ;;  %v730_v61 = vadd.f32 %v697_v8, %v664_v49  ;;  %v1348_v8 = vmul.f32 1.442695, %v7739_v5  ;;  %3441 = vmatpush.bf16.msrb.mxu1 %v1783_v59  ;;  %v7866_v49 = vld [vmem:[#allocation2 + $0x48] sm:$0xff]  ;;  %v7891_v59 = vor.u32 %v5716_v25, %v5394_v15 }
 0x134   : > { %10839 = vst [vmem:[#allocation124_spill] sm:$0xff] %v7730_v62  ;;  %4174 = vperm.xlu0 %5809, %v7749_v3   ;;  %v5386_v62 = vld [vmem:[%s10553_s4 + $0x1e8] sm:$0xf]  ;;  %4154 = vperm.xlu2 %5808, %v7866_v49  }
 0x135   : > { %10840 = vst [vmem:[#allocation125_spill] sm:$0xff] %v7732_v11  ;;  %v7771_v11 = vld [vmem:[%s6557_s12 + $0xb0] sm:$0xff]  ;;  %v2636_v1 = vpop.f32.mrf.mxu0  ;;  %v763_v37 = vadd.f32 1e-12, %v730_v61 }
 0x136   : > { %370 = vst.msk [vmem:[#allocation2 + $0xc8] sm:$0xff] %vm344_vm1, %v10617_v55  ;;  %v696_v20 = vmul.f32 %v7771_v11, %v7771_v11  ;;  %v1815_v26 = vpack.c.bf16 %v7774_v40, %v7771_v11  ;;  %v2806_v29 = vadd.f32 %v2805_v42, %v2636_v1  ;;  %v1324_v42 = vmul.f32 0.15, %v7741_v63  ;;  %v2974_v63 = vpop.f32.mrf.mxu2  ;;  %v7882_v61 = vld [vmem:[#allocation2 + $0x70] sm:$0xff] }
 0x137   : > { %371 = vst.msk [vmem:[#allocation2 + $0xd0] sm:$0xff] %vm344_vm1, %v10617_v55 }
 0x138   : > { %372 = vst.msk [vmem:[#allocation2 + $0xd8] sm:$0xff] %vm344_vm1, %v10617_v55  ;;  %3779 = vmatpush.bf16.msrb.mxu3 %v1815_v26  ;;  %v7834_v26 = vor.u32 %v5713_v12, %v5386_v62  ;;  %v5388_v12 = vld [vmem:[%s10553_s4 + $0x1f8] sm:$0xf0]  ;;  %v747_v62 = vadd.f32 1e-12, %v714_v27  ;;  %v3140_v27 = vpop.f32.mrf.mxu3  ;;  %v7922_v41 = vld [vmem:[#allocation2 + $0xb0] sm:$0xff] }
 0x139   : > { %373 = vst.msk [vmem:[#allocation2 + $0xe0] sm:$0xff] %vm344_vm1, %v10617_v55  ;;  %v7861_v54 = vadd.f32 %v3140_v27, %v2972_v28  ;;  %v1380_v35 = vmul.f32 1.442695, %v1324_v42  ;;  %v2807_v7 = vpop.f32.mrf.mxu1  ;;  %v5717_v42 = vld [vmem:[%s10553_s4 + $0x214] sm:$0xf0] }
 0x13a   : > { %374 = vst.msk [vmem:[#allocation2 + $0xe8] sm:$0xff] %vm344_vm1, %v10617_v55  ;;  %3013 = vmatmul.bf16.gmra.mxu2 %v7834_v26  ;;  %6021 = vlog2.f32 %v747_v62  ;;  %v5396_v62 = vld [vmem:[%s10553_s4 + $0x210] sm:$0xf0]  ;;  %4179 = vperm.xlu1 %5807, %v7882_v61  }
 0x13b   : > { %375 = vst.msk [vmem:[#allocation2 + $0xf0] sm:$0xff] %vm344_vm1, %v10617_v55 }
 0x13c   : > { %376 = vst.msk [vmem:[#allocation2 + $0xf8] sm:$0xff] %vm344_vm1, %v10617_v55  ;;  %v5380_v55 = vld [vmem:[%s10553_s4 + $0x1f0] sm:$0xf0]  ;;  %4189 = vperm.xlu0 %5809, %v7838_v21   ;;  %4169 = vperm.xlu2 %5808, %v7924_v16  }
 0x13d   : > { %10841 = vst [vmem:[#allocation126_spill] sm:$0xff] %v7805_v38  ;;  %v663_v38 = vmul.f32 %v7817_v58, %v7817_v58  ;;  %v7832_v14 = vor.u32 %v5710_v17, %v5380_v55  ;;  %v5711_v55 = vld [vmem:[%s10553_s4 + $0x1ec] sm:$0xf]  ;;  %v2638_v28 = vpop.f32.mrf.mxu0  ;;  %v7870_v17 = vld [vmem:[#allocation2 + $0x98] sm:$0xff] }
 0x13e   : > { %10842 = vst [vmem:[#allocation127_spill] sm:$0xff] %v7830_v46  ;;  %v7863_v1 = vor.u32 %v5711_v55, %v5388_v12  ;;  %v2808_v12 = vadd.f32 %v2807_v7, %v2638_v28  ;;  %v7904_v7 = vor.u32 %v5714_v18, %v5396_v62  ;;  %v5715_v18 = vld [vmem:[%s10553_s4 + $0x20c] sm:$0xf]  ;;  %v5404_v62 = vld [vmem:[%s10553_s4 + $0x218] sm:$0xf0] }
 0x13f   : > { %10843 = vst [vmem:[#allocation128_spill] sm:$0xff] %v7832_v14  ;;  %v729_v47 = vadd.f32 %v696_v20, %v663_v38  ;;  %v7848_v20 = vpop.eup %6013  ;;  %2844 = vmatmul.bf16.gmra.mxu1 %v7832_v14 }
 0x140   : > { %10844 = vst [vmem:[#allocation129_spill] sm:$0xff] %v7834_v26  ;;  %v7868_v5 = vpop.eup %6015  ;;  %3182 = vmatmul.bf16.gmra.mxu3 %v7863_v1  ;;  %v2976_v26 = vpop.f32.mrf.mxu2 }
 0x141   : > { %v762_v38 = vadd.f32 1e-12, %v729_v47  ;;  %v982_v47 = vmul.f32 1.442695, %v7752_v53  ;;  %10845 = vst [vmem:[#allocation130_spill] sm:$0xff] %v7861_v54  ;;  %v2975_v53 = vadd.f32 %v2974_v63, %v2806_v29  ;;  %v7872_v32 = vpop.eup %6017  ;;  %2680 = vmatmul.bf16.gmra.mxu0 %v7891_v59 }
 0x142   : > { %10846 = vst [vmem:[#allocation131_spill] sm:$0xff] %v7863_v1  ;;  %v6020_v55 = vpop.eup %6019  ;;  %4194 = vperm.xlu1 %5807, %v7926_v2  }
 0x143   : > { %6023 = vlog2.f32 %v762_v38  ;;  %v6022_v29 = vpop.eup %6021  ;;  %v852_v38 = vmul.f32 0.6931472, %v6020_v55  ;;  %10847 = vst [vmem:[#allocation132_spill] sm:$0xff] %v7891_v59 }
 0x144   : > { %6025 = vlog2.f32 %v763_v37  ;;  %4204 = vperm.xlu0 %5809, %v7870_v17   ;;  %v3143_v37 = vpop.f32.mrf.mxu3  ;;  %v854_v27 = vmul.f32 0.6931472, %v6022_v29  ;;  %10849 = vst [vmem:[#allocation134_spill] sm:$0xff] %v7904_v7 }
 0x145   : > { %6027 = vpow2.f32 %v1348_v8  ;;  %v5402_v8 = vld [vmem:[%s10553_s4 + $0x208] sm:$0xf]  ;;  %v1406_v63 = vmul.f32 0.15, %v852_v38 }
 0x146   : > { %6029 = vpow2.f32 %v982_v47  ;;  %v1011_v15 = vmul.f32 -0.35, %v854_v27  ;;  %v1407_v25 = vmul.f32 0.15, %v854_v27  ;;  %v7908_v14 = vor.u32 %v5717_v42, %v5402_v8  ;;  %v2810_v42 = vpop.f32.mrf.mxu1 }
 0x147   : > { %6031 = vpow2.f32 %v984_v50  ;;  %v7899_v50 = vadd.f32 %v3143_v37, %v2975_v53  ;;  %v1445_v53 = vmul.f32 1.442695, %v1406_v63 }
 0x148   : > { %6033 = vpow2.f32 %v1378_v23  ;;  %v1010_v23 = vmul.f32 -0.35, %v852_v38  ;;  %10850 = vst [vmem:[#allocation135_spill] sm:$0xff] %v7908_v14  ;;  %v2977_v38 = vadd.f32 %v2976_v26, %v2808_v12  ;;  %v1051_v27 = vmul.f32 1.442695, %v1011_v15 }
 0x149   : > { %v6024_v56 = vpop.eup %6023  ;;  %6035 = vpow2.f32 %v1380_v35  ;;  %10848 = vst [vmem:[#allocation133_spill] sm:$0xff] %v7899_v50 }
 0x14a   : > { %v6026_v47 = vpop.eup %6025  ;;  %v884_v28 = vmul.f32 0.6931472, %v6024_v56  ;;  %v1049_v29 = vmul.f32 1.442695, %v1010_v23  ;;  %v2641_v56 = vpop.f32.mrf.mxu0  ;;  %3018 = vmatmul.bf16.gmra.mxu2 %v7908_v14 }
 0x14b   : > { %v7902_v35 = vpop.eup %6027  ;;  %v886_v55 = vmul.f32 0.6931472, %v6026_v47  ;;  %v1447_v47 = vmul.f32 1.442695, %v1407_v25  ;;  %v2811_v12 = vadd.f32 %v2810_v42, %v2641_v56  ;;  %v7956_v42 = vld [vmem:[%s6356_s28 + $0x20] sm:$0xff] }
 0x14c   : > { %v7906_v1 = vpop.eup %6029  ;;  %v1026_v37 = vmul.f32 -0.35, %v884_v28  ;;  %6037 = vpow2.f32 %v1049_v29  ;;  %v1422_v63 = vmul.f32 0.15, %v884_v28  ;;  %4219 = vperm.xlu0 %5809, %v7922_v41   ;;  %v3145_v28 = vpop.f32.mrf.mxu3  ;;  %v1208_v29 = vmul.f32 %v7501_v30, %v7848_v20 }
 0x14d   : > { %v7910_v46 = vpop.eup %6031  ;;  %v1027_v54 = vmul.f32 -0.35, %v886_v55  ;;  %v1423_v50 = vmul.f32 0.15, %v886_v55  ;;  %6039 = vpow2.f32 %v1051_v27  ;;  %v7932_v25 = vadd.f32 %v3145_v28, %v2977_v38  ;;  %v7945_v38 = vld [vmem:[%s6350_s25 + $0x20] sm:$0xff] }
 0x14e   : > { %v7918_v8 = vpop.eup %6033  ;;  %v1081_v23 = vmul.f32 1.442695, %v1026_v37  ;;  %6041 = vpow2.f32 %v1445_v53  ;;  %v1477_v15 = vmul.f32 1.442695, %v1422_v63  ;;  %v7934_v55 = vor.u32 %v5715_v18, %v5404_v62  ;;  %v2979_v18 = vpop.f32.mrf.mxu2 }
 0x14f   : > { %v7920_v26 = vpop.eup %6035  ;;  %v1083_v24 = vmul.f32 1.442695, %v1027_v54  ;;  %2849 = vmatmul.bf16.gmra.mxu1 %v7904_v7  ;;  %6043 = vpow2.f32 %v1447_v47  ;;  %v1479_v54 = vmul.f32 1.442695, %v1423_v50  ;;  %10851 = vst [vmem:[#allocation136_spill] sm:$0xff] %v7932_v25  ;;  %v1109_v53 = vmul.f32 %v7481_v51, %v7848_v20  ;;  %v7953_v47 = vld [vmem:[#allocation2 + $0xc8] sm:$0xff] }
 0x150   : > { %10852 = vst [vmem:[#allocation137_spill] sm:$0xff] %v7934_v55  ;;  %6045 = vpow2.f32 %v1081_v23  ;;  %v1209_v50 = vmul.f32 %v7512_v34, %v7868_v5  ;;  %v513_v56 = vmul.f32 %v7945_v38, %v7945_v38  ;;  %v1110_v62 = vmul.f32 %v7487_v9, %v7868_v5  ;;  %3187 = vmatmul.bf16.gmra.mxu3 %v7934_v55 }
 0x151   : > { %6047 = vpow2.f32 %v1083_v24  ;;  %v2980_v27 = vadd.f32 %v2979_v18, %v2811_v12  ;;  %v546_v23 = vmul.f32 %v7956_v42, %v7956_v42 }
 0x152   : > { %v6038_v37 = vpop.eup %6037  ;;  %6049 = vpow2.f32 %v1477_v15  ;;  %v2643_v20 = vpop.f32.mrf.mxu0 }
 0x153   : > { %v6040_v30 = vpop.eup %6039  ;;  %v1142_v51 = vmul.f32 %v6038_v37, %v7811_v45  ;;  %v1241_v24 = vmul.f32 %v6038_v37, %v7760_v22  ;;  %6051 = vpow2.f32 %v1479_v54  ;;  %v1125_v45 = vmul.f32 %v7492_v6, %v7906_v1  ;;  %v2812_v22 = vpop.f32.mrf.mxu1  ;;  %v7972_v37 = vld [vmem:[#allocation2 + $0x78] sm:$0xff]  ;;  %v5410_v6 = vld [vmem:[%s10553_s4 + $0x220] sm:$0xf] }
 0x154   : > { %v6042_v34 = vpop.eup %6041  ;;  %v1143_v9 = vmul.f32 %v6040_v30, %v7814_v57  ;;  %v1242_v5 = vmul.f32 %v6040_v30, %v7768_v43  ;;  %v2813_v54 = vadd.f32 %v2812_v22, %v2643_v20  ;;  %10856 = vst [vmem:[#allocation141_spill] sm:$0xff] %v7972_v37  ;;  %4234 = vperm.xlu0 %5809, %v7953_v47  }
 0x155   : > { %v6044_v63 = vpop.eup %6043  ;;  %v7965_v12 = vsub.f32 %v1109_v53, %v1142_v51  ;;  %v7967_v15 = vsub.f32 %v1208_v29, %v1241_v24  ;;  %v7970_v28 = vsub.f32 %v7872_v32, %v6042_v34  ;;  %v7985_v32 = vld [vmem:[#allocation2 + $0xa0] sm:$0xff]  ;;  %v1224_v53 = vmul.f32 %v7569_v44, %v7906_v1  ;;  %v5720_v51 = vld [vmem:[%s10553_s4 + $0x22c] sm:$0xf0]  ;;  %v5412_v44 = vld [vmem:[%s10553_s4 + $0x230] sm:$0xf0]  ;;  %4184 = vperm.xlu2 %5808, %v7972_v37  }
 0x156   : > { %v6046_v18 = vpop.eup %6045  ;;  %v7974_v55 = vsub.f32 %v1110_v62, %v1143_v9  ;;  %v7976_v57 = vsub.f32 %v1209_v50, %v1242_v5  ;;  %v7979_v43 = vsub.f32 %v7902_v35, %v6044_v63  ;;  %10860 = vst [vmem:[#allocation145_spill] sm:$0xff] %v7985_v32  ;;  %v1225_v50 = vmul.f32 %v7620_v4, %v7910_v46  ;;  %v3148_v62 = vpop.f32.mrf.mxu3  ;;  %v5718_v24 = vld [vmem:[%s10553_s4 + $0x224] sm:$0xf]  ;;  %v8004_v4 = vld [vmem:[%s6350_s25 + $0x28] sm:$0xff]  ;;  %v5721_v5 = vld [vmem:[%s10553_s4 + $0x234] sm:$0xf0] }
 0x157   : > { %10853 = vst [vmem:[#allocation138_spill] sm:$0xff] %v7965_v12  ;;  %v6048_v29 = vpop.eup %6047  ;;  %v1126_v35 = vmul.f32 %v7615_v0, %v7910_v46  ;;  %v1158_v30 = vmul.f32 %v6046_v18, %v7817_v58  ;;  %v514_v46 = vmul.f32 %v8004_v4, %v8004_v4  ;;  %v8009_v0 = vld [vmem:[%s6356_s28 + $0x28] sm:$0xff]  ;;  %v579_v20 = vadd.f32 %v546_v23, %v513_v56  ;;  %v2981_v7 = vpop.f32.mrf.mxu2 }
 0x158   : > { %10854 = vst [vmem:[#allocation139_spill] sm:$0xff] %v7967_v15  ;;  %v6050_v1 = vpop.eup %6049  ;;  %v547_v58 = vmul.f32 %v8009_v0, %v8009_v0  ;;  %v8013_v34 = vadd.f32 %v3148_v62, %v2980_v27  ;;  %v5418_v9 = vld [vmem:[%s10553_s4 + $0x228] sm:$0xf]  ;;  %v1159_v63 = vmul.f32 %v6048_v29, %v7826_v36  ;;  %v1257_v56 = vmul.f32 %v6046_v18, %v7771_v11 }
 0x159   : > { %10855 = vst [vmem:[#allocation140_spill] sm:$0xff] %v7970_v28  ;;  %v6052_v22 = vpop.eup %6051  ;;  %v8023_v14 = vsub.f32 %v1125_v45, %v1158_v30  ;;  %v1258_v27 = vmul.f32 %v6048_v29, %v7774_v40  ;;  %4209 = vperm.xlu1 %5807, %v7985_v32   ;;  %v8029_v23 = vsub.f32 %v7918_v8, %v6050_v1  ;;  %v8046_v8 = vld [vmem:[#allocation2 + $0xe0] sm:$0xff]  ;;  %v5420_v1 = vld [vmem:[%s10553_s4 + $0x238] sm:$0xf0]  ;;  %v5729_v28 = vld [vmem:[%s10553_s4 + $0x274] sm:$0xf0] }
 0x15a   : > { %10857 = vst [vmem:[#allocation142_spill] sm:$0xff] %v7974_v55  ;;  %v8032_v62 = vsub.f32 %v7920_v26, %v6052_v22  ;;  %v8034_v59 = vor.u32 %v5720_v51, %v5410_v6  ;;  %v8036_v36 = vor.u32 %v5718_v24, %v5412_v44  ;;  %v8038_v45 = vsub.f32 %v1126_v35, %v1159_v63  ;;  %v2646_v40 = vpop.f32.mrf.mxu0  ;;  %v8049_v26 = vld [vmem:[%s6350_s25 + $0xa0] sm:$0xff]  ;;  %v5719_v44 = vld [vmem:[%s10553_s4 + $0x22c] sm:$0xf] }
 0x15b   : > { %10858 = vst [vmem:[#allocation143_spill] sm:$0xff] %v7976_v57  ;;  %v8040_v30 = vsub.f32 %v1224_v53, %v1257_v56  ;;  %v8042_v11 = vsub.f32 %v1225_v50, %v1258_v27  ;;  %v8044_v18 = vor.u32 %v5721_v5, %v5418_v9  ;;  %v529_v6 = vmul.f32 %v8049_v26, %v8049_v26  ;;  %v8054_v29 = vld [vmem:[%s6356_s28 + $0xa0] sm:$0xff]  ;;  %v2815_v51 = vpop.f32.mrf.mxu1  ;;  %v8064_v9 = vld [vmem:[#allocation2 + $0x90] sm:$0xff]  ;;  %v8067_v5 = vld [vmem:[%s6350_s25 + $0xa8] sm:$0xff] }
 0x15c   : > { %10859 = vst [vmem:[#allocation144_spill] sm:$0xff] %v7979_v43  ;;  %v562_v53 = vmul.f32 %v8054_v29, %v8054_v29  ;;  %v2982_v35 = vadd.f32 %v2981_v7, %v2813_v54  ;;  %v580_v50 = vadd.f32 %v547_v58, %v514_v46  ;;  %v2816_v24 = vadd.f32 %v2815_v51, %v2646_v40  ;;  %v8072_v63 = vld [vmem:[%s6356_s28 + $0xa8] sm:$0xff]  ;;  %v8078_v54 = vld [vmem:[#allocation2 + $0xb8] sm:$0xff] }
 0x15d   : > { %10861 = vst [vmem:[#allocation146_spill] sm:$0xff] %v8013_v34  ;;  %v530_v22 = vmul.f32 %v8067_v5, %v8067_v5  ;;  %v563_v7 = vmul.f32 %v8072_v63, %v8072_v63  ;;  %2685 = vmatmul.bf16.gmra.mxu0 %v8034_v59  ;;  %4249 = vperm.xlu0 %5809, %v8046_v8   ;;  %v612_v46 = vadd.f32 1e-12, %v579_v20 }
 0x15e   : > { %10862 = vst [vmem:[#allocation147_spill] sm:$0xff] %v8023_v14  ;;  %v3150_v58 = vpop.f32.mrf.mxu3  ;;  %3023 = vmatmul.bf16.gmra.mxu2 %v8044_v18  ;;  %v595_v56 = vadd.f32 %v562_v53, %v529_v6  ;;  %v8084_v40 = vor.u32 %v5719_v44, %v5420_v1  ;;  %4199 = vperm.xlu2 %5808, %v8064_v9   ;;  %v613_v51 = vadd.f32 1e-12, %v580_v50  ;;  %v8094_v50 = vld [vmem:[#allocation2 + $0xd0] sm:$0xff] }
 0x15f   : > { %10863 = vst [vmem:[#allocation148_spill] sm:$0xff] %v8029_v23  ;;  %2854 = vmatmul.bf16.gmra.mxu1 %v8036_v36  ;;  %v8082_v27 = vadd.f32 %v3150_v58, %v2982_v35  ;;  %v2984_v34 = vpop.f32.mrf.mxu2  ;;  %6053 = vlog2.f32 %v612_v46  ;;  %v8091_v35 = vld [vmem:[#allocation2 + $0xa8] sm:$0xff]  ;;  %v5725_v58 = vld [vmem:[%s10553_s4 + $0x254] sm:$0xf0] }
 0x160   : > { %10864 = vst [vmem:[#allocation149_spill] sm:$0xff] %v8032_v62  ;;  %v2985_v25 = vadd.f32 %v2984_v34, %v2816_v24  ;;  %v8088_v62 = vld [vmem:[#allocation2 + $0xf8] sm:$0xff]  ;;  %3192 = vmatmul.bf16.gmra.mxu3 %v8084_v40  ;;  %6055 = vlog2.f32 %v613_v51  ;;  %v5426_v34 = vld [vmem:[%s10553_s4 + $0x240] sm:$0xf]  ;;  %v5724_v24 = vld [vmem:[%s10553_s4 + $0x24c] sm:$0xf0] }
 0x161   : > { %10865 = vst [vmem:[#allocation150_spill] sm:$0xff] %v8034_v59  ;;  %4224 = vperm.xlu1 %5807, %v8078_v54   ;;  %v596_v59 = vadd.f32 %v563_v7, %v530_v22  ;;  %v5722_v22 = vld [vmem:[%s10553_s4 + $0x244] sm:$0xf]  ;;  %v5434_v46 = vld [vmem:[%s10553_s4 + $0x248] sm:$0xf] }
 0x162   : > { %10866 = vst [vmem:[#allocation151_spill] sm:$0xff] %v8036_v36  ;;  %v2648_v20 = vpop.f32.mrf.mxu0  ;;  %v628_v36 = vadd.f32 1e-12, %v595_v56  ;;  %v5723_v23 = vld [vmem:[%s10553_s4 + $0x24c] sm:$0xf] }
 0x163   : > { %10867 = vst [vmem:[#allocation152_spill] sm:$0xff] %v8038_v45  ;;  %v2817_v6 = vpop.f32.mrf.mxu1  ;;  %v629_v44 = vadd.f32 1e-12, %v596_v59  ;;  %v5428_v59 = vld [vmem:[%s10553_s4 + $0x250] sm:$0xf0] }
 0x164   : > { %10868 = vst [vmem:[#allocation153_spill] sm:$0xff] %v8040_v30  ;;  %v2818_v53 = vadd.f32 %v2817_v6, %v2648_v20  ;;  %6057 = vlog2.f32 %v628_v36  ;;  %v8118_v36 = vor.u32 %v5724_v24, %v5426_v34  ;;  %v8130_v34 = vld [vmem:[#allocation2 + $0xc0] sm:$0xff]  ;;  %v5450_v45 = vld [vmem:[%s10553_s4 + $0x268] sm:$0xf] }
 0x165   : > { %10869 = vst [vmem:[#allocation154_spill] sm:$0xff] %v8042_v11  ;;  %4264 = vperm.xlu0 %5809, %v8088_v62   ;;  %v6054_v56 = vpop.eup %6053  ;;  %6059 = vlog2.f32 %v629_v44  ;;  %v5436_v44 = vld [vmem:[%s10553_s4 + $0x258] sm:$0xf0]  ;;  %v5726_v30 = vld [vmem:[%s10553_s4 + $0x264] sm:$0xf] }
 0x166   : > { %10870 = vst [vmem:[#allocation155_spill] sm:$0xff] %v8044_v18  ;;  %v3153_v1 = vpop.f32.mrf.mxu3  ;;  %4214 = vperm.xlu2 %5808, %v8091_v35   ;;  %v6056_v51 = vpop.eup %6055  ;;  %v782_v18 = vmul.f32 0.6931472, %v6054_v56  ;;  %v8140_v56 = vor.u32 %v5723_v23, %v5436_v44 }
 0x167   : > { %10871 = vst [vmem:[#allocation156_spill] sm:$0xff] %v8064_v9  ;;  %v8105_v7 = vadd.f32 %v3153_v1, %v2985_v25  ;;  %v2986_v25 = vpop.f32.mrf.mxu2  ;;  %v8120_v1 = vor.u32 %v5722_v22, %v5428_v59  ;;  %v10630_v22 = vmov 1   ;;  %v8134_v59 = vld [vmem:[#allocation2 + $0xe8] sm:$0xff] }
 0x168   : > { %10872 = vst [vmem:[#allocation157_spill] sm:$0xff] %v8078_v54  ;;  %v2987_v20 = vadd.f32 %v2986_v25, %v2818_v53  ;;  %v784_v53 = vmul.f32 0.6931472, %v6056_v51  ;;  %v909_v25 = vmul.f32 -0.35, %v782_v18 }
 0x169   : > { %10873 = vst [vmem:[#allocation158_spill] sm:$0xff] %v8082_v27  ;;  %4239 = vperm.xlu1 %5807, %v8094_v50  }
 0x16a   : > { %10874 = vst [vmem:[#allocation159_spill] sm:$0xff] %v8084_v40  ;;  %v2651_v6 = vpop.f32.mrf.mxu0  ;;  %v8122_v40 = vor.u32 %v5725_v58, %v5434_v46  ;;  %v6058_v24 = vpop.eup %6057 }
 0x16b   : > { %10875 = vst [vmem:[#allocation160_spill] sm:$0xff] %v8088_v62  ;;  %v6060_v46 = vpop.eup %6059  ;;  %v8144_v51 = vmul.f32 0.6931472, %v6058_v24  ;;  %v8159_v24 = vld [vmem:[%s6557_s12 + $0xa0] sm:$0xff]  ;;  %v8231_v62 = vor.u32 %v5729_v28, %v5450_v45 }
 0x16c   : > { %10876 = vst [vmem:[#allocation161_spill] sm:$0xff] %v8091_v35  ;;  %v8149_v44 = vmul.f32 0.6931472, %v6060_v46  ;;  %v694_v15 = vmul.f32 %v8159_v24, %v8159_v24 }
 0x16d   : > { %10877 = vst [vmem:[#allocation162_spill] sm:$0xff] %v8094_v50  ;;  %2690 = vmatmul.bf16.gmra.mxu0 %v8118_v36  ;;  %5812 = vset.pattern.permute.xlu0 %v10630_v22  ;;  %v8162_v11 = vmul.f32 -0.35, %v8144_v51 }
 0x16e   : > { %10878 = vst [vmem:[#allocation163_spill] sm:$0xff] %v8105_v7  ;;  %v2820_v7 = vpop.f32.mrf.mxu1  ;;  %3028 = vmatmul.bf16.gmra.mxu2 %v8122_v40  ;;  %4229 = vperm.xlu2 %5808, %v8130_v34  }
 0x16f   : > { %10879 = vst [vmem:[#allocation164_spill] sm:$0xff] %v8118_v36  ;;  %v2821_v27 = vadd.f32 %v2820_v7, %v2651_v6  ;;  %v3155_v7 = vpop.f32.mrf.mxu3  ;;  %2859 = vmatmul.bf16.gmra.mxu1 %v8120_v1  ;;  %4308 = vperm.xlu0 %5812, %v7610_v52   ;;  %v910_v6 = vmul.f32 -0.35, %v784_v53  ;;  %v2989_v22 = vpop.f32.mrf.mxu2  ;;  %v8153_v36 = vld [vmem:[%s6557_s12 + $0x20] sm:$0xff]  ;;  %v8156_v52 = vld [vmem:[%s6557_s12 + $0x28] sm:$0xff] }
 0x170   : > { %10880 = vst [vmem:[#allocation165_spill] sm:$0xff] %v8120_v1  ;;  %v8138_v58 = vadd.f32 %v3155_v7, %v2987_v20  ;;  %v8147_v20 = vmul.f32 0.15, %v784_v53  ;;  %3197 = vmatmul.bf16.gmra.mxu3 %v8140_v56  ;;  %v8164_v53 = vld [vmem:[#allocation2 + $0xd8] sm:$0xff]  ;;  %v678_v14 = vmul.f32 %v8153_v36, %v8153_v36  ;;  %v679_v43 = vmul.f32 %v8156_v52, %v8156_v52 }
 0x171   : > { %10881 = vst [vmem:[#allocation166_spill] sm:$0xff] %v8122_v40  ;;  %4254 = vperm.xlu1 %5807, %v8134_v59   ;;  %v1305_v40 = vmul.f32 0.15, %v782_v18  ;;  %v2990_v7 = vadd.f32 %v2989_v22, %v2821_v27  ;;  %v1797_v27 = vpack.c.bf16 %v8156_v52, %v8153_v36  ;;  %v8169_v22 = vld [vmem:[%s6557_s12 + $0xa8] sm:$0xff]  ;;  %v948_v46 = vmul.f32 1.442695, %v910_v6 }
 0x172   : > { %10882 = vst [vmem:[#allocation167_spill] sm:$0xff] %v8130_v34  ;;  %v2653_v23 = vpop.f32.mrf.mxu0  ;;  %v5444_v6 = vld [vmem:[%s10553_s4 + $0x270] sm:$0xf0]  ;;  %v695_v12 = vmul.f32 %v8169_v22, %v8169_v22 }
 0x173   : > { %10883 = vst [vmem:[#allocation168_spill] sm:$0xff] %v8134_v59  ;;  %3611 = vmatpush.bf16.msrb.mxu2 %v1797_v27  ;;  %v1342_v57 = vmul.f32 1.442695, %v1305_v40  ;;  %v8204_v27 = vld [vmem:[%s6575_s15 + $0x20] sm:$0xff]  ;;  %v8207_v40 = vld [vmem:[%s6575_s15 + $0x28] sm:$0xff] }
 0x174   : > { %10884 = vst [vmem:[#allocation169_spill] sm:$0xff] %v8138_v58  ;;  %v946_v58 = vmul.f32 1.442695, %v909_v25  ;;  %v5728_v25 = vld [vmem:[%s10553_s4 + $0x26c] sm:$0xf0]  ;;  %v8220_v59 = vld [vmem:[%s6575_s15 + $0xa8] sm:$0xff] }
 0x175   : > { %10885 = vst [vmem:[#allocation170_spill] sm:$0xff] %v8140_v56  ;;  %v5442_v56 = vld [vmem:[%s10553_s4 + $0x260] sm:$0xf]  ;;  %v662_v35 = vmul.f32 %v8220_v59, %v8220_v59 }
 0x176   : > { %v2822_v1 = vpop.f32.mrf.mxu1  ;;  %10886 = vst [vmem:[#allocation171_spill] sm:$0xff] %v8164_v53  ;;  %4244 = vperm.xlu2 %5808, %v8164_v53   ;;  %6061 = vpow2.f32 %v946_v58  ;;  %v8217_v53 = vld [vmem:[%s6575_s15 + $0xa0] sm:$0xff]  ;;  %v8222_v50 = vor.u32 %v5728_v25, %v5442_v56  ;;  %v8224_v58 = vor.u32 %v5726_v30, %v5444_v6  ;;  %v926_v56 = vmul.f32 -0.35, %v8149_v44  ;;  %v5452_v25 = vld [vmem:[%s10553_s4 + $0x278] sm:$0xf0] }
 0x177   : > { %v2823_v18 = vadd.f32 %v2822_v1, %v2653_v23  ;;  %v1813_v1 = vpack.c.bf16 %v8169_v22, %v8159_v24  ;;  %v3158_v23 = vpop.f32.mrf.mxu3  ;;  %4328 = vperm.xlu0 %5812, %v7661_v39   ;;  %v646_v39 = vmul.f32 %v8207_v40, %v8207_v40  ;;  %v2991_v34 = vpop.f32.mrf.mxu2  ;;  %10891 = vst [vmem:[#allocation175_spill] sm:$0xff] %v8231_v62  ;;  %6063 = vpow2.f32 %v948_v46 }
 0x178   : > { %v8192_v55 = vadd.f32 %v3158_v23, %v2990_v7  ;;  %v10888_v7 = vmov 1   ;;  %v645_v23 = vmul.f32 %v8204_v27, %v8204_v27  ;;  %10889 = vst [vmem:[#allocation173_spill] sm:$0xff] %v8222_v50  ;;  %6065 = vpow2.f32 %v1342_v57 }
 0x179   : > { %5810 = vset.pattern.permute.xlu1 %v10888_v7  ;;  %3780 = vmatpush.bf16.msrb.mxu3 %v1813_v1  ;;  %10890 = vst [vmem:[#allocation174_spill] sm:$0xff] %v8224_v58  ;;  %v661_v1 = vmul.f32 %v8217_v53, %v8217_v53  ;;  %v2992_v54 = vadd.f32 %v2991_v34, %v2823_v18 }
 0x17a   : > { %10887 = vst [vmem:[#allocation172_spill] sm:$0xff] %v8192_v55  ;;  %v1765_v55 = vpack.c.bf16 %v8207_v40, %v8204_v27  ;;  %4300 = vperm.xlu1 %5810, %v7631_v31   ;;  %v2656_v9 = vpop.f32.mrf.mxu0  ;;  %v711_v32 = vadd.f32 %v678_v14, %v645_v23  ;;  %v712_v37 = vadd.f32 %v679_v43, %v646_v39  ;;  %v5727_v31 = vld [vmem:[%s10553_s4 + $0x26c] sm:$0xf]  ;;  %v1321_v43 = vmul.f32 0.15, %v8144_v51 }
 0x17b   : > { %v727_v6 = vadd.f32 %v694_v15, %v661_v1  ;;  %v728_v34 = vadd.f32 %v695_v12, %v662_v35  ;;  %v1781_v14 = vpack.c.bf16 %v8220_v59, %v8217_v53  ;;  %v1344_v15 = vmul.f32 1.442695, %v8147_v20 }
 0x17c   : > { %3273 = vmatpush.bf16.msrb.mxu0 %v1765_v55  ;;  %v744_v28 = vadd.f32 1e-12, %v711_v32  ;;  %v745_v45 = vadd.f32 1e-12, %v712_v37  ;;  %v8242_v55 = vld [vmem:[#allocation2 + $0xf0] sm:$0xff]  ;;  %v8246_v39 = vpop.eup %6061 }
 0x17d   : > { %2695 = vmatmul.bf16.gmra.mxu0 %v8222_v50  ;;  %v760_v46 = vadd.f32 1e-12, %v727_v6  ;;  %v761_v23 = vadd.f32 1e-12, %v728_v34  ;;  %v1322_v12 = vmul.f32 0.15, %v8149_v44  ;;  %3442 = vmatpush.bf16.msrb.mxu1 %v1781_v14  ;;  %v8259_v51 = vpop.eup %6063 }
 0x17e   : > { %v2825_v30 = vpop.f32.mrf.mxu1  ;;  %3033 = vmatmul.bf16.gmra.mxu2 %v8231_v62  ;;  %6067 = vlog2.f32 %v744_v28  ;;  %v978_v37 = vmul.f32 1.442695, %v8162_v11  ;;  %4259 = vperm.xlu2 %5808, %v8242_v55   ;;  %v980_v35 = vmul.f32 1.442695, %v926_v56  ;;  %v1374_v20 = vmul.f32 1.442695, %v1321_v43 }
 0x17f   : > { %v2826_v18 = vadd.f32 %v2825_v30, %v2656_v9  ;;  %v3160_v32 = vpop.f32.mrf.mxu3  ;;  %2864 = vmatmul.bf16.gmra.mxu1 %v8224_v58  ;;  %v8255_v9 = vor.u32 %v5727_v31, %v5452_v25  ;;  %6069 = vlog2.f32 %v745_v45  ;;  %4340 = vperm.xlu0 %5812, %v7706_v48   ;;  %v2994_v44 = vpop.f32.mrf.mxu2  ;;  %v1376_v11 = vmul.f32 1.442695, %v1322_v12  ;;  %v5458_v48 = vld [vmem:[%s10553_s4 + $0x280] sm:$0xf]  ;;  %v5732_v31 = vld [vmem:[%s10553_s4 + $0x28c] sm:$0xf0] }
 0x180   : > { %v8253_v57 = vadd.f32 %v3160_v32, %v2992_v54  ;;  %6071 = vlog2.f32 %v760_v46  ;;  %v8262_v30 = vpop.eup %6065  ;;  %v8271_v25 = vpop.permute.xlu2 %4114  ;;  %v5460_v28 = vld [vmem:[%s10553_s4 + $0x290] sm:$0xf0]  ;;  %v8279_v46 = vor.u32 %v5732_v31, %v5458_v48  ;;  %v8559_v50 = vld [vmem:[%s6575_s15 + $0x18] sm:$0xff] }
 0x181   : > { %10893 = vst [vmem:[#allocation177_spill] sm:$0xff] %v8255_v9  ;;  %6073 = vlog2.f32 %v761_v23  ;;  %v2995_v54 = vadd.f32 %v2994_v44, %v2826_v18  ;;  %3202 = vmatmul.bf16.gmra.mxu3 %v8255_v9  ;;  %v5730_v18 = vld [vmem:[%s10553_s4 + $0x284] sm:$0xf]  ;;  %v5466_v23 = vld [vmem:[%s10553_s4 + $0x288] sm:$0xf] }
 0x182   : > { %10892 = vst [vmem:[#allocation176_spill] sm:$0xff] %v8253_v57  ;;  %4312 = vperm.xlu1 %5810, %v7654_v60   ;;  %6075 = vpow2.f32 %v1344_v15  ;;  %v2658_v1 = vpop.f32.mrf.mxu0  ;;  %v5733_v15 = vld [vmem:[%s10553_s4 + $0x294] sm:$0xf0]  ;;  %v10945_v57 = vmov 0.0  }
 0x183   : > { %6077 = vpow2.f32 %v978_v37  ;;  %10894 = vst [vmem:[#allocation178_spill] sm:$0xff] %v8271_v25 }
 0x184   : > { %v6068_v60 = vpop.eup %6067  ;;  %6079 = vpow2.f32 %v980_v35  ;;  %10895 = vst [vmem:[#allocation179_spill] sm:$0xff] %v8279_v46 }
 0x185   : > { %v6070_v34 = vpop.eup %6069  ;;  %6081 = vpow2.f32 %v1374_v20  ;;  %v848_v45 = vmul.f32 0.6931472, %v6068_v60  ;;  %343 = vst [vmem:[%s8567_s18] sm:$0x3f] %v10945_v57 }
 0x186   : > { %v2827_v56 = vpop.f32.mrf.mxu1  ;;  %v6072_v14 = vpop.eup %6071  ;;  %6083 = vpow2.f32 %v1376_v11  ;;  %v850_v12 = vmul.f32 0.6931472, %v6070_v34  ;;  %5811 = vset.pattern.permute.xlu2 %v10888_v7  ;;  %v8298_v34 = vor.u32 %v5733_v15, %v5466_v23 }
 0x187   : > { %v2828_v6 = vadd.f32 %v2827_v56, %v2658_v1  ;;  %v3163_v43 = vpop.f32.mrf.mxu3  ;;  %v6074_v32 = vpop.eup %6073  ;;  %v1008_v35 = vmul.f32 -0.35, %v848_v45  ;;  %v1404_v20 = vmul.f32 0.15, %v848_v45  ;;  %v880_v44 = vmul.f32 0.6931472, %v6072_v14  ;;  %4352 = vperm.xlu0 %5812, %v7749_v3   ;;  %4304 = vperm.xlu2 %5811, %v7691_v13  }
 0x188   : > { %v8287_v37 = vadd.f32 %v3163_v43, %v2995_v54  ;;  %v8290_v11 = vpop.eup %6075  ;;  %v8292_v1 = vor.u32 %v5730_v18, %v5460_v28  ;;  %v1009_v56 = vmul.f32 -0.35, %v850_v12  ;;  %v1405_v48 = vmul.f32 0.15, %v850_v12  ;;  %v2996_v54 = vpop.f32.mrf.mxu2  ;;  %10898 = vst [vmem:[#allocation182_spill] sm:$0xff] %v8298_v34 }
 0x189   : > { %v882_v31 = vmul.f32 0.6931472, %v6074_v32  ;;  %v8296_v60 = vpop.eup %6077  ;;  %v1045_v45 = vmul.f32 1.442695, %v1008_v35  ;;  %v1441_v14 = vmul.f32 1.442695, %v1404_v20  ;;  %v2997_v18 = vadd.f32 %v2996_v54, %v2828_v6  ;;  %v8305_v15 = vpop.permute.xlu2 %4129 }
 0x18a   : > { %10896 = vst [vmem:[#allocation180_spill] sm:$0xff] %v8287_v37  ;;  %v1024_v43 = vmul.f32 -0.35, %v880_v44  ;;  %4320 = vperm.xlu1 %5810, %v7718_v10   ;;  %v8301_v7 = vpop.eup %6079  ;;  %v2661_v28 = vpop.f32.mrf.mxu0  ;;  %v1047_v12 = vmul.f32 1.442695, %v1009_v56 }
 0x18b   : > { %10897 = vst [vmem:[#allocation181_spill] sm:$0xff] %v8292_v1  ;;  %v1443_v32 = vmul.f32 1.442695, %v1405_v48  ;;  %v1025_v9 = vmul.f32 -0.35, %v882_v31  ;;  %v8303_v3 = vpop.eup %6081  ;;  %6085 = vpow2.f32 %v1045_v45  ;;  %v8318_v54 = vpop.permute.xlu0 %4119 }
 0x18c   : > { %v1077_v62 = vmul.f32 1.442695, %v1024_v43  ;;  %v1420_v58 = vmul.f32 0.15, %v880_v44  ;;  %v1421_v23 = vmul.f32 0.15, %v882_v31  ;;  %v8307_v35 = vpop.eup %6083  ;;  %6087 = vpow2.f32 %v1047_v12 }
 0x18d   : > { %10899 = vst [vmem:[#allocation183_spill] sm:$0xff] %v8305_v15  ;;  %v5731_v10 = vld [vmem:[%s10553_s4 + $0x28c] sm:$0xf]  ;;  %v5468_v6 = vld [vmem:[%s10553_s4 + $0x298] sm:$0xf0]  ;;  %2700 = vmatmul.bf16.gmra.mxu0 %v8279_v46  ;;  %6089 = vpow2.f32 %v1441_v14  ;;  %v6242_v14 = vld [vmem:[#allocation2 + $0x20] sm:$0xff] }
 0x18e   : > { %v2830_v13 = vpop.f32.mrf.mxu1  ;;  %v1079_v56 = vmul.f32 1.442695, %v1025_v9  ;;  %v1473_v44 = vmul.f32 1.442695, %v1420_v58  ;;  %3038 = vmatmul.bf16.gmra.mxu2 %v8298_v34  ;;  %6091 = vpow2.f32 %v1443_v32  ;;  %v1475_v31 = vmul.f32 1.442695, %v1421_v23 }
 0x18f   : > { %v2831_v20 = vadd.f32 %v2830_v13, %v2661_v28  ;;  %v3165_v48 = vpop.f32.mrf.mxu3  ;;  %2869 = vmatmul.bf16.gmra.mxu1 %v8292_v1  ;;  %10900 = vst [vmem:[#allocation184_spill] sm:$0xff] %v8318_v54  ;;  %v8322_v43 = vor.u32 %v5731_v10, %v5468_v6  ;;  %6093 = vpow2.f32 %v1077_v62  ;;  %v8324_v28 = vpop.permute.xlu1 %4109  ;;  %v1206_v9 = vmul.f32 %v7956_v42, %v8246_v39  ;;  %v8556_v46 = vld [vmem:[%s6575_s15 + $0x10] sm:$0xff] }
 0x190   : > { %v8320_v45 = vadd.f32 %v3165_v48, %v2997_v18  ;;  %10903 = vst [vmem:[#allocation187_spill] sm:$0xff] %v8324_v28  ;;  %v1107_v58 = vmul.f32 %v7945_v38, %v8246_v39  ;;  %6095 = vpow2.f32 %v1079_v56  ;;  %4364 = vperm.xlu0 %5812, %v7838_v21   ;;  %4316 = vperm.xlu2 %5811, %v6242_v14   ;;  %v2999_v32 = vpop.f32.mrf.mxu2  ;;  %v5474_v56 = vld [vmem:[%s10553_s4 + $0x2a0] sm:$0xf] }
 0x191   : > { %10902 = vst [vmem:[#allocation186_spill] sm:$0xff] %v8322_v43  ;;  %v6086_v12 = vpop.eup %6085  ;;  %v1207_v18 = vmul.f32 %v8009_v0, %v8259_v51  ;;  %v1108_v62 = vmul.f32 %v8004_v4, %v8259_v51  ;;  %6097 = vpow2.f32 %v1473_v44  ;;  %v3000_v13 = vadd.f32 %v2999_v32, %v2831_v20  ;;  %3207 = vmatmul.bf16.gmra.mxu3 %v8322_v43 }
 0x192   : > { %10901 = vst [vmem:[#allocation185_spill] sm:$0xff] %v8320_v45  ;;  %4332 = vperm.xlu1 %5810, %v7757_v33   ;;  %v6088_v42 = vpop.eup %6087  ;;  %v1140_v38 = vmul.f32 %v6086_v12, %v8204_v27  ;;  %v1239_v39 = vmul.f32 %v6086_v12, %v8153_v36  ;;  %6099 = vpow2.f32 %v1475_v31  ;;  %v2663_v21 = vpop.f32.mrf.mxu0  ;;  %v1123_v4 = vmul.f32 %v8049_v26, %v8296_v60 }
 0x193   : > { %v6090_v23 = vpop.eup %6089  ;;  %v1141_v0 = vmul.f32 %v6088_v42, %v8207_v40  ;;  %v1240_v10 = vmul.f32 %v6088_v42, %v8156_v52  ;;  %v5736_v52 = vld [vmem:[%s10553_s4 + $0x2ac] sm:$0xf0]  ;;  %v8363_v31 = vpop.permute.xlu2 %4139  ;;  %v1124_v12 = vmul.f32 %v8067_v5, %v8301_v7  ;;  %v5737_v5 = vld [vmem:[%s10553_s4 + $0x2b4] sm:$0xf0] }
 0x194   : > { %v6092_v33 = vpop.eup %6091  ;;  %v8343_v6 = vsub.f32 %v1107_v58, %v1140_v38  ;;  %v8345_v20 = vsub.f32 %v1206_v9, %v1239_v39  ;;  %v8348_v36 = vsub.f32 %v8262_v30, %v6090_v23  ;;  %10904 = vst [vmem:[#allocation188_spill] sm:$0xff] %v8363_v31  ;;  %v1222_v9 = vmul.f32 %v8054_v29, %v8296_v60  ;;  %v5546_v31 = vld [vmem:[%s10553_s4 + $0x328] sm:$0xf] }
 0x195   : > { %v6094_v40 = vpop.eup %6093  ;;  %v8356_v26 = vsub.f32 %v1108_v62, %v1141_v0  ;;  %v8358_v44 = vsub.f32 %v1207_v18, %v1240_v10  ;;  %v8361_v48 = vsub.f32 %v8290_v11, %v6092_v33  ;;  %v1223_v58 = vmul.f32 %v8072_v63, %v8301_v7  ;;  %v5734_v11 = vld [vmem:[%s10553_s4 + $0x2a4] sm:$0xf]  ;;  %v5476_v18 = vld [vmem:[%s10553_s4 + $0x2b0] sm:$0xf0]  ;;  %v5482_v63 = vld [vmem:[%s10553_s4 + $0x2a8] sm:$0xf] }
 0x196   : > { %v2832_v51 = vpop.f32.mrf.mxu1  ;;  %v6096_v30 = vpop.eup %6095  ;;  %v1156_v32 = vmul.f32 %v6094_v40, %v8217_v53  ;;  %v8380_v29 = vor.u32 %v5736_v52, %v5474_v56  ;;  %v6243_v33 = vld [vmem:[#allocation2 + $0x30] sm:$0xff]  ;;  %v5735_v52 = vld [vmem:[%s10553_s4 + $0x2ac] sm:$0xf] }
 0x197   : > { %v2833_v27 = vadd.f32 %v2832_v51, %v2663_v21  ;;  %v3168_v14 = vpop.f32.mrf.mxu3  ;;  %v6098_v62 = vpop.eup %6097  ;;  %v1157_v38 = vmul.f32 %v6096_v30, %v8220_v59  ;;  %v1256_v21 = vmul.f32 %v6096_v30, %v8169_v22  ;;  %v8404_v51 = vor.u32 %v5734_v11, %v5476_v18  ;;  %v8443_v18 = vld [vmem:[%s6356_s28 + $0x10] sm:$0xff] }
 0x198   : > { %v8378_v42 = vadd.f32 %v3168_v14, %v3000_v13  ;;  %10906 = vst [vmem:[#allocation190_spill] sm:$0xff] %v8380_v29  ;;  %v8388_v53 = vpop.permute.xlu0 %4144  ;;  %v8390_v60 = vpop.permute.xlu1 %4124  ;;  %v8393_v39 = vsub.f32 %v1123_v4, %v1156_v32  ;;  %v1255_v13 = vmul.f32 %v6094_v40, %v8159_v24  ;;  %4376 = vperm.xlu0 %5812, %v7870_v17   ;;  %v8438_v32 = vld [vmem:[%s6350_s25 + $0x10] sm:$0xff] }
 0x199   : > { %10907 = vst [vmem:[#allocation191_spill] sm:$0xff] %v8388_v53  ;;  %v6100_v7 = vpop.eup %6099  ;;  %v8399_v23 = vsub.f32 %v8303_v3, %v6098_v62  ;;  %v3001_v10 = vpop.f32.mrf.mxu2  ;;  %4324 = vperm.xlu2 %5811, %v6243_v33   ;;  %v8407_v59 = vsub.f32 %v1124_v12, %v1157_v38  ;;  %v8411_v22 = vsub.f32 %v1223_v58, %v1256_v21  ;;  %v5490_v38 = vld [vmem:[%s10553_s4 + $0x2c0] sm:$0xf]  ;;  %v5738_v21 = vld [vmem:[%s10553_s4 + $0x2c4] sm:$0xf] }
 0x19a   : > { %10905 = vst [vmem:[#allocation189_spill] sm:$0xff] %v8378_v42  ;;  %v8402_v0 = vsub.f32 %v8307_v35, %v6100_v7  ;;  %4344 = vperm.xlu1 %5810, %v7846_v19   ;;  %v8409_v24 = vsub.f32 %v1222_v9, %v1255_v13  ;;  %v2666_v17 = vpop.f32.mrf.mxu0  ;;  %v8413_v4 = vor.u32 %v5737_v5, %v5482_v63  ;;  %v5484_v19 = vld [vmem:[%s10553_s4 + $0x2b8] sm:$0xf0]  ;;  %v5740_v13 = vld [vmem:[%s10553_s4 + $0x2cc] sm:$0xf0] }
 0x19b   : > { %10908 = vst [vmem:[#allocation192_spill] sm:$0xff] %v8390_v60  ;;  %v3002_v3 = vadd.f32 %v3001_v10, %v2833_v27  ;;  %v8426_v30 = vor.u32 %v5735_v52, %v5484_v19  ;;  %v8430_v58 = vpop.permute.xlu2 %4154  ;;  %v511_v11 = vmul.f32 %v8438_v32, %v8438_v32  ;;  %v544_v62 = vmul.f32 %v8443_v18, %v8443_v18  ;;  %v5492_v33 = vld [vmem:[%s10553_s4 + $0x2d0] sm:$0xf0] }
 0x19c   : > { %10909 = vst [vmem:[#allocation193_spill] sm:$0xff] %v8393_v39  ;;  %v8471_v52 = vor.u32 %v5740_v13, %v5490_v38  ;;  %v5540_v53 = vld [vmem:[%s10553_s4 + $0x330] sm:$0xf0]  ;;  %v8943_v39 = vld [vmem:[%s6575_s15] sm:$0xff] }
 0x19d   : > { %10910 = vst [vmem:[#allocation194_spill] sm:$0xff] %v8399_v23  ;;  %2705 = vmatmul.bf16.gmra.mxu0 %v8380_v29  ;;  %v577_v7 = vadd.f32 %v544_v62, %v511_v11  ;;  %v8477_v62 = vor.u32 %v5738_v21, %v5492_v33  ;;  %v10932_v21 = vld [vmem:[#allocation141_spill] sm:$0xff] }
 0x19e   : > { %10911 = vst [vmem:[#allocation195_spill] sm:$0xff] %v8402_v0  ;;  %v2835_v56 = vpop.f32.mrf.mxu1  ;;  %3043 = vmatmul.bf16.gmra.mxu2 %v8413_v4  ;;  %v10933_v33 = vld [vmem:[#allocation145_spill] sm:$0xff] }
 0x19f   : > { %10912 = vst [vmem:[#allocation196_spill] sm:$0xff] %v8404_v51  ;;  %v2836_v35 = vadd.f32 %v2835_v56, %v2666_v17  ;;  %v3170_v40 = vpop.f32.mrf.mxu3  ;;  %2874 = vmatmul.bf16.gmra.mxu1 %v8404_v51  ;;  %v5498_v17 = vld [vmem:[%s10553_s4 + $0x2c8] sm:$0xf] }
 0x1a0   : > { %10913 = vst [vmem:[#allocation197_spill] sm:$0xff] %v8407_v59  ;;  %v8424_v27 = vadd.f32 %v3170_v40, %v3002_v3  ;;  %v8428_v9 = vpop.permute.xlu0 %4159  ;;  %4388 = vperm.xlu0 %5812, %v7922_v41   ;;  %v8435_v12 = vpop.permute.xlu1 %4134  ;;  %v5741_v3 = vld [vmem:[%s10553_s4 + $0x2d4] sm:$0xf0]  ;;  %v610_v40 = vadd.f32 1e-12, %v577_v7 }
 0x1a1   : > { %10914 = vst [vmem:[#allocation198_spill] sm:$0xff] %v8409_v24  ;;  %v3004_v14 = vpop.f32.mrf.mxu2  ;;  %4336 = vperm.xlu2 %5811, %v7866_v49   ;;  %3212 = vmatmul.bf16.gmra.mxu3 %v8426_v30  ;;  %v5761_v59 = vld [vmem:[%s10553_s4 + $0x374] sm:$0xf0] }
 0x1a2   : > { %10915 = vst [vmem:[#allocation199_spill] sm:$0xff] %v8411_v22  ;;  %4356 = vperm.xlu1 %5810, %v7882_v61   ;;  %v3005_v63 = vadd.f32 %v3004_v14, %v2836_v35  ;;  %v2668_v5 = vpop.f32.mrf.mxu0  ;;  %6101 = vlog2.f32 %v610_v40 }
 0x1a3   : > { %10916 = vst [vmem:[#allocation200_spill] sm:$0xff] %v8413_v4  ;;  %v8475_v19 = vpop.permute.xlu2 %4169 }
 0x1a4   : > { %10917 = vst [vmem:[#allocation201_spill] sm:$0xff] %v8424_v27  ;;  %v10943_v27 = vld [vmem:[#allocation157_spill] sm:$0xff] }
 0x1a5   : > { %10918 = vst [vmem:[#allocation202_spill] sm:$0xff] %v8426_v30 }
 0x1a6   : > { %10919 = vst [vmem:[#allocation203_spill] sm:$0xff] %v8428_v9  ;;  %v2837_v41 = vpop.f32.mrf.mxu1 }
 0x1a7   : > { %10920 = vst [vmem:[#allocation204_spill] sm:$0xff] %v8430_v58  ;;  %v2838_v49 = vadd.f32 %v2837_v41, %v2668_v5  ;;  %v3173_v61 = vpop.f32.mrf.mxu3  ;;  %v8761_v58 = vld [vmem:[%s6356_s28 + $0x80] sm:$0xff] }
 0x1a8   : > { %10921 = vst [vmem:[#allocation205_spill] sm:$0xff] %v8435_v12  ;;  %v8457_v10 = vadd.f32 %v3173_v61, %v3005_v63  ;;  %v8468_v56 = vpop.permute.xlu0 %4174  ;;  %4400 = vperm.xlu0 %5812, %v7953_v47   ;;  %v8479_v63 = vor.u32 %v5741_v3, %v5498_v17  ;;  %v8481_v5 = vpop.permute.xlu1 %4149  ;;  %v5739_v61 = vld [vmem:[%s10553_s4 + $0x2cc] sm:$0xf] }
 0x1a9   : > { %10923 = vst [vmem:[#allocation207_spill] sm:$0xff] %v8468_v56  ;;  %v3006_v35 = vpop.f32.mrf.mxu2  ;;  %4348 = vperm.xlu2 %5811, %v7924_v16  }
 0x1aa   : > { %10922 = vst [vmem:[#allocation206_spill] sm:$0xff] %v8457_v10  ;;  %4368 = vperm.xlu1 %5810, %v7926_v2   ;;  %v3007_v14 = vadd.f32 %v3006_v35, %v2838_v49  ;;  %v2671_v11 = vpop.f32.mrf.mxu0  ;;  %v5500_v2 = vld [vmem:[%s10553_s4 + $0x2d8] sm:$0xf0] }
 0x1ab   : > { %10924 = vst [vmem:[#allocation208_spill] sm:$0xff] %v8471_v52  ;;  %v8494_v7 = vor.u32 %v5739_v61, %v5500_v2  ;;  %v6102_v61 = vpop.eup %6101 }
 0x1ac   : > { %10925 = vst [vmem:[#allocation209_spill] sm:$0xff] %v8475_v19  ;;  %v778_v51 = vmul.f32 0.6931472, %v6102_v61  ;;  %v644_v61 = vmul.f32 %v8559_v50, %v8559_v50  ;;  %v8732_v19 = vld [vmem:[%s6356_s28 + $0x8] sm:$0xff] }
 0x1ad   : > { %10926 = vst [vmem:[#allocation210_spill] sm:$0xff] %v8477_v62  ;;  %2710 = vmatmul.bf16.gmra.mxu0 %v8471_v52 }
 0x1ae   : > { %10927 = vst [vmem:[#allocation211_spill] sm:$0xff] %v8479_v63  ;;  %v2840_v41 = vpop.f32.mrf.mxu1  ;;  %3048 = vmatmul.bf16.gmra.mxu2 %v8479_v63  ;;  %v5514_v63 = vld [vmem:[%s10553_s4 + $0x2e8] sm:$0xf] }
 0x1af   : > { %10928 = vst [vmem:[#allocation212_spill] sm:$0xff] %v8481_v5  ;;  %v2841_v47 = vadd.f32 %v2840_v41, %v2671_v11  ;;  %v3175_v16 = vpop.f32.mrf.mxu3  ;;  %2879 = vmatmul.bf16.gmra.mxu1 %v8477_v62  ;;  %v8501_v17 = vpop.permute.xlu2 %4184  ;;  %v8507_v11 = vld [vmem:[%s6557_s12 + $0x10] sm:$0xff]  ;;  %v8510_v41 = vld [vmem:[%s6557_s12 + $0x18] sm:$0xff] }
 0x1b0   : > { %v8492_v49 = vadd.f32 %v3175_v16, %v3007_v14  ;;  %10930 = vst [vmem:[#allocation214_spill] sm:$0xff] %v8494_v7  ;;  %v8496_v38 = vpop.permute.xlu0 %4189  ;;  %4412 = vperm.xlu0 %5812, %v8046_v8   ;;  %v8503_v40 = vpop.permute.xlu1 %4164  ;;  %v8513_v8 = vld [vmem:[%s6557_s12 + $0x90] sm:$0xff]  ;;  %v5506_v16 = vld [vmem:[%s10553_s4 + $0x2e0] sm:$0xf]  ;;  %v5745_v62 = vld [vmem:[%s10553_s4 + $0x2f4] sm:$0xf0]  ;;  %v676_v52 = vmul.f32 %v8507_v11, %v8507_v11  ;;  %v677_v30 = vmul.f32 %v8510_v41, %v8510_v41 }
 0x1b1   : > { %10931 = vst [vmem:[#allocation215_spill] sm:$0xff] %v8496_v38  ;;  %v3009_v13 = vpop.f32.mrf.mxu2  ;;  %4360 = vperm.xlu2 %5811, %v10932_v21   ;;  %3217 = vmatmul.bf16.gmra.mxu3 %v8494_v7  ;;  %v8524_v21 = vld [vmem:[%s6557_s12 + $0x98] sm:$0xff]  ;;  %v692_v4 = vmul.f32 %v8513_v8, %v8513_v8  ;;  %v8583_v10 = vor.u32 %v5745_v62, %v5514_v63 }
 0x1b2   : > { %10929 = vst [vmem:[#allocation213_spill] sm:$0xff] %v8492_v49  ;;  %4380 = vperm.xlu1 %5810, %v10933_v33   ;;  %v3010_v3 = vadd.f32 %v3009_v13, %v2841_v47  ;;  %v2673_v35 = vpop.f32.mrf.mxu0  ;;  %v5744_v47 = vld [vmem:[%s10553_s4 + $0x2ec] sm:$0xf0]  ;;  %v1795_v13 = vpack.c.bf16 %v8510_v41, %v8507_v11  ;;  %v5742_v33 = vld [vmem:[%s10553_s4 + $0x2e4] sm:$0xf]  ;;  %v693_v1 = vmul.f32 %v8524_v21, %v8524_v21 }
 0x1b3   : > { %10934 = vst [vmem:[#allocation141_spill] sm:$0xff] %v8501_v17  ;;  %v8549_v43 = vor.u32 %v5744_v47, %v5506_v16  ;;  %v1763_v16 = vpack.c.bf16 %v8559_v50, %v8556_v46  ;;  %v8577_v47 = vld [vmem:[%s6575_s15 + $0x98] sm:$0xff] }
 0x1b4   : > { %10935 = vst [vmem:[#allocation145_spill] sm:$0xff] %v8503_v40  ;;  %3612 = vmatpush.bf16.msrb.mxu2 %v1795_v13  ;;  %v8562_v13 = vld [vmem:[%s6575_s15 + $0x90] sm:$0xff]  ;;  %v660_v37 = vmul.f32 %v8577_v47, %v8577_v47  ;;  %v5753_v5 = vld [vmem:[%s10553_s4 + $0x334] sm:$0xf0] }
 0x1b5   : > { %10937 = vst [vmem:[#allocation217_spill] sm:$0xff] %v8549_v43  ;;  %3274 = vmatpush.bf16.msrb.mxu0 %v1763_v16  ;;  %v10950_v16 = vld [vmem:[#allocation161_spill] sm:$0xff] }
 0x1b6   : > { %v2842_v14 = vpop.f32.mrf.mxu1  ;;  %10941 = vst [vmem:[#allocation219_spill] sm:$0xff] %v8583_v10 }
 0x1b7   : > { %v2843_v2 = vadd.f32 %v2842_v14, %v2673_v35  ;;  %v5508_v35 = vld [vmem:[%s10553_s4 + $0x2f0] sm:$0xf0]  ;;  %v1811_v14 = vpack.c.bf16 %v8524_v21, %v8513_v8  ;;  %v3178_v7 = vpop.f32.mrf.mxu3 }
 0x1b8   : > { %v8547_v29 = vadd.f32 %v3178_v7, %v3010_v3  ;;  %v8551_v34 = vpop.permute.xlu0 %4204  ;;  %v10939_v7 = vld [vmem:[#allocation160_spill] sm:$0xff]  ;;  %v643_v3 = vmul.f32 %v8556_v46, %v8556_v46  ;;  %v8581_v49 = vor.u32 %v5742_v33, %v5508_v35  ;;  %v8587_v42 = vpop.permute.xlu2 %4199  ;;  %v710_v33 = vadd.f32 %v677_v30, %v644_v61  ;;  %v5516_v35 = vld [vmem:[%s10553_s4 + $0x2f8] sm:$0xf0] }
 0x1b9   : > { %10938 = vst [vmem:[#allocation218_spill] sm:$0xff] %v8551_v34  ;;  %3781 = vmatpush.bf16.msrb.mxu3 %v1811_v14  ;;  %4424 = vperm.xlu0 %5812, %v10939_v7   ;;  %v659_v14 = vmul.f32 %v8562_v13, %v8562_v13  ;;  %v10942_v7 = vld [vmem:[#allocation156_spill] sm:$0xff]  ;;  %v8593_v34 = vpop.permute.xlu1 %4179  ;;  %v907_v30 = vmul.f32 -0.35, %v778_v51 }
 0x1ba   : > { %10936 = vst [vmem:[#allocation216_spill] sm:$0xff] %v8547_v29  ;;  %v3011_v29 = vpop.f32.mrf.mxu2  ;;  %4372 = vperm.xlu2 %5811, %v10942_v7   ;;  %4392 = vperm.xlu1 %5810, %v10943_v27   ;;  %v2676_v25 = vpop.f32.mrf.mxu0  ;;  %v709_v38 = vadd.f32 %v676_v52, %v643_v3  ;;  %v5743_v27 = vld [vmem:[%s10553_s4 + $0x2ec] sm:$0xf]  ;;  %v726_v7 = vadd.f32 %v693_v1, %v660_v37  ;;  %v1303_v1 = vmul.f32 0.15, %v778_v51 }
 0x1bb   : > { %10940 = vst [vmem:[#allocation160_spill] sm:$0xff] %v8581_v49  ;;  %v3012_v45 = vadd.f32 %v3011_v29, %v2843_v2  ;;  %v725_v62 = vadd.f32 %v692_v4, %v659_v14  ;;  %v743_v29 = vadd.f32 1e-12, %v710_v33  ;;  %v1779_v4 = vpack.c.bf16 %v8577_v47, %v8562_v13  ;;  %v10951_v14 = vld [vmem:[#allocation162_spill] sm:$0xff] }
 0x1bc   : > { %10944 = vst [vmem:[#allocation156_spill] sm:$0xff] %v8587_v42  ;;  %v742_v57 = vadd.f32 1e-12, %v709_v38  ;;  %v759_v52 = vadd.f32 1e-12, %v726_v7  ;;  %v8608_v37 = vor.u32 %v5743_v27, %v5516_v35 }
 0x1bd   : > { %10946 = vst [vmem:[#allocation157_spill] sm:$0xff] %v8593_v34  ;;  %v758_v2 = vadd.f32 1e-12, %v725_v62  ;;  %2715 = vmatmul.bf16.gmra.mxu0 %v8549_v43  ;;  %3443 = vmatpush.bf16.msrb.mxu1 %v1779_v4  ;;  %v942_v62 = vmul.f32 1.442695, %v907_v30  ;;  %v8756_v34 = vld [vmem:[%s6350_s25 + $0x80] sm:$0xff] }
 0x1be   : > { %v2845_v63 = vpop.f32.mrf.mxu1  ;;  %3053 = vmatmul.bf16.gmra.mxu2 %v8583_v10  ;;  %6103 = vlog2.f32 %v742_v57  ;;  %10948 = vst [vmem:[#allocation221_spill] sm:$0xff] %v8608_v37  ;;  %v1338_v57 = vmul.f32 1.442695, %v1303_v1  ;;  %v5524_v4 = vld [vmem:[%s10553_s4 + $0x310] sm:$0xf0]  ;;  %v525_v9 = vmul.f32 %v8756_v34, %v8756_v34 }
 0x1bf   : > { %v2846_v42 = vadd.f32 %v2845_v63, %v2676_v25  ;;  %v3180_v3 = vpop.f32.mrf.mxu3  ;;  %2884 = vmatmul.bf16.gmra.mxu1 %v8581_v49  ;;  %6105 = vlog2.f32 %v743_v29  ;;  %v5522_v29 = vld [vmem:[%s10553_s4 + $0x300] sm:$0xf]  ;;  %10972 = vst [vmem:[#allocation235_spill] sm:$0xff] %v8756_v34 }
 0x1c0   : > { %v8606_v61 = vadd.f32 %v3180_v3, %v3012_v45  ;;  %v8610_v25 = vpop.permute.xlu0 %4219  ;;  %6107 = vlog2.f32 %v758_v2  ;;  %v8614_v33 = vpop.permute.xlu2 %4214  ;;  %v5748_v2 = vld [vmem:[%s10553_s4 + $0x30c] sm:$0xf0] }
 0x1c1   : > { %10949 = vst [vmem:[#allocation222_spill] sm:$0xff] %v8610_v25  ;;  %6109 = vlog2.f32 %v759_v52  ;;  %v8616_v7 = vpop.permute.xlu1 %4194  ;;  %3222 = vmatmul.bf16.gmra.mxu3 %v8608_v37 }
 0x1c2   : > { %10947 = vst [vmem:[#allocation220_spill] sm:$0xff] %v8606_v61  ;;  %v3014_v38 = vpop.f32.mrf.mxu2  ;;  %4384 = vperm.xlu2 %5811, %v10950_v16   ;;  %4404 = vperm.xlu1 %5810, %v10951_v14   ;;  %v2678_v45 = vpop.f32.mrf.mxu0  ;;  %6111 = vpow2.f32 %v942_v62  ;;  %v5749_v16 = vld [vmem:[%s10553_s4 + $0x314] sm:$0xf0]  ;;  %v8643_v62 = vor.u32 %v5748_v2, %v5522_v29 }
 0x1c3   : > { %10952 = vst [vmem:[#allocation161_spill] sm:$0xff] %v8614_v33  ;;  %v3015_v63 = vadd.f32 %v3014_v38, %v2846_v42  ;;  %v5746_v42 = vld [vmem:[%s10553_s4 + $0x304] sm:$0xf]  ;;  %v5530_v38 = vld [vmem:[%s10553_s4 + $0x308] sm:$0xf]  ;;  %6113 = vpow2.f32 %v1338_v57 }
 0x1c4   : > { %10953 = vst [vmem:[#allocation162_spill] sm:$0xff] %v8616_v7  ;;  %v6104_v35 = vpop.eup %6103  ;;  %v8650_v33 = vor.u32 %v5746_v42, %v5524_v4 }
 0x1c5   : > { %v6106_v52 = vpop.eup %6105  ;;  %v844_v30 = vmul.f32 0.6931472, %v6104_v35  ;;  %10956 = vst [vmem:[#allocation225_spill] sm:$0xff] %v8643_v62 }
 0x1c6   : > { %v2847_v27 = vpop.f32.mrf.mxu1  ;;  %v6108_v3 = vpop.eup %6107  ;;  %v8637_v14 = vmul.f32 0.6931472, %v6106_v52  ;;  %10959 = vst [vmem:[#allocation228_spill] sm:$0xff] %v8650_v33 }
 0x1c7   : > { %v2848_v51 = vadd.f32 %v2847_v27, %v2678_v45  ;;  %v3183_v1 = vpop.f32.mrf.mxu3  ;;  %v6110_v45 = vpop.eup %6109  ;;  %v1006_v37 = vmul.f32 -0.35, %v844_v30  ;;  %v1402_v10 = vmul.f32 0.15, %v844_v30  ;;  %v8641_v49 = vmul.f32 0.6931472, %v6108_v3 }
 0x1c8   : > { %v8639_v27 = vadd.f32 %v3183_v1, %v3015_v63  ;;  %v1007_v35 = vmul.f32 -0.35, %v8637_v14  ;;  %v8646_v43 = vmul.f32 0.6931472, %v6110_v45  ;;  %v8648_v61 = vpop.permute.xlu0 %4234  ;;  %v10960_v1 = vld [vmem:[#allocation167_spill] sm:$0xff]  ;;  %v10961_v30 = vld [vmem:[#allocation168_spill] sm:$0xff]  ;;  %v8655_v57 = vpop.permute.xlu2 %4229  ;;  %v8657_v3 = vor.u32 %v5749_v16, %v5530_v38 }
 0x1c9   : > { %10955 = vst [vmem:[#allocation224_spill] sm:$0xff] %v8641_v49  ;;  %v1041_v52 = vmul.f32 1.442695, %v1006_v37  ;;  %v1437_v17 = vmul.f32 1.442695, %v1402_v10  ;;  %v8669_v38 = vld [vmem:[%s6350_s25 + $0x18] sm:$0xff] }
 0x1ca   : > { %10954 = vst [vmem:[#allocation223_spill] sm:$0xff] %v8639_v27  ;;  %v3016_v25 = vpop.f32.mrf.mxu2  ;;  %v1022_v63 = vmul.f32 -0.35, %v8641_v49  ;;  %4396 = vperm.xlu2 %5811, %v10960_v1   ;;  %4416 = vperm.xlu1 %5810, %v10961_v30   ;;  %v2681_v2 = vpop.f32.mrf.mxu0  ;;  %v1043_v45 = vmul.f32 1.442695, %v1007_v35  ;;  %v512_v16 = vmul.f32 %v8669_v38, %v8669_v38  ;;  %v8674_v35 = vld [vmem:[%s6356_s28 + $0x18] sm:$0xff] }
 0x1cb   : > { %10957 = vst [vmem:[#allocation226_spill] sm:$0xff] %v8646_v43  ;;  %v3017_v29 = vadd.f32 %v3016_v25, %v2848_v51  ;;  %v1023_v42 = vmul.f32 -0.35, %v8646_v43  ;;  %v8660_v4 = vpop.permute.xlu1 %4209  ;;  %6115 = vpow2.f32 %v1041_v52  ;;  %v6112_v27 = vpop.eup %6111  ;;  %v5747_v1 = vld [vmem:[%s10553_s4 + $0x30c] sm:$0xf]  ;;  %v545_v52 = vmul.f32 %v8674_v35, %v8674_v35 }
 0x1cc   : > { %10958 = vst [vmem:[#allocation227_spill] sm:$0xff] %v8648_v61  ;;  %v1073_v37 = vmul.f32 1.442695, %v1022_v63  ;;  %v5532_v25 = vld [vmem:[%s10553_s4 + $0x318] sm:$0xf0]  ;;  %6117 = vpow2.f32 %v1043_v45  ;;  %v6114_v63 = vpop.eup %6113 }
 0x1cd   : > { %10962 = vst [vmem:[#allocation167_spill] sm:$0xff] %v8655_v57  ;;  %v1075_v51 = vmul.f32 1.442695, %v1023_v42  ;;  %2720 = vmatmul.bf16.gmra.mxu0 %v8643_v62  ;;  %6119 = vpow2.f32 %v1437_v17  ;;  %v8683_v61 = vor.u32 %v5747_v1, %v5532_v25  ;;  %v1204_v57 = vmul.f32 %v8443_v18, %v6112_v27  ;;  %v6250_v1 = vld [vmem:[%s6350_s25 + $0x98] sm:$0xff] }
 0x1ce   : > { %10963 = vst [vmem:[#allocation168_spill] sm:$0xff] %v8657_v3  ;;  %v2850_v10 = vpop.f32.mrf.mxu1  ;;  %3058 = vmatmul.bf16.gmra.mxu2 %v8657_v3  ;;  %6121 = vpow2.f32 %v1073_v37  ;;  %v1105_v62 = vmul.f32 %v8438_v32, %v6112_v27  ;;  %v578_v56 = vadd.f32 %v545_v52, %v512_v16  ;;  %v528_v25 = vmul.f32 %v6250_v1, %v6250_v1  ;;  %v6251_v18 = vld [vmem:[%s6356_s28 + $0x98] sm:$0xff]  ;;  %v8699_v52 = vld [vmem:[%s6350_s25] sm:$0xff] }
 0x1cf   : > { %10964 = vst [vmem:[#allocation229_spill] sm:$0xff] %v8660_v4  ;;  %v3185_v30 = vpop.f32.mrf.mxu3  ;;  %2889 = vmatmul.bf16.gmra.mxu1 %v8650_v33  ;;  %v2851_v42 = vadd.f32 %v2850_v10, %v2681_v2  ;;  %6123 = vpow2.f32 %v1075_v51  ;;  %v6248_v4 = vld [vmem:[%s6350_s25 + $0x90] sm:$0xff]  ;;  %v10967_v2 = vld [vmem:[#allocation171_spill] sm:$0xff]  ;;  %v561_v32 = vmul.f32 %v6251_v18, %v6251_v18 }
 0x1d0   : > { %v8681_v45 = vadd.f32 %v3185_v30, %v3017_v29  ;;  %10966 = vst [vmem:[#allocation231_spill] sm:$0xff] %v8683_v61  ;;  %v527_v7 = vmul.f32 %v6248_v4, %v6248_v4  ;;  %v6249_v33 = vld [vmem:[%s6356_s28 + $0x90] sm:$0xff]  ;;  %v8690_v10 = vpop.permute.xlu2 %4244  ;;  %v509_v30 = vmul.f32 %v8699_v52, %v8699_v52  ;;  %v8713_v18 = vpop.permute.xlu0 %4249 }
 0x1d1   : > { %v6116_v17 = vpop.eup %6115  ;;  %v560_v3 = vmul.f32 %v6249_v33, %v6249_v33  ;;  %10968 = vst [vmem:[#allocation171_spill] sm:$0xff] %v8690_v10  ;;  %3227 = vmatmul.bf16.gmra.mxu3 %v8683_v61 }
 0x1d2   : > { %10965 = vst [vmem:[#allocation230_spill] sm:$0xff] %v8681_v45  ;;  %v3019_v29 = vpop.f32.mrf.mxu2  ;;  %4408 = vperm.xlu2 %5811, %v10967_v2   ;;  %v6118_v37 = vpop.eup %6117  ;;  %v1138_v27 = vmul.f32 %v6116_v17, %v8556_v46  ;;  %v1237_v4 = vmul.f32 %v6116_v17, %v8507_v11  ;;  %v8704_v2 = vld [vmem:[%s6356_s28 + $0x100] sm:$0x1] }
 0x1d3   : > { %v2683_v51 = vpop.f32.mrf.mxu0  ;;  %v8696_v16 = vpop.permute.xlu1 %4224  ;;  %v3020_v1 = vadd.f32 %v3019_v29, %v2851_v42  ;;  %v8708_v46 = vmul.f32 %v6118_v37, %v8559_v50  ;;  %v8711_v11 = vmul.f32 %v6118_v37, %v8510_v41  ;;  %10970 = vst [vmem:[#allocation233_spill] sm:$0xff] %v8713_v18  ;;  %v8716_v45 = vld [vmem:[%s6356_s28] sm:$0xff]  ;;  %v611_v29 = vadd.f32 1e-12, %v578_v56  ;;  %v8727_v37 = vld [vmem:[%s6350_s25 + $0x8] sm:$0xff] }
 0x1d4   : > { %10969 = vst [vmem:[#allocation232_spill] sm:$0xff] %v8696_v16  ;;  %v6120_v33 = vpop.eup %6119  ;;  %v542_v10 = vmul.f32 %v8716_v45, %v8716_v45  ;;  %v8720_v16 = vsub.f32 %v1105_v62, %v1138_v27  ;;  %v8722_v61 = vsub.f32 %v1204_v57, %v1237_v4  ;;  %v593_v41 = vadd.f32 %v560_v3, %v527_v7  ;;  %v8737_v4 = vld [vmem:[%s6350_s25 + $0x100] sm:$0x1] }
 0x1d5   : > { %v8724_v42 = vsub.f32 %v6114_v63, %v6120_v33  ;;  %v6122_v50 = vpop.eup %6121  ;;  %v510_v18 = vmul.f32 %v8727_v37, %v8727_v37  ;;  %v543_v62 = vmul.f32 %v8732_v19, %v8732_v19  ;;  %v594_v57 = vadd.f32 %v561_v32, %v528_v25  ;;  %v5538_v33 = vld [vmem:[%s10553_s4 + $0x320] sm:$0xf]  ;;  %v5752_v25 = vld [vmem:[%s10553_s4 + $0x32c] sm:$0xf0]  ;;  %v5750_v32 = vld [vmem:[%s10553_s4 + $0x324] sm:$0xf] }
 0x1d6   : > { %v2852_v17 = vpop.f32.mrf.mxu1  ;;  %v6124_v27 = vpop.eup %6123  ;;  %v541_v56 = vmul.f32 %v8737_v4, %v8737_v4  ;;  %v574_v7 = vmul.f32 %v8704_v2, %v8704_v2  ;;  %v8744_v63 = vmul.f32 %v6122_v50, %v8562_v13  ;;  %v558_v13 = vmul.f32 %v8761_v58, %v8761_v58 }
 0x1d7   : > { %v3188_v3 = vpop.f32.mrf.mxu3  ;;  %v575_v60 = vadd.f32 %v542_v10, %v509_v30  ;;  %v8775_v0 = vmul.f32 %v6124_v27, %v8577_v47  ;;  %v8778_v23 = vmul.f32 %v6122_v50, %v8513_v8  ;;  %v576_v12 = vadd.f32 %v543_v62, %v510_v18  ;;  %v8794_v18 = vld [vmem:[%s6350_s25 + $0x88] sm:$0xff] }
 0x1d8   : > { %10971 = vst [vmem:[#allocation234_spill] sm:$0xff] %v8744_v63  ;;  %v3189_v40 = vadd.f32 %v3188_v3, %v3020_v1  ;;  %v8781_v1 = vmul.f32 %v6124_v27, %v8524_v21  ;;  %v626_v3 = vadd.f32 1e-12, %v593_v41  ;;  %v2853_v54 = vadd.f32 %v2852_v17, %v2683_v51  ;;  %v8799_v51 = vld [vmem:[%s6356_s28 + $0x88] sm:$0xff]  ;;  %v8803_v62 = vpop.permute.xlu2 %4259 }
 0x1d9   : > { %10973 = vst [vmem:[#allocation236_spill] sm:$0xff] %v8775_v0  ;;  %v8784_v22 = vor.u32 %v5752_v25, %v5538_v33  ;;  %v627_v47 = vadd.f32 1e-12, %v594_v57  ;;  %v607_v10 = vadd.f32 %v574_v7, %v541_v56  ;;  %v8787_v30 = vor.u32 %v5750_v32, %v5540_v53  ;;  %v8812_v57 = vpop.permute.xlu0 %4264 }
 0x1da   : > { %10974 = vst [vmem:[#allocation237_spill] sm:$0xff] %v8778_v23  ;;  %3944 = vrot.lane.b32.xlu0 %v3189_v40, %s6292_s22  ;;  %v3021_v15 = vpop.f32.mrf.mxu2  ;;  %4420 = vperm.xlu2 %5811, %v8242_v55   ;;  %v8789_v21 = vor.u32 %v5753_v5, %v5546_v31  ;;  %6125 = vlog2.f32 %v611_v29  ;;  %v526_v40 = vmul.f32 %v8794_v18, %v8794_v18  ;;  %v608_v53 = vadd.f32 1e-12, %v575_v60  ;;  %v5751_v5 = vld [vmem:[%s10553_s4 + $0x32c] sm:$0xf] }
 0x1db   : > { %10975 = vst [vmem:[#allocation238_spill] sm:$0xff] %v8781_v1  ;;  %v2686_v8 = vpop.f32.mrf.mxu0  ;;  %v8791_v50 = vpop.permute.xlu1 %4239  ;;  %v559_v55 = vmul.f32 %v8799_v51, %v8799_v51  ;;  %v3022_v17 = vadd.f32 %v3021_v15, %v2853_v54  ;;  %v591_v31 = vadd.f32 %v558_v13, %v525_v9  ;;  %v5548_v29 = vld [vmem:[%s10553_s4 + $0x338] sm:$0xf0]  ;;  %6127 = vlog2.f32 %v626_v3 }
 0x1dc   : > { %10976 = vst [vmem:[#allocation239_spill] sm:$0xff] %v8784_v22  ;;  %v609_v27 = vadd.f32 1e-12, %v576_v12  ;;  %6129 = vlog2.f32 %v627_v47  ;;  %v640_v15 = vadd.f32 1e-12, %v607_v10  ;;  %v8816_v7 = vor.u32 %v5751_v5, %v5548_v29 }
 0x1dd   : > { %10977 = vst [vmem:[#allocation240_spill] sm:$0xff] %v8787_v30  ;;  %2725 = vmatmul.bf16.gmra.mxu0 %v8784_v22  ;;  %v592_v60 = vadd.f32 %v559_v55, %v526_v40  ;;  %6131 = vlog2.f32 %v608_v53  ;;  %v624_v33 = vadd.f32 1e-12, %v591_v31  ;;  %v5554_v31 = vld [vmem:[%s10553_s4 + $0x340] sm:$0xf] }
 0x1de   : > { %10978 = vst [vmem:[#allocation241_spill] sm:$0xff] %v8789_v21  ;;  %v2855_v41 = vpop.f32.mrf.mxu1  ;;  %3063 = vmatmul.bf16.gmra.mxu2 %v8789_v21  ;;  %6133 = vlog2.f32 %v609_v27  ;;  %v5756_v5 = vld [vmem:[%s10553_s4 + $0x34c] sm:$0xf0]  ;;  %v5754_v29 = vld [vmem:[%s10553_s4 + $0x344] sm:$0xf] }
 0x1df   : > { %10979 = vst [vmem:[#allocation242_spill] sm:$0xff] %v8791_v50  ;;  %v3190_v54 = vpop.f32.mrf.mxu3  ;;  %2894 = vmatmul.bf16.gmra.mxu1 %v8787_v30  ;;  %v2856_v56 = vadd.f32 %v2855_v41, %v2686_v8  ;;  %6135 = vlog2.f32 %v640_v15  ;;  %v625_v3 = vadd.f32 1e-12, %v592_v60  ;;  %v5562_v60 = vld [vmem:[%s10553_s4 + $0x348] sm:$0xf] }
 0x1e0   : > { %10980 = vst [vmem:[#allocation243_spill] sm:$0xff] %v8794_v18  ;;  %v3191_v9 = vadd.f32 %v3190_v54, %v3022_v17  ;;  %v6126_v25 = vpop.eup %6125  ;;  %6137 = vlog2.f32 %v624_v33  ;;  %v5556_v54 = vld [vmem:[%s10553_s4 + $0x350] sm:$0xf0] }
 0x1e1   : > { %10981 = vst [vmem:[#allocation244_spill] sm:$0xff] %v8803_v62  ;;  %v6128_v13 = vpop.eup %6127  ;;  %3232 = vmatmul.bf16.gmra.mxu3 %v8816_v7  ;;  %v780_v55 = vmul.f32 0.6931472, %v6126_v25  ;;  %v8822_v17 = vpop.permute.xlu2 %4304  ;;  %6139 = vlog2.f32 %v625_v3  ;;  %v8851_v62 = vor.u32 %v5754_v29, %v5556_v54 }
 0x1e2   : > { %10982 = vst [vmem:[#allocation245_spill] sm:$0xff] %v8812_v57  ;;  %3946 = vrot.lane.b32.xlu0 %v3191_v9, %s6292_s22  ;;  %v3024_v12 = vpop.f32.mrf.mxu2  ;;  %v6130_v8 = vpop.eup %6129  ;;  %v5757_v9 = vld [vmem:[%s10553_s4 + $0x354] sm:$0xf0] }
 0x1e3   : > { %10983 = vst [vmem:[#allocation246_spill] sm:$0xff] %v8816_v7  ;;  %v2688_v32 = vpop.f32.mrf.mxu0  ;;  %v3025_v47 = vadd.f32 %v3024_v12, %v2856_v56  ;;  %v8820_v40 = vpop.permute.xlu1 %4254  ;;  %v908_v25 = vmul.f32 -0.35, %v780_v55  ;;  %v8844_v12 = vmul.f32 0.6931472, %v6128_v13  ;;  %v8849_v7 = vor.u32 %v5756_v5, %v5554_v31 }
 0x1e4   : > { %10984 = vst [vmem:[#allocation247_spill] sm:$0xff] %v8820_v40  ;;  %v6132_v41 = vpop.eup %6131  ;;  %v8842_v56 = vpop.permute.xlu0 %4308  ;;  %v8846_v3 = vmul.f32 0.6931472, %v6130_v8  ;;  %v1304_v30 = vmul.f32 0.15, %v780_v55 }
 0x1e5   : > { %10985 = vst [vmem:[#allocation248_spill] sm:$0xff] %v8822_v17  ;;  %v6134_v27 = vpop.eup %6133 }
 0x1e6   : > { %v2857_v10 = vpop.f32.mrf.mxu1  ;;  %10986 = vst [vmem:[#allocation249_spill] sm:$0xff] %v8842_v56  ;;  %v6136_v33 = vpop.eup %6135  ;;  %v776_v22 = vmul.f32 0.6931472, %v6134_v27  ;;  %v8853_v56 = vor.u32 %v5757_v9, %v5562_v60  ;;  %v924_v31 = vmul.f32 -0.35, %v8846_v3 }
 0x1e7   : > { %v3193_v53 = vpop.f32.mrf.mxu3  ;;  %10987 = vst [vmem:[#allocation250_spill] sm:$0xff] %v8844_v12  ;;  %v6138_v21 = vpop.eup %6137  ;;  %v8855_v40 = vmul.f32 0.6931472, %v6136_v33  ;;  %v944_v27 = vmul.f32 1.442695, %v908_v25 }
 0x1e8   : > { %v3194_v15 = vadd.f32 %v3193_v53, %v3025_v47  ;;  %10988 = vst [vmem:[#allocation251_spill] sm:$0xff] %v8846_v3  ;;  %v774_v47 = vmul.f32 0.6931472, %v6132_v41  ;;  %v2858_v53 = vadd.f32 %v2857_v10, %v2688_v32  ;;  %v923_v41 = vmul.f32 -0.35, %v8844_v12  ;;  %v6140_v55 = vpop.eup %6139 }
 0x1e9   : > { %10989 = vst [vmem:[#allocation252_spill] sm:$0xff] %v8849_v7  ;;  %v5755_v32 = vld [vmem:[%s10553_s4 + $0x34c] sm:$0xf]  ;;  %v5564_v10 = vld [vmem:[%s10553_s4 + $0x358] sm:$0xf0]  ;;  %6141 = vpow2.f32 %v944_v27 }
 0x1ea   : > { %3948 = vrot.lane.b32.xlu1 %v3194_v15, %s6292_s22  ;;  %v3026_v17 = vpop.f32.mrf.mxu2  ;;  %10990 = vst [vmem:[#allocation253_spill] sm:$0xff] %v8851_v62  ;;  %v905_v5 = vmul.f32 -0.35, %v774_v47  ;;  %v8865_v29 = vmul.f32 0.6931472, %v6138_v21  ;;  %v8873_v50 = vor.u32 %v5755_v32, %v5564_v10  ;;  %v8875_v21 = vpop.permute.xlu2 %4316 }
 0x1eb   : > { %v2691_v57 = vpop.f32.mrf.mxu0  ;;  %10991 = vst [vmem:[#allocation254_spill] sm:$0xff] %v8853_v56  ;;  %v3027_v13 = vadd.f32 %v3026_v17, %v2858_v53  ;;  %v1340_v15 = vmul.f32 1.442695, %v1304_v30  ;;  %v906_v54 = vmul.f32 -0.35, %v776_v22 }
 0x1ec   : > { %10992 = vst [vmem:[#allocation255_spill] sm:$0xff] %v8865_v29  ;;  %v8868_v17 = vpop.permute.xlu1 %4300  ;;  %v937_v9 = vmul.f32 -0.35, %v8855_v40  ;;  %v974_v24 = vmul.f32 1.442695, %v923_v41 }
 0x1ed   : > { %2730 = vmatmul.bf16.gmra.mxu0 %v8849_v7  ;;  %10993 = vst [vmem:[#allocation256_spill] sm:$0xff] %v8868_v17  ;;  %v8877_v7 = vmul.f32 0.6931472, %v6140_v55  ;;  %v8879_v17 = vmul.f32 1.442695, %v924_v31  ;;  %6143 = vpow2.f32 %v1340_v15 }
 0x1ee   : > { %v2860_v8 = vpop.f32.mrf.mxu1  ;;  %3068 = vmatmul.bf16.gmra.mxu2 %v8853_v56  ;;  %10994 = vst [vmem:[#allocation257_spill] sm:$0xff] %v8873_v50  ;;  %v938_v30 = vmul.f32 1.442695, %v905_v5  ;;  %v921_v25 = vmul.f32 -0.35, %v8865_v29  ;;  %6145 = vpow2.f32 %v974_v24  ;;  %v8946_v29 = vld [vmem:[%s6575_s15 + $0x8] sm:$0xff] }
 0x1ef   : > { %v3195_v60 = vpop.f32.mrf.mxu3  ;;  %2899 = vmatmul.bf16.gmra.mxu1 %v8851_v62  ;;  %v2861_v53 = vadd.f32 %v2860_v8, %v2691_v57  ;;  %10995 = vst [vmem:[#allocation258_spill] sm:$0xff] %v8875_v21  ;;  %v940_v57 = vmul.f32 1.442695, %v906_v54  ;;  %v1301_v8 = vmul.f32 0.15, %v774_v47  ;;  %v8948_v12 = vpop.eup %6141 }
 0x1f0   : > { %v3196_v33 = vadd.f32 %v3195_v60, %v3027_v13  ;;  %10996 = vst [vmem:[#allocation259_spill] sm:$0xff] %v8877_v7  ;;  %v8883_v13 = vpop.permute.xlu0 %4328  ;;  %v8885_v41 = vmul.f32 0.15, %v776_v22  ;;  %v1002_v10 = vmul.f32 1.442695, %v937_v9  ;;  %v8892_v60 = vld [vmem:[%s6557_s12] sm:$0xff]  ;;  %6147 = vpow2.f32 %v938_v30 }
 0x1f1   : > { %10997 = vst [vmem:[#allocation260_spill] sm:$0xff] %v8883_v13  ;;  %3237 = vmatmul.bf16.gmra.mxu3 %v8873_v50  ;;  %v8889_v5 = vld [vmem:[%s6575_s15 + $0x100] sm:$0x1]  ;;  %v922_v47 = vmul.f32 -0.35, %v8877_v7  ;;  %v8918_v13 = vld [vmem:[%s6557_s12 + $0x88] sm:$0xff]  ;;  %v674_v62 = vmul.f32 %v8892_v60, %v8892_v60  ;;  %6149 = vpow2.f32 %v940_v57 }
 0x1f2   : > { %3950 = vrot.lane.b32.xlu1 %v3196_v33, %s6292_s22  ;;  %v3029_v56 = vpop.f32.mrf.mxu2  ;;  %v8895_v33 = vld [vmem:[%s6557_s12 + $0x8] sm:$0xff]  ;;  %v5570_v22 = vld [vmem:[%s10553_s4 + $0x360] sm:$0xf]  ;;  %v970_v15 = vmul.f32 1.442695, %v921_v25  ;;  %v1759_v9 = vsel %vm1597_vm0, %v8889_v5, %v8892_v60  ;;  %6151 = vpow2.f32 %v1002_v10 }
 0x1f3   : > { %v2693_v32 = vpop.f32.mrf.mxu0  ;;  %v3030_v55 = vadd.f32 %v3029_v56, %v2861_v53  ;;  %v8902_v27 = vld [vmem:[%s6557_s12 + $0x100] sm:$0x1]  ;;  %v673_v56 = vmul.f32 %v8889_v5, %v8889_v5  ;;  %v5760_v54 = vld [vmem:[%s10553_s4 + $0x36c] sm:$0xf0]  ;;  %v5758_v30 = vld [vmem:[%s10553_s4 + $0x364] sm:$0xf]  ;;  %v675_v28 = vmul.f32 %v8895_v33, %v8895_v33  ;;  %v1793_v43 = vpack.c.bf16 %v8895_v33, %v1759_v9  ;;  %v8954_v57 = vpop.eup %6143 }
 0x1f4   : > { %v706_v24 = vmul.f32 %v8902_v27, %v8902_v27  ;;  %v8915_v53 = vld [vmem:[%s6557_s12 + $0x80] sm:$0xff]  ;;  %v5572_v25 = vld [vmem:[%s10553_s4 + $0x370] sm:$0xf0]  ;;  %v5578_v50 = vld [vmem:[%s10553_s4 + $0x368] sm:$0xf]  ;;  %v8940_v3 = vpop.permute.xlu1 %4312  ;;  %6153 = vpow2.f32 %v970_v15 }
 0x1f5   : > { %v1809_v1 = vpack.c.bf16 %v8918_v13, %v8915_v53  ;;  %v1333_v49 = vmul.f32 0.15, %v8855_v40  ;;  %10998 = vst [vmem:[#allocation261_spill] sm:$0xff] %v8940_v3  ;;  %v972_v9 = vmul.f32 1.442695, %v922_v47  ;;  %3613 = vmatpush.bf16.msrb.mxu2 %v1793_v43  ;;  %v641_v40 = vmul.f32 %v8943_v39, %v8943_v39  ;;  %v8959_v3 = vpop.permute.xlu2 %4324  ;;  %v8961_v43 = vpop.eup %6145 }
 0x1f6   : > { %v2862_v31 = vpop.f32.mrf.mxu1  ;;  %v739_v7 = vadd.f32 %v706_v24, %v673_v56  ;;  %v8957_v24 = vor.u32 %v5760_v54, %v5570_v22  ;;  %11000 = vst [vmem:[#allocation263_spill] sm:$0xff] %v8959_v3  ;;  %v8963_v47 = vor.u32 %v5758_v30, %v5572_v25  ;;  %v8965_v0 = vor.u32 %v5761_v59, %v5578_v50  ;;  %v6148_v34 = vpop.eup %6147 }
 0x1f7   : > { %v3198_v21 = vpop.f32.mrf.mxu3  ;;  %3782 = vmatpush.bf16.msrb.mxu3 %v1809_v1  ;;  %v707_v63 = vadd.f32 %v674_v62, %v641_v40  ;;  %v1334_v15 = vmul.f32 1.442695, %v1301_v8  ;;  %v8975_v62 = vpop.eup %6149  ;;  %v1398_v54 = vmul.f32 1.442695, %v1333_v49  ;;  %v1403_v30 = vmul.f32 0.15, %v8637_v14 }
 0x1f8   : > { %v3199_v23 = vadd.f32 %v3198_v21, %v3030_v55  ;;  %v642_v21 = vmul.f32 %v8946_v29, %v8946_v29  ;;  %v2863_v55 = vadd.f32 %v2862_v31, %v2693_v32  ;;  %10999 = vst [vmem:[#allocation262_spill] sm:$0xff] %v8957_v24  ;;  %v772_v10 = vadd.f32 1e-12, %v739_v7  ;;  %v8970_v22 = vpop.permute.xlu0 %4340  ;;  %v5580_v7 = vld [vmem:[%s10553_s4 + $0x378] sm:$0xf0]  ;;  %v6152_v8 = vpop.eup %6151 }
 0x1f9   : > { %11001 = vst [vmem:[#allocation264_spill] sm:$0xff] %v8963_v47  ;;  %v740_v59 = vadd.f32 1e-12, %v707_v63  ;;  %v8989_v49 = vmul.f32 %v8674_v35, %v8948_v12  ;;  %v9005_v35 = vmul.f32 %v8737_v4, %v6152_v8 }
 0x1fa   : > { %3952 = vrot.lane.b32.xlu2 %v3199_v23, %s6292_s22  ;;  %v3031_v56 = vpop.f32.mrf.mxu2  ;;  %11002 = vst [vmem:[#allocation265_spill] sm:$0xff] %v8965_v0  ;;  %v708_v18 = vadd.f32 %v675_v28, %v642_v21  ;;  %v5759_v23 = vld [vmem:[%s10553_s4 + $0x36c] sm:$0xf]  ;;  %6155 = vlog2.f32 %v772_v10  ;;  %v1336_v28 = vmul.f32 1.442695, %v8885_v41  ;;  %v8983_v63 = vpop.eup %6153 }
 0x1fb   : > { %v2696_v1 = vpop.f32.mrf.mxu0  ;;  %v3032_v32 = vadd.f32 %v3031_v56, %v2863_v55  ;;  %11003 = vst [vmem:[#allocation266_spill] sm:$0xff] %v8970_v22  ;;  %6157 = vpow2.f32 %v972_v9  ;;  %v8985_v40 = vor.u32 %v5759_v23, %v5580_v7  ;;  %v8997_v55 = vmul.f32 %v8699_v52, %v6148_v34 }
 0x1fc   : > { %v741_v50 = vadd.f32 1e-12, %v708_v18  ;;  %6159 = vpow2.f32 %v8879_v17  ;;  %v8992_v41 = vpop.permute.xlu1 %4320  ;;  %v9000_v56 = vmul.f32 %v8716_v45, %v6148_v34  ;;  %v5586_v34 = vld [vmem:[%s10553_s4 + $0x380] sm:$0xf]  ;;  %v9022_v4 = vmul.f32 %v8761_v58, %v8983_v63  ;;  %v5762_v58 = vld [vmem:[%s10553_s4 + $0x384] sm:$0xf] }
 0x1fd   : > { %2735 = vmatmul.bf16.gmra.mxu0 %v8957_v24  ;;  %6161 = vlog2.f32 %v740_v59  ;;  %11004 = vst [vmem:[#allocation267_spill] sm:$0xff] %v8985_v40  ;;  %v9015_v45 = vpop.permute.xlu2 %4336  ;;  %v9018_v59 = vmul.f32 %v6152_v8, %v8704_v2  ;;  %v11010_v2 = vld [vmem:[#allocation15_spill] sm:$0xff] }
 0x1fe   : > { %v2865_v31 = vpop.f32.mrf.mxu1  ;;  %3073 = vmatmul.bf16.gmra.mxu2 %v8965_v0  ;;  %6163 = vlog2.f32 %v741_v50  ;;  %11005 = vst [vmem:[#allocation268_spill] sm:$0xff] %v8992_v41  ;;  %v9037_v8 = vmul.f32 %v11010_v2, %v11010_v2  ;;  %v5765_v0 = vld [vmem:[%s10553_s4 + $0x394] sm:$0xf0] }
 0x1ff   : > { %v3200_v25 = vpop.f32.mrf.mxu3  ;;  %2904 = vmatmul.bf16.gmra.mxu1 %v8963_v47  ;;  %v2866_v9 = vadd.f32 %v2865_v31, %v2696_v1  ;;  %6165 = vpow2.f32 %v1334_v15  ;;  %v1439_v31 = vmul.f32 1.442695, %v1403_v30  ;;  %11006 = vst [vmem:[#allocation269_spill] sm:$0xff] %v9015_v45 }
 0x200   : > { %v3201_v18 = vadd.f32 %v3200_v25, %v3032_v32  ;;  %v6156_v17 = vpop.eup %6155  ;;  %6167 = vpow2.f32 %v1336_v28  ;;  %v9009_v32 = vmul.f32 %v8732_v19, %v8975_v62  ;;  %11007 = vst [vmem:[#allocation270_spill] sm:$0xff] %v9022_v4  ;;  %v5764_v19 = vld [vmem:[%s10553_s4 + $0x38c] sm:$0xf0]  ;;  %v11009_v25 = vld [vmem:[#allocation16_spill] sm:$0xff] }
 0x201   : > { %v8994_v21 = vpop.eup %6157  ;;  %6169 = vpow2.f32 %v1398_v54  ;;  %v904_v1 = vmul.f32 0.6931472, %v6156_v17  ;;  %3242 = vmatmul.bf16.gmra.mxu3 %v8985_v40  ;;  %11011 = vst [vmem:[#allocation16_spill] sm:$0xff] %v9037_v8  ;;  %v9048_v17 = vpop.permute.xlu0 %4352  ;;  %v9059_v24 = vor.u32 %v5764_v19, %v5586_v34  ;;  %v11015_v8 = vld [vmem:[#allocation17_spill] sm:$0xff] }
 0x202   : > { %3954 = vrot.lane.b32.xlu2 %v3201_v18, %s6292_s22  ;;  %v3034_v14 = vpop.f32.mrf.mxu2  ;;  %v9002_v15 = vpop.eup %6159  ;;  %v9029_v30 = vmul.f32 %v8799_v51, %v8994_v21  ;;  %v9033_v18 = vmul.f32 %v11009_v25, %v11009_v25  ;;  %v5594_v51 = vld [vmem:[%s10553_s4 + $0x388] sm:$0xf]  ;;  %11012 = vst [vmem:[#allocation15_spill] sm:$0xff] %v9048_v17  ;;  %v1106_v25 = vmul.f32 %v8669_v38, %v8948_v12  ;;  %6171 = vpow2.f32 %v1439_v31 }
 0x203   : > { %v2698_v10 = vpop.f32.mrf.mxu0  ;;  %v3035_v52 = vadd.f32 %v3034_v14, %v2866_v9  ;;  %v6162_v7 = vpop.eup %6161  ;;  %v1036_v50 = vmul.f32 -0.35, %v904_v1  ;;  %v1432_v28 = vmul.f32 0.15, %v904_v1  ;;  %v5588_v9 = vld [vmem:[%s10553_s4 + $0x390] sm:$0xf0]  ;;  %v9068_v34 = vmul.f32 %v11015_v8, %v11015_v8 }
 0x204   : > { %v6164_v54 = vpop.eup %6163  ;;  %11008 = vst [vmem:[#allocation271_spill] sm:$0xff] %v9029_v30  ;;  %v840_v14 = vmul.f32 0.6931472, %v6162_v7 }
 0x205   : > { %v9050_v1 = vpop.eup %6165  ;;  %v1101_v22 = vmul.f32 1.442695, %v1036_v50  ;;  %v1497_v45 = vmul.f32 1.442695, %v1432_v28  ;;  %v842_v41 = vmul.f32 0.6931472, %v6164_v54  ;;  %v9062_v54 = vor.u32 %v5762_v58, %v5588_v9 }
 0x206   : > { %v2867_v23 = vpop.f32.mrf.mxu1  ;;  %v9054_v3 = vpop.eup %6167  ;;  %v1004_v47 = vmul.f32 -0.35, %v840_v14  ;;  %v1400_v17 = vmul.f32 0.15, %v840_v14  ;;  %11013 = vst [vmem:[#allocation272_spill] sm:$0xff] %v9059_v24  ;;  %v11021_v58 = vld [vmem:[#allocation38_spill] sm:$0xff] }
 0x207   : > { %v3203_v2 = vpop.f32.mrf.mxu3  ;;  %v6170_v7 = vpop.eup %6169  ;;  %6173 = vpow2.f32 %v1101_v22  ;;  %v1005_v30 = vmul.f32 -0.35, %v842_v41  ;;  %v1401_v38 = vmul.f32 0.15, %v842_v41  ;;  %v2868_v12 = vadd.f32 %v2867_v23, %v2698_v10  ;;  %v11016_v22 = vld [vmem:[#allocation23_spill] sm:$0xff] }
 0x208   : > { %v3204_v40 = vadd.f32 %v3203_v2, %v3035_v52  ;;  %6175 = vpow2.f32 %v1497_v45  ;;  %v1037_v28 = vmul.f32 1.442695, %v1004_v47  ;;  %v1433_v31 = vmul.f32 1.442695, %v1400_v17  ;;  %v5763_v47 = vld [vmem:[%s10553_s4 + $0x38c] sm:$0xf]  ;;  %v9080_v23 = vpop.permute.xlu1 %4332 }
 0x209   : > { %v9064_v2 = vor.u32 %v5765_v0, %v5594_v51  ;;  %v1039_v4 = vmul.f32 1.442695, %v1005_v30  ;;  %v1435_v14 = vmul.f32 1.442695, %v1401_v38  ;;  %v9072_v41 = vmul.f32 %v11016_v22, %v11016_v22  ;;  %v5596_v0 = vld [vmem:[%s10553_s4 + $0x398] sm:$0xf0]  ;;  %v6172_v51 = vpop.eup %6171 }
 0x20a   : > { %3956 = vrot.lane.b32.xlu0 %v3204_v40, %s6292_s22  ;;  %v3036_v50 = vpop.f32.mrf.mxu2  ;;  %6177 = vpow2.f32 %v1037_v28  ;;  %11017 = vst [vmem:[#allocation17_spill] sm:$0xff] %v9080_v23  ;;  %v11018_v45 = vld [vmem:[#allocation25_spill] sm:$0xff]  ;;  %v9092_v9 = vmul.f32 %v11021_v58, %v11021_v58  ;;  %v11022_v17 = vld [vmem:[#allocation66_spill] sm:$0xff]  ;;  %v11024_v28 = vld [vmem:[#allocation139_spill] sm:$0xff]  ;;  %v1271_v58 = vsub.f32 %v8989_v49, %v8711_v11  ;;  %v1502_v11 = vsub.f32 %v8954_v57, %v6172_v51 }
 0x20b   : > { %v2701_v52 = vpop.f32.mrf.mxu0  ;;  %11014 = vst [vmem:[#allocation273_spill] sm:$0xff] %v9064_v2  ;;  %v3037_v40 = vadd.f32 %v3036_v50, %v2868_v12  ;;  %v9084_v19 = vmul.f32 %v11018_v45, %v11018_v45  ;;  %v11020_v30 = vld [vmem:[#allocation37_spill] sm:$0xff]  ;;  %6179 = vpow2.f32 %v1039_v4  ;;  %v9096_v38 = vmul.f32 %v11022_v17, %v11022_v17  ;;  %v11023_v12 = vld [vmem:[#allocation138_spill] sm:$0xff]  ;;  %v9107_v45 = vpop.permute.xlu2 %4348 }
 0x20c   : > { %v9088_v8 = vmul.f32 %v11020_v30, %v11020_v30  ;;  %v9100_v50 = vmul.f32 %v11023_v12, %v11023_v12  ;;  %v9104_v22 = vmul.f32 %v11024_v28, %v11024_v28  ;;  %6181 = vpow2.f32 %v1433_v31  ;;  %11025 = vst [vmem:[#allocation25_spill] sm:$0xff] %v9107_v45 }
 0x20d   : > { %11019 = vst [vmem:[#allocation23_spill] sm:$0xff] %v9084_v19  ;;  %2740 = vmatmul.bf16.gmra.mxu0 %v9059_v24  ;;  %v6174_v30 = vpop.eup %6173  ;;  %v1172_v4 = vsub.f32 %v1106_v25, %v8708_v46  ;;  %v9114_v12 = vor.u32 %v5763_v47, %v5596_v0  ;;  %6183 = vpow2.f32 %v1435_v14  ;;  %v9118_v19 = vpop.permute.xlu0 %4364  ;;  %v9122_v46 = vmul.f32 %v8343_v6, %v8343_v6 }
 0x20e   : > { %v2870_v10 = vpop.f32.mrf.mxu1  ;;  %3078 = vmatmul.bf16.gmra.mxu2 %v9064_v2  ;;  %v6176_v28 = vpop.eup %6175  ;;  %v1168_v31 = vmul.f32 %v6174_v30, %v8889_v5  ;;  %v1267_v45 = vmul.f32 %v6174_v30, %v8902_v27  ;;  %11027 = vst [vmem:[#allocation38_spill] sm:$0xff] %v9118_v19  ;;  %v9127_v49 = vmul.f32 %v8720_v16, %v8720_v16 }
 0x20f   : > { %v3205_v17 = vpop.f32.mrf.mxu3  ;;  %2909 = vmatmul.bf16.gmra.mxu1 %v9062_v54  ;;  %11026 = vst [vmem:[#allocation37_spill] sm:$0xff] %v9114_v12  ;;  %v2871_v24 = vadd.f32 %v2870_v10, %v2701_v52  ;;  %v9129_v25 = vsub.f32 %v6170_v7, %v6176_v28  ;;  %v9133_v5 = vmul.f32 %v8722_v61, %v8722_v61 }
 0x210   : > { %v3206_v23 = vadd.f32 %v3205_v17, %v3037_v40  ;;  %v6178_v14 = vpop.eup %6177  ;;  %v9136_v27 = vsub.f32 %v9005_v35, %v1168_v31  ;;  %v9139_v52 = vsub.f32 %v9018_v59, %v1267_v45  ;;  %v1104_v16 = vmul.f32 %v8727_v37, %v8975_v62 }
 0x211   : > { %v6180_v57 = vpop.eup %6179  ;;  %v9144_v7 = vmul.f32 %v1172_v4, %v1172_v4  ;;  %v9148_v40 = vmul.f32 %v8724_v42, %v8724_v42  ;;  %v1136_v61 = vmul.f32 %v6178_v14, %v8943_v39  ;;  %v1235_v35 = vmul.f32 %v6178_v14, %v8892_v60  ;;  %3247 = vmatmul.bf16.gmra.mxu3 %v9114_v12 }
 0x212   : > { %3958 = vrot.lane.b32.xlu1 %v3206_v23, %s6292_s22  ;;  %v3039_v6 = vpop.f32.mrf.mxu2  ;;  %v6182_v59 = vpop.eup %6181  ;;  %v9152_v47 = vmul.f32 %v1271_v58, %v1271_v58  ;;  %v1137_v37 = vmul.f32 %v6180_v57, %v8946_v29  ;;  %v1236_v62 = vmul.f32 %v6180_v57, %v8895_v33  ;;  %v1687_v45 = vmul.f32 %v1502_v11, %v1502_v11  ;;  %v5602_v33 = vld [vmem:[%s10553_s4 + $0x3a0] sm:$0xf] }
 0x213   : > { %v2703_v10 = vpop.f32.mrf.mxu0  ;;  %v3040_v0 = vadd.f32 %v3039_v6, %v2871_v24  ;;  %v6184_v51 = vpop.eup %6183  ;;  %v1169_v42 = vsub.f32 %v8997_v55, %v1136_v61  ;;  %v1268_v30 = vsub.f32 %v9000_v56, %v1235_v35  ;;  %v1499_v60 = vsub.f32 %v9050_v1, %v6182_v59  ;;  %v5768_v55 = vld [vmem:[%s10553_s4 + $0x3ac] sm:$0xf0]  ;;  %v5604_v6 = vld [vmem:[%s10553_s4 + $0x3b0] sm:$0xf0]  ;;  %v9186_v59 = vld [vmem:[%s6575_s15 + $0x80] sm:$0xff] }
 0x214   : > { %v690_v4 = vmul.f32 %v8915_v53, %v8915_v53  ;;  %v691_v58 = vmul.f32 %v8918_v13, %v8918_v13  ;;  %v1170_v24 = vsub.f32 %v1104_v16, %v1137_v37  ;;  %v1269_v17 = vsub.f32 %v9009_v32, %v1236_v62  ;;  %v9171_v56 = vpop.permute.xlu1 %4344  ;;  %v5766_v32 = vld [vmem:[%s10553_s4 + $0x3a4] sm:$0xf]  ;;  %v5610_v16 = vld [vmem:[%s10553_s4 + $0x3a8] sm:$0xf]  ;;  %v5769_v62 = vld [vmem:[%s10553_s4 + $0x3b4] sm:$0xf0] }
 0x215   : > { %11028 = vst [vmem:[#allocation66_spill] sm:$0xff] %v9171_v56  ;;  %v1500_v28 = vsub.f32 %v9054_v3, %v6184_v51  ;;  %v1533_v31 = vmul.f32 %v1169_v42, %v1169_v42  ;;  %v1609_v11 = vmul.f32 %v1268_v30, %v1268_v30  ;;  %v1684_v14 = vmul.f32 %v1499_v60, %v1499_v60  ;;  %v9189_v37 = vld [vmem:[%s6575_s15 + $0x88] sm:$0xff]  ;;  %v9194_v51 = vpop.permute.xlu2 %4360  ;;  %v9204_v19 = vpop.permute.xlu0 %4376 }
 0x216   : > { %v2872_v23 = vpop.f32.mrf.mxu1  ;;  %v1534_v61 = vmul.f32 %v1170_v24, %v1170_v24  ;;  %v1610_v35 = vmul.f32 %v1269_v17, %v1269_v17  ;;  %v1761_v3 = vpack.c.bf16 %v8946_v29, %v8943_v39  ;;  %11029 = vst [vmem:[#allocation138_spill] sm:$0xff] %v9194_v51  ;;  %v657_v30 = vmul.f32 %v9186_v59, %v9186_v59 }
 0x217   : > { %v3208_v1 = vpop.f32.mrf.mxu3  ;;  %v1685_v42 = vmul.f32 %v1500_v28, %v1500_v28  ;;  %v9200_v60 = vor.u32 %v5768_v55, %v5602_v33  ;;  %v2873_v24 = vadd.f32 %v2872_v23, %v2703_v10  ;;  %11030 = vst [vmem:[#allocation139_spill] sm:$0xff] %v9204_v19  ;;  %v9207_v2 = vor.u32 %v5769_v62, %v5610_v16 }
 0x218   : > { %v3209_v57 = vadd.f32 %v3208_v1, %v3040_v0  ;;  %v658_v0 = vmul.f32 %v9189_v37, %v9189_v37  ;;  %v1566_v39 = vadd.f32 %v1534_v61, %v1533_v31  ;;  %v1642_v29 = vadd.f32 %v1610_v35, %v1609_v11  ;;  %3275 = vmatpush.bf16.msrb.mxu0 %v1761_v3  ;;  %v5767_v11 = vld [vmem:[%s10553_s4 + $0x3ac] sm:$0xf]  ;;  %v11032_v61 = vld [vmem:[#allocation67_spill] sm:$0xff] }
 0x219   : > { %v9202_v1 = vor.u32 %v5766_v32, %v5604_v6  ;;  %v1717_v56 = vadd.f32 %v1685_v42, %v1684_v14  ;;  %v723_v51 = vadd.f32 %v690_v4, %v657_v30  ;;  %v1613_v33 = vmul.f32 %v8345_v20, %v8345_v20  ;;  %v5612_v4 = vld [vmem:[%s10553_s4 + $0x3b8] sm:$0xf0]  ;;  %v11035_v30 = vld [vmem:[#allocation143_spill] sm:$0xff] }
 0x21a   : > { %v3041_v17 = vpop.f32.mrf.mxu2  ;;  %v724_v28 = vadd.f32 %v691_v58, %v658_v0  ;;  %3960 = vrot.lane.b32.xlu2 %v3209_v57, %s6292_s22  ;;  %v1567_v55 = vadd.f32 %v1566_v39, %v9127_v49  ;;  %v1643_v10 = vadd.f32 %v1642_v29, %v9133_v5  ;;  %v1688_v58 = vmul.f32 %v8348_v36, %v8348_v36 }
 0x21b   : > { %v2706_v12 = vpop.f32.mrf.mxu0  ;;  %v3042_v23 = vadd.f32 %v3041_v17, %v2873_v24  ;;  %v1718_v14 = vadd.f32 %v1717_v56, %v9148_v40  ;;  %v756_v20 = vadd.f32 1e-12, %v723_v51  ;;  %v1538_v49 = vmul.f32 %v8356_v26, %v8356_v26  ;;  %v11034_v51 = vld [vmem:[#allocation142_spill] sm:$0xff] }
 0x21c   : > { %v757_v32 = vadd.f32 1e-12, %v724_v28  ;;  %v1614_v5 = vmul.f32 %v8358_v44, %v8358_v44  ;;  %v1568_v6 = vadd.f32 %v1567_v55, %v9144_v7  ;;  %v1644_v16 = vadd.f32 %v1643_v10, %v9152_v47  ;;  %v9236_v47 = vpop.permute.xlu1 %4356  ;;  %v11037_v17 = vld [vmem:[#allocation70_spill] sm:$0xff]  ;;  %v11039_v55 = vld [vmem:[#allocation144_spill] sm:$0xff] }
 0x21d   : > { %2745 = vmatmul.bf16.gmra.mxu0 %v9200_v60  ;;  %v1689_v57 = vmul.f32 %v8361_v48, %v8361_v48  ;;  %v1719_v36 = vadd.f32 %v1718_v14, %v1687_v45  ;;  %6185 = vlog2.f32 %v756_v20  ;;  %v9233_v26 = vor.u32 %v5767_v11, %v5612_v4  ;;  %11031 = vst [vmem:[#allocation274_spill] sm:$0xff] %v9236_v47  ;;  %v11033_v48 = vld [vmem:[#allocation140_spill] sm:$0xff]  ;;  %v9249_v24 = vpop.permute.xlu2 %4372  ;;  %v11040_v11 = vld [vmem:[#allocation102_spill] sm:$0xff] }
 0x21e   : > { %v2875_v31 = vpop.f32.mrf.mxu1  ;;  %3083 = vmatmul.bf16.gmra.mxu2 %v9207_v2  ;;  %v1569_v44 = vadd.f32 %v1568_v6, %v9122_v46  ;;  %v1645_v56 = vadd.f32 %v1644_v16, %v1613_v33  ;;  %6187 = vlog2.f32 %v757_v32  ;;  %v9240_v35 = vmul.f32 %v11032_v61, %v11032_v61  ;;  %11036 = vst [vmem:[#allocation67_spill] sm:$0xff] %v9249_v24  ;;  %v11038_v33 = vld [vmem:[#allocation68_spill] sm:$0xff]  ;;  %v11043_v16 = vld [vmem:[#allocation105_spill] sm:$0xff]  ;;  %v11045_v61 = vld [vmem:[#allocation106_spill] sm:$0xff] }
 0x21f   : > { %v3210_v40 = vpop.f32.mrf.mxu3  ;;  %2914 = vmatmul.bf16.gmra.mxu1 %v9202_v1  ;;  %v1690_v45 = vmul.f32 %v11033_v48, %v11033_v48  ;;  %v1720_v3 = vadd.f32 %v1719_v36, %v1688_v58  ;;  %v2876_v62 = vadd.f32 %v2875_v31, %v2706_v12  ;;  %v1540_v42 = vmul.f32 %v11034_v51, %v11034_v51  ;;  %v11041_v58 = vld [vmem:[#allocation103_spill] sm:$0xff]  ;;  %v11044_v36 = vld [vmem:[#allocation104_spill] sm:$0xff] }
 0x220   : > { %v3211_v7 = vadd.f32 %v3210_v40, %v3042_v23  ;;  %v1616_v46 = vmul.f32 %v11035_v30, %v11035_v30  ;;  %v1570_v0 = vadd.f32 %v1569_v44, %v1538_v49  ;;  %v1646_v39 = vadd.f32 %v1645_v56, %v1614_v5  ;;  %v9266_v5 = vpop.permute.xlu0 %4388  ;;  %v5618_v51 = vld [vmem:[%s10553_s4 + $0x3c0] sm:$0xf]  ;;  %v5772_v30 = vld [vmem:[%s10553_s4 + $0x3cc] sm:$0xf0] }
 0x221   : > { %v9253_v28 = vmul.f32 %v11037_v17, %v11037_v17  ;;  %v1694_v12 = vmul.f32 %v11038_v33, %v11038_v33  ;;  %v1691_v10 = vmul.f32 %v11039_v55, %v11039_v55  ;;  %v1721_v23 = vadd.f32 %v1720_v3, %v1689_v57  ;;  %3252 = vmatmul.bf16.gmra.mxu3 %v9233_v26  ;;  %v5620_v33 = vld [vmem:[%s10553_s4 + $0x3d0] sm:$0xf0]  ;;  %v11048_v55 = vld [vmem:[#allocation72_spill] sm:$0xff] }
 0x222   : > { %3962 = vrot.lane.b32.xlu0 %v3211_v7, %s6292_s22  ;;  %v3044_v29 = vpop.f32.mrf.mxu2  ;;  %v1541_v4 = vmul.f32 %v11040_v11, %v11040_v11  ;;  %v1617_v14 = vmul.f32 %v11041_v58, %v11041_v58  ;;  %v1571_v20 = vadd.f32 %v1570_v0, %v9100_v50  ;;  %v1647_v32 = vadd.f32 %v1646_v39, %v9104_v22  ;;  %v11046_v0 = vld [vmem:[#allocation71_spill] sm:$0xff] }
 0x223   : > { %v2708_v31 = vpop.f32.mrf.mxu0  ;;  %11042 = vst [vmem:[#allocation140_spill] sm:$0xff] %v9266_v5  ;;  %v6186_v6 = vpop.eup %6185  ;;  %v1542_v57 = vmul.f32 %v11043_v16, %v11043_v16  ;;  %v1692_v40 = vmul.f32 %v11044_v36, %v11044_v36  ;;  %v1722_v44 = vadd.f32 %v1721_v23, %v1690_v45  ;;  %v3045_v56 = vadd.f32 %v3044_v29, %v2876_v62  ;;  %v11047_v62 = vld [vmem:[#allocation107_spill] sm:$0xff] }
 0x224   : > { %v6188_v7 = vpop.eup %6187  ;;  %v1618_v50 = vmul.f32 %v11045_v61, %v11045_v61  ;;  %v1572_v48 = vadd.f32 %v1571_v20, %v1540_v42  ;;  %v1648_v22 = vadd.f32 %v1647_v32, %v1616_v46  ;;  %v9274_v3 = vmul.f32 0.6931472, %v6186_v6  ;;  %v5770_v46 = vld [vmem:[%s10553_s4 + $0x3c4] sm:$0xf]  ;;  %v5773_v32 = vld [vmem:[%s10553_s4 + $0x3d4] sm:$0xf0] }
 0x225   : > { %v1620_v45 = vmul.f32 %v11046_v0, %v11046_v0  ;;  %v1693_v39 = vmul.f32 %v11047_v62, %v11047_v62  ;;  %v1723_v29 = vadd.f32 %v1722_v44, %v1691_v10  ;;  %v9286_v17 = vmul.f32 0.6931472, %v6188_v7  ;;  %v5626_v10 = vld [vmem:[%s10553_s4 + $0x3c8] sm:$0xf] }
 0x226   : > { %v2877_v49 = vpop.f32.mrf.mxu1  ;;  %v1695_v23 = vmul.f32 %v11048_v55, %v11048_v55  ;;  %v1573_v11 = vadd.f32 %v1572_v48, %v1541_v4  ;;  %v1649_v58 = vadd.f32 %v1648_v22, %v1617_v14  ;;  %v1020_v20 = vmul.f32 -0.35, %v9274_v3  ;;  %v9306_v22 = vpop.permute.xlu1 %4368 }
 0x227   : > { %v3213_v42 = vpop.f32.mrf.mxu3  ;;  %v1724_v6 = vadd.f32 %v1723_v29, %v1692_v40  ;;  %v1021_v16 = vmul.f32 -0.35, %v9286_v17  ;;  %v9304_v44 = vor.u32 %v5772_v30, %v5618_v51  ;;  %v2878_v14 = vadd.f32 %v2877_v49, %v2708_v31  ;;  %11049 = vst [vmem:[#allocation142_spill] sm:$0xff] %v9306_v22  ;;  %v9315_v31 = vpop.permute.xlu2 %4384  ;;  %v11051_v49 = vld [vmem:[#allocation40_spill] sm:$0xff] }
 0x228   : > { %v3214_v36 = vadd.f32 %v3213_v42, %v3045_v56  ;;  %v1650_v7 = vadd.f32 %v1649_v58, %v1618_v50  ;;  %v1069_v61 = vmul.f32 1.442695, %v1020_v20  ;;  %v1574_v4 = vadd.f32 %v1573_v11, %v1542_v57  ;;  %11050 = vst [vmem:[#allocation143_spill] sm:$0xff] %v9315_v31  ;;  %v11054_v11 = vld [vmem:[#allocation42_spill] sm:$0xff] }
 0x229   : > { %v1725_v0 = vadd.f32 %v1724_v6, %v1693_v39  ;;  %v1071_v62 = vmul.f32 1.442695, %v1021_v16  ;;  %v9309_v5 = vor.u32 %v5770_v46, %v5620_v33  ;;  %v9311_v40 = vor.u32 %v5773_v32, %v5626_v10  ;;  %v11052_v39 = vld [vmem:[#allocation39_spill] sm:$0xff]  ;;  %v5771_v46 = vld [vmem:[%s10553_s4 + $0x3cc] sm:$0xf] }
 0x22a   : > { %v3046_v48 = vpop.f32.mrf.mxu2  ;;  %3964 = vrot.lane.b32.xlu1 %v3214_v36, %s6292_s22  ;;  %v1651_v56 = vadd.f32 %v1650_v7, %v9240_v35  ;;  %6189 = vpow2.f32 %v1069_v61  ;;  %v1575_v50 = vadd.f32 %v1574_v4, %v9096_v38  ;;  %v1546_v30 = vmul.f32 %v11051_v49, %v11051_v49  ;;  %v5628_v38 = vld [vmem:[%s10553_s4 + $0x3d8] sm:$0xf0]  ;;  %v11053_v35 = vld [vmem:[#allocation41_spill] sm:$0xff] }
 0x22b   : > { %v2711_v55 = vpop.f32.mrf.mxu0  ;;  %v3047_v51 = vadd.f32 %v3046_v48, %v2878_v14  ;;  %v1696_v29 = vmul.f32 %v11052_v39, %v11052_v39  ;;  %v1726_v42 = vadd.f32 %v1725_v0, %v1694_v12  ;;  %6191 = vpow2.f32 %v1071_v62  ;;  %v9333_v12 = vpop.permute.xlu0 %4400  ;;  %v11056_v4 = vld [vmem:[#allocation26_spill] sm:$0xff]  ;;  %v6261_v14 = vld [vmem:[%s6350_s25 + $0x90] sm:$0xff]  ;;  %v11057_v62 = vld [vmem:[#allocation235_spill] sm:$0xff] }
 0x22c   : > { %v1622_v33 = vmul.f32 %v11053_v35, %v11053_v35  ;;  %v1697_v58 = vmul.f32 %v11054_v11, %v11054_v11  ;;  %v1652_v20 = vadd.f32 %v1651_v56, %v1620_v45  ;;  %v1576_v10 = vadd.f32 %v1575_v50, %v9253_v28  ;;  %11055 = vst [vmem:[#allocation70_spill] sm:$0xff] %v9333_v12  ;;  %v6262_v50 = vld [vmem:[%s6350_s25 + $0x98] sm:$0xff] }
 0x22d   : > { %2750 = vmatmul.bf16.gmra.mxu0 %v9304_v44  ;;  %v1727_v32 = vadd.f32 %v1726_v42, %v1695_v23  ;;  %v1777_v6 = vpack.c.bf16 %v9189_v37, %v9186_v59  ;;  %v9341_v61 = vor.u32 %v5771_v46, %v5628_v38  ;;  %v1624_v23 = vmul.f32 %v11056_v4, %v11056_v4 }
 0x22e   : > { %v2880_v57 = vpop.f32.mrf.mxu1  ;;  %3088 = vmatmul.bf16.gmra.mxu2 %v9311_v40  ;;  %v1653_v7 = vadd.f32 %v1652_v20, %v9092_v9  ;;  %v1577_v45 = vadd.f32 %v1576_v10, %v9088_v8  ;;  %v1121_v48 = vmul.f32 %v6261_v14, %v8961_v43  ;;  %v1122_v9 = vmul.f32 %v6262_v50, %v9002_v15  ;;  %v11058_v8 = vld [vmem:[#allocation243_spill] sm:$0xff]  ;;  %v9361_v10 = vpop.permute.xlu1 %4380 }
 0x22f   : > { %v3215_v16 = vpop.f32.mrf.mxu3  ;;  %v2881_v36 = vadd.f32 %v2880_v57, %v2711_v55  ;;  %2919 = vmatmul.bf16.gmra.mxu1 %v9309_v5  ;;  %v1728_v0 = vadd.f32 %v1727_v32, %v1696_v29  ;;  %v1119_v55 = vmul.f32 %v11057_v62, %v8983_v63  ;;  %11059 = vst [vmem:[#allocation68_spill] sm:$0xff] %v9361_v10  ;;  %v11212_v10 = vld [vmem:[#allocation92_spill] sm:$0xff] }
 0x230   : > { %v3216_v28 = vadd.f32 %v3215_v16, %v3047_v51  ;;  %3444 = vmatpush.bf16.msrb.mxu1 %v1777_v6  ;;  %v6190_v56 = vpop.eup %6189  ;;  %v1654_v57 = vadd.f32 %v1653_v7, %v1622_v33  ;;  %v1120_v51 = vmul.f32 %v11058_v8, %v8994_v21  ;;  %v1578_v49 = vadd.f32 %v1577_v45, %v1546_v30  ;;  %v11062_v16 = vld [vmem:[#allocation270_spill] sm:$0xff]  ;;  %v11063_v7 = vld [vmem:[#allocation271_spill] sm:$0xff]  ;;  %v11065_v45 = vld [vmem:[#allocation236_spill] sm:$0xff] }
 0x231   : > { %v6192_v42 = vpop.eup %6191  ;;  %v1729_v46 = vadd.f32 %v1728_v0, %v1697_v58  ;;  %v1152_v29 = vmul.f32 %v6190_v56, %v9186_v59  ;;  %v1251_v38 = vmul.f32 %v6190_v56, %v8915_v53  ;;  %3257 = vmatmul.bf16.gmra.mxu3 %v9341_v61  ;;  %v11060_v58 = vld [vmem:[#allocation234_spill] sm:$0xff]  ;;  %v11061_v59 = vld [vmem:[#allocation16_spill] sm:$0xff]  ;;  %v5774_v56 = vld [vmem:[%s10553_s4 + $0x3e4] sm:$0xf] }
 0x232   : > { %3966 = vrot.lane.b32.xlu2 %v3216_v28, %s6292_s22  ;;  %v3049_v39 = vpop.f32.mrf.mxu2  ;;  %v1655_v11 = vadd.f32 %v1654_v57, %v9068_v34  ;;  %v1153_v20 = vmul.f32 %v6192_v42, %v9189_v37  ;;  %v1252_v33 = vmul.f32 %v6192_v42, %v8918_v13  ;;  %v1579_v21 = vadd.f32 %v1578_v49, %v9033_v18  ;;  %v9373_v18 = vpop.permute.xlu2 %4396  ;;  %v5636_v57 = vld [vmem:[%s10553_s4 + $0x3f0] sm:$0xf0]  ;;  %v5642_v8 = vld [vmem:[%s10553_s4 + $0x3e8] sm:$0xf] }
 0x233   : > { %v3050_v63 = vadd.f32 %v3049_v39, %v2881_v36  ;;  %v2713_v35 = vpop.f32.mrf.mxu0  ;;  %v1187_v32 = vsub.f32 %v1121_v48, %v11060_v58  ;;  %v1730_v6 = vadd.f32 %v1729_v46, %v11061_v59  ;;  %v1185_v53 = vsub.f32 %v1119_v55, %v1152_v29  ;;  %11064 = vst [vmem:[#allocation144_spill] sm:$0xff] %v9373_v18  ;;  %v11066_v48 = vld [vmem:[#allocation23_spill] sm:$0xff]  ;;  %v5776_v55 = vld [vmem:[%s10553_s4 + $0x3ec] sm:$0xf0] }
 0x234   : > { %v9366_v36 = vsub.f32 %v11062_v16, %v1251_v38  ;;  %v9368_v34 = vadd.f32 %v1655_v11, %v1624_v23  ;;  %v1186_v37 = vsub.f32 %v1120_v51, %v1153_v20  ;;  %v9371_v13 = vsub.f32 %v11063_v7, %v1252_v33  ;;  %v5634_v23 = vld [vmem:[%s10553_s4 + $0x3e0] sm:$0xf]  ;;  %v5777_v51 = vld [vmem:[%s10553_s4 + $0x3f4] sm:$0xf0]  ;;  %v11070_v16 = vld [vmem:[#allocation193_spill] sm:$0xff] }
 0x235   : > { %v1188_v28 = vsub.f32 %v1122_v9, %v11065_v45  ;;  %v9377_v4 = vadd.f32 %v1730_v6, %v9072_v41  ;;  %v1549_v14 = vmul.f32 %v1185_v53, %v1185_v53  ;;  %v1580_v0 = vadd.f32 %v1579_v21, %v11066_v48  ;;  %v9389_v41 = vpop.permute.xlu0 %4412  ;;  %v11068_v21 = vld [vmem:[#allocation250_spill] sm:$0xff]  ;;  %v11069_v53 = vld [vmem:[#allocation255_spill] sm:$0xff] }
 0x236   : > { %v2882_v30 = vpop.f32.mrf.mxu1  ;;  %v1550_v50 = vmul.f32 %v1186_v37, %v1186_v37  ;;  %11067 = vst [vmem:[#allocation102_spill] sm:$0xff] %v9389_v41  ;;  %v1551_v49 = vmul.f32 %v1187_v32, %v1187_v32  ;;  %v9401_v29 = vor.u32 %v5776_v55, %v5634_v23  ;;  %v9403_v20 = vor.u32 %v5774_v56, %v5636_v57  ;;  %v5775_v37 = vld [vmem:[%s10553_s4 + $0x3ec] sm:$0xf]  ;;  %v5644_v7 = vld [vmem:[%s10553_s4 + $0x3f8] sm:$0xf0]  ;;  %v11071_v45 = vld [vmem:[#allocation259_spill] sm:$0xff] }
 0x237   : > { %v3218_v62 = vpop.f32.mrf.mxu3  ;;  %v1581_v39 = vadd.f32 %v1580_v0, %v1549_v14  ;;  %v2883_v42 = vadd.f32 %v2882_v30, %v2713_v35  ;;  %v1552_v38 = vmul.f32 %v1188_v28, %v1188_v28  ;;  %v9405_v33 = vor.u32 %v5777_v51, %v5642_v8  ;;  %v9419_v14 = vpop.permute.xlu1 %4392  ;;  %v11073_v48 = vld [vmem:[#allocation251_spill] sm:$0xff]  ;;  %v11108_v41 = vld [vmem:[#allocation77_spill] sm:$0xff] }
 0x238   : > { %v3219_v9 = vadd.f32 %v3218_v62, %v3050_v63  ;;  %v1319_v58 = vmul.f32 0.15, %v11068_v21  ;;  %v1317_v32 = vmul.f32 0.15, %v11069_v53  ;;  %v1553_v35 = vmul.f32 %v11070_v16, %v11070_v16  ;;  %11072 = vst [vmem:[#allocation103_spill] sm:$0xff] %v9419_v14  ;;  %v11074_v62 = vld [vmem:[#allocation197_spill] sm:$0xff] }
 0x239   : > { %v1582_v63 = vadd.f32 %v1581_v39, %v1550_v50  ;;  %v1318_v28 = vmul.f32 0.15, %v11071_v45  ;;  %v1320_v0 = vmul.f32 0.15, %v11073_v48  ;;  %v1554_v23 = vmul.f32 %v11074_v62, %v11074_v62  ;;  %v11076_v39 = vld [vmem:[#allocation147_spill] sm:$0xff] }
 0x23a   : > { %3968 = vrot.lane.b32.xlu0 %v3219_v9, %s6292_s22  ;;  %v3051_v46 = vpop.f32.mrf.mxu2  ;;  %v1370_v50 = vmul.f32 1.442695, %v1319_v58  ;;  %v9426_v8 = vor.u32 %v5775_v37, %v5644_v7  ;;  %v9428_v51 = vpop.permute.xlu2 %4408  ;;  %v4072_v53 = vlaneseq  ;;  %v6263_v58 = vld [vmem:[%s6356_s28 + $0x90] sm:$0xff]  ;;  %v11211_v18 = vld [vmem:[#allocation91_spill] sm:$0xff] }
 0x23b   : > { %v2716_v11 = vpop.f32.mrf.mxu0  ;;  %v3052_v59 = vadd.f32 %v3051_v46, %v2883_v42  ;;  %v1583_v30 = vadd.f32 %v1582_v63, %v1551_v49  ;;  %11075 = vst [vmem:[#allocation105_spill] sm:$0xff] %v9428_v51  ;;  %v1366_v49 = vmul.f32 1.442695, %v1317_v32  ;;  %v1555_v42 = vmul.f32 %v11076_v39, %v11076_v39  ;;  %v6264_v32 = vld [vmem:[%s6356_s28 + $0x98] sm:$0xff] }
 0x23c   : > { %v1221_v37 = vmul.f32 %v6264_v32, %v9002_v15  ;;  %6193 = vpow2.f32 %v1370_v50  ;;  %v9448_v15 = vand.u32 127, %v4072_v53 }
 0x23d   : > { %2755 = vmatmul.bf16.gmra.mxu0 %v9401_v29  ;;  %v1584_v55 = vadd.f32 %v1583_v30, %v1552_v38  ;;  %v1368_v38 = vmul.f32 1.442695, %v1318_v28  ;;  %v9433_v63 = vpop.permute.xlu0 %4424  ;;  %6195 = vpow2.f32 %v1366_v49  ;;  %v11079_v28 = vld [vmem:[#allocation110_spill] sm:$0xff]  ;;  %v11083_v49 = vld [vmem:[#allocation224_spill] sm:$0xff] }
 0x23e   : > { %v2885_v6 = vpop.f32.mrf.mxu1  ;;  %3093 = vmatmul.bf16.gmra.mxu2 %v9405_v33  ;;  %11077 = vst [vmem:[#allocation104_spill] sm:$0xff] %v9433_v63  ;;  %v1557_v48 = vmul.f32 %v11079_v28, %v11079_v28  ;;  %v1418_v39 = vmul.f32 0.15, %v11083_v49  ;;  %vm4074_vm2 = vcmp.eq.s32.totalorder %v9448_v15, 0  ;;  %vm4462_vm4 = vcmp.ge.s32.totalorder %v9448_v15, 1 }
 0x23f   : > { %v3220_v56 = vpop.f32.mrf.mxu3  ;;  %2924 = vmatmul.bf16.gmra.mxu1 %v9403_v20  ;;  %v2886_v57 = vadd.f32 %v2885_v6, %v2716_v11  ;;  %v1585_v46 = vadd.f32 %v1584_v55, %v1553_v35  ;;  %v1220_v11 = vmul.f32 %v6263_v58, %v8961_v43  ;;  %v1372_v35 = vmul.f32 1.442695, %v1320_v0  ;;  %v11080_v55 = vld [vmem:[#allocation73_spill] sm:$0xff]  ;;  %v11081_v0 = vld [vmem:[#allocation114_spill] sm:$0xff]  ;;  %v11084_v58 = vld [vmem:[#allocation75_spill] sm:$0xff] }
 0x240   : > { %v3221_v9 = vadd.f32 %v3220_v56, %v3052_v59  ;;  %v11078_v59 = vld [vmem:[#allocation152_spill] sm:$0xff]  ;;  %v1416_v43 = vmul.f32 0.15, %v9274_v3  ;;  %6197 = vpow2.f32 %v1368_v38  ;;  %v1417_v56 = vmul.f32 0.15, %v9286_v17  ;;  %v9458_v17 = vpop.permute.xlu1 %4404 }
 0x241   : > { %v1556_v6 = vmul.f32 %v11078_v59, %v11078_v59  ;;  %v1586_v16 = vadd.f32 %v1585_v46, %v1554_v23  ;;  %3262 = vmatmul.bf16.gmra.mxu3 %v9426_v8  ;;  %v1559_v23 = vmul.f32 %v11080_v55, %v11080_v55  ;;  %v1558_v50 = vmul.f32 %v11081_v0, %v11081_v0  ;;  %v11086_v59 = vld [vmem:[#allocation226_spill] sm:$0xff] }
 0x242   : > { %3970 = vrot.lane.b32.xlu1 %v3221_v9, %s6292_s22  ;;  %v3054_v21 = vpop.f32.mrf.mxu2  ;;  %v11082_v9 = vld [vmem:[#allocation237_spill] sm:$0xff]  ;;  %v1560_v3 = vmul.f32 %v11084_v58, %v11084_v58  ;;  %11087 = vst [vmem:[#allocation106_spill] sm:$0xff] %v9458_v17  ;;  %v1465_v53 = vmul.f32 1.442695, %v1416_v43  ;;  %v1625_v55 = vmul.f32 %v9366_v36, %v9366_v36  ;;  %vm4463_vm5 = vcmp.le.s32.totalorder %v9448_v15, 7 }
 0x243   : > { %v2718_v30 = vpop.f32.mrf.mxu0  ;;  %v3055_v7 = vadd.f32 %v3054_v21, %v2886_v57  ;;  %v1587_v62 = vadd.f32 %v1586_v16, %v1555_v42  ;;  %v1286_v57 = vsub.f32 %v1220_v11, %v11082_v9  ;;  %v11085_v42 = vld [vmem:[#allocation238_spill] sm:$0xff]  ;;  %v1419_v16 = vmul.f32 0.15, %v11086_v59  ;;  %vm9778_vm6 = vmand %vm4462_vm4, %vm4463_vm5 }
 0x244   : > { %v1287_v38 = vsub.f32 %v1221_v37, %v11085_v42  ;;  %v1626_v11 = vmul.f32 %v9371_v13, %v9371_v13  ;;  %v9467_v37 = vpop.permute.xlu2 %4420  ;;  %v1657_v49 = vadd.f32 %v9368_v34, %v1625_v55  ;;  %6199 = vpow2.f32 %v1465_v53  ;;  %v11091_v34 = vld [vmem:[#allocation21_spill] sm:$0xff] }
 0x245   : > { %v1588_v46 = vadd.f32 %v1587_v62, %v1556_v6  ;;  %v9464_v6 = vpop.eup %6193  ;;  %v1467_v62 = vmul.f32 1.442695, %v1417_v56  ;;  %11088 = vst [vmem:[#allocation71_spill] sm:$0xff] %v9467_v37  ;;  %v1627_v9 = vmul.f32 %v1286_v57, %v1286_v57  ;;  %v11090_v37 = vld [vmem:[#allocation187_spill] sm:$0xff] }
 0x246   : > { %v2887_v45 = vpop.f32.mrf.mxu1  ;;  %v9470_v43 = vpop.eup %6195  ;;  %v1628_v56 = vmul.f32 %v1287_v38, %v1287_v38  ;;  %v1658_v63 = vadd.f32 %v1657_v49, %v1626_v11  ;;  %v11093_v38 = vld [vmem:[#allocation3_spill] sm:$0xff] }
 0x247   : > { %v3223_v21 = vpop.f32.mrf.mxu3  ;;  %v1589_v28 = vadd.f32 %v1588_v46, %v1557_v48  ;;  %v2888_v0 = vadd.f32 %v2887_v45, %v2718_v30  ;;  %v1469_v48 = vmul.f32 1.442695, %v1418_v39  ;;  %v6198_v46 = vpop.eup %6197  ;;  %v1471_v45 = vmul.f32 1.442695, %v1419_v16  ;;  %v11092_v39 = vld [vmem:[#allocation59_spill] sm:$0xff]  ;;  %v11094_v16 = vld [vmem:[#allocation198_spill] sm:$0xff] }
 0x248   : > { %v3224_v32 = vadd.f32 %v3223_v21, %v3055_v7  ;;  %v11089_v21 = vld [vmem:[#allocation46_spill] sm:$0xff]  ;;  %6201 = vpow2.f32 %v1467_v62  ;;  %v1629_v53 = vmul.f32 %v11094_v16, %v11094_v16  ;;  %v1659_v55 = vadd.f32 %v1658_v63, %v1627_v9 }
 0x249   : > { %v1590_v36 = vadd.f32 %v1589_v28, %v1558_v50  ;;  %v1561_v30 = vmul.f32 %v11089_v21, %v11089_v21  ;;  %v1562_v50 = vmul.f32 %v11091_v34, %v11091_v34  ;;  %6203 = vpow2.f32 %v1469_v48  ;;  %v11098_v21 = vld [vmem:[#allocation199_spill] sm:$0xff]  ;;  %v11100_v9 = vld [vmem:[#allocation30_spill] sm:$0xff] }
 0x24a   : > { %3972 = vrot.lane.b32.xlu2 %v3224_v32, %s6292_s22  ;;  %v3056_v7 = vpop.f32.mrf.mxu2  ;;  %6205 = vpow2.f32 %v1372_v35  ;;  %v1660_v34 = vadd.f32 %v1659_v55, %v1628_v56  ;;  %v1565_v63 = vmul.f32 %v9136_v27, %v9136_v27  ;;  %v6200_v35 = vpop.eup %6199  ;;  %v11102_v56 = vld [vmem:[#allocation6_spill] sm:$0xff] }
 0x24b   : > { %v2721_v13 = vpop.f32.mrf.mxu0  ;;  %v3057_v42 = vadd.f32 %v3056_v7, %v2888_v0  ;;  %v1591_v32 = vadd.f32 %v1590_v36, %v1559_v23  ;;  %v11095_v0 = vld [vmem:[#allocation4_spill] sm:$0xff]  ;;  %v11097_v7 = vld [vmem:[#allocation27_spill] sm:$0xff]  ;;  %6207 = vpow2.f32 %v1471_v45  ;;  %v11103_v55 = vld [vmem:[#allocation154_spill] sm:$0xff] }
 0x24c   : > { %v3945_v58 = vpop.permute.xlu0 %3944  ;;  %v1563_v62 = vmul.f32 %v11097_v7, %v11097_v7  ;;  %v11104_v7 = vld [vmem:[#allocation183_spill] sm:$0xff] }
 0x24d   : > { %v4267_v57 = vsel %vm4074_vm2, %v11090_v37, %v3945_v58  ;;  %4812 = vst.msk [vmem:[#allocation2] sm:$0xff] %vm4811_vm3, %v3945_v58  ;;  %3276 = vmatmul.bf16.vlgmr.msrb.gmra.mxu0 %v11093_v38  ;;  %v1592_v23 = vadd.f32 %v1591_v32, %v1560_v3  ;;  %v11096_v37 = vld [vmem:[#allocation5_spill] sm:$0xff]  ;;  %v1630_v58 = vmul.f32 %v11098_v21, %v11098_v21  ;;  %v9496_v3 = vpop.permute.xlu1 %4416  ;;  %v11105_v21 = vld [vmem:[#allocation115_spill] sm:$0xff] }
 0x24e   : > { %v2890_v59 = vpop.f32.mrf.mxu1  ;;  %v9482_v28 = vadd.f32 %v4267_v57, %v11092_v39  ;;  %3614 = vmatmul.bf16.vlgmr.msrb.gmra.mxu2 %v11096_v37  ;;  %11099 = vst [vmem:[#allocation107_spill] sm:$0xff] %v9496_v3  ;;  %v1564_v32 = vmul.f32 %v11100_v9, %v11100_v9  ;;  %v1661_v39 = vadd.f32 %v1660_v34, %v1629_v53  ;;  %v11106_v34 = vld [vmem:[#allocation90_spill] sm:$0xff] }
 0x24f   : > { %v3225_v11 = vpop.f32.mrf.mxu3  ;;  %3445 = vmatmul.bf16.vlgmr.msrb.gmra.mxu1 %v11095_v0  ;;  %v2891_v49 = vadd.f32 %v2890_v59, %v2721_v13  ;;  %v1593_v57 = vadd.f32 %v1592_v23, %v1561_v30  ;;  %v6202_v30 = vpop.eup %6201 }
 0x250   : > { %v3226_v36 = vadd.f32 %v3225_v11, %v3057_v42  ;;  %v11101_v42 = vld [vmem:[#allocation153_spill] sm:$0xff]  ;;  %v6204_v23 = vpop.eup %6203  ;;  %v1632_v11 = vmul.f32 %v11103_v55, %v11103_v55  ;;  %v1662_v37 = vadd.f32 %v1661_v39, %v1630_v58  ;;  %v1515_v58 = vsub.f32 %v9470_v43, %v6200_v35 }
 0x251   : > { %v1631_v13 = vmul.f32 %v11101_v42, %v11101_v42  ;;  %v1594_v59 = vadd.f32 %v1593_v57, %v1562_v50  ;;  %3783 = vmatmul.bf16.vlgmr.msrb.gmra.mxu3 %v11102_v56  ;;  %v1633_v57 = vmul.f32 %v11105_v21, %v11105_v21  ;;  %v1516_v9 = vsub.f32 %v6198_v46, %v6202_v30 }
 0x252   : > { %3974 = vrot.lane.b32.xlu0 %v3226_v36, %s6292_s22  ;;  %v3059_v48 = vpop.f32.mrf.mxu2  ;;  %v6206_v36 = vpop.eup %6205  ;;  %v1517_v56 = vsub.f32 %v9464_v6, %v6204_v23  ;;  %v11109_v6 = vld [vmem:[#allocation48_spill] sm:$0xff]  ;;  %v11110_v23 = vld [vmem:[#allocation78_spill] sm:$0xff] }
 0x253   : > { %v2723_v45 = vpop.f32.mrf.mxu0  ;;  %v3060_v16 = vadd.f32 %v3059_v48, %v2891_v49  ;;  %v1595_v0 = vadd.f32 %v1594_v59, %v1563_v62  ;;  %v1598_v49 = vsel %vm1597_vm0, %v1565_v63, 0.0  ;;  %v6208_v62 = vpop.eup %6207  ;;  %v1663_v59 = vadd.f32 %v1662_v37, %v1631_v13 }
 0x254   : > { %v9503_v38 = vpop.permute.xlu0 %3946  ;;  %v3953_v27 = vpop.permute.xlu2 %3952  ;;  %v1701_v13 = vmul.f32 %v1516_v9, %v1516_v9 }
 0x255   : > { %4813 = vst.msk [vmem:[#allocation2 + $0x8] sm:$0xff] %vm4811_vm3, %v9503_v38  ;;  %v4271_v50 = vsel %vm4074_vm2, %v11104_v7, %v3953_v27  ;;  %v1596_v42 = vadd.f32 %v1595_v0, %v1564_v32  ;;  %v11107_v7 = vld [vmem:[#allocation116_spill] sm:$0xff]  ;;  %v1664_v63 = vadd.f32 %v1663_v59, %v1632_v11  ;;  %v1700_v32 = vmul.f32 %v1515_v58, %v1515_v58 }
 0x256   : > { %v2892_v53 = vpop.f32.mrf.mxu1  ;;  %v9516_v48 = vadd.f32 %v4271_v50, %v11106_v34  ;;  %4816 = vst.msk [vmem:[#allocation2 + $0x20] sm:$0xff] %vm4811_vm3, %v3953_v27  ;;  %v1634_v21 = vmul.f32 %v11107_v7, %v11107_v7  ;;  %v1635_v50 = vmul.f32 %v11108_v41, %v11108_v41  ;;  %v1518_v34 = vsub.f32 %v6206_v36, %v6208_v62  ;;  %v11111_v62 = vld [vmem:[#allocation184_spill] sm:$0xff] }
 0x257   : > { %v3228_v39 = vpop.f32.mrf.mxu3  ;;  %v1599_v3 = vadd.f32 %v1598_v49, %v1596_v42  ;;  %v2893_v27 = vadd.f32 %v2892_v53, %v2723_v45  ;;  %v1665_v35 = vadd.f32 %v1664_v63, %v1633_v57  ;;  %v1636_v0 = vmul.f32 %v11110_v23, %v11110_v23  ;;  %v11112_v42 = vld [vmem:[#allocation84_spill] sm:$0xff]  ;;  %v11119_v23 = vld [vmem:[#allocation194_spill] sm:$0xff] }
 0x258   : > { %v3229_v55 = vadd.f32 %v3228_v39, %v3060_v16  ;;  %v1637_v16 = vmul.f32 %v11109_v6, %v11109_v6  ;;  %v1702_v11 = vmul.f32 %v1517_v56, %v1517_v56  ;;  %v1732_v53 = vadd.f32 %v9377_v4, %v1700_v32  ;;  %v11113_v39 = vld [vmem:[#allocation205_spill] sm:$0xff] }
 0x259   : > { %v1600_v46 = vrot.slane %v1599_v3, 4  ;;  %v1666_v45 = vadd.f32 %v1665_v35, %v1634_v21  ;;  %v1703_v9 = vmul.f32 %v1518_v34, %v1518_v34  ;;  %v11115_v21 = vld [vmem:[#allocation94_spill] sm:$0xff]  ;;  %v11117_v34 = vld [vmem:[#allocation9_spill] sm:$0xff] }
 0x25a   : > { %3976 = vrot.lane.b32.xlu1 %v3229_v55, %s6292_s22  ;;  %v3061_v43 = vpop.f32.mrf.mxu2  ;;  %v1733_v7 = vadd.f32 %v1732_v53, %v1701_v13 }
 0x25b   : > { %v2726_v30 = vpop.f32.mrf.mxu0  ;;  %v3062_v41 = vadd.f32 %v3061_v43, %v2893_v27  ;;  %v1601_v36 = vadd.f32 %v1600_v46, %v1599_v3  ;;  %v11114_v3 = vld [vmem:[#allocation7_spill] sm:$0xff]  ;;  %v1667_v55 = vadd.f32 %v1666_v45, %v1635_v50  ;;  %v11116_v43 = vld [vmem:[#allocation8_spill] sm:$0xff]  ;;  %v11118_v46 = vld [vmem:[#allocation49_spill] sm:$0xff] }
 0x25c   : > { %v3949_v37 = vpop.permute.xlu1 %3948  ;;  %v3955_v49 = vpop.permute.xlu2 %3954  ;;  %v1638_v35 = vmul.f32 %v11118_v46, %v11118_v46  ;;  %v1734_v13 = vadd.f32 %v1733_v7, %v1702_v11  ;;  %v11120_v45 = vld [vmem:[#allocation28_spill] sm:$0xff]  ;;  %v1641_v11 = vmul.f32 %v9139_v52, %v9139_v52  ;;  %v11127_v52 = vld [vmem:[#allocation149_spill] sm:$0xff] }
 0x25d   : > { %v4269_v57 = vsel %vm4074_vm2, %v11111_v62, %v3949_v37  ;;  %4814 = vst.msk [vmem:[#allocation2 + $0x10] sm:$0xff] %vm4811_vm3, %v3949_v37  ;;  %v4272_v56 = vsel %vm4074_vm2, %v11113_v39, %v3955_v49  ;;  %3281 = vmatmul.bf16.gmra.mxu0 %v11114_v3  ;;  %v1602_v4 = vrot.slane %v1601_v36, 2  ;;  %v1704_v37 = vmul.f32 %v11119_v23, %v11119_v23 }
 0x25e   : > { %v2895_v58 = vpop.f32.mrf.mxu1  ;;  %v9536_v59 = vadd.f32 %v4269_v57, %v11112_v42  ;;  %4817 = vst.msk [vmem:[#allocation2 + $0x28] sm:$0xff] %vm4811_vm3, %v3955_v49  ;;  %v9544_v63 = vadd.f32 %v4272_v56, %v11115_v21  ;;  %3619 = vmatmul.bf16.gmra.mxu2 %v11117_v34  ;;  %v1668_v50 = vadd.f32 %v1667_v55, %v1636_v0  ;;  %v11121_v57 = vld [vmem:[#allocation195_spill] sm:$0xff]  ;;  %v11123_v21 = vld [vmem:[#allocation148_spill] sm:$0xff] }
 0x25f   : > { %v3230_v27 = vpop.f32.mrf.mxu3  ;;  %3450 = vmatmul.bf16.gmra.mxu1 %v11116_v43  ;;  %v2896_v6 = vadd.f32 %v2895_v58, %v2726_v30  ;;  %v1603_v49 = vadd.f32 %v1602_v4, %v1601_v36  ;;  %v1639_v53 = vmul.f32 %v11120_v45, %v11120_v45  ;;  %v1705_v42 = vmul.f32 %v11121_v57, %v11121_v57  ;;  %v11122_v58 = vld [vmem:[#allocation31_spill] sm:$0xff]  ;;  %v11124_v4 = vld [vmem:[#allocation10_spill] sm:$0xff] }
 0x260   : > { %v3231_v32 = vadd.f32 %v3230_v27, %v3062_v41  ;;  %v1669_v56 = vadd.f32 %v1668_v50, %v1637_v16  ;;  %v1735_v41 = vadd.f32 %v1734_v13, %v1703_v9  ;;  %v1640_v3 = vmul.f32 %v11122_v58, %v11122_v58  ;;  %v1532_v36 = vld [vmem:[%s8567_s18] sm:$0x1]  ;;  %v11125_v9 = vld [vmem:[#allocation192_spill] sm:$0xff] }
 0x261   : > { %v1604_v39 = vrot.slane %v1603_v49, 1  ;;  %v1706_v0 = vmul.f32 %v11123_v21, %v11123_v21  ;;  %3788 = vmatmul.bf16.gmra.mxu3 %v11124_v4  ;;  %v1707_v50 = vmul.f32 %v11127_v52, %v11127_v52  ;;  %v11129_v21 = vld [vmem:[#allocation112_spill] sm:$0xff]  ;;  %v11134_v52 = vld [vmem:[#allocation13_spill] sm:$0xff] }
 0x262   : > { %3978 = vrot.lane.b32.xlu2 %v3231_v32, %s6292_s22  ;;  %v3064_v62 = vpop.f32.mrf.mxu2  ;;  %v1670_v43 = vadd.f32 %v1669_v56, %v1638_v35  ;;  %v1736_v16 = vadd.f32 %v1735_v41, %v1704_v37  ;;  %v11126_v32 = vld [vmem:[#allocation88_spill] sm:$0xff]  ;;  %v1673_v35 = vsel %vm1597_vm0, %v1641_v11, 0.0  ;;  %v1709_v4 = vmul.f32 %v11129_v21, %v11129_v21 }
 0x263   : > { %v2728_v30 = vpop.f32.mrf.mxu0  ;;  %v3065_v7 = vadd.f32 %v3064_v62, %v2896_v6  ;;  %v1605_v27 = vadd.f32 %v1604_v39, %v1603_v49  ;;  %v11128_v49 = vld [vmem:[#allocation111_spill] sm:$0xff] }
 0x264   : > { %v3951_v55 = vpop.permute.xlu1 %3950  ;;  %v1671_v45 = vadd.f32 %v1670_v43, %v1639_v53  ;;  %v1737_v6 = vadd.f32 %v1736_v16, %v1705_v42  ;;  %v1708_v57 = vmul.f32 %v11128_v49, %v11128_v49  ;;  %v11136_v49 = vld [vmem:[#allocation47_spill] sm:$0xff] }
 0x265   : > { %v4270_v34 = vsel %vm4074_vm2, %v11125_v9, %v3951_v55  ;;  %4815 = vst.msk [vmem:[#allocation2 + $0x18] sm:$0xff] %vm4811_vm3, %v3951_v55  ;;  %v1606_v13 = vadd.f32 %v1605_v27, %v1532_v36  ;;  %v11130_v27 = vld [vmem:[#allocation74_spill] sm:$0xff]  ;;  %v11131_v9 = vld [vmem:[#allocation11_spill] sm:$0xff] }
 0x266   : > { %v2897_v46 = vpop.f32.mrf.mxu1  ;;  %v9570_v23 = vadd.f32 %v4270_v34, %v11126_v32  ;;  %v1672_v39 = vadd.f32 %v1671_v45, %v1640_v3  ;;  %v1738_v56 = vadd.f32 %v1737_v6, %v1706_v0  ;;  %v1710_v11 = vmul.f32 %v11130_v27, %v11130_v27  ;;  %v11132_v3 = vld [vmem:[#allocation76_spill] sm:$0xff] }
 0x267   : > { %v3233_v62 = vpop.f32.mrf.mxu3  ;;  %1607 = vst [vmem:[%s8567_s18] sm:$0x1] %v1606_v13  ;;  %v2898_v41 = vadd.f32 %v2897_v46, %v2728_v30  ;;  %v1711_v30 = vmul.f32 %v11132_v3, %v11132_v3  ;;  %v11133_v32 = vld [vmem:[#allocation12_spill] sm:$0xff] }
 0x268   : > { %v3234_v37 = vadd.f32 %v3233_v62, %v3065_v7  ;;  %v1674_v36 = vadd.f32 %v1673_v35, %v1672_v39  ;;  %v1739_v53 = vadd.f32 %v1738_v56, %v1707_v50  ;;  %v11135_v45 = vld [vmem:[#allocation20_spill] sm:$0xff] }
 0x269   : > { %v1712_v6 = vmul.f32 %v11135_v45, %v11135_v45 }
 0x26a   : > { %3980 = vrot.lane.b32.xlu0 %v3234_v37, %s6292_s22  ;;  %v3066_v58 = vpop.f32.mrf.mxu2  ;;  %v1675_v7 = vrot.slane %v1674_v36, 4  ;;  %v1740_v43 = vadd.f32 %v1739_v53, %v1708_v57  ;;  %v1713_v57 = vmul.f32 %v11136_v49, %v11136_v49 }
 0x26b   : > { %v2731_v42 = vpop.f32.mrf.mxu0  ;;  %v3067_v55 = vadd.f32 %v3066_v58, %v2898_v41  ;;  %v11137_v58 = vld [vmem:[#allocation14_spill] sm:$0xff] }
 0x26c   : > { %v1676_v0 = vadd.f32 %v1675_v7, %v1674_v36  ;;  %v1741_v34 = vadd.f32 %v1740_v43, %v1709_v4  ;;  %v11138_v4 = vld [vmem:[#allocation29_spill] sm:$0xff]  ;;  %v1608_v7 = vld [vmem:[%s8567_s18 + $0x1] sm:$0x1]  ;;  %v11139_v43 = vld [vmem:[#allocation212_spill] sm:$0xff] }
 0x26d   : > { %3286 = vmatmul.bf16.gmra.mxu0 %v11131_v9  ;;  %v1714_v36 = vmul.f32 %v11138_v4, %v11138_v4  ;;  %v11140_v9 = vld [vmem:[#allocation32_spill] sm:$0xff] }
 0x26e   : > { %v2900_v16 = vpop.f32.mrf.mxu1  ;;  %3624 = vmatmul.bf16.gmra.mxu2 %v11134_v52  ;;  %v1677_v62 = vrot.slane %v1676_v0, 2  ;;  %v1742_v35 = vadd.f32 %v1741_v34, %v1710_v11  ;;  %v1716_v11 = vmul.f32 %v9129_v25, %v9129_v25  ;;  %v1715_v3 = vmul.f32 %v11140_v9, %v11140_v9  ;;  %v11141_v34 = vld [vmem:[#allocation108_spill] sm:$0xff] }
 0x26f   : > { %v3235_v46 = vpop.f32.mrf.mxu3  ;;  %3455 = vmatmul.bf16.gmra.mxu1 %v11133_v32  ;;  %v2901_v13 = vadd.f32 %v2900_v16, %v2731_v42 }
 0x270   : > { %v3236_v50 = vadd.f32 %v3235_v46, %v3067_v55  ;;  %v1678_v39 = vadd.f32 %v1677_v62, %v1676_v0  ;;  %v1743_v56 = vadd.f32 %v1742_v35, %v1711_v30 }
 0x271   : > { %3793 = vmatmul.bf16.gmra.mxu3 %v11137_v58 }
 0x272   : > { %3982 = vrot.lane.b32.xlu1 %v3236_v50, %s6292_s22  ;;  %v3069_v37 = vpop.f32.mrf.mxu2  ;;  %v1679_v53 = vrot.slane %v1678_v39, 1  ;;  %v1744_v42 = vadd.f32 %v1743_v56, %v1712_v6 }
 0x273   : > { %v2733_v41 = vpop.f32.mrf.mxu0  ;;  %v3070_v21 = vadd.f32 %v3069_v37, %v2901_v13  ;;  %v1748_v13 = vsel %vm1597_vm0, %v1716_v11, 0.0 }
 0x274   : > { %v3961_v55 = vpop.permute.xlu2 %3960  ;;  %v1680_v30 = vadd.f32 %v1679_v53, %v1678_v39  ;;  %v1745_v0 = vadd.f32 %v1744_v42, %v1713_v57  ;;  %v11142_v57 = vld [vmem:[#allocation188_spill] sm:$0xff]  ;;  %v11145_v42 = vld [vmem:[#allocation19_spill] sm:$0xff] }
 0x275   : > { %v4275_v16 = vsel %vm4074_vm2, %v11139_v43, %v3961_v55  ;;  %4820 = vst.msk [vmem:[#allocation2 + $0x40] sm:$0xff] %vm4811_vm3, %v3961_v55  ;;  %v11146_v55 = vld [vmem:[#allocation22_spill] sm:$0xff] }
 0x276   : > { %v2902_v27 = vpop.f32.mrf.mxu1  ;;  %v9606_v46 = vadd.f32 %v4275_v16, %v11141_v34  ;;  %v1681_v50 = vadd.f32 %v1680_v30, %v1608_v7  ;;  %v1746_v25 = vadd.f32 %v1745_v0, %v1714_v36 }
 0x277   : > { %v3238_v32 = vpop.f32.mrf.mxu3  ;;  %v2903_v45 = vadd.f32 %v2902_v27, %v2733_v41  ;;  %v11144_v41 = vld [vmem:[#allocation18_spill] sm:$0xff] }
 0x278   : > { %v3239_v52 = vadd.f32 %v3238_v32, %v3070_v21  ;;  %1682 = vst [vmem:[%s8567_s18 + $0x1] sm:$0x1] %v1681_v50  ;;  %v1747_v62 = vadd.f32 %v1746_v25, %v1715_v3  ;;  %v11143_v21 = vld [vmem:[#allocation97_spill] sm:$0xff]  ;;  %v11147_v3 = vld [vmem:[#allocation24_spill] sm:$0xff]  ;;  %v11148_v32 = vld [vmem:[#allocation191_spill] sm:$0xff] }
 0x279   : > { %v11149_v25 = vld [vmem:[#allocation100_spill] sm:$0xff] }
 0x27a   : > { %3984 = vrot.lane.b32.xlu2 %v3239_v52, %s6292_s22  ;;  %v3071_v6 = vpop.f32.mrf.mxu2  ;;  %v1749_v39 = vadd.f32 %v1748_v13, %v1747_v62  ;;  %v1683_v62 = vld [vmem:[%s8567_s18 + $0x2] sm:$0x1] }
 0x27b   : > { %v2736_v35 = vpop.f32.mrf.mxu0  ;;  %v3072_v49 = vadd.f32 %v3071_v6, %v2903_v45 }
 0x27c   : > { %v3957_v37 = vpop.permute.xlu0 %3956  ;;  %v1750_v36 = vrot.slane %v1749_v39, 4 }
 0x27d   : > { %v4273_v56 = vsel %vm4074_vm2, %v11142_v57, %v3957_v37  ;;  %4818 = vst.msk [vmem:[#allocation2 + $0x30] sm:$0xff] %vm4811_vm3, %v3957_v37  ;;  %3291 = vmatmul.bf16.gmra.mxu0 %v11144_v41  ;;  %v11150_v41 = vld [vmem:[#allocation145_spill] sm:$0xff] }
 0x27e   : > { %v2905_v58 = vpop.f32.mrf.mxu1  ;;  %v9616_v4 = vadd.f32 %v4273_v56, %v11143_v21  ;;  %3629 = vmatmul.bf16.gmra.mxu2 %v11146_v55  ;;  %v1751_v7 = vadd.f32 %v1750_v36, %v1749_v39 }
 0x27f   : > { %v3240_v53 = vpop.f32.mrf.mxu3  ;;  %3460 = vmatmul.bf16.gmra.mxu1 %v11145_v42  ;;  %v2906_v11 = vadd.f32 %v2905_v58, %v2736_v35  ;;  %v11151_v42 = vld [vmem:[#allocation124_spill] sm:$0xff] }
 0x280   : > { %v3241_v27 = vadd.f32 %v3240_v53, %v3072_v49  ;;  %v1752_v16 = vrot.slane %v1751_v7, 2 }
 0x281   : > { %3798 = vmatmul.bf16.gmra.mxu3 %v11147_v3 }
 0x282   : > { %3986 = vrot.lane.b32.xlu0 %v3241_v27, %s6292_s22  ;;  %v3074_v43 = vpop.f32.mrf.mxu2  ;;  %v1753_v34 = vadd.f32 %v1752_v16, %v1751_v7  ;;  %v11152_v27 = vld [vmem:[#allocation33_spill] sm:$0xff]  ;;  %v11153_v7 = vld [vmem:[#allocation34_spill] sm:$0xff] }
 0x283   : > { %v2738_v9 = vpop.f32.mrf.mxu0  ;;  %v3075_v0 = vadd.f32 %v3074_v43, %v2906_v11  ;;  %v11154_v43 = vld [vmem:[#allocation35_spill] sm:$0xff] }
 0x284   : > { %v3959_v30 = vpop.permute.xlu1 %3958  ;;  %v1754_v45 = vrot.slane %v1753_v34, 1 }
 0x285   : > { %v4274_v52 = vsel %vm4074_vm2, %v11148_v32, %v3959_v30  ;;  %4819 = vst.msk [vmem:[#allocation2 + $0x38] sm:$0xff] %vm4811_vm3, %v3959_v30 }
 0x286   : > { %v2907_v50 = vpop.f32.mrf.mxu1  ;;  %v9628_v13 = vadd.f32 %v4274_v52, %v11149_v25  ;;  %v1755_v37 = vadd.f32 %v1754_v45, %v1753_v34  ;;  %v11156_v52 = vld [vmem:[#allocation204_spill] sm:$0xff]  ;;  %v11157_v45 = vld [vmem:[#allocation118_spill] sm:$0xff] }
 0x287   : > { %v3243_v6 = vpop.f32.mrf.mxu3  ;;  %v2908_v49 = vadd.f32 %v2907_v50, %v2738_v9 }
 0x288   : > { %v3244_v35 = vadd.f32 %v3243_v6, %v3075_v0  ;;  %v1756_v57 = vadd.f32 %v1755_v37, %v1683_v62  ;;  %v11155_v0 = vld [vmem:[#allocation36_spill] sm:$0xff] }
 0x28a   : > { %3988 = vrot.lane.b32.xlu1 %v3244_v35, %s6292_s22  ;;  %v3076_v39 = vpop.f32.mrf.mxu2  ;;  %1757 = vst [vmem:[%s8567_s18 + $0x2] sm:$0x1] %v1756_v57 }
 0x28b   : > { %v2741_v56 = vpop.f32.mrf.mxu0  ;;  %v3077_v21 = vadd.f32 %v3076_v39, %v2908_v49 }
 0x28c   : > { %v3967_v58 = vpop.permute.xlu2 %3966 }
 0x28d   : > { %v4278_v36 = vsel %vm4074_vm2, %v11150_v41, %v3967_v58  ;;  %4823 = vst.msk [vmem:[#allocation2 + $0x58] sm:$0xff] %vm4811_vm3, %v3967_v58  ;;  %3296 = vmatmul.bf16.gmra.mxu0 %v11152_v27 }
 0x28e   : > { %v2910_v53 = vpop.f32.mrf.mxu1  ;;  %v9637_v55 = vadd.f32 %v4278_v36, %v11151_v42  ;;  %3634 = vmatmul.bf16.gmra.mxu2 %v11154_v43  ;;  %v11159_v36 = vld [vmem:[#allocation43_spill] sm:$0xff] }
 0x28f   : > { %v3245_v11 = vpop.f32.mrf.mxu3  ;;  %3465 = vmatmul.bf16.gmra.mxu1 %v11153_v7  ;;  %v2911_v9 = vadd.f32 %v2910_v53, %v2741_v56  ;;  %v11160_v53 = vld [vmem:[#allocation120_spill] sm:$0xff]  ;;  %v11162_v7 = vld [vmem:[#allocation45_spill] sm:$0xff] }
 0x290   : > { %v3246_v16 = vadd.f32 %v3245_v11, %v3077_v21  ;;  %v11158_v21 = vld [vmem:[#allocation203_spill] sm:$0xff]  ;;  %v11161_v11 = vld [vmem:[#allocation44_spill] sm:$0xff]  ;;  %v9893_v47 = vsel %vm9778_vm6, %v9637_v55, 0.0 }
 0x291   : > { %3803 = vmatmul.bf16.gmra.mxu3 %v11155_v0  ;;  %11218 = vst [vmem:[#allocation72_spill] sm:$0xff] %v9893_v47  ;;  %v4751_v55 = vmul.f32 %v9893_v47, %v9893_v47 }
 0x292   : > { %3990 = vrot.lane.b32.xlu2 %v3246_v16, %s6292_s22  ;;  %v3079_v3 = vpop.f32.mrf.mxu2 }
 0x293   : > { %v2743_v30 = vpop.f32.mrf.mxu0  ;;  %v3080_v32 = vadd.f32 %v3079_v3, %v2911_v9 }
 0x294   : > { %v3963_v34 = vpop.permute.xlu0 %3962 }
 0x295   : > { %v4276_v50 = vsel %vm4074_vm2, %v11156_v52, %v3963_v34  ;;  %4821 = vst.msk [vmem:[#allocation2 + $0x48] sm:$0xff] %vm4811_vm3, %v3963_v34 }
 0x296   : > { %v2912_v25 = vpop.f32.mrf.mxu1  ;;  %v9650_v6 = vadd.f32 %v4276_v50, %v11157_v45 }
 0x297   : > { %v3248_v62 = vpop.f32.mrf.mxu3  ;;  %v2913_v37 = vadd.f32 %v2912_v25, %v2743_v30  ;;  %v11163_v30 = vld [vmem:[#allocation50_spill] sm:$0xff]  ;;  %v11165_v25 = vld [vmem:[#allocation133_spill] sm:$0xff] }
 0x298   : > { %v3249_v35 = vadd.f32 %v3248_v62, %v3080_v32  ;;  %v11164_v32 = vld [vmem:[#allocation157_spill] sm:$0xff]  ;;  %v9868_v19 = vsel %vm9778_vm6, %v9650_v6, 0.0 }
 0x29a   : > { %3992 = vrot.lane.b32.xlu0 %v3249_v35, %s6292_s22  ;;  %v3081_v49 = vpop.f32.mrf.mxu2 }
 0x29b   : > { %v2746_v39 = vpop.f32.mrf.mxu0  ;;  %v3082_v57 = vadd.f32 %v3081_v49, %v2913_v37 }
 0x29c   : > { %v3965_v56 = vpop.permute.xlu1 %3964 }
 0x29d   : > { %v4277_v41 = vsel %vm4074_vm2, %v11158_v21, %v3965_v56  ;;  %4822 = vst.msk [vmem:[#allocation2 + $0x50] sm:$0xff] %vm4811_vm3, %v3965_v56  ;;  %3301 = vmatmul.bf16.gmra.mxu0 %v11159_v36  ;;  %v11167_v36 = vld [vmem:[#allocation126_spill] sm:$0xff] }
 0x29e   : > { %v2915_v58 = vpop.f32.mrf.mxu1  ;;  %v9659_v42 = vadd.f32 %v4277_v41, %v11160_v53  ;;  %3639 = vmatmul.bf16.gmra.mxu2 %v11162_v7  ;;  %v11169_v7 = vld [vmem:[#allocation52_spill] sm:$0xff] }
 0x29f   : > { %v3250_v27 = vpop.f32.mrf.mxu3  ;;  %3470 = vmatmul.bf16.gmra.mxu1 %v11161_v11  ;;  %v2916_v16 = vadd.f32 %v2915_v58, %v2746_v39  ;;  %v11166_v58 = vld [vmem:[#allocation209_spill] sm:$0xff] }
 0x2a0   : > { %v3251_v43 = vadd.f32 %v3250_v27, %v3082_v57  ;;  %v11168_v27 = vld [vmem:[#allocation51_spill] sm:$0xff] }
 0x2a1   : > { %3808 = vmatmul.bf16.gmra.mxu3 %v11163_v30 }
 0x2a2   : > { %3994 = vrot.lane.b32.xlu1 %v3251_v43, %s6292_s22  ;;  %v3084_v9 = vpop.f32.mrf.mxu2  ;;  %v11170_v43 = vld [vmem:[#allocation53_spill] sm:$0xff] }
 0x2a3   : > { %v2748_v3 = vpop.f32.mrf.mxu0  ;;  %v3085_v34 = vadd.f32 %v3084_v9, %v2916_v16 }
 0x2a4   : > { %v3973_v0 = vpop.permute.xlu2 %3972 }
 0x2a5   : > { %v4281_v52 = vsel %vm4074_vm2, %v11164_v32, %v3973_v0  ;;  %4826 = vst.msk [vmem:[#allocation2 + $0x70] sm:$0xff] %vm4811_vm3, %v3973_v0  ;;  %v11171_v0 = vld [vmem:[#allocation54_spill] sm:$0xff] }
 0x2a6   : > { %v2917_v50 = vpop.f32.mrf.mxu1  ;;  %v9670_v45 = vadd.f32 %v4281_v52, %v11165_v25  ;;  %v11172_v52 = vld [vmem:[#allocation207_spill] sm:$0xff] }
 0x2a7   : > { %v3253_v62 = vpop.f32.mrf.mxu3  ;;  %v2918_v37 = vadd.f32 %v2917_v50, %v2748_v3 }
 0x2a8   : > { %v3254_v35 = vadd.f32 %v3253_v62, %v3085_v34  ;;  %v11173_v62 = vld [vmem:[#allocation130_spill] sm:$0xff] }
 0x2aa   : > { %3996 = vrot.lane.b32.xlu2 %v3254_v35, %s6292_s22  ;;  %v3086_v49 = vpop.f32.mrf.mxu2 }
 0x2ab   : > { %v2751_v39 = vpop.f32.mrf.mxu0  ;;  %v3087_v56 = vadd.f32 %v3086_v49, %v2918_v37 }
 0x2ac   : > { %v3969_v57 = vpop.permute.xlu0 %3968 }
 0x2ad   : > { %v4279_v21 = vsel %vm4074_vm2, %v11166_v58, %v3969_v57  ;;  %4824 = vst.msk [vmem:[#allocation2 + $0x60] sm:$0xff] %vm4811_vm3, %v3969_v57  ;;  %3306 = vmatmul.bf16.gmra.mxu0 %v11168_v27 }
 0x2ae   : > { %v2920_v41 = vpop.f32.mrf.mxu1  ;;  %v9678_v53 = vadd.f32 %v4279_v21, %v11167_v36  ;;  %3644 = vmatmul.bf16.gmra.mxu2 %v11170_v43  ;;  %v11176_v43 = vld [vmem:[#allocation55_spill] sm:$0xff] }
 0x2af   : > { %v3255_v11 = vpop.f32.mrf.mxu3  ;;  %3475 = vmatmul.bf16.gmra.mxu1 %v11169_v7  ;;  %v2921_v9 = vadd.f32 %v2920_v41, %v2751_v39  ;;  %v11174_v41 = vld [vmem:[#allocation162_spill] sm:$0xff] }
 0x2b0   : > { %v3256_v16 = vadd.f32 %v3255_v11, %v3087_v56  ;;  %v11175_v11 = vld [vmem:[#allocation158_spill] sm:$0xff] }
 0x2b1   : > { %3813 = vmatmul.bf16.gmra.mxu3 %v11171_v0 }
 0x2b2   : > { %3998 = vrot.lane.b32.xlu0 %v3256_v16, %s6292_s22  ;;  %v3089_v3 = vpop.f32.mrf.mxu2 }
 0x2b3   : > { %v2753_v30 = vpop.f32.mrf.mxu0  ;;  %v3090_v32 = vadd.f32 %v3089_v3, %v2921_v9  ;;  %v11177_v9 = vld [vmem:[#allocation56_spill] sm:$0xff]  ;;  %v11178_v3 = vld [vmem:[#allocation57_spill] sm:$0xff] }
 0x2b4   : > { %v3971_v34 = vpop.permute.xlu1 %3970 }
 0x2b5   : > { %v4280_v50 = vsel %vm4074_vm2, %v11172_v52, %v3971_v34  ;;  %4825 = vst.msk [vmem:[#allocation2 + $0x68] sm:$0xff] %vm4811_vm3, %v3971_v34  ;;  %v11179_v52 = vld [vmem:[#allocation58_spill] sm:$0xff] }
 0x2b6   : > { %v2922_v25 = vpop.f32.mrf.mxu1  ;;  %v9690_v35 = vadd.f32 %v4280_v50, %v11173_v62  ;;  %v11180_v62 = vld [vmem:[#allocation141_spill] sm:$0xff] }
 0x2b7   : > { %v3258_v37 = vpop.f32.mrf.mxu3  ;;  %v2923_v39 = vadd.f32 %v2922_v25, %v2753_v30 }
 0x2b8   : > { %v3259_v49 = vadd.f32 %v3258_v37, %v3090_v32 }
 0x2ba   : > { %4000 = vrot.lane.b32.xlu1 %v3259_v49, %s6292_s22  ;;  %v3091_v57 = vpop.f32.mrf.mxu2 }
 0x2bb   : > { %v2756_v56 = vpop.f32.mrf.mxu0  ;;  %v3092_v21 = vadd.f32 %v3091_v57, %v2923_v39  ;;  %v11181_v39 = vld [vmem:[#allocation136_spill] sm:$0xff] }
 0x2bc   : > { %v3979_v58 = vpop.permute.xlu2 %3978 }
 0x2bd   : > { %v4284_v36 = vsel %vm4074_vm2, %v11174_v41, %v3979_v58  ;;  %4829 = vst.msk [vmem:[#allocation2 + $0x88] sm:$0xff] %vm4811_vm3, %v3979_v58  ;;  %3311 = vmatmul.bf16.gmra.mxu0 %v11176_v43  ;;  %v11182_v43 = vld [vmem:[#allocation215_spill] sm:$0xff] }
 0x2be   : > { %v2925_v27 = vpop.f32.mrf.mxu1  ;;  %v9698_v7 = vadd.f32 %v4284_v36, %v11175_v11  ;;  %3649 = vmatmul.bf16.gmra.mxu2 %v11178_v3  ;;  %v11183_v3 = vld [vmem:[#allocation146_spill] sm:$0xff] }
 0x2bf   : > { %v3260_v16 = vpop.f32.mrf.mxu3  ;;  %3480 = vmatmul.bf16.gmra.mxu1 %v11177_v9  ;;  %v2926_v0 = vadd.f32 %v2925_v27, %v2756_v56 }
 0x2c0   : > { %v3261_v30 = vadd.f32 %v3260_v16, %v3092_v21 }
 0x2c1   : > { %3818 = vmatmul.bf16.gmra.mxu3 %v11179_v52  ;;  %v11185_v52 = vld [vmem:[#allocation63_spill] sm:$0xff] }
 0x2c2   : > { %4002 = vrot.lane.b32.xlu2 %v3261_v30, %s6292_s22  ;;  %v3094_v34 = vpop.f32.mrf.mxu2 }
 0x2c3   : > { %v2758_v32 = vpop.f32.mrf.mxu0  ;;  %v3095_v25 = vadd.f32 %v3094_v34, %v2926_v0  ;;  %v11184_v34 = vld [vmem:[#allocation62_spill] sm:$0xff] }
 0x2c4   : > { %v3975_v50 = vpop.permute.xlu0 %3974 }
 0x2c5   : > { %v4282_v37 = vsel %vm4074_vm2, %v11180_v62, %v3975_v50  ;;  %4827 = vst.msk [vmem:[#allocation2 + $0x78] sm:$0xff] %vm4811_vm3, %v3975_v50  ;;  %v11186_v50 = vld [vmem:[#allocation64_spill] sm:$0xff] }
 0x2c6   : > { %v2927_v49 = vpop.f32.mrf.mxu1  ;;  %v9710_v57 = vadd.f32 %v4282_v37, %v11181_v39  ;;  %v11187_v39 = vld [vmem:[#allocation65_spill] sm:$0xff] }
 0x2c7   : > { %v3263_v58 = vpop.f32.mrf.mxu3  ;;  %v2928_v21 = vadd.f32 %v2927_v49, %v2758_v32 }
 0x2c8   : > { %v3264_v56 = vadd.f32 %v3263_v58, %v3095_v25 }
 0x2ca   : > { %4004 = vrot.lane.b32.xlu0 %v3264_v56, %s6292_s22  ;;  %v3096_v41 = vpop.f32.mrf.mxu2  ;;  %v11188_v56 = vld [vmem:[#allocation229_spill] sm:$0xff] }
 0x2cb   : > { %v3277_v36 = vpop.f32.mrf.mxu0  ;;  %v3097_v11 = vadd.f32 %v3096_v41, %v2928_v21 }
 0x2cc   : > { %v3977_v27 = vpop.permute.xlu1 %3976 }
 0x2cd   : > { %v4283_v16 = vsel %vm4074_vm2, %v11182_v43, %v3977_v27  ;;  %4828 = vst.msk [vmem:[#allocation2 + $0x80] sm:$0xff] %vm4811_vm3, %v3977_v27  ;;  %3316 = vmatmul.bf16.gmra.mxu0 %v11184_v34 }
 0x2ce   : > { %v3446_v9 = vpop.f32.mrf.mxu1  ;;  %v9718_v30 = vadd.f32 %v4283_v16, %v11183_v3  ;;  %3654 = vmatmul.bf16.gmra.mxu2 %v11186_v50 }
 0x2cf   : > { %v3447_v0 = vadd.f32 %v3446_v9, %v3277_v36  ;;  %v3265_v32 = vpop.f32.mrf.mxu3  ;;  %3485 = vmatmul.bf16.gmra.mxu1 %v11185_v52  ;;  %v11189_v36 = vld [vmem:[#allocation172_spill] sm:$0xff] }
 0x2d0   : > { %v3266_v25 = vadd.f32 %v3265_v32, %v3097_v11  ;;  %v11190_v32 = vld [vmem:[#allocation156_spill] sm:$0xff] }
 0x2d1   : > { %3823 = vmatmul.bf16.gmra.mxu3 %v11187_v39 }
 0x2d2   : > { %4006 = vrot.lane.b32.xlu1 %v3266_v25, %s6292_s22  ;;  %v3615_v62 = vpop.f32.mrf.mxu2  ;;  %v11191_v25 = vld [vmem:[#allocation163_spill] sm:$0xff] }
 0x2d3   : > { %v3616_v37 = vadd.f32 %v3615_v62, %v3447_v0  ;;  %v3279_v49 = vpop.f32.mrf.mxu0 }
 0x2d4   : > { %v3985_v58 = vpop.permute.xlu2 %3984 }
 0x2d5   : > { %v4287_v21 = vsel %vm4074_vm2, %v11188_v56, %v3985_v58  ;;  %4832 = vst.msk [vmem:[#allocation2 + $0xa0] sm:$0xff] %vm4811_vm3, %v3985_v58  ;;  %v11192_v58 = vld [vmem:[#allocation79_spill] sm:$0xff]  ;;  %v11194_v56 = vld [vmem:[#allocation81_spill] sm:$0xff] }
 0x2d6   : > { %v3448_v41 = vpop.f32.mrf.mxu1  ;;  %v9730_v27 = vadd.f32 %v4287_v21, %v11189_v36 }
 0x2d7   : > { %v3449_v43 = vadd.f32 %v3448_v41, %v3279_v49  ;;  %v3784_v11 = vpop.f32.mrf.mxu3 }
 0x2d8   : > { %v9732_v16 = vadd.f32 %v3784_v11, %v3616_v37  ;;  %v11193_v37 = vld [vmem:[#allocation80_spill] sm:$0xff]  ;;  %v11195_v11 = vld [vmem:[#allocation83_spill] sm:$0xff] }
 0x2da   : > { %v3617_v9 = vpop.f32.mrf.mxu2 }
 0x2db   : > { %v3618_v3 = vadd.f32 %v3617_v9, %v3449_v43  ;;  %v3282_v0 = vpop.f32.mrf.mxu0 }
 0x2dc   : > { %v3981_v34 = vpop.permute.xlu0 %3980 }
 0x2dd   : > { %v4285_v52 = vsel %vm4074_vm2, %v11190_v32, %v3981_v34  ;;  %4830 = vst.msk [vmem:[#allocation2 + $0x90] sm:$0xff] %vm4811_vm3, %v3981_v34  ;;  %3321 = vmatmul.bf16.gmra.mxu0 %v11192_v58  ;;  %v11196_v34 = vld [vmem:[#allocation218_spill] sm:$0xff] }
 0x2de   : > { %v3451_v50 = vpop.f32.mrf.mxu1  ;;  %v9739_v62 = vadd.f32 %v4285_v52, %v11191_v25  ;;  %3659 = vmatmul.bf16.gmra.mxu2 %v11194_v56  ;;  %v11197_v52 = vld [vmem:[#allocation169_spill] sm:$0xff] }
 0x2df   : > { %v3452_v39 = vadd.f32 %v3451_v50, %v3282_v0  ;;  %v3786_v49 = vpop.f32.mrf.mxu3  ;;  %3490 = vmatmul.bf16.gmra.mxu1 %v11193_v37  ;;  %v11200_v56 = vld [vmem:[#allocation69_spill] sm:$0xff] }
 0x2e0   : > { %v9744_v21 = vadd.f32 %v3786_v49, %v3618_v3  ;;  %v11198_v3 = vld [vmem:[#allocation60_spill] sm:$0xff]  ;;  %v11199_v49 = vld [vmem:[#allocation61_spill] sm:$0xff] }
 0x2e1   : > { %3828 = vmatmul.bf16.gmra.mxu3 %v11195_v11  ;;  %v2773_v37 = vadd.f32 %v11199_v49, %v11198_v3  ;;  %v11205_v49 = vld [vmem:[#allocation85_spill] sm:$0xff] }
 0x2e2   : > { %v3620_v41 = vpop.f32.mrf.mxu2 }
 0x2e3   : > { %v3621_v36 = vadd.f32 %v3620_v41, %v3452_v39  ;;  %v3284_v43 = vpop.f32.mrf.mxu0  ;;  %v2942_v41 = vadd.f32 %v11200_v56, %v2773_v37  ;;  %v11206_v56 = vld [vmem:[#allocation86_spill] sm:$0xff] }
 0x2e4   : > { %v3983_v9 = vpop.permute.xlu1 %3982 }
 0x2e5   : > { %v4286_v32 = vsel %vm4074_vm2, %v11196_v34, %v3983_v9  ;;  %4831 = vst.msk [vmem:[#allocation2 + $0x98] sm:$0xff] %vm4811_vm3, %v3983_v9  ;;  %v11201_v34 = vld [vmem:[#allocation178_spill] sm:$0xff] }
 0x2e6   : > { %v3453_v0 = vpop.f32.mrf.mxu1  ;;  %v9752_v50 = vadd.f32 %v4286_v32, %v11197_v52  ;;  %v4268_v9 = vsel %vm4074_vm2, %v11201_v34, %v9503_v38  ;;  %v11202_v32 = vld [vmem:[#allocation232_spill] sm:$0xff] }
 0x2e7   : > { %v3454_v25 = vadd.f32 %v3453_v0, %v3284_v43  ;;  %v3789_v58 = vpop.f32.mrf.mxu3 }
 0x2e8   : > { %v9756_v39 = vadd.f32 %v3789_v58, %v3621_v36  ;;  %v11203_v36 = vld [vmem:[#allocation82_spill] sm:$0xff]  ;;  %v11204_v58 = vld [vmem:[#allocation185_spill] sm:$0xff] }
 0x2e9   : > { %v3111_v52 = vadd.f32 %v11203_v36, %v2942_v41 }
 0x2ea   : > { %v3622_v11 = vpop.f32.mrf.mxu2 }
 0x2eb   : > { %v3623_v17 = vadd.f32 %v3622_v11, %v3454_v25  ;;  %v3287_v51 = vpop.f32.mrf.mxu0  ;;  %v11207_v11 = vld [vmem:[#allocation87_spill] sm:$0xff]  ;;  %v4466_v38 = vadd.f32 %v4268_v9, %v3111_v52  ;;  %v9794_v9 = vsel %vm9778_vm6, %v9482_v28, 0.0  ;;  %v9799_v52 = vsel %vm9778_vm6, %v9536_v59, 0.0 }
 0x2ec   : > { %v3991_v12 = vpop.permute.xlu2 %3990  ;;  %v4740_v28 = vmul.f32 %v9794_v9, %v9794_v9 }
 0x2ed   : > { %v4290_v43 = vsel %vm4074_vm2, %v11202_v32, %v3991_v12  ;;  %4835 = vst.msk [vmem:[#allocation2 + $0xb8] sm:$0xff] %vm4811_vm3, %v3991_v12  ;;  %3326 = vmatmul.bf16.gmra.mxu0 %v11205_v49 }
 0x2ee   : > { %v3456_v0 = vpop.f32.mrf.mxu1  ;;  %v9769_v3 = vadd.f32 %v4290_v43, %v11204_v58  ;;  %3664 = vmatmul.bf16.gmra.mxu2 %v11207_v11  ;;  %v9784_v43 = vsel %vm9778_vm6, %v4466_v38, 0.0  ;;  %v4742_v11 = vmul.f32 %v9799_v52, %v9799_v52 }
 0x2ef   : > { %v3457_v25 = vadd.f32 %v3456_v0, %v3287_v51  ;;  %v3791_v37 = vpop.f32.mrf.mxu3  ;;  %3495 = vmatmul.bf16.gmra.mxu1 %v11206_v56  ;;  %v11210_v0 = vld [vmem:[#allocation89_spill] sm:$0xff] }
 0x2f0   : > { %v9776_v12 = vadd.f32 %v3791_v37, %v3623_v17  ;;  %v9806_v37 = vsel %vm9778_vm6, %v9570_v23, 0.0 }
 0x2f1   : > { %3833 = vmatmul.bf16.gmra.mxu3 %v11210_v0 }
 0x2f2   : > { %v3625_v34 = vpop.f32.mrf.mxu2 }
 0x2f3   : > { %v3626_v51 = vadd.f32 %v3625_v34, %v3457_v25  ;;  %v3289_v32 = vpop.f32.mrf.mxu0  ;;  %v4741_v25 = vmul.f32 %v9784_v43, %v9784_v43  ;;  %v4743_v34 = vmul.f32 %v9806_v37, %v9806_v37 }
 0x2f4   : > { %v9787_v36 = vpop.permute.xlu0 %3986 }
 0x2f5   : > { %4833 = vst.msk [vmem:[#allocation2 + $0xa8] sm:$0xff] %vm4811_vm3, %v9787_v36  ;;  %v4772_v38 = vadd.f32 %v4741_v25, %v4740_v28 }
 0x2f6   : > { %v3458_v17 = vpop.f32.mrf.mxu1 }
 0x2f7   : > { %v3459_v58 = vadd.f32 %v3458_v17, %v3289_v32  ;;  %v3794_v49 = vpop.f32.mrf.mxu3  ;;  %v4773_v14 = vadd.f32 %v4772_v38, %v4742_v11  ;;  %v9835_v38 = vsel %vm9778_vm6, %v9544_v63, 0.0 }
 0x2f8   : > { %v9808_v56 = vadd.f32 %v3794_v49, %v3626_v51  ;;  %v9823_v51 = vsel %vm9778_vm6, %v9516_v48, 0.0  ;;  %v4745_v63 = vmul.f32 %v9835_v38, %v9835_v38 }
 0x2f9   : > { %v4774_v25 = vadd.f32 %v4773_v14, %v4743_v34  ;;  %v4744_v11 = vmul.f32 %v9823_v51, %v9823_v51 }
 0x2fa   : > { %v3627_v59 = vpop.f32.mrf.mxu2 }
 0x2fb   : > { %v3628_v32 = vadd.f32 %v3627_v59, %v3459_v58  ;;  %v3292_v0 = vpop.f32.mrf.mxu0  ;;  %v11213_v58 = vld [vmem:[#allocation93_spill] sm:$0xff]  ;;  %v4775_v48 = vadd.f32 %v4774_v25, %v4744_v11 }
 0x2fc   : > { %v9816_v17 = vpop.permute.xlu1 %3988 }
 0x2fd   : > { %4834 = vst.msk [vmem:[#allocation2 + $0xb0] sm:$0xff] %vm4811_vm3, %v9816_v17  ;;  %3331 = vmatmul.bf16.gmra.mxu0 %v11211_v18  ;;  %v9840_v18 = vsel %vm9778_vm6, %v9616_v4, 0.0 }
 0x2fe   : > { %v3461_v23 = vpop.f32.mrf.mxu1  ;;  %3669 = vmatmul.bf16.gmra.mxu2 %v11213_v58  ;;  %v4746_v4 = vmul.f32 %v9840_v18, %v9840_v18 }
 0x2ff   : > { %v3462_v49 = vadd.f32 %v3461_v23, %v3292_v0  ;;  %v3796_v28 = vpop.f32.mrf.mxu3  ;;  %3500 = vmatmul.bf16.gmra.mxu1 %v11212_v10  ;;  %v11214_v0 = vld [vmem:[#allocation95_spill] sm:$0xff] }
 0x300   : > { %v9828_v59 = vadd.f32 %v3796_v28, %v3628_v32  ;;  %v9845_v32 = vsel %vm9778_vm6, %v9628_v13, 0.0  ;;  %v4776_v28 = vadd.f32 %v4775_v48, %v4745_v63 }
 0x301   : > { %3838 = vmatmul.bf16.gmra.mxu3 %v11214_v0  ;;  %v4747_v13 = vmul.f32 %v9845_v32, %v9845_v32  ;;  %v9863_v0 = vsel %vm9778_vm6, %v9606_v46, 0.0 }
 0x302   : > { %v3630_v14 = vpop.f32.mrf.mxu2  ;;  %v4748_v46 = vmul.f32 %v9863_v0, %v9863_v0 }
 0x303   : > { %v3631_v10 = vadd.f32 %v3630_v14, %v3462_v49  ;;  %v3294_v34 = vpop.f32.mrf.mxu0  ;;  %v4777_v14 = vadd.f32 %v4776_v28, %v4746_v4 }
 0x304   : > { %v9848_v23 = vpop.permute.xlu2 %3996 }
 0x305   : > { %4838 = vst.msk [vmem:[#allocation2 + $0xd0] sm:$0xff] %vm4811_vm3, %v9848_v23 }
 0x306   : > { %v3463_v49 = vpop.f32.mrf.mxu1 }
 0x307   : > { %v3464_v25 = vadd.f32 %v3463_v49, %v3294_v34  ;;  %v3799_v58 = vpop.f32.mrf.mxu3  ;;  %v4778_v34 = vadd.f32 %v4777_v14, %v4747_v13  ;;  %v4749_v49 = vmul.f32 %v9868_v19, %v9868_v19  ;;  %v11217_v14 = vld [vmem:[#allocation99_spill] sm:$0xff] }
 0x308   : > { %v9858_v11 = vadd.f32 %v3799_v58, %v3631_v10  ;;  %v9873_v10 = vsel %vm9778_vm6, %v9659_v42, 0.0  ;;  %v11216_v58 = vld [vmem:[#allocation98_spill] sm:$0xff] }
 0x309   : > { %v4750_v42 = vmul.f32 %v9873_v10, %v9873_v10 }
 0x30a   : > { %v3632_v31 = vpop.f32.mrf.mxu2 }
 0x30b   : > { %v3633_v48 = vadd.f32 %v3632_v31, %v3464_v25  ;;  %v3297_v63 = vpop.f32.mrf.mxu0  ;;  %v11215_v31 = vld [vmem:[#allocation96_spill] sm:$0xff]  ;;  %v4779_v25 = vadd.f32 %v4778_v34, %v4748_v46  ;;  %v9898_v34 = vsel %vm9778_vm6, %v9678_v53, 0.0 }
 0x30c   : > { %v9875_v4 = vpop.permute.xlu0 %3992  ;;  %11219 = vst [vmem:[#allocation40_spill] sm:$0xff] %v9898_v34  ;;  %v4752_v53 = vmul.f32 %v9898_v34, %v9898_v34 }
 0x30d   : > { %4836 = vst.msk [vmem:[#allocation2 + $0xc0] sm:$0xff] %vm4811_vm3, %v9875_v4  ;;  %3336 = vmatmul.bf16.gmra.mxu0 %v11215_v31  ;;  %v4780_v24 = vadd.f32 %v4779_v25, %v4749_v49  ;;  %v11221_v49 = vld [vmem:[#allocation101_spill] sm:$0xff] }
 0x30e   : > { %v3466_v6 = vpop.f32.mrf.mxu1  ;;  %3674 = vmatmul.bf16.gmra.mxu2 %v11217_v14 }
 0x30f   : > { %v3467_v28 = vadd.f32 %v3466_v6, %v3297_v63  ;;  %v3801_v13 = vpop.f32.mrf.mxu3  ;;  %3505 = vmatmul.bf16.gmra.mxu1 %v11216_v58  ;;  %v4781_v46 = vadd.f32 %v4780_v24, %v4750_v42 }
 0x310   : > { %v9888_v22 = vadd.f32 %v3801_v13, %v3633_v48  ;;  %v9903_v48 = vsel %vm9778_vm6, %v9690_v35, 0.0 }
 0x311   : > { %11220 = vst [vmem:[#allocation39_spill] sm:$0xff] %v9903_v48  ;;  %3843 = vmatmul.bf16.gmra.mxu3 %v11221_v49  ;;  %v4782_v42 = vadd.f32 %v4781_v46, %v4751_v55  ;;  %v4753_v35 = vmul.f32 %v9903_v48, %v9903_v48  ;;  %v9926_v49 = vsel %vm9778_vm6, %v9710_v57, 0.0 }
 0x312   : > { %v3635_v63 = vpop.f32.mrf.mxu2  ;;  %11223 = vst [vmem:[#allocation42_spill] sm:$0xff] %v9926_v49 }
 0x313   : > { %v3636_v6 = vadd.f32 %v3635_v63, %v3467_v28  ;;  %v3299_v31 = vpop.f32.mrf.mxu0  ;;  %v4783_v14 = vadd.f32 %v4782_v42, %v4752_v53  ;;  %v9921_v63 = vsel %vm9778_vm6, %v9670_v45, 0.0 }
 0x314   : > { %v9906_v25 = vpop.permute.xlu1 %3994  ;;  %11222 = vst [vmem:[#allocation41_spill] sm:$0xff] %v9921_v63  ;;  %v4754_v45 = vmul.f32 %v9921_v63, %v9921_v63 }
 0x315   : > { %4837 = vst.msk [vmem:[#allocation2 + $0xc8] sm:$0xff] %vm4811_vm3, %v9906_v25 }
 0x316   : > { %v3468_v24 = vpop.f32.mrf.mxu1 }
 0x317   : > { %v3469_v28 = vadd.f32 %v3468_v24, %v3299_v31  ;;  %v3804_v13 = vpop.f32.mrf.mxu3  ;;  %v4784_v31 = vadd.f32 %v4783_v14, %v4753_v35  ;;  %v4755_v24 = vmul.f32 %v9926_v49, %v9926_v49  ;;  %v11227_v14 = vld [vmem:[#allocation117_spill] sm:$0xff]  ;;  %v9951_v49 = vsel %vm9778_vm6, %v9698_v7, 0.0  ;;  %v11232_v7 = vld [vmem:[#allocation119_spill] sm:$0xff] }
 0x318   : > { %v9916_v58 = vadd.f32 %v3804_v13, %v3636_v6  ;;  %v9931_v6 = vsel %vm9778_vm6, %v9718_v30, 0.0  ;;  %v11226_v13 = vld [vmem:[#allocation113_spill] sm:$0xff]  ;;  %11228 = vst [vmem:[#allocation235_spill] sm:$0xff] %v9951_v49 }
 0x319   : > { %11224 = vst [vmem:[#allocation26_spill] sm:$0xff] %v9931_v6  ;;  %v4756_v30 = vmul.f32 %v9931_v6, %v9931_v6 }
 0x31a   : > { %v3637_v34 = vpop.f32.mrf.mxu2 }
 0x31b   : > { %v3638_v46 = vadd.f32 %v3637_v34, %v3469_v28  ;;  %v3302_v55 = vpop.f32.mrf.mxu0  ;;  %v11225_v34 = vld [vmem:[#allocation109_spill] sm:$0xff]  ;;  %v4785_v28 = vadd.f32 %v4784_v31, %v4754_v45  ;;  %v9956_v31 = vsel %vm9778_vm6, %v9739_v62, 0.0  ;;  %v4757_v62 = vmul.f32 %v9951_v49, %v9951_v49  ;;  %v11235_v49 = vld [vmem:[#allocation180_spill] sm:$0xff] }
 0x31c   : > { %v9933_v53 = vpop.permute.xlu2 %4002  ;;  %11229 = vst [vmem:[#allocation243_spill] sm:$0xff] %v9956_v31 }
 0x31d   : > { %4841 = vst.msk [vmem:[#allocation2 + $0xe8] sm:$0xff] %vm4811_vm3, %v9933_v53  ;;  %3341 = vmatmul.bf16.gmra.mxu0 %v11225_v34  ;;  %v4786_v48 = vadd.f32 %v4785_v28, %v4755_v24  ;;  %v9965_v24 = vsel %vm9778_vm6, %v9752_v50, 0.0 }
 0x31e   : > { %v3471_v57 = vpop.f32.mrf.mxu1  ;;  %3679 = vmatmul.bf16.gmra.mxu2 %v11227_v14  ;;  %11231 = vst [vmem:[#allocation234_spill] sm:$0xff] %v9965_v24 }
 0x31f   : > { %v3472_v42 = vadd.f32 %v3471_v57, %v3302_v55  ;;  %v3806_v35 = vpop.f32.mrf.mxu3  ;;  %3510 = vmatmul.bf16.gmra.mxu1 %v11226_v13  ;;  %v4787_v45 = vadd.f32 %v4786_v48, %v4756_v30  ;;  %v11230_v57 = vld [vmem:[#allocation161_spill] sm:$0xff]  ;;  %v4758_v48 = vmul.f32 %v9956_v31, %v9956_v31  ;;  %v11233_v30 = vld [vmem:[#allocation222_spill] sm:$0xff]  ;;  %v11234_v13 = vld [vmem:[#allocation176_spill] sm:$0xff] }
 0x320   : > { %v9946_v63 = vadd.f32 %v3806_v35, %v3638_v46  ;;  %v4288_v34 = vsel %vm4074_vm2, %v11230_v57, %v9787_v36  ;;  %v4289_v36 = vsel %vm4074_vm2, %v11233_v30, %v9816_v17  ;;  %v4759_v57 = vmul.f32 %v9965_v24, %v9965_v24 }
 0x321   : > { %3848 = vmatmul.bf16.gmra.mxu3 %v11232_v7  ;;  %v4486_v50 = vadd.f32 %v4288_v34, %v11234_v13  ;;  %v4487_v6 = vadd.f32 %v4289_v36, %v11235_v49  ;;  %v9986_v17 = vsel %vm9778_vm6, %v9730_v27, 0.0 }
 0x322   : > { %v3640_v55 = vpop.f32.mrf.mxu2  ;;  %11236 = vst [vmem:[#allocation16_spill] sm:$0xff] %v9986_v17  ;;  %v4760_v27 = vmul.f32 %v9986_v17, %v9986_v17  ;;  %v11245_v17 = vld [vmem:[#allocation201_spill] sm:$0xff] }
 0x323   : > { %v3641_v46 = vadd.f32 %v3640_v55, %v3472_v42  ;;  %v3304_v35 = vpop.f32.mrf.mxu0  ;;  %v4788_v55 = vadd.f32 %v4787_v45, %v4757_v62  ;;  %v9990_v30 = vsel %vm9778_vm6, %v4486_v50, 0.0  ;;  %v11241_v50 = vld [vmem:[#allocation189_spill] sm:$0xff] }
 0x324   : > { %v3999_v28 = vpop.permute.xlu0 %3998  ;;  %11237 = vst [vmem:[#allocation270_spill] sm:$0xff] %v9990_v30 }
 0x325   : > { %4839 = vst.msk [vmem:[#allocation2 + $0xd8] sm:$0xff] %vm4811_vm3, %v3999_v28  ;;  %v4789_v31 = vadd.f32 %v4788_v55, %v4758_v48  ;;  %v9998_v48 = vsel %vm9778_vm6, %v4487_v6, 0.0  ;;  %v11242_v6 = vld [vmem:[#allocation121_spill] sm:$0xff] }
 0x326   : > { %v3473_v42 = vpop.f32.mrf.mxu1  ;;  %11239 = vst [vmem:[#allocation271_spill] sm:$0xff] %v9998_v48 }
 0x327   : > { %v3474_v14 = vadd.f32 %v3473_v42, %v3304_v35  ;;  %v3809_v7 = vpop.f32.mrf.mxu3  ;;  %v4790_v45 = vadd.f32 %v4789_v31, %v4759_v57  ;;  %v11238_v35 = vld [vmem:[#allocation167_spill] sm:$0xff]  ;;  %v4761_v42 = vmul.f32 %v9990_v30, %v9990_v30 }
 0x328   : > { %v9981_v47 = vadd.f32 %v3809_v7, %v3641_v46  ;;  %v4291_v62 = vsel %vm4074_vm2, %v11238_v35, %v9875_v4  ;;  %v11240_v31 = vld [vmem:[#allocation227_spill] sm:$0xff]  ;;  %v4762_v7 = vmul.f32 %v9998_v48, %v9998_v48  ;;  %v11243_v35 = vld [vmem:[#allocation122_spill] sm:$0xff] }
 0x329   : > { %v4292_v13 = vsel %vm4074_vm2, %v11240_v31, %v9906_v25  ;;  %v4791_v57 = vadd.f32 %v4790_v45, %v4760_v27  ;;  %v11244_v30 = vld [vmem:[#allocation123_spill] sm:$0xff] }
 0x32a   : > { %v3642_v34 = vpop.f32.mrf.mxu2  ;;  %v4490_v24 = vadd.f32 %v4292_v13, %v11245_v17  ;;  %v11249_v17 = vld [vmem:[#allocation171_spill] sm:$0xff] }
 0x32b   : > { %v3643_v49 = vadd.f32 %v3642_v34, %v3474_v14  ;;  %v3307_v46 = vpop.f32.mrf.mxu0  ;;  %v4489_v14 = vadd.f32 %v4291_v62, %v11241_v50  ;;  %v4792_v31 = vadd.f32 %v4791_v57, %v4761_v42  ;;  %v10021_v62 = vsel %vm9778_vm6, %v9769_v3, 0.0  ;;  %v11251_v50 = vld [vmem:[#allocation125_spill] sm:$0xff] }
 0x32c   : > { %v4001_v36 = vpop.permute.xlu1 %4000  ;;  %11246 = vst [vmem:[#allocation236_spill] sm:$0xff] %v10021_v62  ;;  %v10036_v3 = vsel %vm9778_vm6, %v4490_v24, 0.0  ;;  %v11252_v57 = vld [vmem:[#allocation233_spill] sm:$0xff] }
 0x32d   : > { %4840 = vst.msk [vmem:[#allocation2 + $0xe0] sm:$0xff] %vm4811_vm3, %v4001_v36  ;;  %3346 = vmatmul.bf16.gmra.mxu0 %v11242_v6  ;;  %v10025_v45 = vsel %vm9778_vm6, %v4489_v14, 0.0  ;;  %v4793_v27 = vadd.f32 %v4792_v31, %v4762_v7  ;;  %v4763_v14 = vmul.f32 %v10021_v62, %v10021_v62 }
 0x32e   : > { %v3476_v4 = vpop.f32.mrf.mxu1  ;;  %3684 = vmatmul.bf16.gmra.mxu2 %v11244_v30  ;;  %11247 = vst [vmem:[#allocation23_spill] sm:$0xff] %v10025_v45  ;;  %v4764_v6 = vmul.f32 %v10025_v45, %v10025_v45 }
 0x32f   : > { %v3477_v55 = vadd.f32 %v3476_v4, %v3307_v46  ;;  %v3811_v34 = vpop.f32.mrf.mxu3  ;;  %3515 = vmatmul.bf16.gmra.mxu1 %v11243_v35  ;;  %v11248_v4 = vld [vmem:[#allocation242_spill] sm:$0xff]  ;;  %11250 = vst [vmem:[#allocation250_spill] sm:$0xff] %v10036_v3  ;;  %v4794_v24 = vadd.f32 %v4793_v27, %v4763_v14  ;;  %v11258_v27 = vld [vmem:[#allocation247_spill] sm:$0xff] }
 0x330   : > { %v10016_v25 = vadd.f32 %v3811_v34, %v3643_v49  ;;  %v4293_v30 = vsel %vm4074_vm2, %v11248_v4, %v9848_v23  ;;  %v4294_v49 = vsel %vm4074_vm2, %v11249_v17, %v3999_v28  ;;  %v4295_v23 = vsel %vm4074_vm2, %v11252_v57, %v4001_v36  ;;  %v11253_v28 = vld [vmem:[#allocation206_spill] sm:$0xff]  ;;  %v11254_v34 = vld [vmem:[#allocation213_spill] sm:$0xff]  ;;  %v11255_v17 = vld [vmem:[#allocation216_spill] sm:$0xff] }
 0x331   : > { %3853 = vmatmul.bf16.gmra.mxu3 %v11251_v50  ;;  %v4492_v35 = vadd.f32 %v4294_v49, %v11254_v34  ;;  %v4493_v50 = vadd.f32 %v4295_v23, %v11255_v17  ;;  %v4795_v45 = vadd.f32 %v4794_v24, %v4764_v6 }
 0x332   : > { %v3645_v46 = vpop.f32.mrf.mxu2 }
 0x333   : > { %v3646_v42 = vadd.f32 %v3645_v46, %v3477_v55  ;;  %v3309_v13 = vpop.f32.mrf.mxu0  ;;  %v4491_v55 = vadd.f32 %v4293_v30, %v11253_v28  ;;  %v4765_v46 = vmul.f32 %v10036_v3, %v10036_v3  ;;  %v10059_v36 = vsel %vm9778_vm6, %v4492_v35, 0.0  ;;  %v11260_v28 = vld [vmem:[#allocation244_spill] sm:$0xff]  ;;  %v11262_v35 = vld [vmem:[#allocation223_spill] sm:$0xff] }
 0x334   : > { %11257 = vst [vmem:[#allocation193_spill] sm:$0xff] %v10059_v36 }
 0x335   : > { %v10055_v48 = vsel %vm9778_vm6, %v4491_v55, 0.0  ;;  %v4796_v49 = vadd.f32 %v4795_v45, %v4765_v46  ;;  %v11261_v55 = vld [vmem:[#allocation220_spill] sm:$0xff]  ;;  %v11263_v46 = vld [vmem:[#allocation127_spill] sm:$0xff] }
 0x336   : > { %v3478_v7 = vpop.f32.mrf.mxu1  ;;  %11256 = vst [vmem:[#allocation255_spill] sm:$0xff] %v10055_v48  ;;  %v4766_v23 = vmul.f32 %v10055_v48, %v10055_v48 }
 0x337   : > { %v3479_v31 = vadd.f32 %v3478_v7, %v3309_v13  ;;  %v3814_v4 = vpop.f32.mrf.mxu3  ;;  %v4296_v13 = vsel %vm4074_vm2, %v11258_v27, %v9933_v53  ;;  %v4767_v7 = vmul.f32 %v10059_v36, %v10059_v36  ;;  %v11265_v27 = vld [vmem:[#allocation129_spill] sm:$0xff] }
 0x338   : > { %v10051_v62 = vadd.f32 %v3814_v4, %v3646_v42  ;;  %v10067_v42 = vsel %vm9778_vm6, %v4493_v50, 0.0  ;;  %v4494_v34 = vadd.f32 %v4296_v13, %v11261_v55  ;;  %v4797_v4 = vadd.f32 %v4796_v49, %v4766_v23  ;;  %v11268_v55 = vld [vmem:[#allocation131_spill] sm:$0xff] }
 0x339   : > { %11259 = vst [vmem:[#allocation259_spill] sm:$0xff] %v10067_v42  ;;  %v4768_v17 = vmul.f32 %v10067_v42, %v10067_v42 }
 0x33a   : > { %v3647_v30 = vpop.f32.mrf.mxu2  ;;  %v10088_v13 = vsel %vm9778_vm6, %v4494_v34, 0.0 }
 0x33b   : > { %v3648_v14 = vadd.f32 %v3647_v30, %v3479_v31  ;;  %v3312_v57 = vpop.f32.mrf.mxu0  ;;  %v11264_v30 = vld [vmem:[#allocation128_spill] sm:$0xff]  ;;  %11266 = vst [vmem:[#allocation251_spill] sm:$0xff] %v10088_v13 }
 0x33c   : > { %v4005_v6 = vpop.permute.xlu0 %4004 }
 0x33d   : > { %v4297_v45 = vsel %vm4074_vm2, %v11260_v28, %v4005_v6  ;;  %4842 = vst.msk [vmem:[#allocation2 + $0xf0] sm:$0xff] %vm4811_vm3, %v4005_v6  ;;  %3351 = vmatmul.bf16.gmra.mxu0 %v11263_v46  ;;  %v4798_v6 = vadd.f32 %v4797_v4, %v4767_v7  ;;  %v11269_v46 = vld [vmem:[#allocation245_spill] sm:$0xff]  ;;  %v11270_v4 = vld [vmem:[#allocation230_spill] sm:$0xff] }
 0x33e   : > { %v3481_v53 = vpop.f32.mrf.mxu1  ;;  %v4495_v31 = vadd.f32 %v4297_v45, %v11262_v35  ;;  %3689 = vmatmul.bf16.gmra.mxu2 %v11265_v27 }
 0x33f   : > { %v3482_v24 = vadd.f32 %v3481_v53, %v3312_v57  ;;  %v3816_v50 = vpop.f32.mrf.mxu3  ;;  %3520 = vmatmul.bf16.gmra.mxu1 %v11264_v30  ;;  %v4799_v23 = vadd.f32 %v4798_v6, %v4768_v17 }
 0x340   : > { %v10084_v28 = vadd.f32 %v3816_v50, %v3648_v14  ;;  %v10092_v57 = vsel %vm9778_vm6, %v4495_v31, 0.0  ;;  %v4769_v14 = vmul.f32 %v10088_v13, %v10088_v13 }
 0x341   : > { %11267 = vst [vmem:[#allocation197_spill] sm:$0xff] %v10092_v57  ;;  %3858 = vmatmul.bf16.gmra.mxu3 %v11268_v55  ;;  %v4770_v7 = vmul.f32 %v10092_v57, %v10092_v57 }
 0x342   : > { %v3650_v49 = vpop.f32.mrf.mxu2  ;;  %v4800_v50 = vadd.f32 %v4799_v23, %v4769_v14  ;;  %v11272_v23 = vld [vmem:[#allocation132_spill] sm:$0xff] }
 0x343   : > { %v3651_v45 = vadd.f32 %v3650_v49, %v3482_v24  ;;  %v3314_v53 = vpop.f32.mrf.mxu0 }
 0x344   : > { %v4007_v35 = vpop.permute.xlu1 %4006  ;;  %v4801_v49 = vadd.f32 %v4800_v50, %v4770_v7 }
 0x345   : > { %v4298_v34 = vsel %vm4074_vm2, %v11269_v46, %v4007_v35  ;;  %4843 = vst.msk [vmem:[#allocation2 + $0xf8] sm:$0xff] %vm4811_vm3, %v4007_v35 }
 0x346   : > { %v3483_v31 = vpop.f32.mrf.mxu1  ;;  %v4496_v17 = vadd.f32 %v4298_v34, %v11270_v4 }
 0x347   : > { %v3484_v24 = vadd.f32 %v3483_v31, %v3314_v53  ;;  %v3819_v30 = vpop.f32.mrf.mxu3  ;;  %v11273_v31 = vld [vmem:[#allocation134_spill] sm:$0xff] }
 0x348   : > { %v10106_v27 = vsel %vm9778_vm6, %v4496_v17, 0.0  ;;  %v10108_v6 = vadd.f32 %v3819_v30, %v3651_v45  ;;  %v11274_v45 = vld [vmem:[#allocation135_spill] sm:$0xff]  ;;  %v11275_v30 = vld [vmem:[#allocation137_spill] sm:$0xff] }
 0x349   : > { %11271 = vst [vmem:[#allocation147_spill] sm:$0xff] %v10106_v27  ;;  %v4771_v55 = vmul.f32 %v10106_v27, %v10106_v27 }
 0x34a   : > { %v3652_v57 = vpop.f32.mrf.mxu2 }
 0x34b   : > { %v4802_v46 = vadd.f32 %v4801_v49, %v4771_v55  ;;  %v3653_v13 = vadd.f32 %v3652_v57, %v3484_v24  ;;  %v3317_v35 = vpop.f32.mrf.mxu0  ;;  %v4739_v55 = vld [vmem:[%s8567_s18 + $0x5] sm:$0x1] }
 0x34d   : > { %v4803_v42 = vrot.slane %v4802_v46, 4  ;;  %3356 = vmatmul.bf16.gmra.mxu0 %v11272_v23 }
 0x34e   : > { %v3486_v36 = vpop.f32.mrf.mxu1  ;;  %3694 = vmatmul.bf16.gmra.mxu2 %v11274_v45 }
 0x34f   : > { %v3487_v53 = vadd.f32 %v3486_v36, %v3317_v35  ;;  %v4804_v14 = vadd.f32 %v4803_v42, %v4802_v46  ;;  %v3821_v34 = vpop.f32.mrf.mxu3  ;;  %3525 = vmatmul.bf16.gmra.mxu1 %v11273_v31 }
 0x350   : > { %v10115_v7 = vadd.f32 %v3821_v34, %v3653_v13 }
 0x351   : > { %v4805_v4 = vrot.slane %v4804_v14, 2  ;;  %3863 = vmatmul.bf16.gmra.mxu3 %v11275_v30 }
 0x352   : > { %v3655_v17 = vpop.f32.mrf.mxu2 }
 0x353   : > { %v4806_v50 = vadd.f32 %v4805_v4, %v4804_v14  ;;  %v3656_v57 = vadd.f32 %v3655_v17, %v3487_v53  ;;  %v3319_v24 = vpop.f32.mrf.mxu0  ;;  %v11276_v14 = vld [vmem:[#allocation150_spill] sm:$0xff]  ;;  %v11277_v4 = vld [vmem:[#allocation151_spill] sm:$0xff] }
 0x354   : > { %v11278_v17 = vld [vmem:[#allocation155_spill] sm:$0xff] }
 0x355   : > { %v4807_v49 = vrot.slane %v4806_v50, 1 }
 0x356   : > { %v3488_v36 = vpop.f32.mrf.mxu1 }
 0x357   : > { %v3489_v35 = vadd.f32 %v3488_v36, %v3319_v24  ;;  %v4808_v42 = vadd.f32 %v4807_v49, %v4806_v50  ;;  %v3824_v46 = vpop.f32.mrf.mxu3  ;;  %v11280_v49 = vld [vmem:[#allocation159_spill] sm:$0xff] }
 0x358   : > { %v10119_v23 = vadd.f32 %v3824_v46, %v3656_v57 }
 0x359   : > { %v4809_v31 = vadd.f32 %v4808_v42, %v4739_v55 }
 0x35a   : > { %v3657_v45 = vpop.f32.mrf.mxu2 }
 0x35b   : > { %4810 = vst [vmem:[%s8567_s18 + $0x5] sm:$0x1] %v4809_v31  ;;  %v3658_v13 = vadd.f32 %v3657_v45, %v3489_v35  ;;  %v3322_v34 = vpop.f32.mrf.mxu0 }
 0x35d   : > { %3361 = vmatmul.bf16.gmra.mxu0 %v11276_v14  ;;  %v11281_v14 = vld [vmem:[#allocation164_spill] sm:$0xff] }
 0x35e   : > { %v3491_v27 = vpop.f32.mrf.mxu1  ;;  %3699 = vmatmul.bf16.gmra.mxu2 %v11278_v17 }
 0x35f   : > { %v3492_v48 = vadd.f32 %v3491_v27, %v3322_v34  ;;  %v3826_v53 = vpop.f32.mrf.mxu3  ;;  %3530 = vmatmul.bf16.gmra.mxu1 %v11277_v4 }
 0x360   : > { %v10125_v30 = vadd.f32 %v3826_v53, %v3658_v13  ;;  %v11282_v13 = vld [vmem:[#allocation165_spill] sm:$0xff]  ;;  %v11283_v53 = vld [vmem:[#allocation166_spill] sm:$0xff] }
 0x361   : > { %3868 = vmatmul.bf16.gmra.mxu3 %v11280_v49  ;;  %v11285_v49 = vld [vmem:[#allocation170_spill] sm:$0xff] }
 0x362   : > { %11279 = vst [vmem:[#allocation152_spill] sm:$0xff] %v10125_v30  ;;  %v3660_v50 = vpop.f32.mrf.mxu2  ;;  %v11321_v30 = vld [vmem:[#allocation239_spill] sm:$0xff] }
 0x363   : > { %v3661_v24 = vadd.f32 %v3660_v50, %v3492_v48  ;;  %v3324_v57 = vpop.f32.mrf.mxu0 }
 0x366   : > { %v3493_v36 = vpop.f32.mrf.mxu1 }
 0x367   : > { %v3494_v55 = vadd.f32 %v3493_v36, %v3324_v57  ;;  %v3829_v35 = vpop.f32.mrf.mxu3 }
 0x368   : > { %v10128_v42 = vadd.f32 %v3829_v35, %v3661_v24 }
 0x36a   : > { %v3662_v27 = vpop.f32.mrf.mxu2 }
 0x36b   : > { %v3663_v46 = vadd.f32 %v3662_v27, %v3494_v55  ;;  %v3327_v31 = vpop.f32.mrf.mxu0 }
 0x36d   : > { %3366 = vmatmul.bf16.gmra.mxu0 %v11281_v14 }
 0x36e   : > { %v3496_v45 = vpop.f32.mrf.mxu1  ;;  %3704 = vmatmul.bf16.gmra.mxu2 %v11283_v53 }
 0x36f   : > { %v3497_v34 = vadd.f32 %v3496_v45, %v3327_v31  ;;  %v3831_v4 = vpop.f32.mrf.mxu3  ;;  %3535 = vmatmul.bf16.gmra.mxu1 %v11282_v13  ;;  %v11287_v13 = vld [vmem:[#allocation173_spill] sm:$0xff] }
 0x370   : > { %v10133_v48 = vadd.f32 %v3831_v4, %v3663_v46  ;;  %v11288_v46 = vld [vmem:[#allocation174_spill] sm:$0xff]  ;;  %v11289_v4 = vld [vmem:[#allocation175_spill] sm:$0xff] }
 0x371   : > { %3873 = vmatmul.bf16.gmra.mxu3 %v11285_v49 }
 0x372   : > { %11284 = vst [vmem:[#allocation110_spill] sm:$0xff] %v10133_v48  ;;  %v3665_v17 = vpop.f32.mrf.mxu2 }
 0x373   : > { %v3666_v50 = vadd.f32 %v3665_v17, %v3497_v34  ;;  %v3329_v57 = vpop.f32.mrf.mxu0 }
 0x376   : > { %v3498_v24 = vpop.f32.mrf.mxu1 }
 0x377   : > { %v3499_v36 = vadd.f32 %v3498_v24, %v3329_v57  ;;  %v3834_v55 = vpop.f32.mrf.mxu3  ;;  %v11291_v24 = vld [vmem:[#allocation177_spill] sm:$0xff] }
 0x378   : > { %v10136_v35 = vadd.f32 %v3834_v55, %v3666_v50 }
 0x37a   : > { %11286 = vst [vmem:[#allocation73_spill] sm:$0xff] %v10136_v35  ;;  %v3667_v27 = vpop.f32.mrf.mxu2 }
 0x37b   : > { %v3668_v31 = vadd.f32 %v3667_v27, %v3499_v36  ;;  %v3332_v45 = vpop.f32.mrf.mxu0 }
 0x37d   : > { %3371 = vmatmul.bf16.gmra.mxu0 %v11287_v13 }
 0x37e   : > { %v3501_v14 = vpop.f32.mrf.mxu1  ;;  %3709 = vmatmul.bf16.gmra.mxu2 %v11289_v4 }
 0x37f   : > { %v3502_v3 = vadd.f32 %v3501_v14, %v3332_v45  ;;  %v3836_v53 = vpop.f32.mrf.mxu3  ;;  %3540 = vmatmul.bf16.gmra.mxu1 %v11288_v46  ;;  %v11293_v46 = vld [vmem:[#allocation179_spill] sm:$0xff] }
 0x380   : > { %v10141_v34 = vadd.f32 %v3836_v53, %v3668_v31  ;;  %v11294_v31 = vld [vmem:[#allocation181_spill] sm:$0xff]  ;;  %v11295_v53 = vld [vmem:[#allocation182_spill] sm:$0xff] }
 0x381   : > { %3878 = vmatmul.bf16.gmra.mxu3 %v11291_v24 }
 0x382   : > { %11290 = vst [vmem:[#allocation114_spill] sm:$0xff] %v10141_v34  ;;  %v3670_v17 = vpop.f32.mrf.mxu2 }
 0x383   : > { %v3671_v49 = vadd.f32 %v3670_v17, %v3502_v3  ;;  %v3334_v57 = vpop.f32.mrf.mxu0 }
 0x386   : > { %v3503_v50 = vpop.f32.mrf.mxu1 }
 0x387   : > { %v3504_v55 = vadd.f32 %v3503_v50, %v3334_v57  ;;  %v3839_v36 = vpop.f32.mrf.mxu3  ;;  %v11297_v50 = vld [vmem:[#allocation186_spill] sm:$0xff] }
 0x388   : > { %v10144_v27 = vadd.f32 %v3839_v36, %v3671_v49 }
 0x38a   : > { %11292 = vst [vmem:[#allocation237_spill] sm:$0xff] %v10144_v27  ;;  %v3672_v45 = vpop.f32.mrf.mxu2 }
 0x38b   : > { %v3673_v14 = vadd.f32 %v3672_v45, %v3504_v55  ;;  %v3337_v13 = vpop.f32.mrf.mxu0 }
 0x38d   : > { %3376 = vmatmul.bf16.gmra.mxu0 %v11293_v46 }
 0x38e   : > { %v3506_v35 = vpop.f32.mrf.mxu1  ;;  %3714 = vmatmul.bf16.gmra.mxu2 %v11295_v53 }
 0x38f   : > { %v3507_v48 = vadd.f32 %v3506_v35, %v3337_v13  ;;  %v3841_v4 = vpop.f32.mrf.mxu3  ;;  %3545 = vmatmul.bf16.gmra.mxu1 %v11294_v31  ;;  %v11299_v31 = vld [vmem:[#allocation190_spill] sm:$0xff] }
 0x390   : > { %v10149_v3 = vadd.f32 %v3841_v4, %v3673_v14  ;;  %v11300_v14 = vld [vmem:[#allocation196_spill] sm:$0xff] }
 0x391   : > { %3883 = vmatmul.bf16.gmra.mxu3 %v11297_v50  ;;  %v11301_v4 = vld [vmem:[#allocation200_spill] sm:$0xff] }
 0x392   : > { %11296 = vst [vmem:[#allocation224_spill] sm:$0xff] %v10149_v3  ;;  %v3675_v17 = vpop.f32.mrf.mxu2 }
 0x393   : > { %v3676_v24 = vadd.f32 %v3675_v17, %v3507_v48  ;;  %v3339_v57 = vpop.f32.mrf.mxu0 }
 0x396   : > { %v3508_v49 = vpop.f32.mrf.mxu1 }
 0x397   : > { %v3509_v36 = vadd.f32 %v3508_v49, %v3339_v57  ;;  %v3844_v55 = vpop.f32.mrf.mxu3  ;;  %v11303_v49 = vld [vmem:[#allocation202_spill] sm:$0xff] }
 0x398   : > { %v10152_v45 = vadd.f32 %v3844_v55, %v3676_v24 }
 0x39a   : > { %11298 = vst [vmem:[#allocation75_spill] sm:$0xff] %v10152_v45  ;;  %v3677_v35 = vpop.f32.mrf.mxu2 }
 0x39b   : > { %v3678_v13 = vadd.f32 %v3677_v35, %v3509_v36  ;;  %v3342_v46 = vpop.f32.mrf.mxu0 }
 0x39d   : > { %3381 = vmatmul.bf16.gmra.mxu0 %v11299_v31 }
 0x39e   : > { %v3511_v27 = vpop.f32.mrf.mxu1  ;;  %3719 = vmatmul.bf16.gmra.mxu2 %v11301_v4 }
 0x39f   : > { %v3512_v34 = vadd.f32 %v3511_v27, %v3342_v46  ;;  %v3846_v53 = vpop.f32.mrf.mxu3  ;;  %3550 = vmatmul.bf16.gmra.mxu1 %v11300_v14  ;;  %v11305_v14 = vld [vmem:[#allocation208_spill] sm:$0xff] }
 0x3a0   : > { %v10157_v48 = vadd.f32 %v3846_v53, %v3678_v13  ;;  %v11306_v13 = vld [vmem:[#allocation210_spill] sm:$0xff]  ;;  %v11307_v53 = vld [vmem:[#allocation211_spill] sm:$0xff] }
 0x3a1   : > { %3888 = vmatmul.bf16.gmra.mxu3 %v11303_v49 }
 0x3a2   : > { %11302 = vst [vmem:[#allocation238_spill] sm:$0xff] %v10157_v48  ;;  %v3680_v17 = vpop.f32.mrf.mxu2 }
 0x3a3   : > { %v3681_v50 = vadd.f32 %v3680_v17, %v3512_v34  ;;  %v3344_v57 = vpop.f32.mrf.mxu0 }
 0x3a6   : > { %v3513_v24 = vpop.f32.mrf.mxu1 }
 0x3a7   : > { %v3514_v55 = vadd.f32 %v3513_v24, %v3344_v57  ;;  %v3849_v36 = vpop.f32.mrf.mxu3  ;;  %v11309_v24 = vld [vmem:[#allocation214_spill] sm:$0xff] }
 0x3a8   : > { %v10160_v35 = vadd.f32 %v3849_v36, %v3681_v50 }
 0x3aa   : > { %11304 = vst [vmem:[#allocation226_spill] sm:$0xff] %v10160_v35  ;;  %v3682_v27 = vpop.f32.mrf.mxu2 }
 0x3ab   : > { %v3683_v46 = vadd.f32 %v3682_v27, %v3514_v55  ;;  %v3347_v31 = vpop.f32.mrf.mxu0 }
 0x3ad   : > { %3386 = vmatmul.bf16.gmra.mxu0 %v11305_v14 }
 0x3ae   : > { %v3516_v3 = vpop.f32.mrf.mxu1  ;;  %3724 = vmatmul.bf16.gmra.mxu2 %v11307_v53 }
 0x3af   : > { %v3517_v45 = vadd.f32 %v3516_v3, %v3347_v31  ;;  %v3851_v4 = vpop.f32.mrf.mxu3  ;;  %3555 = vmatmul.bf16.gmra.mxu1 %v11306_v13  ;;  %v11311_v13 = vld [vmem:[#allocation217_spill] sm:$0xff] }
 0x3b0   : > { %v10165_v34 = vadd.f32 %v3851_v4, %v3683_v46  ;;  %v11312_v46 = vld [vmem:[#allocation160_spill] sm:$0xff]  ;;  %v11313_v4 = vld [vmem:[#allocation219_spill] sm:$0xff] }
 0x3b1   : > { %3893 = vmatmul.bf16.gmra.mxu3 %v11309_v24 }
 0x3b2   : > { %11308 = vst [vmem:[#allocation46_spill] sm:$0xff] %v10165_v34  ;;  %v3685_v17 = vpop.f32.mrf.mxu2  ;;  %v11317_v34 = vld [vmem:[#allocation225_spill] sm:$0xff] }
 0x3b3   : > { %v3686_v49 = vadd.f32 %v3685_v17, %v3517_v45  ;;  %v3349_v57 = vpop.f32.mrf.mxu0 }
 0x3b6   : > { %v3518_v50 = vpop.f32.mrf.mxu1 }
 0x3b7   : > { %v3519_v36 = vadd.f32 %v3518_v50, %v3349_v57  ;;  %v3854_v55 = vpop.f32.mrf.mxu3  ;;  %v11315_v50 = vld [vmem:[#allocation221_spill] sm:$0xff] }
 0x3b8   : > { %v10168_v27 = vadd.f32 %v3854_v55, %v3686_v49 }
 0x3ba   : > { %11310 = vst [vmem:[#allocation187_spill] sm:$0xff] %v10168_v27  ;;  %v3687_v3 = vpop.f32.mrf.mxu2 }
 0x3bb   : > { %v3688_v31 = vadd.f32 %v3687_v3, %v3519_v36  ;;  %v3352_v14 = vpop.f32.mrf.mxu0 }
 0x3bd   : > { %3391 = vmatmul.bf16.gmra.mxu0 %v11311_v13 }
 0x3be   : > { %v3521_v35 = vpop.f32.mrf.mxu1  ;;  %3729 = vmatmul.bf16.gmra.mxu2 %v11313_v4  ;;  %v11318_v4 = vld [vmem:[#allocation228_spill] sm:$0xff] }
 0x3bf   : > { %v3522_v48 = vadd.f32 %v3521_v35, %v3352_v14  ;;  %v3856_v53 = vpop.f32.mrf.mxu3  ;;  %3560 = vmatmul.bf16.gmra.mxu1 %v11312_v46 }
 0x3c0   : > { %v10173_v45 = vadd.f32 %v3856_v53, %v3688_v31  ;;  %v11319_v31 = vld [vmem:[#allocation168_spill] sm:$0xff] }
 0x3c1   : > { %3898 = vmatmul.bf16.gmra.mxu3 %v11315_v50 }
 0x3c2   : > { %11314 = vst [vmem:[#allocation21_spill] sm:$0xff] %v10173_v45  ;;  %v3690_v17 = vpop.f32.mrf.mxu2 }
 0x3c3   : > { %v3691_v24 = vadd.f32 %v3690_v17, %v3522_v48  ;;  %v3354_v57 = vpop.f32.mrf.mxu0 }
 0x3c6   : > { %v3523_v49 = vpop.f32.mrf.mxu1 }
 0x3c7   : > { %v3524_v55 = vadd.f32 %v3523_v49, %v3354_v57  ;;  %v3859_v36 = vpop.f32.mrf.mxu3  ;;  %v11320_v57 = vld [vmem:[#allocation231_spill] sm:$0xff] }
 0x3c8   : > { %v10176_v3 = vadd.f32 %v3859_v36, %v3691_v24 }
 0x3ca   : > { %11316 = vst [vmem:[#allocation59_spill] sm:$0xff] %v10176_v3  ;;  %v3692_v35 = vpop.f32.mrf.mxu2 }
 0x3cb   : > { %v3693_v14 = vadd.f32 %v3692_v35, %v3524_v55  ;;  %v3357_v13 = vpop.f32.mrf.mxu0 }
 0x3cd   : > { %3396 = vmatmul.bf16.gmra.mxu0 %v11317_v34 }
 0x3ce   : > { %v3526_v27 = vpop.f32.mrf.mxu1  ;;  %3734 = vmatmul.bf16.gmra.mxu2 %v11319_v31 }
 0x3cf   : > { %v3861_v46 = vpop.f32.mrf.mxu3  ;;  %3565 = vmatmul.bf16.gmra.mxu1 %v11318_v4  ;;  %v3527_v53 = vadd.f32 %v3526_v27, %v3357_v13  ;;  %v11323_v27 = vld [vmem:[#allocation241_spill] sm:$0xff] }
 0x3d0   : > { %v10181_v48 = vadd.f32 %v3861_v46, %v3693_v14  ;;  %v11322_v46 = vld [vmem:[#allocation240_spill] sm:$0xff] }
 0x3d1   : > { %3903 = vmatmul.bf16.gmra.mxu3 %v11320_v57 }
 0x3d2   : > { %v3695_v17 = vpop.f32.mrf.mxu2 }
 0x3d3   : > { %v3359_v50 = vpop.f32.mrf.mxu0  ;;  %v3696_v24 = vadd.f32 %v3695_v17, %v3527_v53 }
 0x3d6   : > { %v3528_v49 = vpop.f32.mrf.mxu1 }
 0x3d7   : > { %v3864_v36 = vpop.f32.mrf.mxu3  ;;  %v3529_v35 = vadd.f32 %v3528_v49, %v3359_v50  ;;  %v11324_v50 = vld [vmem:[#allocation246_spill] sm:$0xff] }
 0x3d8   : > { %v3865_v55 = vadd.f32 %v3864_v36, %v3696_v24 }
 0x3da   : > { %4008 = vrot.lane.b32.xlu2 %v3865_v55, %s6292_s22  ;;  %v3697_v34 = vpop.f32.mrf.mxu2 }
 0x3db   : > { %v3362_v45 = vpop.f32.mrf.mxu0  ;;  %v3698_v3 = vadd.f32 %v3697_v34, %v3529_v35 }
 0x3dd   : > { %3401 = vmatmul.bf16.gmra.mxu0 %v11321_v30 }
 0x3de   : > { %v3531_v4 = vpop.f32.mrf.mxu1  ;;  %3739 = vmatmul.bf16.gmra.mxu2 %v11323_v27  ;;  %v11325_v27 = vld [vmem:[#allocation252_spill] sm:$0xff] }
 0x3df   : > { %v3866_v14 = vpop.f32.mrf.mxu3  ;;  %3570 = vmatmul.bf16.gmra.mxu1 %v11322_v46  ;;  %v3532_v31 = vadd.f32 %v3531_v4, %v3362_v45  ;;  %v11327_v4 = vld [vmem:[#allocation254_spill] sm:$0xff] }
 0x3e0   : > { %v3867_v13 = vadd.f32 %v3866_v14, %v3698_v3  ;;  %v11326_v3 = vld [vmem:[#allocation253_spill] sm:$0xff] }
 0x3e1   : > { %3908 = vmatmul.bf16.gmra.mxu3 %v11324_v50 }
 0x3e2   : > { %4010 = vrot.lane.b32.xlu0 %v3867_v13, %s6292_s22  ;;  %v3700_v53 = vpop.f32.mrf.mxu2 }
 0x3e3   : > { %v3364_v17 = vpop.f32.mrf.mxu0  ;;  %v3701_v57 = vadd.f32 %v3700_v53, %v3532_v31 }
 0x3e6   : > { %v3533_v24 = vpop.f32.mrf.mxu1 }
 0x3e7   : > { %v3869_v49 = vpop.f32.mrf.mxu3  ;;  %v3534_v55 = vadd.f32 %v3533_v24, %v3364_v17  ;;  %v11328_v17 = vld [vmem:[#allocation257_spill] sm:$0xff] }
 0x3e8   : > { %v3870_v36 = vadd.f32 %v3869_v49, %v3701_v57 }
 0x3ea   : > { %4012 = vrot.lane.b32.xlu1 %v3870_v36, %s6292_s22  ;;  %v3702_v30 = vpop.f32.mrf.mxu2 }
 0x3eb   : > { %v3367_v35 = vpop.f32.mrf.mxu0  ;;  %v3703_v34 = vadd.f32 %v3702_v30, %v3534_v55 }
 0x3ed   : > { %3406 = vmatmul.bf16.gmra.mxu0 %v11325_v27 }
 0x3ee   : > { %v3536_v46 = vpop.f32.mrf.mxu1  ;;  %3744 = vmatmul.bf16.gmra.mxu2 %v11327_v4  ;;  %v11329_v4 = vld [vmem:[#allocation262_spill] sm:$0xff] }
 0x3ef   : > { %v3871_v45 = vpop.f32.mrf.mxu3  ;;  %3575 = vmatmul.bf16.gmra.mxu1 %v11326_v3  ;;  %v3537_v13 = vadd.f32 %v3536_v46, %v3367_v35  ;;  %v11331_v46 = vld [vmem:[#allocation265_spill] sm:$0xff] }
 0x3f0   : > { %v3872_v14 = vadd.f32 %v3871_v45, %v3703_v34  ;;  %v11330_v34 = vld [vmem:[#allocation264_spill] sm:$0xff] }
 0x3f1   : > { %3913 = vmatmul.bf16.gmra.mxu3 %v11328_v17 }
 0x3f2   : > { %4014 = vrot.lane.b32.xlu2 %v3872_v14, %s6292_s22  ;;  %v3705_v31 = vpop.f32.mrf.mxu2 }
 0x3f3   : > { %v3369_v53 = vpop.f32.mrf.mxu0  ;;  %v3706_v50 = vadd.f32 %v3705_v31, %v3537_v13 }
 0x3f6   : > { %v3538_v57 = vpop.f32.mrf.mxu1 }
 0x3f7   : > { %v3874_v24 = vpop.f32.mrf.mxu3  ;;  %v3539_v36 = vadd.f32 %v3538_v57, %v3369_v53  ;;  %v11332_v53 = vld [vmem:[#allocation267_spill] sm:$0xff] }
 0x3f8   : > { %v3875_v49 = vadd.f32 %v3874_v24, %v3706_v50 }
 0x3fa   : > { %4016 = vrot.lane.b32.xlu0 %v3875_v49, %s6292_s22  ;;  %v3707_v55 = vpop.f32.mrf.mxu2 }
 0x3fb   : > { %v3372_v30 = vpop.f32.mrf.mxu0  ;;  %v3708_v27 = vadd.f32 %v3707_v55, %v3539_v36 }
 0x3fd   : > { %3411 = vmatmul.bf16.gmra.mxu0 %v11329_v4 }
 0x3fe   : > { %v3541_v3 = vpop.f32.mrf.mxu1  ;;  %3749 = vmatmul.bf16.gmra.mxu2 %v11331_v46  ;;  %v11333_v46 = vld [vmem:[#allocation272_spill] sm:$0xff] }
 0x3ff   : > { %v3876_v35 = vpop.f32.mrf.mxu3  ;;  %3580 = vmatmul.bf16.gmra.mxu1 %v11330_v34  ;;  %v3542_v14 = vadd.f32 %v3541_v3, %v3372_v30 }
 0x400   : > { %v3877_v45 = vadd.f32 %v3876_v35, %v3708_v27  ;;  %v11334_v27 = vld [vmem:[#allocation273_spill] sm:$0xff] }
 0x401   : > { %3918 = vmatmul.bf16.gmra.mxu3 %v11332_v53 }
 0x402   : > { %4018 = vrot.lane.b32.xlu1 %v3877_v45, %s6292_s22  ;;  %v3710_v13 = vpop.f32.mrf.mxu2 }
 0x403   : > { %v3374_v31 = vpop.f32.mrf.mxu0  ;;  %v3711_v17 = vadd.f32 %v3710_v13, %v3542_v14  ;;  %v11335_v13 = vld [vmem:[#allocation37_spill] sm:$0xff] }
 0x406   : > { %v3543_v50 = vpop.f32.mrf.mxu1 }
 0x407   : > { %v3879_v57 = vpop.f32.mrf.mxu3  ;;  %v3544_v49 = vadd.f32 %v3543_v50, %v3374_v31 }
 0x408   : > { %v3880_v24 = vadd.f32 %v3879_v57, %v3711_v17 }
 0x40a   : > { %4020 = vrot.lane.b32.xlu2 %v3880_v24, %s6292_s22  ;;  %v3712_v36 = vpop.f32.mrf.mxu2 }
 0x40b   : > { %v3377_v55 = vpop.f32.mrf.mxu0  ;;  %v3713_v4 = vadd.f32 %v3712_v36, %v3544_v49 }
 0x40d   : > { %3416 = vmatmul.bf16.gmra.mxu0 %v11333_v46 }
 0x40e   : > { %v3546_v34 = vpop.f32.mrf.mxu1  ;;  %3754 = vmatmul.bf16.gmra.mxu2 %v11334_v27 }
 0x40f   : > { %v3881_v30 = vpop.f32.mrf.mxu3  ;;  %3585 = vmatmul.bf16.gmra.mxu1 %v9062_v54  ;;  %v3547_v35 = vadd.f32 %v3546_v34, %v3377_v55 }
 0x410   : > { %v3882_v3 = vadd.f32 %v3881_v30, %v3713_v4 }
 0x411   : > { %3923 = vmatmul.bf16.gmra.mxu3 %v11335_v13 }
 0x412   : > { %4022 = vrot.lane.b32.xlu0 %v3882_v3, %s6292_s22  ;;  %v3715_v45 = vpop.f32.mrf.mxu2 }
 0x413   : > { %v3379_v14 = vpop.f32.mrf.mxu0  ;;  %v3716_v31 = vadd.f32 %v3715_v45, %v3547_v35 }
 0x416   : > { %v3548_v53 = vpop.f32.mrf.mxu1 }
 0x417   : > { %v3884_v17 = vpop.f32.mrf.mxu3  ;;  %v3549_v57 = vadd.f32 %v3548_v53, %v3379_v14 }
 0x418   : > { %v3885_v50 = vadd.f32 %v3884_v17, %v3716_v31 }
 0x41a   : > { %4024 = vrot.lane.b32.xlu1 %v3885_v50, %s6292_s22  ;;  %v3717_v24 = vpop.f32.mrf.mxu2 }
 0x41b   : > { %v3382_v49 = vpop.f32.mrf.mxu0  ;;  %v3718_v54 = vadd.f32 %v3717_v24, %v3549_v57 }
 0x41d   : > { %3421 = vmatmul.bf16.gmra.mxu0 %v9200_v60 }
 0x41e   : > { %v3551_v36 = vpop.f32.mrf.mxu1  ;;  %3759 = vmatmul.bf16.gmra.mxu2 %v9207_v2 }
 0x41f   : > { %v3886_v55 = vpop.f32.mrf.mxu3  ;;  %3590 = vmatmul.bf16.gmra.mxu1 %v9202_v1  ;;  %v3552_v34 = vadd.f32 %v3551_v36, %v3382_v49  ;;  %v11336_v49 = vld [vmem:[#allocation256_spill] sm:$0xff] }
 0x420   : > { %v3887_v4 = vadd.f32 %v3886_v55, %v3718_v54 }
 0x421   : > { %3928 = vmatmul.bf16.gmra.mxu3 %v9233_v26 }
 0x422   : > { %4026 = vrot.lane.b32.xlu2 %v3887_v4, %s6292_s22  ;;  %v3720_v46 = vpop.f32.mrf.mxu2 }
 0x423   : > { %v3384_v30 = vpop.f32.mrf.mxu0  ;;  %v3721_v27 = vadd.f32 %v3720_v46, %v3552_v34 }
 0x426   : > { %v3553_v3 = vpop.f32.mrf.mxu1 }
 0x427   : > { %v3889_v35 = vpop.f32.mrf.mxu3  ;;  %v3554_v14 = vadd.f32 %v3553_v3, %v3384_v30 }
 0x428   : > { %v3890_v45 = vadd.f32 %v3889_v35, %v3721_v27 }
 0x42a   : > { %4028 = vrot.lane.b32.xlu0 %v3890_v45, %s6292_s22  ;;  %v3722_v60 = vpop.f32.mrf.mxu2 }
 0x42b   : > { %v3387_v13 = vpop.f32.mrf.mxu0  ;;  %v3723_v1 = vadd.f32 %v3722_v60, %v3554_v14 }
 0x42d   : > { %3426 = vmatmul.bf16.gmra.mxu0 %v9304_v44 }
 0x42e   : > { %v3556_v31 = vpop.f32.mrf.mxu1  ;;  %3764 = vmatmul.bf16.gmra.mxu2 %v9311_v40 }
 0x42f   : > { %v3891_v2 = vpop.f32.mrf.mxu3  ;;  %3595 = vmatmul.bf16.gmra.mxu1 %v9309_v5  ;;  %v3557_v26 = vadd.f32 %v3556_v31, %v3387_v13 }
 0x430   : > { %v3892_v53 = vadd.f32 %v3891_v2, %v3723_v1 }
 0x431   : > { %3933 = vmatmul.bf16.gmra.mxu3 %v9341_v61 }
 0x432   : > { %4030 = vrot.lane.b32.xlu1 %v3892_v53, %s6292_s22  ;;  %v3725_v17 = vpop.f32.mrf.mxu2 }
 0x433   : > { %v3389_v50 = vpop.f32.mrf.mxu0  ;;  %v3726_v24 = vadd.f32 %v3725_v17, %v3557_v26 }
 0x434   : > { %v4009_v57 = vpop.permute.xlu2 %4008 }
 0x435   : > { %v4427_v54 = vsel %vm4074_vm2, %v11336_v49, %v4009_v57 }
 0x436   : > { %v3558_v44 = vpop.f32.mrf.mxu1  ;;  %v4531_v36 = vadd.f32 %v4427_v54, %v9732_v16 }
 0x437   : > { %v3894_v5 = vpop.f32.mrf.mxu3  ;;  %v3559_v40 = vadd.f32 %v3558_v44, %v3389_v50 }
 0x438   : > { %v3895_v55 = vadd.f32 %v3894_v5, %v3726_v24 }
 0x43a   : > { %4032 = vrot.lane.b32.xlu2 %v3895_v55, %s6292_s22  ;;  %v3727_v4 = vpop.f32.mrf.mxu2  ;;  %v11338_v55 = vld [vmem:[#allocation248_spill] sm:$0xff] }
 0x43b   : > { %v3392_v34 = vpop.f32.mrf.mxu0  ;;  %v3728_v46 = vadd.f32 %v3727_v4, %v3559_v40 }
 0x43d   : > { %3431 = vmatmul.bf16.gmra.mxu0 %v9401_v29 }
 0x43e   : > { %v3561_v30 = vpop.f32.mrf.mxu1  ;;  %3769 = vmatmul.bf16.gmra.mxu2 %v9405_v33 }
 0x43f   : > { %v3896_v61 = vpop.f32.mrf.mxu3  ;;  %3600 = vmatmul.bf16.gmra.mxu1 %v9403_v20  ;;  %v3562_v3 = vadd.f32 %v3561_v30, %v3392_v34  ;;  %v11337_v20 = vld [vmem:[#allocation261_spill] sm:$0xff]  ;;  %v4563_v34 = vsel %vm9778_vm6, %v4531_v36, 0.0 }
 0x440   : > { %v3897_v27 = vadd.f32 %v3896_v61, %v3728_v46 }
 0x441   : > { %3938 = vmatmul.bf16.gmra.mxu3 %v9426_v8 }
 0x442   : > { %4034 = vrot.lane.b32.xlu0 %v3897_v27, %s6292_s22  ;;  %v3730_v16 = vpop.f32.mrf.mxu2  ;;  %v4668_v27 = vmul.f32 %v4563_v34, %v4563_v34 }
 0x443   : > { %v3394_v35 = vpop.f32.mrf.mxu0  ;;  %v3731_v45 = vadd.f32 %v3730_v16, %v3562_v3 }
 0x446   : > { %v3563_v14 = vpop.f32.mrf.mxu1 }
 0x447   : > { %v3899_v60 = vpop.f32.mrf.mxu3  ;;  %v3564_v1 = vadd.f32 %v3563_v14, %v3394_v35 }
 0x448   : > { %v3900_v13 = vadd.f32 %v3899_v60, %v3731_v45 }
 0x44a   : > { %4036 = vrot.lane.b32.xlu1 %v3900_v13, %s6292_s22  ;;  %v3732_v29 = vpop.f32.mrf.mxu2 }
 0x44b   : > { %v3397_v31 = vpop.f32.mrf.mxu0  ;;  %v3733_v2 = vadd.f32 %v3732_v29, %v3564_v1  ;;  %v11339_v1 = vld [vmem:[#allocation249_spill] sm:$0xff] }
 0x44c   : > { %v4015_v33 = vpop.permute.xlu2 %4014 }
 0x44d   : > { %v4430_v53 = vsel %vm4074_vm2, %v11337_v20, %v4015_v33 }
 0x44e   : > { %v3566_v26 = vpop.f32.mrf.mxu1  ;;  %v4534_v17 = vadd.f32 %v4430_v53, %v9776_v12 }
 0x44f   : > { %v3901_v50 = vpop.f32.mrf.mxu3  ;;  %v3567_v24 = vadd.f32 %v3566_v26, %v3397_v31 }
 0x450   : > { %v3902_v8 = vadd.f32 %v3901_v50, %v3733_v2  ;;  %v4566_v2 = vsel %vm9778_vm6, %v4534_v17, 0.0 }
 0x452   : > { %4038 = vrot.lane.b32.xlu2 %v3902_v8, %s6292_s22  ;;  %4876 = vrot.lane.b32.xlu1 %v4009_v57, %s6292_s22  ;;  %v3735_v49 = vpop.f32.mrf.mxu2  ;;  %v4596_v57 = vmul.f32 %v4563_v34, %v9794_v9 }
 0x453   : > { %v3399_v54 = vpop.f32.mrf.mxu0  ;;  %v3736_v5 = vadd.f32 %v3735_v49, %v3567_v24  ;;  %v4599_v49 = vmul.f32 %v4566_v2, %v9806_v37 }
 0x454   : > { %v4011_v44 = vpop.permute.xlu0 %4010 }
 0x455   : > { %v4428_v40 = vsel %vm4074_vm2, %v11338_v55, %v4011_v44 }
 0x456   : > { %v3568_v4 = vpop.f32.mrf.mxu1  ;;  %v4532_v12 = vadd.f32 %v4428_v40, %v9744_v21  ;;  %v11340_v40 = vld [vmem:[#allocation263_spill] sm:$0xff] }
 0x457   : > { %v3904_v46 = vpop.f32.mrf.mxu3  ;;  %v3569_v35 = vadd.f32 %v3568_v4, %v3399_v54 }
 0x458   : > { %v4564_v30 = vsel %vm9778_vm6, %v4532_v12, 0.0  ;;  %v3905_v61 = vadd.f32 %v3904_v46, %v3736_v5 }
 0x459   : > { %v4597_v3 = vmul.f32 %v4564_v30, %v9784_v43  ;;  %v4669_v16 = vmul.f32 %v4564_v30, %v4564_v30 }
 0x45a   : > { %4878 = vrot.lane.b32.xlu2 %v4011_v44, %s6292_s22  ;;  %4040 = vrot.lane.b32.xlu0 %v3905_v61, %s6292_s22  ;;  %v3737_v45 = vpop.f32.mrf.mxu2 }
 0x45b   : > { %v4628_v36 = vadd.f32 %v4597_v3, %v4596_v57  ;;  %v4700_v14 = vadd.f32 %v4669_v16, %v4668_v27  ;;  %v3402_v21 = vpop.f32.mrf.mxu0  ;;  %v3738_v13 = vadd.f32 %v3737_v45, %v3569_v35  ;;  %v11341_v35 = vld [vmem:[#allocation258_spill] sm:$0xff] }
 0x45c   : > { %v4013_v60 = vpop.permute.xlu1 %4012 }
 0x45d   : > { %v4429_v29 = vsel %vm4074_vm2, %v11339_v1, %v4013_v60 }
 0x45e   : > { %v3571_v9 = vpop.f32.mrf.mxu1  ;;  %v4533_v31 = vadd.f32 %v4429_v29, %v9756_v39  ;;  %v4671_v39 = vmul.f32 %v4566_v2, %v4566_v2 }
 0x45f   : > { %v3906_v43 = vpop.f32.mrf.mxu3  ;;  %v3572_v26 = vadd.f32 %v3571_v9, %v3402_v21 }
 0x460   : > { %v4565_v20 = vsel %vm9778_vm6, %v4533_v31, 0.0  ;;  %v3907_v53 = vadd.f32 %v3906_v43, %v3738_v13 }
 0x461   : > { %v4598_v50 = vmul.f32 %v4565_v20, %v9799_v52  ;;  %v4670_v8 = vmul.f32 %v4565_v20, %v4565_v20 }
 0x462   : > { %4042 = vrot.lane.b32.xlu1 %v3907_v53, %s6292_s22  ;;  %4880 = vrot.lane.b32.xlu0 %v4013_v60, %s6292_s22  ;;  %v3740_v24 = vpop.f32.mrf.mxu2 }
 0x463   : > { %v4629_v54 = vadd.f32 %v4628_v36, %v4598_v50  ;;  %v4701_v44 = vadd.f32 %v4700_v14, %v4670_v8  ;;  %v3404_v5 = vpop.f32.mrf.mxu0  ;;  %v3741_v55 = vadd.f32 %v3740_v24, %v3572_v26 }
 0x464   : > { %v4021_v17 = vpop.permute.xlu2 %4020 }
 0x465   : > { %v4433_v4 = vsel %vm4074_vm2, %v11340_v40, %v4021_v17  ;;  %v4630_v52 = vadd.f32 %v4629_v54, %v4599_v49  ;;  %v4702_v12 = vadd.f32 %v4701_v44, %v4671_v39 }
 0x466   : > { %v3573_v34 = vpop.f32.mrf.mxu1  ;;  %v4537_v46 = vadd.f32 %v4433_v4, %v9858_v11 }
 0x467   : > { %v3909_v30 = vpop.f32.mrf.mxu3  ;;  %v3574_v57 = vadd.f32 %v3573_v34, %v3404_v5 }
 0x468   : > { %v3910_v61 = vadd.f32 %v3909_v30, %v3741_v55 }
 0x46a   : > { %4044 = vrot.lane.b32.xlu2 %v3910_v61, %s6292_s22  ;;  %4882 = vrot.lane.b32.xlu1 %v4015_v33, %s6292_s22  ;;  %v3742_v37 = vpop.f32.mrf.mxu2 }
 0x46b   : > { %v3407_v27 = vpop.f32.mrf.mxu0  ;;  %v3743_v16 = vadd.f32 %v3742_v37, %v3574_v57 }
 0x46c   : > { %v4017_v3 = vpop.permute.xlu0 %4016 }
 0x46d   : > { %v4431_v45 = vsel %vm4074_vm2, %v11341_v35, %v4017_v3 }
 0x46e   : > { %v3576_v36 = vpop.f32.mrf.mxu1  ;;  %v4535_v14 = vadd.f32 %v4431_v45, %v9808_v56  ;;  %v11342_v56 = vld [vmem:[#allocation268_spill] sm:$0xff] }
 0x46f   : > { %v3911_v21 = vpop.f32.mrf.mxu3  ;;  %v3577_v13 = vadd.f32 %v3576_v36, %v3407_v27 }
 0x470   : > { %v4567_v11 = vsel %vm9778_vm6, %v4535_v14, 0.0  ;;  %v3912_v60 = vadd.f32 %v3911_v21, %v3743_v16  ;;  %v11344_v14 = vld [vmem:[#allocation260_spill] sm:$0xff] }
 0x471   : > { %v4600_v1 = vmul.f32 %v4567_v11, %v9823_v51  ;;  %v4672_v33 = vmul.f32 %v4567_v11, %v4567_v11  ;;  %v4569_v51 = vsel %vm9778_vm6, %v4537_v46, 0.0  ;;  %v11343_v46 = vld [vmem:[#allocation269_spill] sm:$0xff] }
 0x472   : > { %4884 = vrot.lane.b32.xlu2 %v4017_v3, %s6292_s22  ;;  %4046 = vrot.lane.b32.xlu0 %v3912_v60, %s6292_s22  ;;  %v3745_v29 = vpop.f32.mrf.mxu2  ;;  %v4602_v55 = vmul.f32 %v4569_v51, %v9840_v18 }
 0x473   : > { %v4631_v9 = vadd.f32 %v4630_v52, %v4600_v1  ;;  %v4703_v31 = vadd.f32 %v4702_v12, %v4672_v33  ;;  %v3409_v43 = vpop.f32.mrf.mxu0  ;;  %v3746_v20 = vadd.f32 %v3745_v29, %v3577_v13 }
 0x474   : > { %v4019_v2 = vpop.permute.xlu1 %4018 }
 0x475   : > { %v4432_v53 = vsel %vm4074_vm2, %v11342_v56, %v4019_v2 }
 0x476   : > { %v3578_v26 = vpop.f32.mrf.mxu1  ;;  %v4536_v50 = vadd.f32 %v4432_v53, %v9828_v59  ;;  %v4674_v59 = vmul.f32 %v4569_v51, %v4569_v51 }
 0x477   : > { %v3914_v8 = vpop.f32.mrf.mxu3  ;;  %v3579_v44 = vadd.f32 %v3578_v26, %v3409_v43 }
 0x478   : > { %v4568_v24 = vsel %vm9778_vm6, %v4536_v50, 0.0  ;;  %v3915_v49 = vadd.f32 %v3914_v8, %v3746_v20 }
 0x479   : > { %v4601_v39 = vmul.f32 %v4568_v24, %v9835_v38  ;;  %v4673_v54 = vmul.f32 %v4568_v24, %v4568_v24 }
 0x47a   : > { %4048 = vrot.lane.b32.xlu1 %v3915_v49, %s6292_s22  ;;  %4886 = vrot.lane.b32.xlu0 %v4019_v2, %s6292_s22  ;;  %v3747_v5 = vpop.f32.mrf.mxu2 }
 0x47b   : > { %v4632_v40 = vadd.f32 %v4631_v9, %v4601_v39  ;;  %v4704_v4 = vadd.f32 %v4703_v31, %v4673_v54  ;;  %v3412_v34 = vpop.f32.mrf.mxu0  ;;  %v3748_v12 = vadd.f32 %v3747_v5, %v3579_v44 }
 0x47c   : > { %v4027_v52 = vpop.permute.xlu2 %4026 }
 0x47d   : > { %v4436_v30 = vsel %vm4074_vm2, %v11343_v46, %v4027_v52  ;;  %v4633_v61 = vadd.f32 %v4632_v40, %v4602_v55  ;;  %v4705_v57 = vadd.f32 %v4704_v4, %v4674_v59 }
 0x47e   : > { %v3581_v38 = vpop.f32.mrf.mxu1  ;;  %v4540_v37 = vadd.f32 %v4436_v30, %v9946_v63 }
 0x47f   : > { %v3916_v27 = vpop.f32.mrf.mxu3  ;;  %v3582_v16 = vadd.f32 %v3581_v38, %v3412_v34 }
 0x480   : > { %v3917_v3 = vadd.f32 %v3916_v27, %v3748_v12  ;;  %v4572_v8 = vsel %vm9778_vm6, %v4540_v37, 0.0  ;;  %v11346_v12 = vld [vmem:[#allocation25_spill] sm:$0xff] }
 0x481   : > { %v4605_v5 = vmul.f32 %v4572_v8, %v9868_v19 }
 0x482   : > { %4050 = vrot.lane.b32.xlu2 %v3917_v3, %s6292_s22  ;;  %4888 = vrot.lane.b32.xlu1 %v4021_v17, %s6292_s22  ;;  %v3750_v18 = vpop.f32.mrf.mxu2 }
 0x483   : > { %v3414_v35 = vpop.f32.mrf.mxu0  ;;  %v3751_v36 = vadd.f32 %v3750_v18, %v3582_v16 }
 0x484   : > { %v4023_v45 = vpop.permute.xlu0 %4022 }
 0x485   : > { %v4434_v21 = vsel %vm4074_vm2, %v11344_v14, %v4023_v45 }
 0x486   : > { %v3583_v11 = vpop.f32.mrf.mxu1  ;;  %v4538_v60 = vadd.f32 %v4434_v21, %v9888_v22  ;;  %v11345_v22 = vld [vmem:[#allocation17_spill] sm:$0xff] }
 0x487   : > { %v3919_v13 = vpop.f32.mrf.mxu3  ;;  %v3584_v17 = vadd.f32 %v3583_v11, %v3414_v35  ;;  %v11347_v35 = vld [vmem:[#allocation266_spill] sm:$0xff] }
 0x488   : > { %v4570_v63 = vsel %vm9778_vm6, %v4538_v60, 0.0  ;;  %v3920_v1 = vadd.f32 %v3919_v13, %v3751_v36 }
 0x489   : > { %v4603_v33 = vmul.f32 %v4570_v63, %v9845_v32  ;;  %v4675_v29 = vmul.f32 %v4570_v63, %v4570_v63 }
 0x48a   : > { %4890 = vrot.lane.b32.xlu2 %v4023_v45, %s6292_s22  ;;  %4052 = vrot.lane.b32.xlu0 %v3920_v1, %s6292_s22  ;;  %v3752_v9 = vpop.f32.mrf.mxu2 }
 0x48b   : > { %v4634_v31 = vadd.f32 %v4633_v61, %v4603_v33  ;;  %v4706_v43 = vadd.f32 %v4705_v57, %v4675_v29  ;;  %v3417_v2 = vpop.f32.mrf.mxu0  ;;  %v3753_v56 = vadd.f32 %v3752_v9, %v3584_v17 }
 0x48c   : > { %v4025_v20 = vpop.permute.xlu1 %4024 }
 0x48d   : > { %v4435_v53 = vsel %vm4074_vm2, %v11345_v22, %v4025_v20 }
 0x48e   : > { %v3586_v26 = vpop.f32.mrf.mxu1  ;;  %v4539_v50 = vadd.f32 %v4435_v53, %v9916_v58  ;;  %v4677_v58 = vmul.f32 %v4572_v8, %v4572_v8  ;;  %v11349_v53 = vld [vmem:[#allocation72_spill] sm:$0xff] }
 0x48f   : > { %v3921_v32 = vpop.f32.mrf.mxu3  ;;  %v3587_v49 = vadd.f32 %v3586_v26, %v3417_v2 }
 0x490   : > { %v4571_v51 = vsel %vm9778_vm6, %v4539_v50, 0.0  ;;  %v3922_v24 = vadd.f32 %v3921_v32, %v3753_v56 }
 0x491   : > { %v4604_v39 = vmul.f32 %v4571_v51, %v9863_v0  ;;  %v4676_v54 = vmul.f32 %v4571_v51, %v4571_v51  ;;  %v11350_v51 = vld [vmem:[#allocation40_spill] sm:$0xff] }
 0x492   : > { %4054 = vrot.lane.b32.xlu1 %v3922_v24, %s6292_s22  ;;  %4892 = vrot.lane.b32.xlu0 %v4025_v20, %s6292_s22  ;;  %v3755_v44 = vpop.f32.mrf.mxu2 }
 0x493   : > { %v4635_v55 = vadd.f32 %v4634_v31, %v4604_v39  ;;  %v4707_v59 = vadd.f32 %v4706_v43, %v4676_v54  ;;  %v3419_v40 = vpop.f32.mrf.mxu0  ;;  %v3756_v34 = vadd.f32 %v3755_v44, %v3587_v49 }
 0x494   : > { %v4033_v4 = vpop.permute.xlu2 %4032 }
 0x495   : > { %v4439_v46 = vsel %vm4074_vm2, %v11346_v12, %v4033_v4  ;;  %v4636_v0 = vadd.f32 %v4635_v55, %v4605_v5  ;;  %v4708_v38 = vadd.f32 %v4707_v59, %v4677_v58  ;;  %v11351_v58 = vld [vmem:[#allocation138_spill] sm:$0xff] }
 0x496   : > { %v3588_v30 = vpop.f32.mrf.mxu1  ;;  %v4543_v61 = vadd.f32 %v4439_v46, %v10051_v62 }
 0x497   : > { %v3924_v57 = vpop.f32.mrf.mxu3  ;;  %v3589_v27 = vadd.f32 %v3588_v30, %v3419_v40 }
 0x498   : > { %v3925_v37 = vadd.f32 %v3924_v57, %v3756_v34 }
 0x49a   : > { %4056 = vrot.lane.b32.xlu2 %v3925_v37, %s6292_s22  ;;  %4894 = vrot.lane.b32.xlu1 %v4027_v52, %s6292_s22  ;;  %v3757_v19 = vpop.f32.mrf.mxu2 }
 0x49b   : > { %v3422_v3 = vpop.f32.mrf.mxu0  ;;  %v3758_v18 = vadd.f32 %v3757_v19, %v3589_v27  ;;  %v11352_v19 = vld [vmem:[#allocation15_spill] sm:$0xff] }
 0x49c   : > { %v4029_v16 = vpop.permute.xlu0 %4028 }
 0x49d   : > { %v4437_v45 = vsel %vm4074_vm2, %v11347_v35, %v4029_v16 }
 0x49e   : > { %v3591_v36 = vpop.f32.mrf.mxu1  ;;  %v4541_v14 = vadd.f32 %v4437_v45, %v9981_v47  ;;  %v11348_v47 = vld [vmem:[#allocation66_spill] sm:$0xff]  ;;  %v11353_v45 = vld [vmem:[#allocation39_spill] sm:$0xff] }
 0x49f   : > { %v3926_v21 = vpop.f32.mrf.mxu3  ;;  %v3592_v60 = vadd.f32 %v3591_v36, %v3422_v3 }
 0x4a0   : > { %v4573_v62 = vsel %vm9778_vm6, %v4541_v14, 0.0  ;;  %v3927_v11 = vadd.f32 %v3926_v21, %v3758_v18 }
 0x4a1   : > { %v4606_v13 = vmul.f32 %v4573_v62, %v9873_v10  ;;  %v4678_v52 = vmul.f32 %v4573_v62, %v4573_v62  ;;  %v4575_v10 = vsel %vm9778_vm6, %v4543_v61, 0.0 }
 0x4a2   : > { %4896 = vrot.lane.b32.xlu2 %v4029_v16, %s6292_s22  ;;  %4058 = vrot.lane.b32.xlu0 %v3927_v11, %s6292_s22  ;;  %v3760_v63 = vpop.f32.mrf.mxu2  ;;  %v4608_v24 = vmul.f32 %v4575_v10, %v11350_v51 }
 0x4a3   : > { %v4637_v1 = vadd.f32 %v4636_v0, %v4606_v13  ;;  %v4709_v33 = vadd.f32 %v4708_v38, %v4678_v52  ;;  %v3424_v29 = vpop.f32.mrf.mxu0  ;;  %v3761_v9 = vadd.f32 %v3760_v63, %v3592_v60 }
 0x4a4   : > { %v4031_v17 = vpop.permute.xlu1 %4030 }
 0x4a5   : > { %v4438_v31 = vsel %vm4074_vm2, %v11348_v47, %v4031_v17 }
 0x4a6   : > { %v3593_v43 = vpop.f32.mrf.mxu1  ;;  %v4542_v2 = vadd.f32 %v4438_v31, %v10016_v25  ;;  %v4680_v25 = vmul.f32 %v4575_v10, %v4575_v10 }
 0x4a7   : > { %v3929_v20 = vpop.f32.mrf.mxu3  ;;  %v3594_v32 = vadd.f32 %v3593_v43, %v3424_v29 }
 0x4a8   : > { %v4574_v56 = vsel %vm9778_vm6, %v4542_v2, 0.0  ;;  %v3930_v22 = vadd.f32 %v3929_v20, %v3761_v9  ;;  %v11355_v2 = vld [vmem:[#allocation41_spill] sm:$0xff] }
 0x4a9   : > { %v4607_v26 = vmul.f32 %v4574_v56, %v11349_v53  ;;  %v4679_v50 = vmul.f32 %v4574_v56, %v4574_v56 }
 0x4aa   : > { %4060 = vrot.lane.b32.xlu1 %v3930_v22, %s6292_s22  ;;  %4898 = vrot.lane.b32.xlu0 %v4031_v17, %s6292_s22  ;;  %v3762_v8 = vpop.f32.mrf.mxu2  ;;  %v11356_v22 = vld [vmem:[#allocation42_spill] sm:$0xff] }
 0x4ab   : > { %v4638_v49 = vadd.f32 %v4637_v1, %v4607_v26  ;;  %v4710_v39 = vadd.f32 %v4709_v33, %v4679_v50  ;;  %v3427_v54 = vpop.f32.mrf.mxu0  ;;  %v3763_v5 = vadd.f32 %v3762_v8, %v3594_v32 }
 0x4ac   : > { %v10342_v44 = vpop.permute.xlu2 %4038 }
 0x4ad   : > { %v4442_v55 = vsel %vm4074_vm2, %v11351_v58, %v10342_v44  ;;  %v4639_v40 = vadd.f32 %v4638_v49, %v4608_v24  ;;  %v4711_v34 = vadd.f32 %v4710_v39, %v4680_v25  ;;  %v11357_v24 = vld [vmem:[#allocation67_spill] sm:$0xff] }
 0x4ae   : > { %v3596_v59 = vpop.f32.mrf.mxu1  ;;  %v4546_v12 = vadd.f32 %v4442_v55, %v10115_v7 }
 0x4af   : > { %v3931_v46 = vpop.f32.mrf.mxu3  ;;  %v3597_v0 = vadd.f32 %v3596_v59, %v3427_v54 }
 0x4b0   : > { %v3932_v30 = vadd.f32 %v3931_v46, %v3763_v5  ;;  %v4578_v9 = vsel %vm9778_vm6, %v4546_v12, 0.0 }
 0x4b1   : > { %v4611_v53 = vmul.f32 %v4578_v9, %v11356_v22  ;;  %v11367_v22 = vld [vmem:[#allocation110_spill] sm:$0xff] }
 0x4b2   : > { %4062 = vrot.lane.b32.xlu2 %v3932_v30, %s6292_s22  ;;  %4900 = vrot.lane.b32.xlu1 %v4033_v4, %s6292_s22  ;;  %v3765_v38 = vpop.f32.mrf.mxu2 }
 0x4b3   : > { %v3429_v61 = vpop.f32.mrf.mxu0  ;;  %v3766_v27 = vadd.f32 %v3765_v38, %v3597_v0  ;;  %v11358_v0 = vld [vmem:[#allocation38_spill] sm:$0xff] }
 0x4b4   : > { %v4035_v57 = vpop.permute.xlu0 %4034  ;;  %v4879_v37 = vpop.permute.xlu2 %4878 }
 0x4b5   : > { %v4440_v3 = vsel %vm4074_vm2, %v11352_v19, %v4035_v57  ;;  %4974 = vst.msk [vmem:[#allocation2 + $0x8] sm:$0xff] %vm4972_vm7, %v4879_v37 }
 0x4b6   : > { %v3598_v7 = vpop.f32.mrf.mxu1  ;;  %v4544_v16 = vadd.f32 %v4440_v3, %v10084_v28  ;;  %v11354_v28 = vld [vmem:[#allocation274_spill] sm:$0xff] }
 0x4b7   : > { %v3934_v18 = vpop.f32.mrf.mxu3  ;;  %v3599_v21 = vadd.f32 %v3598_v7, %v3429_v61 }
 0x4b8   : > { %v4576_v35 = vsel %vm9778_vm6, %v4544_v16, 0.0  ;;  %v3935_v4 = vadd.f32 %v3934_v18, %v3766_v27  ;;  %v11359_v27 = vld [vmem:[#allocation26_spill] sm:$0xff] }
 0x4b9   : > { %v4609_v36 = vmul.f32 %v4576_v35, %v11353_v45  ;;  %v4681_v14 = vmul.f32 %v4576_v35, %v4576_v35 }
 0x4ba   : > { %4902 = vrot.lane.b32.xlu2 %v4035_v57, %s6292_s22  ;;  %4064 = vrot.lane.b32.xlu0 %v3935_v4, %s6292_s22  ;;  %v3767_v62 = vpop.f32.mrf.mxu2  ;;  %v11361_v4 = vld [vmem:[#allocation152_spill] sm:$0xff] }
 0x4bb   : > { %v4640_v11 = vadd.f32 %v4639_v40, %v4609_v36  ;;  %v4712_v60 = vadd.f32 %v4711_v34, %v4681_v14  ;;  %v3432_v13 = vpop.f32.mrf.mxu0  ;;  %v3768_v63 = vadd.f32 %v3767_v62, %v3599_v21  ;;  %v11362_v21 = vld [vmem:[#allocation235_spill] sm:$0xff] }
 0x4bc   : > { %v4037_v52 = vpop.permute.xlu1 %4036 }
 0x4bd   : > { %v4441_v1 = vsel %vm4074_vm2, %v11354_v28, %v4037_v52 }
 0x4be   : > { %v3601_v33 = vpop.f32.mrf.mxu1  ;;  %v4545_v29 = vadd.f32 %v4441_v1, %v10108_v6  ;;  %v4683_v6 = vmul.f32 %v4578_v9, %v4578_v9 }
 0x4bf   : > { %v3936_v17 = vpop.f32.mrf.mxu3  ;;  %v3602_v43 = vadd.f32 %v3601_v33, %v3432_v13 }
 0x4c0   : > { %v4577_v47 = vsel %vm9778_vm6, %v4545_v29, 0.0  ;;  %v3937_v31 = vadd.f32 %v3936_v17, %v3768_v63  ;;  %v11364_v29 = vld [vmem:[#allocation143_spill] sm:$0xff] }
 0x4c1   : > { %v4610_v20 = vmul.f32 %v4577_v47, %v11355_v2  ;;  %v4682_v10 = vmul.f32 %v4577_v47, %v4577_v47 }
 0x4c2   : > { %4066 = vrot.lane.b32.xlu1 %v3937_v31, %s6292_s22  ;;  %4904 = vrot.lane.b32.xlu0 %v4037_v52, %s6292_s22  ;;  %v3770_v56 = vpop.f32.mrf.mxu2  ;;  %v11365_v31 = vld [vmem:[#allocation114_spill] sm:$0xff] }
 0x4c3   : > { %v4641_v26 = vadd.f32 %v4640_v11, %v4610_v20  ;;  %v4713_v50 = vadd.f32 %v4712_v60, %v4682_v10  ;;  %v3771_v51 = vadd.f32 %v3770_v56, %v3602_v43  ;;  %v3434_v49 = vpop.f32.mrf.mxu0  ;;  %v11363_v60 = vld [vmem:[#allocation243_spill] sm:$0xff] }
 0x4c4   : > { %v4045_v32 = vpop.permute.xlu2 %4044  ;;  %v4877_v8 = vpop.permute.xlu1 %4876  ;;  %v11366_v10 = vld [vmem:[#allocation139_spill] sm:$0xff] }
 0x4c5   : > { %v4445_v25 = vsel %vm4074_vm2, %v11357_v24, %v4045_v32  ;;  %4973 = vst.msk [vmem:[#allocation2] sm:$0xff] %vm4972_vm7, %v4877_v8  ;;  %v4642_v54 = vadd.f32 %v4641_v26, %v4611_v53  ;;  %v4714_v5 = vadd.f32 %v4713_v50, %v4683_v6  ;;  %v11368_v26 = vld [vmem:[#allocation234_spill] sm:$0xff] }
 0x4c6   : > { %v3603_v39 = vpop.f32.mrf.mxu1  ;;  %v4549_v58 = vadd.f32 %v4445_v25, %v10128_v42 }
 0x4c7   : > { %v3939_v55 = vpop.f32.mrf.mxu3  ;;  %v3604_v40 = vadd.f32 %v3603_v39, %v3434_v49  ;;  %v11369_v49 = vld [vmem:[#allocation68_spill] sm:$0xff] }
 0x4c8   : > { %v3940_v59 = vadd.f32 %v3939_v55, %v3771_v51  ;;  %v4581_v36 = vsel %vm9778_vm6, %v4549_v58, 0.0 }
 0x4c9   : > { %v4614_v13 = vmul.f32 %v4581_v36, %v11363_v60  ;;  %v4686_v52 = vmul.f32 %v4581_v36, %v4581_v36  ;;  %v11377_v36 = vld [vmem:[#allocation271_spill] sm:$0xff] }
 0x4ca   : > { %4068 = vrot.lane.b32.xlu2 %v3940_v59, %s6292_s22  ;;  %4906 = vrot.lane.b32.xlu1 %v10342_v44, %s6292_s22  ;;  %v3772_v34 = vpop.f32.mrf.mxu2  ;;  %v11371_v59 = vld [vmem:[#allocation16_spill] sm:$0xff] }
 0x4cb   : > { %v3773_v30 = vadd.f32 %v3772_v34, %v3604_v40 }
 0x4cc   : > { %v4041_v12 = vpop.permute.xlu0 %4040  ;;  %v4885_v46 = vpop.permute.xlu2 %4884 }
 0x4cd   : > { %v4443_v38 = vsel %vm4074_vm2, %v11358_v0, %v4041_v12  ;;  %4977 = vst.msk [vmem:[#allocation2 + $0x20] sm:$0xff] %vm4972_vm7, %v4885_v46 }
 0x4ce   : > { %v4547_v42 = vadd.f32 %v4443_v38, %v10119_v23  ;;  %v11360_v23 = vld [vmem:[#allocation142_spill] sm:$0xff] }
 0x4cf   : > { %v3941_v61 = vpop.f32.mrf.mxu3 }
 0x4d0   : > { %v4579_v57 = vsel %vm9778_vm6, %v4547_v42, 0.0  ;;  %v3942_v37 = vadd.f32 %v3941_v61, %v3773_v30 }
 0x4d1   : > { %v4612_v19 = vmul.f32 %v4579_v57, %v11359_v27  ;;  %v4684_v44 = vmul.f32 %v4579_v57, %v4579_v57  ;;  %v11373_v57 = vld [vmem:[#allocation144_spill] sm:$0xff] }
 0x4d2   : > { %4908 = vrot.lane.b32.xlu2 %v4041_v12, %s6292_s22  ;;  %4912 = vrot.lane.b32.xlu1 %v4045_v32, %s6292_s22  ;;  %v11372_v12 = vld [vmem:[#allocation270_spill] sm:$0xff] }
 0x4d3   : > { %v4643_v3 = vadd.f32 %v4642_v54, %v4612_v19  ;;  %v4715_v7 = vadd.f32 %v4714_v5, %v4684_v44  ;;  %4070 = vrot.lane.b32.xlu0 %v3942_v37, %s6292_s22  ;;  %v11370_v54 = vld [vmem:[#allocation73_spill] sm:$0xff]  ;;  %v11374_v44 = vld [vmem:[#allocation75_spill] sm:$0xff] }
 0x4d4   : > { %v4881_v16 = vpop.permute.xlu0 %4880  ;;  %v4043_v18 = vpop.permute.xlu1 %4042 }
 0x4d5   : > { %4975 = vst.msk [vmem:[#allocation2 + $0x10] sm:$0xff] %vm4972_vm7, %v4881_v16  ;;  %v4444_v35 = vsel %vm4074_vm2, %v11360_v23, %v4043_v18 }
 0x4d6   : > { %v4548_v45 = vadd.f32 %v4444_v35, %v11361_v4  ;;  %v11376_v35 = vld [vmem:[#allocation237_spill] sm:$0xff] }
 0x4d8   : > { %v4580_v14 = vsel %vm9778_vm6, %v4548_v45, 0.0 }
 0x4d9   : > { %v4613_v62 = vmul.f32 %v4580_v14, %v11362_v21  ;;  %v4685_v11 = vmul.f32 %v4580_v14, %v4580_v14 }
 0x4db   : > { %v4644_v63 = vadd.f32 %v4643_v3, %v4613_v62  ;;  %v4716_v28 = vadd.f32 %v4715_v7, %v4685_v11  ;;  %4910 = vrot.lane.b32.xlu0 %v4043_v18, %s6292_s22  ;;  %v11375_v18 = vld [vmem:[#allocation140_spill] sm:$0xff] }
 0x4dc   : > { %v4051_v1 = vpop.permute.xlu2 %4050  ;;  %v4883_v33 = vpop.permute.xlu1 %4882 }
 0x4dd   : > { %v4448_v17 = vsel %vm4074_vm2, %v11364_v29, %v4051_v1  ;;  %4976 = vst.msk [vmem:[#allocation2 + $0x18] sm:$0xff] %vm4972_vm7, %v4883_v33  ;;  %4918 = vrot.lane.b32.xlu1 %v4051_v1, %s6292_s22  ;;  %v4645_v9 = vadd.f32 %v4644_v63, %v4614_v13  ;;  %v4717_v47 = vadd.f32 %v4716_v28, %v4686_v52  ;;  %v11378_v52 = vld [vmem:[#allocation103_spill] sm:$0xff]  ;;  %v11379_v28 = vld [vmem:[#allocation224_spill] sm:$0xff] }
 0x4de   : > { %v4552_v43 = vadd.f32 %v4448_v17, %v11365_v31  ;;  %v11380_v17 = vld [vmem:[#allocation236_spill] sm:$0xff]  ;;  %v11381_v31 = vld [vmem:[#allocation23_spill] sm:$0xff] }
 0x4e0   : > { %v4584_v58 = vsel %vm9778_vm6, %v4552_v43, 0.0 }
 0x4e1   : > { %v4617_v46 = vmul.f32 %v4584_v58, %v11372_v12  ;;  %v4689_v30 = vmul.f32 %v4584_v58, %v4584_v58 }
 0x4e4   : > { %v4891_v2 = vpop.permute.xlu2 %4890  ;;  %v4047_v20 = vpop.permute.xlu0 %4046 }
 0x4e5   : > { %4980 = vst.msk [vmem:[#allocation2 + $0x38] sm:$0xff] %vm4972_vm7, %v4891_v2  ;;  %v4446_v56 = vsel %vm4074_vm2, %v11366_v10, %v4047_v20  ;;  %4914 = vrot.lane.b32.xlu2 %v4047_v20, %s6292_s22 }
 0x4e6   : > { %v4550_v53 = vadd.f32 %v4446_v56, %v11367_v22 }
 0x4e8   : > { %v4582_v6 = vsel %vm9778_vm6, %v4550_v53, 0.0 }
 0x4e9   : > { %v4615_v50 = vmul.f32 %v4582_v6, %v11368_v26  ;;  %v4687_v32 = vmul.f32 %v4582_v6, %v4582_v6 }
 0x4eb   : > { %v4646_v8 = vadd.f32 %v4645_v9, %v4615_v50  ;;  %v4718_v51 = vadd.f32 %v4717_v47, %v4687_v32  ;;  %v11382_v32 = vld [vmem:[#allocation70_spill] sm:$0xff] }
 0x4ec   : > { %v4887_v24 = vpop.permute.xlu0 %4886  ;;  %v4049_v25 = vpop.permute.xlu1 %4048 }
 0x4ed   : > { %4978 = vst.msk [vmem:[#allocation2 + $0x28] sm:$0xff] %vm4972_vm7, %v4887_v24  ;;  %v4447_v39 = vsel %vm4074_vm2, %v11369_v49, %v4049_v25  ;;  %4916 = vrot.lane.b32.xlu0 %v4049_v25, %s6292_s22  ;;  %v11384_v49 = vld [vmem:[#allocation105_spill] sm:$0xff] }
 0x4ee   : > { %v4551_v5 = vadd.f32 %v4447_v39, %v11370_v54  ;;  %v11385_v54 = vld [vmem:[#allocation250_spill] sm:$0xff] }
 0x4f0   : > { %v4583_v55 = vsel %vm9778_vm6, %v4551_v5, 0.0 }
 0x4f1   : > { %v4616_v40 = vmul.f32 %v4583_v55, %v11371_v59  ;;  %v4688_v34 = vmul.f32 %v4583_v55, %v4583_v55 }
 0x4f3   : > { %v4647_v0 = vadd.f32 %v4646_v8, %v4616_v40  ;;  %v4719_v38 = vadd.f32 %v4718_v51, %v4688_v34  ;;  %v11383_v51 = vld [vmem:[#allocation238_spill] sm:$0xff] }
 0x4f4   : > { %v4057_v42 = vpop.permute.xlu2 %4056  ;;  %v4889_v61 = vpop.permute.xlu1 %4888  ;;  %v11386_v40 = vld [vmem:[#allocation46_spill] sm:$0xff] }
 0x4f5   : > { %v4451_v37 = vsel %vm4074_vm2, %v11373_v57, %v4057_v42  ;;  %4979 = vst.msk [vmem:[#allocation2 + $0x30] sm:$0xff] %vm4972_vm7, %v4889_v61  ;;  %4924 = vrot.lane.b32.xlu1 %v4057_v42, %s6292_s22  ;;  %v4648_v27 = vadd.f32 %v4647_v0, %v4617_v46  ;;  %v4720_v19 = vadd.f32 %v4719_v38, %v4689_v30  ;;  %v11387_v30 = vld [vmem:[#allocation106_spill] sm:$0xff] }
 0x4f6   : > { %v4555_v3 = vadd.f32 %v4451_v37, %v11374_v44  ;;  %v11388_v38 = vld [vmem:[#allocation226_spill] sm:$0xff]  ;;  %v11389_v37 = vld [vmem:[#allocation255_spill] sm:$0xff]  ;;  %v11390_v44 = vld [vmem:[#allocation193_spill] sm:$0xff] }
 0x4f8   : > { %v4587_v33 = vsel %vm9778_vm6, %v4555_v3, 0.0 }
 0x4f9   : > { %v4620_v43 = vmul.f32 %v4587_v33, %v11381_v31  ;;  %v4692_v2 = vmul.f32 %v4587_v33, %v4587_v33 }
 0x4fc   : > { %v4897_v7 = vpop.permute.xlu2 %4896  ;;  %v4053_v16 = vpop.permute.xlu0 %4052 }
 0x4fd   : > { %4983 = vst.msk [vmem:[#allocation2 + $0x50] sm:$0xff] %vm4972_vm7, %v4897_v7  ;;  %v4449_v23 = vsel %vm4074_vm2, %v11375_v18, %v4053_v16  ;;  %4920 = vrot.lane.b32.xlu2 %v4053_v16, %s6292_s22 }
 0x4fe   : > { %v4553_v4 = vadd.f32 %v4449_v23, %v11376_v35 }
 0x500   : > { %v4585_v45 = vsel %vm9778_vm6, %v4553_v4, 0.0 }
 0x501   : > { %v4618_v14 = vmul.f32 %v4585_v45, %v11377_v36  ;;  %v4690_v21 = vmul.f32 %v4585_v45, %v4585_v45 }
 0x503   : > { %v4649_v62 = vadd.f32 %v4648_v27, %v4618_v14  ;;  %v4721_v11 = vadd.f32 %v4720_v19, %v4690_v21  ;;  %v11391_v21 = vld [vmem:[#allocation102_spill] sm:$0xff] }
 0x504   : > { %v4893_v60 = vpop.permute.xlu0 %4892  ;;  %v4055_v13 = vpop.permute.xlu1 %4054 }
 0x505   : > { %4981 = vst.msk [vmem:[#allocation2 + $0x40] sm:$0xff] %vm4972_vm7, %v4893_v60  ;;  %v4450_v63 = vsel %vm4074_vm2, %v11378_v52, %v4055_v13  ;;  %4922 = vrot.lane.b32.xlu0 %v4055_v13, %s6292_s22  ;;  %v11393_v52 = vld [vmem:[#allocation71_spill] sm:$0xff] }
 0x506   : > { %v4554_v1 = vadd.f32 %v4450_v63, %v11379_v28  ;;  %v11394_v28 = vld [vmem:[#allocation259_spill] sm:$0xff] }
 0x508   : > { %v4586_v29 = vsel %vm9778_vm6, %v4554_v1, 0.0 }
 0x509   : > { %v4619_v9 = vmul.f32 %v4586_v29, %v11380_v17  ;;  %v4691_v47 = vmul.f32 %v4586_v29, %v4586_v29 }
 0x50b   : > { %v4650_v20 = vadd.f32 %v4649_v62, %v4619_v9  ;;  %v4722_v10 = vadd.f32 %v4721_v11, %v4691_v47  ;;  %v11392_v11 = vld [vmem:[#allocation187_spill] sm:$0xff] }
 0x50c   : > { %v4063_v56 = vpop.permute.xlu2 %4062  ;;  %v4895_v22 = vpop.permute.xlu1 %4894  ;;  %v11395_v9 = vld [vmem:[#allocation59_spill] sm:$0xff] }
 0x50d   : > { %4982 = vst.msk [vmem:[#allocation2 + $0x48] sm:$0xff] %vm4972_vm7, %v4895_v22  ;;  %4930 = vrot.lane.b32.xlu1 %v4063_v56, %s6292_s22  ;;  %v4651_v53 = vadd.f32 %v4650_v20, %v4620_v43  ;;  %v4723_v6 = vadd.f32 %v4722_v10, %v4692_v2  ;;  %v4454_v39 = vsel %vm4074_vm2, %v11384_v49, %v4063_v56  ;;  %v11396_v2 = vld [vmem:[#allocation107_spill] sm:$0xff]  ;;  %v11397_v10 = vld [vmem:[#allocation21_spill] sm:$0xff] }
 0x50e   : > { %v4558_v34 = vadd.f32 %v4454_v39, %v11386_v40 }
 0x510   : > { %v4590_v61 = vsel %vm9778_vm6, %v4558_v34, 0.0 }
 0x511   : > { %v4623_v3 = vmul.f32 %v4590_v61, %v11390_v44  ;;  %v4695_v7 = vmul.f32 %v4590_v61, %v4590_v61 }
 0x514   : > { %v4903_v26 = vpop.permute.xlu2 %4902  ;;  %v4059_v50 = vpop.permute.xlu0 %4058 }
 0x515   : > { %4986 = vst.msk [vmem:[#allocation2 + $0x68] sm:$0xff] %vm4972_vm7, %v4903_v26  ;;  %v4452_v8 = vsel %vm4074_vm2, %v11382_v32, %v4059_v50  ;;  %4926 = vrot.lane.b32.xlu2 %v4059_v50, %s6292_s22  ;;  %v11399_v32 = vld [vmem:[#allocation197_spill] sm:$0xff] }
 0x516   : > { %v4556_v24 = vadd.f32 %v4452_v8, %v11383_v51 }
 0x518   : > { %v4588_v25 = vsel %vm9778_vm6, %v4556_v24, 0.0 }
 0x519   : > { %v4621_v5 = vmul.f32 %v4588_v25, %v11385_v54  ;;  %v4693_v58 = vmul.f32 %v4588_v25, %v4588_v25 }
 0x51b   : > { %v4652_v55 = vadd.f32 %v4651_v53, %v4621_v5  ;;  %v4724_v59 = vadd.f32 %v4723_v6, %v4693_v58  ;;  %v11398_v6 = vld [vmem:[#allocation251_spill] sm:$0xff] }
 0x51c   : > { %v4899_v12 = vpop.permute.xlu0 %4898  ;;  %v4061_v46 = vpop.permute.xlu1 %4060 }
 0x51d   : > { %4984 = vst.msk [vmem:[#allocation2 + $0x58] sm:$0xff] %vm4972_vm7, %v4899_v12  ;;  %v4453_v0 = vsel %vm4074_vm2, %v11387_v30, %v4061_v46  ;;  %4928 = vrot.lane.b32.xlu0 %v4061_v46, %s6292_s22  ;;  %v11401_v46 = vld [vmem:[#allocation147_spill] sm:$0xff] }
 0x51e   : > { %v4557_v42 = vadd.f32 %v4453_v0, %v11388_v38 }
 0x520   : > { %v4589_v57 = vsel %vm9778_vm6, %v4557_v42, 0.0 }
 0x521   : > { %v4622_v27 = vmul.f32 %v4589_v57, %v11389_v37  ;;  %v4694_v19 = vmul.f32 %v4589_v57, %v4589_v57 }
 0x523   : > { %v4653_v16 = vadd.f32 %v4652_v55, %v4622_v27  ;;  %v4725_v18 = vadd.f32 %v4724_v59, %v4694_v19  ;;  %v11400_v59 = vld [vmem:[#allocation104_spill] sm:$0xff] }
 0x524   : > { %v4069_v23 = vpop.permute.xlu2 %4068  ;;  %v4901_v35 = vpop.permute.xlu1 %4900 }
 0x525   : > { %4985 = vst.msk [vmem:[#allocation2 + $0x60] sm:$0xff] %vm4972_vm7, %v4901_v35  ;;  %v4654_v4 = vadd.f32 %v4653_v16, %v4623_v3  ;;  %v4726_v45 = vadd.f32 %v4725_v18, %v4695_v7  ;;  %4936 = vrot.lane.b32.xlu1 %v4069_v23, %s6292_s22  ;;  %v4457_v63 = vsel %vm4074_vm2, %v11393_v52, %v4069_v23  ;;  %v4595_v18 = vld [vmem:[%s8567_s18 + $0x3] sm:$0x1]  ;;  %v4667_v23 = vld [vmem:[%s8567_s18 + $0x4] sm:$0x1] }
 0x526   : > { %v4561_v47 = vadd.f32 %v4457_v63, %v11395_v9 }
 0x528   : > { %v4593_v22 = vsel %vm9778_vm6, %v4561_v47, 0.0 }
 0x529   : > { %v4626_v8 = vmul.f32 %v4593_v22, %v11399_v32  ;;  %v4698_v51 = vmul.f32 %v4593_v22, %v4593_v22 }
 0x52c   : > { %v4909_v36 = vpop.permute.xlu2 %4908  ;;  %v4065_v14 = vpop.permute.xlu0 %4064 }
 0x52d   : > { %4989 = vst.msk [vmem:[#allocation2 + $0x80] sm:$0xff] %vm4972_vm7, %v4909_v36  ;;  %v4455_v62 = vsel %vm4074_vm2, %v11391_v21, %v4065_v14  ;;  %4932 = vrot.lane.b32.xlu2 %v4065_v14, %s6292_s22 }
 0x52e   : > { %v4559_v60 = vadd.f32 %v4455_v62, %v11392_v11 }
 0x530   : > { %v4591_v13 = vsel %vm9778_vm6, %v4559_v60, 0.0 }
 0x531   : > { %v4624_v1 = vmul.f32 %v4591_v13, %v11394_v28  ;;  %v4696_v33 = vmul.f32 %v4591_v13, %v4591_v13 }
 0x533   : > { %v4655_v29 = vadd.f32 %v4654_v4, %v4624_v1  ;;  %v4727_v17 = vadd.f32 %v4726_v45, %v4696_v33 }
 0x534   : > { %v4905_v31 = vpop.permute.xlu0 %4904  ;;  %v4067_v43 = vpop.permute.xlu1 %4066 }
 0x535   : > { %4987 = vst.msk [vmem:[#allocation2 + $0x70] sm:$0xff] %vm4972_vm7, %v4905_v31  ;;  %v4456_v20 = vsel %vm4074_vm2, %v11396_v2, %v4067_v43  ;;  %4934 = vrot.lane.b32.xlu0 %v4067_v43, %s6292_s22 }
 0x536   : > { %v4560_v56 = vadd.f32 %v4456_v20, %v11397_v10 }
 0x538   : > { %v4592_v53 = vsel %vm9778_vm6, %v4560_v56, 0.0 }
 0x539   : > { %v4625_v26 = vmul.f32 %v4592_v53, %v11398_v6  ;;  %v4697_v50 = vmul.f32 %v4592_v53, %v4592_v53 }
 0x53b   : > { %v4656_v24 = vadd.f32 %v4655_v29, %v4625_v26  ;;  %v4728_v25 = vadd.f32 %v4727_v17, %v4697_v50 }
 0x53c   : > { %v4907_v49 = vpop.permute.xlu1 %4906 }
 0x53d   : > { %4988 = vst.msk [vmem:[#allocation2 + $0x78] sm:$0xff] %vm4972_vm7, %v4907_v49  ;;  %v4657_v39 = vadd.f32 %v4656_v24, %v4626_v8  ;;  %v4729_v54 = vadd.f32 %v4728_v25, %v4698_v51 }
 0x53f   : > { %v4915_v5 = vpop.permute.xlu2 %4914 }
 0x540   : > { %4992 = vst.msk [vmem:[#allocation2 + $0x98] sm:$0xff] %vm4972_vm7, %v4915_v5 }
 0x544   : > { %v4913_v58 = vpop.permute.xlu1 %4912 }
 0x545   : > { %v4071_v55 = vpop.permute.xlu0 %4070  ;;  %4991 = vst.msk [vmem:[#allocation2 + $0x90] sm:$0xff] %vm4972_vm7, %v4913_v58 }
 0x546   : > { %v4458_v40 = vsel %vm4074_vm2, %v11400_v59, %v4071_v55  ;;  %4938 = vrot.lane.b32.xlu2 %v4071_v55, %s6292_s22 }
 0x547   : > { %v4562_v34 = vadd.f32 %v4458_v40, %v10181_v48 }
 0x549   : > { %v4594_v12 = vsel %vm9778_vm6, %v4562_v34, 0.0 }
 0x54a   : > { %v4627_v30 = vmul.f32 %v4594_v12, %v11401_v46  ;;  %v4699_v0 = vmul.f32 %v4594_v12, %v4594_v12 }
 0x54c   : > { %v4658_v38 = vadd.f32 %v4657_v39, %v4627_v30  ;;  %v4730_v42 = vadd.f32 %v4729_v54, %v4699_v0 }
 0x54d   : > { %v4911_v61 = vpop.permute.xlu0 %4910 }
 0x54e   : > { %v4659_v57 = vrot.slane %v4658_v38, 4  ;;  %v4731_v37 = vrot.slane %v4730_v42, 4  ;;  %4990 = vst.msk [vmem:[#allocation2 + $0x88] sm:$0xff] %vm4972_vm7, %v4911_v61 }
 0x54f   : > { %v4919_v15 = vpop.permute.xlu1 %4918 }
 0x550   : > { %v4660_v27 = vadd.f32 %v4659_v57, %v4658_v38  ;;  %v4732_v19 = vadd.f32 %v4731_v37, %v4730_v42  ;;  %4994 = vst.msk [vmem:[#allocation2 + $0xa8] sm:$0xff] %vm4972_vm7, %v4919_v15 }
 0x552   : > { %v4661_v41 = vrot.slane %v4660_v27, 2  ;;  %v4733_v48 = vrot.slane %v4732_v19, 2 }
 0x554   : > { %v4662_v44 = vadd.f32 %v4661_v41, %v4660_v27  ;;  %v4734_v3 = vadd.f32 %v4733_v48, %v4732_v19 }
 0x556   : > { %v4663_v7 = vrot.slane %v4662_v44, 1  ;;  %v4735_v16 = vrot.slane %v4734_v3, 1 }
 0x557   : > { %v4921_v35 = vpop.permute.xlu2 %4920 }
 0x558   : > { %v4664_v4 = vadd.f32 %v4663_v7, %v4662_v44  ;;  %v4736_v45 = vadd.f32 %v4735_v16, %v4734_v3  ;;  %4995 = vst.msk [vmem:[#allocation2 + $0xb0] sm:$0xff] %vm4972_vm7, %v4921_v35 }
 0x55a   : > { %v4665_v36 = vadd.f32 %v4664_v4, %v4595_v18  ;;  %v4737_v14 = vadd.f32 %v4736_v45, %v4667_v23 }
 0x55c   : > { %4666 = vst [vmem:[%s8567_s18 + $0x3] sm:$0x1] %v4665_v36 }
 0x55d   : > { %4738 = vst [vmem:[%s8567_s18 + $0x4] sm:$0x1] %v4737_v14 }
 0x55f   : > { %v4917_v21 = vpop.permute.xlu0 %4916 }
 0x560   : > { %4993 = vst.msk [vmem:[#allocation2 + $0xa0] sm:$0xff] %vm4972_vm7, %v4917_v21 }
 0x567   : > { %v4925_v62 = vpop.permute.xlu1 %4924 }
 0x568   : > { %4997 = vst.msk [vmem:[#allocation2 + $0xc0] sm:$0xff] %vm4972_vm7, %v4925_v62 }
 0x56f   : > { %v4927_v11 = vpop.permute.xlu2 %4926 }
 0x570   : > { %4998 = vst.msk [vmem:[#allocation2 + $0xc8] sm:$0xff] %vm4972_vm7, %v4927_v11 }
 0x577   : > { %v4923_v60 = vpop.permute.xlu0 %4922 }
 0x578   : > { %4996 = vst.msk [vmem:[#allocation2 + $0xb8] sm:$0xff] %vm4972_vm7, %v4923_v60 }
 0x57f   : > { %v4931_v13 = vpop.permute.xlu1 %4930 }
 0x580   : > { %5000 = vst.msk [vmem:[#allocation2 + $0xd8] sm:$0xff] %vm4972_vm7, %v4931_v13 }
 0x587   : > { %v4933_v52 = vpop.permute.xlu2 %4932 }
 0x588   : > { %5001 = vst.msk [vmem:[#allocation2 + $0xe0] sm:$0xff] %vm4972_vm7, %v4933_v52 }
 0x58f   : > { %v4929_v63 = vpop.permute.xlu0 %4928 }
 0x590   : > { %4999 = vst.msk [vmem:[#allocation2 + $0xd0] sm:$0xff] %vm4972_vm7, %v4929_v63 }
 0x597   : > { %v4937_v28 = vpop.permute.xlu1 %4936 }
 0x598   : > { %5003 = vst.msk [vmem:[#allocation2 + $0xf0] sm:$0xff] %vm4972_vm7, %v4937_v28 }
 0x5a0   : > { %v4939_v1 = vpop.permute.xlu2 %4938 }
 0x5a1   : > { %5004 = vst.msk [vmem:[#allocation2 + $0xf8] sm:$0xff] %vm4972_vm7, %v4939_v1 }
 0x5a7   : > { %v4935_v33 = vpop.permute.xlu0 %4934 }
 0x5a8   : > { %5002 = vst.msk [vmem:[#allocation2 + $0xe8] sm:$0xff] %vm4972_vm7, %v4935_v33 }
 0x5a9 PF: > { %s15_s20 = sadd.s32 1, %s6287_s20   ;;  %s11402_s18 = smov %s6283_s19 }
 0x5aa   : > { %p12_p5 = scmp.ge.s32.totalorder %s15_s20, 4   ;;  %s11403_s19 = smov %s11405_s21 }
 0x5ac   :  { %14 = sbr.rel (!%p12_p5) target bundleno = 2 (0x2), region = 83 }

</bundles_post_ra>
